<compile_context>
chip_gen: v7x
topology: tpu7x:2x2x1
jax: 0.10.0
libtpu: 0.0.40
codegen_flags: <defaults>
</compile_context>

<pallas_src>
import functools

import jax
import jax.numpy as jnp
from jax import lax
from jax.experimental import pallas as pl
from jax.experimental.pallas import tpu as pltpu

EPS = 1e-5      # PyTorch BatchNorm default eps
LANE = 128      # TPU lane width


# ----------------------------- kernel ---------------------------------------
def _embedder_head_kernel(
    x0_ref, y_ref, z_ref,
    w1_ref, b1_ref, w2_ref, b2_ref, w3_ref, b3_ref,
    w4_ref, b4_ref, w5_ref, b5_ref, w6_ref, b6_ref,
    out_ref, *, c3,
):
    f32, bf16 = jnp.float32, jnp.bfloat16
    tile = x0_ref.shape[0]
    slab = b1_ref.shape[1]

    # Lane-region ReLU masks (slab is a multiple of 128 lanes, so all the
    # elementwise work below runs on full-lane vregs).
    lane = lax.broadcasted_iota(jnp.int32, (tile, slab), 1)
    relu_1 = (lane < c3) | (lane >= 3 * c3)   # y4 & pt regions (x0 aux passes raw)
    relu_2 = (lane < c3) | (lane >= 2 * c3)   # h region (d passes raw)

    def mm(a, w_ref, b_ref):
        return jnp.dot(a.astype(bf16), w_ref[...],
                       preferred_element_type=f32) + b_ref[...]

    # --- stage 1: one block-diagonal matmul for the three leading layers -----
    #   lanes: [y4 | x0->h branch | x0->d branch | pt]
    lhs = jnp.concatenate(
        [y_ref[...].astype(bf16), x0_ref[...].astype(bf16), z_ref[...].astype(bf16)],
        axis=-1)
    s = mm(lhs, w1_ref, b1_ref)
    s = jnp.where(relu_1, jnp.maximum(s, 0.0), s)

    # --- stage 2: ResBlock1 conv1 + 1x1 downsample (x0 parts added via I blocks)
    #   lanes: [h_pre | d | 0 | pt]
    s = mm(s, w2_ref, b2_ref)
    s = jnp.where(relu_2, jnp.maximum(s, 0.0), s)

    # --- stage 3: ResBlock1 conv2, "+ d" folded in via identity -> r1 --------
    #   remaining regions are >= 0 (or exactly 0), so whole-slab relu is exact.
    s = jnp.maximum(mm(s, w3_ref, b3_ref), 0.0)          # [r1 | 0 | 0 | pt]

    # --- stage 4: ResBlock2 conv1 (r1 carried via identity for the residual) -
    s = jnp.maximum(mm(s, w4_ref, b4_ref), 0.0)          # [h3 | r1 | 0 | pt]

    # --- stage 5: ResBlock2 conv2, "+ r1" folded in via identity -> r2 -------
    s = jnp.maximum(mm(s, w5_ref, b5_ref), 0.0)          # [r2 | 0 | 0 | pt]

    # --- stage 6: e_lin applied to (r2 + pt); 128-lane-dense bf16 store ------
    out_ref[...] = mm(s, w6_ref, b6_ref).astype(out_ref.dtype)


# ------------------------- parameter folding --------------------------------
def fold_params(p, eps=EPS):
    """Fold eval-mode BN into the preceding matmuls and build the six
    block-structured slab weights (bf16) + biases (f32)."""

    def fold(w, bn):
        scale = bn["gamma"] / jnp.sqrt(bn["var"] + eps)
        return w * scale[None, :], bn["beta"] - bn["mean"] * scale

    w_up, b_up = fold(p["w_up"], p["bn_up"])
    w_r1a, b_r1a = fold(p["w_r1a"], p["bn_r1a"])
    w_r1b, b_r1b = fold(p["w_r1b"], p["bn_r1b"])
    w_r1d, b_r1d = fold(p["w_r1d"], p["bn_r1d"])
    w_r2a, b_r2a = fold(p["w_r2a"], p["bn_r2a"])
    w_r2b, b_r2b = fold(p["w_r2b"], p["bn_r2b"])
    w_pt, b_pt = fold(p["w_pt"], p["bn_pt"])
    # fold the point-transform Linear bias through its BN as well
    scale_pt = p["bn_pt"]["gamma"] / jnp.sqrt(p["bn_pt"]["var"] + eps)
    b_pt = b_pt + p["bias_pt"] * scale_pt

    c2, c3 = p["w_up"].shape
    c0 = p["w_r1a"].shape[0] - c3
    c1 = p["w_pt"].shape[0]
    embed_dim = p["w_lin"].shape[1]

    slab = ((max(4 * c3, LANE) + LANE - 1) // LANE) * LANE
    d_pad = ((embed_dim + LANE - 1) // LANE) * LANE

    r = lambda k: slice(k * c3, (k + 1) * c3)       # lane region k of the slab
    eye = jnp.eye(c3, dtype=jnp.float32)
    W = lambda shape: jnp.zeros(shape, jnp.float32)
    B = lambda: jnp.zeros((1, slab), jnp.float32)

    # stage 1: [y | x0 | z] -> [y4 | x0->h | x0->d | pt]
    w1 = W((c2 + c0 + c1, slab))
    w1 = w1.at[0:c2, r(0)].set(w_up)
    w1 = w1.at[c2:c2 + c0, r(1)].set(w_r1a[c3:])
    w1 = w1.at[c2:c2 + c0, r(2)].set(w_r1d[c3:])
    w1 = w1.at[c2 + c0:, r(3)].set(w_pt)
    b1 = B().at[0, r(0)].set(b_up).at[0, r(3)].set(b_pt)

    # stage 2: -> [h_pre | d | 0 | pt]
    w2 = W((slab, slab))
    w2 = w2.at[r(0), r(0)].set(w_r1a[:c3]).at[r(0), r(1)].set(w_r1d[:c3])
    w2 = w2.at[r(1), r(0)].set(eye).at[r(2), r(1)].set(eye).at[r(3), r(3)].set(eye)
    b2 = B().at[0, r(0)].set(b_r1a).at[0, r(1)].set(b_r1d)

    # stage 3: -> [h2 + d (= r1_pre) | 0 | 0 | pt]
    w3 = W((slab, slab))
    w3 = w3.at[r(0), r(0)].set(w_r1b).at[r(1), r(0)].set(eye).at[r(3), r(3)].set(eye)
    b3 = B().at[0, r(0)].set(b_r1b)

    # stage 4: -> [h3_pre | r1 (carried) | 0 | pt]
    w4 = W((slab, slab))
    w4 = w4.at[r(0), r(0)].set(w_r2a).at[r(0), r(1)].set(eye).at[r(3), r(3)].set(eye)
    b4 = B().at[0, r(0)].set(b_r2a)

    # stage 5: -> [h4 + r1 (= r2_pre) | 0 | 0 | pt]
    w5 = W((slab, slab))
    w5 = w5.at[r(0), r(0)].set(w_r2b).at[r(1), r(0)].set(eye).at[r(3), r(3)].set(eye)
    b5 = B().at[0, r(0)].set(b_r2b)

    # stage 6: out = (r2 + pt) @ w_lin + bias_lin, padded to a 128-lane slab
    w6 = W((slab, d_pad))
    w6 = w6.at[r(0), 0:embed_dim].set(p["w_lin"]).at[r(3), 0:embed_dim].set(p["w_lin"])
    b6 = jnp.zeros((1, d_pad), jnp.float32).at[0, 0:embed_dim].set(p["bias_lin"])

    bf = lambda a: a.astype(jnp.bfloat16)
    folded = (bf(w1), b1, bf(w2), b2, bf(w3), b3, bf(w4), b4, bf(w5), b5, bf(w6), b6)
    dims = dict(c3=c3, slab=slab, d_pad=d_pad, embed_dim=embed_dim)
    return folded, dims


# ------------------------------ wrapper --------------------------------------
def spvcnn_embedder_head(x0, y, z, params, *, tile_n=1024, trim=False):
    """Returns a (n, 128)-padded bf16 slab by default (columns [embed_dim:] are
    zero padding) so the kernel's store stays 128-lane dense and no extra XLA
    slice pass is spent; pass trim=True to get (n, embed_dim)."""
    n = x0.shape[0]
    folded, dims = fold_params(params)
    c3, d_pad, embed_dim = dims["c3"], dims["d_pad"], dims["embed_dim"]
    tile_n = min(tile_n, n)

    grid = (pl.cdiv(n, tile_n),)

    def row_spec(c):
        return pl.BlockSpec((tile_n, c), lambda i: (i, 0))

    def const_spec(a):
        # full array, constant block index -> DMA'd once, VMEM-resident
        return pl.BlockSpec(a.shape, lambda i: (0,) * a.ndim)

    in_specs = ([row_spec(x0.shape[1]), row_spec(y.shape[1]), row_spec(z.shape[1])]
                + [const_spec(a) for a in folded])

    out = pl.pallas_call(
        functools.partial(_embedder_head_kernel, c3=c3),
        out_shape=jax.ShapeDtypeStruct((n, d_pad), jnp.bfloat16),
        grid=grid,
        in_specs=in_specs,
        out_specs=pl.BlockSpec((tile_n, d_pad), lambda i: (i, 0)),
        compiler_params=pltpu.CompilerParams(
            dimension_semantics=("parallel",),
            vmem_limit_bytes=32 * 1024 * 1024,
        ),
    )(x0, y, z, *folded)
    if trim:
        return out[:, :embed_dim]
    return out


# -------------------- pure-JAX reference (module semantics) ------------------
def _bn_eval(x, bn, eps=EPS):
    return (x - bn["mean"]) * (bn["gamma"] / jnp.sqrt(bn["var"] + eps)) + bn["beta"]


def reference(x0, y, z, p):
    y4 = jnp.maximum(_bn_eval(y @ p["w_up"], p["bn_up"]), 0.0)
    cat = jnp.concatenate([y4, x0], axis=-1)
    h = jnp.maximum(_bn_eval(cat @ p["w_r1a"], p["bn_r1a"]), 0.0)
    h = _bn_eval(h @ p["w_r1b"], p["bn_r1b"])
    d = _bn_eval(cat @ p["w_r1d"], p["bn_r1d"])
    r1 = jnp.maximum(h + d, 0.0)
    h = jnp.maximum(_bn_eval(r1 @ p["w_r2a"], p["bn_r2a"]), 0.0)
    h = _bn_eval(h @ p["w_r2b"], p["bn_r2b"])
    r2 = jnp.maximum(h + r1, 0.0)
    pt = jnp.maximum(_bn_eval(z @ p["w_pt"] + p["bias_pt"], p["bn_pt"]), 0.0)
    z3 = r2 + pt
    return z3 @ p["w_lin"] + p["bias_lin"]


# ------------------------------ init -----------------------------------------
def init_params(key, cs, embed_dim):
    c0, c1, c2, c3 = cs
    ks = jax.random.split(key, 16)

    def w(k, cin, cout):
        return jax.random.normal(k, (cin, cout), jnp.float32) / jnp.sqrt(cin)

    def bn(k, c):
        k1, k2, k3, k4 = jax.random.split(k, 4)
        return {
            "gamma": 1.0 + 0.1 * jax.random.normal(k1, (c,), jnp.float32),
            "beta": 0.1 * jax.random.normal(k2, (c,), jnp.float32),
            "mean": 0.1 * jax.random.normal(k3, (c,), jnp.float32),
            "var": jax.random.uniform(k4, (c,), jnp.float32, minval=0.5, maxval=1.5),
        }

    return {
        "w_up": w(ks[0], c2, c3), "bn_up": bn(ks[1], c3),
        "w_r1a": w(ks[2], c3 + c0, c3), "bn_r1a": bn(ks[3], c3),
        "w_r1b": w(ks[4], c3, c3), "bn_r1b": bn(ks[5], c3),
        "w_r1d": w(ks[6], c3 + c0, c3), "bn_r1d": bn(ks[7], c3),
        "w_r2a": w(ks[8], c3, c3), "bn_r2a": bn(ks[9], c3),
        "w_r2b": w(ks[10], c3, c3), "bn_r2b": bn(ks[11], c3),
        "w_pt": w(ks[12], c1, c3),
        "bias_pt": 0.1 * jax.random.normal(ks[13], (c3,), jnp.float32),
        "bn_pt": bn(ks[14], c3),
        "w_lin": w(ks[15], c3, embed_dim),
        "bias_lin": jnp.zeros((embed_dim,), jnp.float32),
    }


if __name__ == "__main__":
    cs = (16, 16, 32, 32)          # (cs[0], cs[1], cs[2], cs[3])
    embed_dim = 8
    n = 8192                       # points / active voxels (1:1 here); grid = 8 tiles

    key = jax.random.PRNGKey(0)
    k_x0, k_y, k_z, k_p = jax.random.split(key, 4)
    x0 = jax.random.normal(k_x0, (n, cs[0]), jnp.float32)   # x0.F
    y = jax.random.normal(k_y, (n, cs[2]), jnp.float32)     # y.F
    z = jax.random.normal(k_z, (n, cs[1]), jnp.float32)     # z.F
    params = init_params(k_p, cs, embed_dim)

    out_padded = spvcnn_embedder_head(x0, y, z, params, tile_n=1024)
    out_padded = jax.block_until_ready(out_padded)
    assert out_padded.shape == (n, 128) and out_padded.dtype == jnp.bfloat16

    out = out_padded[:, :embed_dim].astype(jnp.float32)     # trim for the check only
    ref = reference(x0, y, z, params)
    assert out.shape == (n, embed_dim)
    max_err = float(jnp.max(jnp.abs(out - ref)))
    # tolerance for bf16 matmul operands / bf16 output (f32 MXU accumulation)
    assert jnp.allclose(out, ref, atol=1e-1, rtol=5e-2), (
        f"mismatch vs reference (max abs err {max_err})")

    print("KERNEL_OK")
</pallas_src>

<mosaic_0001>
module attributes {stable_mosaic.version = 11 : i64} {
  func.func @_embedder_head_kernel(%arg0: i32, %arg1: memref<1024x16xf32, #tpu.memory_space<vmem>>, %arg2: memref<1024x32xf32, #tpu.memory_space<vmem>>, %arg3: memref<1024x16xf32, #tpu.memory_space<vmem>>, %arg4: memref<64x128xbf16, #tpu.memory_space<vmem>>, %arg5: memref<1x128xf32, #tpu.memory_space<vmem>>, %arg6: memref<128x128xbf16, #tpu.memory_space<vmem>>, %arg7: memref<1x128xf32, #tpu.memory_space<vmem>>, %arg8: memref<128x128xbf16, #tpu.memory_space<vmem>>, %arg9: memref<1x128xf32, #tpu.memory_space<vmem>>, %arg10: memref<128x128xbf16, #tpu.memory_space<vmem>>, %arg11: memref<1x128xf32, #tpu.memory_space<vmem>>, %arg12: memref<128x128xbf16, #tpu.memory_space<vmem>>, %arg13: memref<1x128xf32, #tpu.memory_space<vmem>>, %arg14: memref<128x128xbf16, #tpu.memory_space<vmem>>, %arg15: memref<1x128xf32, #tpu.memory_space<vmem>>, %arg16: memref<1024x128xbf16, #tpu.memory_space<vmem>>) attributes {dimension_semantics = [#tpu.dimension_semantics<parallel>], iteration_bounds = array<i64: 8>, scalar_prefetch = 0 : i64, scratch_operands = 0 : i64, tpu.core_type = #tpu.core_type<tc>, window_params = [{transform_indices = @transform_0, window_bounds = array<i64: 1024, 16>}, {transform_indices = @transform_1, window_bounds = array<i64: 1024, 32>}, {transform_indices = @transform_2, window_bounds = array<i64: 1024, 16>}, {pipeline_mode = #tpu.pipeline_mode<synchronous>, transform_indices = @transform_3, window_bounds = array<i64: 64, 128>}, {pipeline_mode = #tpu.pipeline_mode<synchronous>, transform_indices = @transform_4, window_bounds = array<i64: 1, 128>}, {pipeline_mode = #tpu.pipeline_mode<synchronous>, transform_indices = @transform_5, window_bounds = array<i64: 128, 128>}, {pipeline_mode = #tpu.pipeline_mode<synchronous>, transform_indices = @transform_6, window_bounds = array<i64: 1, 128>}, {pipeline_mode = #tpu.pipeline_mode<synchronous>, transform_indices = @transform_7, window_bounds = array<i64: 128, 128>}, {pipeline_mode = #tpu.pipeline_mode<synchronous>, transform_indices = @transform_8, window_bounds = array<i64: 1, 128>}, {pipeline_mode = #tpu.pipeline_mode<synchronous>, transform_indices = @transform_9, window_bounds = array<i64: 128, 128>}, {pipeline_mode = #tpu.pipeline_mode<synchronous>, transform_indices = @transform_10, window_bounds = array<i64: 1, 128>}, {pipeline_mode = #tpu.pipeline_mode<synchronous>, transform_indices = @transform_11, window_bounds = array<i64: 128, 128>}, {pipeline_mode = #tpu.pipeline_mode<synchronous>, transform_indices = @transform_12, window_bounds = array<i64: 1, 128>}, {pipeline_mode = #tpu.pipeline_mode<synchronous>, transform_indices = @transform_13, window_bounds = array<i64: 128, 128>}, {pipeline_mode = #tpu.pipeline_mode<synchronous>, transform_indices = @transform_14, window_bounds = array<i64: 1, 128>}, {transform_indices = @transform_15, window_bounds = array<i64: 1024, 128>}]} {
    %0 = tpu.iota {dimensions = array<i32: 1>} : vector<1024x128xi32>
    %c32_i32 = arith.constant 32 : i32
    %1 = vector.broadcast %c32_i32 : i32 to vector<1024x128xi32>
    %2 = arith.cmpi slt, %0, %1 : vector<1024x128xi32>
    %c96_i32 = arith.constant 96 : i32
    %3 = vector.broadcast %c96_i32 : i32 to vector<1024x128xi32>
    %4 = arith.cmpi sge, %0, %3 : vector<1024x128xi32>
    %5 = arith.ori %2, %4 : vector<1024x128xi1>
    %c32_i32_0 = arith.constant 32 : i32
    %6 = vector.broadcast %c32_i32_0 : i32 to vector<1024x128xi32>
    %7 = arith.cmpi slt, %0, %6 : vector<1024x128xi32>
    %c64_i32 = arith.constant 64 : i32
    %8 = vector.broadcast %c64_i32 : i32 to vector<1024x128xi32>
    %9 = arith.cmpi sge, %0, %8 : vector<1024x128xi32>
    %10 = arith.ori %7, %9 : vector<1024x128xi1>
    %c0 = arith.constant 0 : index
    %c0_1 = arith.constant 0 : index
    %11 = vector.load %arg2[%c0, %c0_1] : memref<1024x32xf32, #tpu.memory_space<vmem>>, vector<1024x32xf32>
    %12 = arith.truncf %11 : vector<1024x32xf32> to vector<1024x32xbf16>
    %c0_2 = arith.constant 0 : index
    %c0_3 = arith.constant 0 : index
    %13 = vector.load %arg1[%c0_2, %c0_3] : memref<1024x16xf32, #tpu.memory_space<vmem>>, vector<1024x16xf32>
    %14 = arith.truncf %13 : vector<1024x16xf32> to vector<1024x16xbf16>
    %c0_4 = arith.constant 0 : index
    %c0_5 = arith.constant 0 : index
    %15 = vector.load %arg3[%c0_4, %c0_5] : memref<1024x16xf32, #tpu.memory_space<vmem>>, vector<1024x16xf32>
    %16 = arith.truncf %15 : vector<1024x16xf32> to vector<1024x16xbf16>
    %17 = tpu.concatenate %12, %14, %16 in 1 : vector<1024x32xbf16>, vector<1024x16xbf16>, vector<1024x16xbf16> -> vector<1024x64xbf16>
    %c0_6 = arith.constant 0 : index
    %c0_7 = arith.constant 0 : index
    %18 = vector.load %arg4[%c0_6, %c0_7] : memref<64x128xbf16, #tpu.memory_space<vmem>>, vector<64x128xbf16>
    %cst = arith.constant dense<0.000000e+00> : vector<1024x128xf32>
    %19 = tpu.matmul %17, %18, %cst {dimension_numbers = #tpu.dot_dimension_numbers<[1], [0], [0], [1], [0, 0, 1, 1], [], []>} : vector<1024x64xbf16>, vector<64x128xbf16>, vector<1024x128xf32> -> vector<1024x128xf32>
    %c0_8 = arith.constant 0 : index
    %c0_9 = arith.constant 0 : index
    %20 = vector.load %arg5[%c0_8, %c0_9] : memref<1x128xf32, #tpu.memory_space<vmem>>, vector<1x128xf32>
    %21 = vector.broadcast %20 : vector<1x128xf32> to vector<1024x128xf32>
    %22 = arith.addf %19, %21 : vector<1024x128xf32>
    %cst_10 = arith.constant 0.000000e+00 : f32
    %23 = vector.broadcast %cst_10 : f32 to vector<1024x128xf32>
    %24 = arith.maximumf %22, %23 : vector<1024x128xf32>
    %25 = arith.select %5, %24, %22 : vector<1024x128xi1>, vector<1024x128xf32>
    %26 = arith.truncf %25 : vector<1024x128xf32> to vector<1024x128xbf16>
    %c0_11 = arith.constant 0 : index
    %c0_12 = arith.constant 0 : index
    %27 = vector.load %arg6[%c0_11, %c0_12] : memref<128x128xbf16, #tpu.memory_space<vmem>>, vector<128x128xbf16>
    %cst_13 = arith.constant dense<0.000000e+00> : vector<1024x128xf32>
    %28 = tpu.matmul %26, %27, %cst_13 {dimension_numbers = #tpu.dot_dimension_numbers<[1], [0], [0], [1], [0, 0, 1, 1], [], []>} : vector<1024x128xbf16>, vector<128x128xbf16>, vector<1024x128xf32> -> vector<1024x128xf32>
    %c0_14 = arith.constant 0 : index
    %c0_15 = arith.constant 0 : index
    %29 = vector.load %arg7[%c0_14, %c0_15] : memref<1x128xf32, #tpu.memory_space<vmem>>, vector<1x128xf32>
    %30 = vector.broadcast %29 : vector<1x128xf32> to vector<1024x128xf32>
    %31 = arith.addf %28, %30 : vector<1024x128xf32>
    %cst_16 = arith.constant 0.000000e+00 : f32
    %32 = vector.broadcast %cst_16 : f32 to vector<1024x128xf32>
    %33 = arith.maximumf %31, %32 : vector<1024x128xf32>
    %34 = arith.select %10, %33, %31 : vector<1024x128xi1>, vector<1024x128xf32>
    %35 = arith.truncf %34 : vector<1024x128xf32> to vector<1024x128xbf16>
    %c0_17 = arith.constant 0 : index
    %c0_18 = arith.constant 0 : index
    %36 = vector.load %arg8[%c0_17, %c0_18] : memref<128x128xbf16, #tpu.memory_space<vmem>>, vector<128x128xbf16>
    %cst_19 = arith.constant dense<0.000000e+00> : vector<1024x128xf32>
    %37 = tpu.matmul %35, %36, %cst_19 {dimension_numbers = #tpu.dot_dimension_numbers<[1], [0], [0], [1], [0, 0, 1, 1], [], []>} : vector<1024x128xbf16>, vector<128x128xbf16>, vector<1024x128xf32> -> vector<1024x128xf32>
    %c0_20 = arith.constant 0 : index
    %c0_21 = arith.constant 0 : index
    %38 = vector.load %arg9[%c0_20, %c0_21] : memref<1x128xf32, #tpu.memory_space<vmem>>, vector<1x128xf32>
    %39 = vector.broadcast %38 : vector<1x128xf32> to vector<1024x128xf32>
    %40 = arith.addf %37, %39 : vector<1024x128xf32>
    %cst_22 = arith.constant 0.000000e+00 : f32
    %41 = vector.broadcast %cst_22 : f32 to vector<1024x128xf32>
    %42 = arith.maximumf %40, %41 : vector<1024x128xf32>
    %43 = arith.truncf %42 : vector<1024x128xf32> to vector<1024x128xbf16>
    %c0_23 = arith.constant 0 : index
    %c0_24 = arith.constant 0 : index
    %44 = vector.load %arg10[%c0_23, %c0_24] : memref<128x128xbf16, #tpu.memory_space<vmem>>, vector<128x128xbf16>
    %cst_25 = arith.constant dense<0.000000e+00> : vector<1024x128xf32>
    %45 = tpu.matmul %43, %44, %cst_25 {dimension_numbers = #tpu.dot_dimension_numbers<[1], [0], [0], [1], [0, 0, 1, 1], [], []>} : vector<1024x128xbf16>, vector<128x128xbf16>, vector<1024x128xf32> -> vector<1024x128xf32>
    %c0_26 = arith.constant 0 : index
    %c0_27 = arith.constant 0 : index
    %46 = vector.load %arg11[%c0_26, %c0_27] : memref<1x128xf32, #tpu.memory_space<vmem>>, vector<1x128xf32>
    %47 = vector.broadcast %46 : vector<1x128xf32> to vector<1024x128xf32>
    %48 = arith.addf %45, %47 : vector<1024x128xf32>
    %cst_28 = arith.constant 0.000000e+00 : f32
    %49 = vector.broadcast %cst_28 : f32 to vector<1024x128xf32>
    %50 = arith.maximumf %48, %49 : vector<1024x128xf32>
    %51 = arith.truncf %50 : vector<1024x128xf32> to vector<1024x128xbf16>
    %c0_29 = arith.constant 0 : index
    %c0_30 = arith.constant 0 : index
    %52 = vector.load %arg12[%c0_29, %c0_30] : memref<128x128xbf16, #tpu.memory_space<vmem>>, vector<128x128xbf16>
    %cst_31 = arith.constant dense<0.000000e+00> : vector<1024x128xf32>
    %53 = tpu.matmul %51, %52, %cst_31 {dimension_numbers = #tpu.dot_dimension_numbers<[1], [0], [0], [1], [0, 0, 1, 1], [], []>} : vector<1024x128xbf16>, vector<128x128xbf16>, vector<1024x128xf32> -> vector<1024x128xf32>
    %c0_32 = arith.constant 0 : index
    %c0_33 = arith.constant 0 : index
    %54 = vector.load %arg13[%c0_32, %c0_33] : memref<1x128xf32, #tpu.memory_space<vmem>>, vector<1x128xf32>
    %55 = vector.broadcast %54 : vector<1x128xf32> to vector<1024x128xf32>
    %56 = arith.addf %53, %55 : vector<1024x128xf32>
    %cst_34 = arith.constant 0.000000e+00 : f32
    %57 = vector.broadcast %cst_34 : f32 to vector<1024x128xf32>
    %58 = arith.maximumf %56, %57 : vector<1024x128xf32>
    %59 = arith.truncf %58 : vector<1024x128xf32> to vector<1024x128xbf16>
    %c0_35 = arith.constant 0 : index
    %c0_36 = arith.constant 0 : index
    %60 = vector.load %arg14[%c0_35, %c0_36] : memref<128x128xbf16, #tpu.memory_space<vmem>>, vector<128x128xbf16>
    %cst_37 = arith.constant dense<0.000000e+00> : vector<1024x128xf32>
    %61 = tpu.matmul %59, %60, %cst_37 {dimension_numbers = #tpu.dot_dimension_numbers<[1], [0], [0], [1], [0, 0, 1, 1], [], []>} : vector<1024x128xbf16>, vector<128x128xbf16>, vector<1024x128xf32> -> vector<1024x128xf32>
    %c0_38 = arith.constant 0 : index
    %c0_39 = arith.constant 0 : index
    %62 = vector.load %arg15[%c0_38, %c0_39] : memref<1x128xf32, #tpu.memory_space<vmem>>, vector<1x128xf32>
    %63 = vector.broadcast %62 : vector<1x128xf32> to vector<1024x128xf32>
    %64 = arith.addf %61, %63 : vector<1024x128xf32>
    %65 = arith.truncf %64 : vector<1024x128xf32> to vector<1024x128xbf16>
    %c0_40 = arith.constant 0 : index
    %c0_41 = arith.constant 0 : index
    %66 = vector.load %arg16[%c0_40, %c0_41] : memref<1024x128xbf16, #tpu.memory_space<vmem>>, vector<1024x128xbf16>
    tpu.vector_store %arg16[%c0_40, %c0_41], %65 {strides = array<i32>} : memref<1024x128xbf16, #tpu.memory_space<vmem>>, vector<1024x128xbf16>,
    return
  }
  func.func @transform_0(%arg0: i32) -> (i32, i32) {
    %c0_i32 = arith.constant 0 : i32
    %c0_i32_0 = arith.constant 0 : i32
    return %arg0, %c0_i32 : i32, i32
  }
  func.func @transform_1(%arg0: i32) -> (i32, i32) {
    %c0_i32 = arith.constant 0 : i32
    %c0_i32_0 = arith.constant 0 : i32
    return %arg0, %c0_i32 : i32, i32
  }
  func.func @transform_2(%arg0: i32) -> (i32, i32) {
    %c0_i32 = arith.constant 0 : i32
    %c0_i32_0 = arith.constant 0 : i32
    return %arg0, %c0_i32 : i32, i32
  }
  func.func @transform_3(%arg0: i32) -> (i32, i32) {
    %c0_i32 = arith.constant 0 : i32
    %c0_i32_0 = arith.constant 0 : i32
    %c0_i32_1 = arith.constant 0 : i32
    return %c0_i32, %c0_i32_0 : i32, i32
  }
  func.func @transform_4(%arg0: i32) -> (i32, i32) {
    %c0_i32 = arith.constant 0 : i32
    %c0_i32_0 = arith.constant 0 : i32
    %c0_i32_1 = arith.constant 0 : i32
    return %c0_i32, %c0_i32_0 : i32, i32
  }
  func.func @transform_5(%arg0: i32) -> (i32, i32) {
    %c0_i32 = arith.constant 0 : i32
    %c0_i32_0 = arith.constant 0 : i32
    %c0_i32_1 = arith.constant 0 : i32
    return %c0_i32, %c0_i32_0 : i32, i32
  }
  func.func @transform_6(%arg0: i32) -> (i32, i32) {
    %c0_i32 = arith.constant 0 : i32
    %c0_i32_0 = arith.constant 0 : i32
    %c0_i32_1 = arith.constant 0 : i32
    return %c0_i32, %c0_i32_0 : i32, i32
  }
  func.func @transform_7(%arg0: i32) -> (i32, i32) {
    %c0_i32 = arith.constant 0 : i32
    %c0_i32_0 = arith.constant 0 : i32
    %c0_i32_1 = arith.constant 0 : i32
    return %c0_i32, %c0_i32_0 : i32, i32
  }
  func.func @transform_8(%arg0: i32) -> (i32, i32) {
    %c0_i32 = arith.constant 0 : i32
    %c0_i32_0 = arith.constant 0 : i32
    %c0_i32_1 = arith.constant 0 : i32
    return %c0_i32, %c0_i32_0 : i32, i32
  }
  func.func @transform_9(%arg0: i32) -> (i32, i32) {
    %c0_i32 = arith.constant 0 : i32
    %c0_i32_0 = arith.constant 0 : i32
    %c0_i32_1 = arith.constant 0 : i32
    return %c0_i32, %c0_i32_0 : i32, i32
  }
  func.func @transform_10(%arg0: i32) -> (i32, i32) {
    %c0_i32 = arith.constant 0 : i32
    %c0_i32_0 = arith.constant 0 : i32
    %c0_i32_1 = arith.constant 0 : i32
    return %c0_i32, %c0_i32_0 : i32, i32
  }
  func.func @transform_11(%arg0: i32) -> (i32, i32) {
    %c0_i32 = arith.constant 0 : i32
    %c0_i32_0 = arith.constant 0 : i32
    %c0_i32_1 = arith.constant 0 : i32
    return %c0_i32, %c0_i32_0 : i32, i32
  }
  func.func @transform_12(%arg0: i32) -> (i32, i32) {
    %c0_i32 = arith.constant 0 : i32
    %c0_i32_0 = arith.constant 0 : i32
    %c0_i32_1 = arith.constant 0 : i32
    return %c0_i32, %c0_i32_0 : i32, i32
  }
  func.func @transform_13(%arg0: i32) -> (i32, i32) {
    %c0_i32 = arith.constant 0 : i32
    %c0_i32_0 = arith.constant 0 : i32
    %c0_i32_1 = arith.constant 0 : i32
    return %c0_i32, %c0_i32_0 : i32, i32
  }
  func.func @transform_14(%arg0: i32) -> (i32, i32) {
    %c0_i32 = arith.constant 0 : i32
    %c0_i32_0 = arith.constant 0 : i32
    %c0_i32_1 = arith.constant 0 : i32
    return %c0_i32, %c0_i32_0 : i32, i32
  }
  func.func @transform_15(%arg0: i32) -> (i32, i32) {
    %c0_i32 = arith.constant 0 : i32
    %c0_i32_0 = arith.constant 0 : i32
    return %arg0, %c0_i32 : i32, i32
  }
}

</mosaic_0001>

<bundles_post_ra>
// kernel: tpu_custom_call.1
= control target key start
LH: loop header
LB: loop body
LE: loop exit
PB: predicated region body
PF: predicated region fallthrough
CT: control target
= control target key end

     0   :  { %20 = vsyncpa [#allocation3], 0  ;;  %s12306_s0 = inlined_call_operand.vmem [shape: f32[8192,16], index: 0, kind: input, shape index: {}]   ;;  %s12307_s1 = inlined_call_operand.vmem [shape: f32[8192,32], index: 1, kind: input, shape index: {}]   ;;  %s12308_s2 = inlined_call_operand.vmem [shape: f32[8192,16], index: 2, kind: input, shape index: {}]   ;;  %s12309_s3 = inlined_call_operand.vmem [shape: bf16[64,128], index: 3, kind: input, shape index: {}]   ;;  %s12310_s4 = inlined_call_operand.vmem [shape: f32[1,128], index: 4, kind: input, shape index: {}]   ;;  %s12311_s5 = inlined_call_operand.vmem [shape: bf16[128,128], index: 5, kind: input, shape index: {}]   ;;  %s12312_s6 = inlined_call_operand.vmem [shape: f32[1,128], index: 6, kind: input, shape index: {}]   ;;  %s12313_s7 = inlined_call_operand.vmem [shape: bf16[128,128], index: 7, kind: input, shape index: {}]   ;;  %s12314_s8 = inlined_call_operand.vmem [shape: f32[1,128], index: 8, kind: input, shape index: {}]   ;;  %s12315_s9 = inlined_call_operand.vmem [shape: bf16[128,128], index: 9, kind: input, shape index: {}]   ;;  %s12316_s10 = inlined_call_operand.vmem [shape: f32[1,128], index: 10, kind: input, shape index: {}]   ;;  %s12317_s11 = inlined_call_operand.vmem [shape: bf16[128,128], index: 11, kind: input, shape index: {}]   ;;  %s12318_s12 = inlined_call_operand.vmem [shape: f32[1,128], index: 12, kind: input, shape index: {}]   ;;  %s12319_s13 = inlined_call_operand.vmem [shape: bf16[128,128], index: 13, kind: input, shape index: {}]   ;;  %s12320_s14 = inlined_call_operand.vmem [shape: f32[1,128], index: 14, kind: input, shape index: {}]   ;;  %s12321_s15 = inlined_call_operand.hbm [shape: bf16[8192,128], index: 15, kind: output, shape index: {}]  }
   0x1   :  { %22 = vsyncpa [#allocation3 + $0x1], 0  ;;  %s9890_s18 = smov 0   ;;  %s9892_s19 = smov 0  }
   0x2   :  { %s9894_s20 = smov 0   ;;  %s9896_s21 = smov 0  }
   0x3 LB: > { %12326 = sst [smem:[#allocation5_spill]] %s9799_s20  ;;  %s9911_s22 = sadd.s32 4294967295, %s9803_s21   ;;  %s9803_s21 = sphi %s9896_s21, %s12337_s21   ;;  %s9799_s20 = sphi %s9894_s20, %s12339_s20   ;;  %s9795_s19 = sphi %s9892_s19, %s12341_s19   ;;  %s9791_s18 = sphi %s9890_s18, %s12340_s18  }
   0x4   : > { %s7579_s23 = sadd.s32 4294967294, %s9803_s21   ;;  %s9915_s24 = sadd.s32 1, %s9803_s21  }
   0x5   : > { %12327 = sst [smem:[#allocation6_spill]] %s9915_s24  ;;  %s365_s25 = sadd.s32 1, %s9799_s20 }
   0x6   : > { %s362_s26 = ssub.s32 %s9803_s21, %s9915_s24  ;;  %p375_p0 = scmp.ne.s32.totalorder %s9799_s20, %s9795_s19 }
   0x7   : > { %p363_p1 = scmp.eq.s32.totalorder %s362_s26, 0  ;;  %p376_p2 = scmp.eq.s32.totalorder %s9911_s22, 7 }
   0x8   : > { %p381_p3 = scmp.ne.s32.totalorder %s9795_s19, %s9791_s18  ;;  %p382_p4 = scmp.eq.s32.totalorder %s7579_s23, 7 }
   0x9   : > { %s9926_s27 = scalar_select %p363_p1, %s9799_s20, %s365_s25  }
   0xa   : > { %p9928_p5 = por %p376_p2, %p375_p0  ;;  %p9932_p6 = por %p382_p4, %p381_p3 }
   0xb   : > { %12328 = sst [smem:[#allocation7_spill]] %s9926_s27  ;;  %p7582_p7 = scmp.ge.s32.totalorder %s9803_s21, 1 }
   0xc   : > { %s12330_s29 = scalar_select %p9932_p6, 1, 0 }
   0xd   : > { %p463_p8 = scmp.lt.s32.totalorder %s9803_s21, 9 }
   0xe   : > { %12331 = sst [smem:[#allocation8_spill]] %s12330_s29 }
   0xf   : > { %p464_p9 = pnand %p7582_p7, %p463_p8 }
  0x10   : > { %s7584_s30 = sshll.u32 (!%p464_p9), %s9911_s22, 7  ;;  %v9692_v0 = vld [vmem:[%s12309_s3] sm:$0xff] (!%p464_p9)   ;;  %v9693_v1 = vld [vmem:[%s12309_s3 + $0x8] sm:$0xff] (!%p464_p9)   ;;  %v9694_v2 = vld [vmem:[%s12309_s3 + $0x10] sm:$0xff] (!%p464_p9)   ;;  %s9805_s27 = smov (!%p464_p9), 48   ;;  %vm1508_vm0 = vcmask (!%p464_p9), 261120  }
  0x11   : > { %467 = sbr.rel (%p464_p9) target bundleno = 1746 (0x6d2), region = 80  ;;  %p522_p10 = scmp.lt.s32.totalorder (!%p464_p9), %s7584_s30, 1023  ;;  %8777 = vmatprep.subr.bf16.mxu0 (!%p464_p9), %v9692_v0  ;;  %v9695_v13 = vld [vmem:[%s12309_s3 + $0x18] sm:$0xff] (!%p464_p9)   ;;  %vm1701_vm1 = vcmask (!%p464_p9), 392192   ;;  %vm1869_vm2 = vcmask (!%p464_p9), 523264  }
  0x12   : > { %8778 = vmatpush3.bf16.msra.mxu0 (!%p464_p9), %v9692_v0  ;;  %s9806_s29 = smov (!%p464_p9), 32   ;;  %s7965_s20 = sshll.u32 (!%p464_p9), %s9911_s22, 13 }
  0x13   : > { %8779 = vmatprep.subr.bf16.mxu0 (!%p464_p9), %v9693_v1 }
  0x16   : > { %8780 = vmatpush3.bf16.msra.mxu0 (!%p464_p9), %v9693_v1 }
  0x17   : > { %8781 = vmatprep.subr.bf16.mxu0 (!%p464_p9), %v9694_v2 }
  0x18   : > { %s12343_s30 = smov (!%p522_p10, %s7584_s30), 1023 }
  0x19   : > { %s9945_s26 = sshll.u32 %s12343_s30, 3 }
  0x1a   : > { %s9954_s16 = scalar_lea.vmem %s12308_s2, %s9945_s26  ;;  %s9962_s23 = scalar_lea.vmem %s12306_s0, %s9945_s26  ;;  %8782 = vmatpush3.bf16.msra.mxu0 %v9694_v2 }
  0x1b   : > { %v932_v3 = vld [vmem:[%s9954_s16] sm:$0xff]  ;;  %v933_v4 = vld [vmem:[%s9954_s16 + $0x8] sm:$0xff]  ;;  %v934_v5 = vld [vmem:[%s9954_s16 + $0x10] sm:$0xff]  ;;  %8783 = vmatprep.subr.bf16.mxu0 %v9695_v13  ;;  %s10133_s17 = scalar_lea.vmem %s12307_s1, %s9945_s26 }
  0x1c   : > { %v1060_v6 = vpack.c.bf16 %v933_v4, %v932_v3  ;;  %v740_v7 = vld [vmem:[%s9962_s23] sm:$0xff]  ;;  %v741_v8 = vld [vmem:[%s9962_s23 + $0x8] sm:$0xff]  ;;  %v935_v9 = vld [vmem:[%s9954_s16 + $0x18] sm:$0xff] }
  0x1d   : > { %v868_v10 = vpack.c.bf16 %v741_v8, %v740_v7  ;;  %v742_v11 = vld [vmem:[%s9962_s23 + $0x10] sm:$0xff]  ;;  %v743_v12 = vld [vmem:[%s9962_s23 + $0x18] sm:$0xff]  ;;  %v1061_v14 = vpack.c.bf16 %v935_v9, %v934_v5  ;;  %v744_v18 = vld [vmem:[%s9962_s23 + $0x20] sm:$0xff] }
  0x1e   : > { %1380 = vrot.lane.b32.xlu1 %v1060_v6, %s9805_s27  ;;  %v869_v15 = vpack.c.bf16 %v743_v12, %v742_v11  ;;  %v746_v16 = vld [vmem:[%s9962_s23 + $0x30] sm:$0xff]  ;;  %v747_v17 = vld [vmem:[%s9962_s23 + $0x38] sm:$0xff]  ;;  %v745_v19 = vld [vmem:[%s9962_s23 + $0x28] sm:$0xff]  ;;  %8784 = vmatpush3.bf16.msra.mxu0 %v9695_v13 }
  0x1f   : > { %1188 = vrot.lane.b32.xlu0 %v868_v10, %s9806_s29  ;;  %v871_v20 = vpack.c.bf16 %v747_v17, %v746_v16  ;;  %v870_v21 = vpack.c.bf16 %v745_v19, %v744_v18  ;;  %v938_v22 = vld [vmem:[%s9954_s16 + $0x30] sm:$0xff]  ;;  %v939_v23 = vld [vmem:[%s9954_s16 + $0x38] sm:$0xff]  ;;  %v936_v24 = vld [vmem:[%s9954_s16 + $0x20] sm:$0xff] }
  0x20   : > { %v937_v25 = vld [vmem:[%s9954_s16 + $0x28] sm:$0xff]  ;;  %v1063_v26 = vpack.c.bf16 %v939_v23, %v938_v22  ;;  %v750_v28 = vld [vmem:[%s9962_s23 + $0x50] sm:$0xff]  ;;  %v751_v29 = vld [vmem:[%s9962_s23 + $0x58] sm:$0xff] }
  0x21   : > { %v1062_v27 = vpack.c.bf16 %v937_v25, %v936_v24  ;;  %v748_v30 = vld [vmem:[%s9962_s23 + $0x40] sm:$0xff]  ;;  %v749_v31 = vld [vmem:[%s9962_s23 + $0x48] sm:$0xff]  ;;  %v873_v32 = vpack.c.bf16 %v751_v29, %v750_v28  ;;  %v942_v34 = vld [vmem:[%s9954_s16 + $0x50] sm:$0xff] }
  0x22   : > { %1382 = vrot.lane.b32.xlu1 %v1061_v14, %s9805_s27  ;;  %v872_v33 = vpack.c.bf16 %v749_v31, %v748_v30  ;;  %v943_v35 = vld [vmem:[%s9954_s16 + $0x58] sm:$0xff]  ;;  %v940_v36 = vld [vmem:[%s9954_s16 + $0x40] sm:$0xff]  ;;  %v941_v37 = vld [vmem:[%s9954_s16 + $0x48] sm:$0xff] }
  0x23   : > { %1190 = vrot.lane.b32.xlu0 %v869_v15, %s9806_s29  ;;  %v1065_v38 = vpack.c.bf16 %v943_v35, %v942_v34  ;;  %v1064_v39 = vpack.c.bf16 %v941_v37, %v940_v36  ;;  %v754_v40 = vld [vmem:[%s9962_s23 + $0x70] sm:$0xff]  ;;  %v755_v41 = vld [vmem:[%s9962_s23 + $0x78] sm:$0xff]  ;;  %v752_v42 = vld [vmem:[%s9962_s23 + $0x60] sm:$0xff] }
  0x24   : > { %v753_v43 = vld [vmem:[%s9962_s23 + $0x68] sm:$0xff]  ;;  %v875_v44 = vpack.c.bf16 %v755_v41, %v754_v40  ;;  %v946_v46 = vld [vmem:[%s9954_s16 + $0x70] sm:$0xff]  ;;  %v947_v47 = vld [vmem:[%s9954_s16 + $0x78] sm:$0xff] }
  0x25   : > { %v874_v45 = vpack.c.bf16 %v753_v43, %v752_v42  ;;  %v944_v48 = vld [vmem:[%s9954_s16 + $0x60] sm:$0xff]  ;;  %v945_v49 = vld [vmem:[%s9954_s16 + $0x68] sm:$0xff]  ;;  %v1067_v50 = vpack.c.bf16 %v947_v47, %v946_v46  ;;  %v758_v52 = vld [vmem:[%s9962_s23 + $0x90] sm:$0xff] }
  0x26   : > { %1194 = vrot.lane.b32.xlu1 %v871_v20, %s9806_s29  ;;  %v1066_v51 = vpack.c.bf16 %v945_v49, %v944_v48  ;;  %v759_v53 = vld [vmem:[%s9962_s23 + $0x98] sm:$0xff]  ;;  %v756_v54 = vld [vmem:[%s9962_s23 + $0x80] sm:$0xff]  ;;  %v757_v55 = vld [vmem:[%s9962_s23 + $0x88] sm:$0xff] }
  0x27   : > { %1192 = vrot.lane.b32.xlu0 %v870_v21, %s9806_s29  ;;  %v877_v56 = vpack.c.bf16 %v759_v53, %v758_v52  ;;  %v876_v57 = vpack.c.bf16 %v757_v55, %v756_v54  ;;  %v950_v58 = vld [vmem:[%s9954_s16 + $0x90] sm:$0xff]  ;;  %v951_v59 = vld [vmem:[%s9954_s16 + $0x98] sm:$0xff]  ;;  %v948_v60 = vld [vmem:[%s9954_s16 + $0x80] sm:$0xff] }
  0x28   : > { %v949_v61 = vld [vmem:[%s9954_s16 + $0x88] sm:$0xff]  ;;  %v1069_v62 = vpack.c.bf16 %v951_v59, %v950_v58  ;;  %v762_v0 = vld [vmem:[%s9962_s23 + $0xb0] sm:$0xff]  ;;  %v763_v1 = vld [vmem:[%s9962_s23 + $0xb8] sm:$0xff] }
  0x29   : > { %v1068_v63 = vpack.c.bf16 %v949_v61, %v948_v60  ;;  %v760_v2 = vld [vmem:[%s9962_s23 + $0xa0] sm:$0xff]  ;;  %v761_v3 = vld [vmem:[%s9962_s23 + $0xa8] sm:$0xff]  ;;  %v879_v4 = vpack.c.bf16 %v763_v1, %v762_v0  ;;  %v954_v6 = vld [vmem:[%s9954_s16 + $0xb0] sm:$0xff] }
  0x2a   : > { %1386 = vrot.lane.b32.xlu1 %v1063_v26, %s9805_s27  ;;  %v878_v5 = vpack.c.bf16 %v761_v3, %v760_v2  ;;  %v955_v7 = vld [vmem:[%s9954_s16 + $0xb8] sm:$0xff]  ;;  %v952_v8 = vld [vmem:[%s9954_s16 + $0xa0] sm:$0xff]  ;;  %v953_v9 = vld [vmem:[%s9954_s16 + $0xa8] sm:$0xff] }
  0x2b   : > { %1384 = vrot.lane.b32.xlu0 %v1062_v27, %s9805_s27  ;;  %v1071_v10 = vpack.c.bf16 %v955_v7, %v954_v6  ;;  %v1070_v11 = vpack.c.bf16 %v953_v9, %v952_v8  ;;  %v766_v12 = vld [vmem:[%s9962_s23 + $0xd0] sm:$0xff]  ;;  %v767_v13 = vld [vmem:[%s9962_s23 + $0xd8] sm:$0xff]  ;;  %v764_v14 = vld [vmem:[%s9962_s23 + $0xc0] sm:$0xff] }
  0x2c   : > { %v765_v15 = vld [vmem:[%s9962_s23 + $0xc8] sm:$0xff]  ;;  %v881_v16 = vpack.c.bf16 %v767_v13, %v766_v12  ;;  %v958_v18 = vld [vmem:[%s9954_s16 + $0xd0] sm:$0xff]  ;;  %v959_v19 = vld [vmem:[%s9954_s16 + $0xd8] sm:$0xff] }
  0x2d   : > { %v880_v17 = vpack.c.bf16 %v765_v15, %v764_v14  ;;  %v956_v20 = vld [vmem:[%s9954_s16 + $0xc0] sm:$0xff]  ;;  %v957_v21 = vld [vmem:[%s9954_s16 + $0xc8] sm:$0xff]  ;;  %v1073_v22 = vpack.c.bf16 %v959_v19, %v958_v18  ;;  %v770_v24 = vld [vmem:[%s9962_s23 + $0xf0] sm:$0xff] }
  0x2e   : > { %1198 = vrot.lane.b32.xlu1 %v873_v32, %s9806_s29  ;;  %v1072_v23 = vpack.c.bf16 %v957_v21, %v956_v20  ;;  %v771_v25 = vld [vmem:[%s9962_s23 + $0xf8] sm:$0xff]  ;;  %v768_v26 = vld [vmem:[%s9962_s23 + $0xe0] sm:$0xff]  ;;  %v769_v27 = vld [vmem:[%s9962_s23 + $0xe8] sm:$0xff] }
  0x2f   : > { %1196 = vrot.lane.b32.xlu0 %v872_v33, %s9806_s29  ;;  %v883_v28 = vpack.c.bf16 %v771_v25, %v770_v24  ;;  %v882_v29 = vpack.c.bf16 %v769_v27, %v768_v26  ;;  %v962_v30 = vld [vmem:[%s9954_s16 + $0xf0] sm:$0xff]  ;;  %v963_v31 = vld [vmem:[%s9954_s16 + $0xf8] sm:$0xff]  ;;  %v960_v32 = vld [vmem:[%s9954_s16 + $0xe0] sm:$0xff] }
  0x30   : > { %v961_v33 = vld [vmem:[%s9954_s16 + $0xe8] sm:$0xff]  ;;  %v1075_v34 = vpack.c.bf16 %v963_v31, %v962_v30  ;;  %v774_v36 = vld [vmem:[%s9962_s23 + $0x110] sm:$0xff]  ;;  %v775_v37 = vld [vmem:[%s9962_s23 + $0x118] sm:$0xff] }
  0x31   : > { %v1074_v35 = vpack.c.bf16 %v961_v33, %v960_v32  ;;  %v885_v40 = vpack.c.bf16 %v775_v37, %v774_v36  ;;  %v966_v42 = vld [vmem:[%s9954_s16 + $0x110] sm:$0xff]  ;;  %v967_v43 = vld [vmem:[%s9954_s16 + $0x118] sm:$0xff] }
  0x32   : > { %1390 = vrot.lane.b32.xlu1 %v1065_v38, %s9805_s27  ;;  %v772_v38 = vld [vmem:[%s9962_s23 + $0x100] sm:$0xff]  ;;  %v1077_v46 = vpack.c.bf16 %v967_v43, %v966_v42  ;;  %v778_v48 = vld [vmem:[%s9962_s23 + $0x130] sm:$0xff]  ;;  %v779_v49 = vld [vmem:[%s9962_s23 + $0x138] sm:$0xff] }
  0x33   : > { %1388 = vrot.lane.b32.xlu0 %v1064_v39, %s9805_s27  ;;  %v773_v39 = vld [vmem:[%s9962_s23 + $0x108] sm:$0xff]  ;;  %v887_v52 = vpack.c.bf16 %v779_v49, %v778_v48  ;;  %v970_v54 = vld [vmem:[%s9954_s16 + $0x130] sm:$0xff]  ;;  %v971_v55 = vld [vmem:[%s9954_s16 + $0x138] sm:$0xff] }
  0x34   : > { %v884_v41 = vpack.c.bf16 %v773_v39, %v772_v38  ;;  %v1079_v58 = vpack.c.bf16 %v971_v55, %v970_v54  ;;  %v782_v60 = vld [vmem:[%s9962_s23 + $0x150] sm:$0xff]  ;;  %v783_v61 = vld [vmem:[%s9962_s23 + $0x158] sm:$0xff]  ;;  %v548_v48 = vld [vmem:[%s10133_s17] sm:$0xff] }
  0x35   : > { %v889_v0 = vpack.c.bf16 %v783_v61, %v782_v60  ;;  %v974_v2 = vld [vmem:[%s9954_s16 + $0x150] sm:$0xff]  ;;  %v975_v3 = vld [vmem:[%s9954_s16 + $0x158] sm:$0xff]  ;;  %v549_v49 = vld [vmem:[%s10133_s17 + $0x8] sm:$0xff] }
  0x36   : > { %1202 = vrot.lane.b32.xlu1 %v875_v44, %s9806_s29  ;;  %v964_v44 = vld [vmem:[%s9954_s16 + $0x100] sm:$0xff]  ;;  %v1081_v6 = vpack.c.bf16 %v975_v3, %v974_v2  ;;  %v786_v8 = vld [vmem:[%s9962_s23 + $0x170] sm:$0xff]  ;;  %v787_v9 = vld [vmem:[%s9962_s23 + $0x178] sm:$0xff] }
  0x37   : > { %1200 = vrot.lane.b32.xlu0 %v874_v45, %s9806_s29  ;;  %v965_v45 = vld [vmem:[%s9954_s16 + $0x108] sm:$0xff]  ;;  %v891_v12 = vpack.c.bf16 %v787_v9, %v786_v8  ;;  %v978_v14 = vld [vmem:[%s9954_s16 + $0x170] sm:$0xff]  ;;  %v979_v15 = vld [vmem:[%s9954_s16 + $0x178] sm:$0xff] }
  0x38   : > { %v1076_v47 = vpack.c.bf16 %v965_v45, %v964_v44  ;;  %v1083_v18 = vpack.c.bf16 %v979_v15, %v978_v14  ;;  %v790_v20 = vld [vmem:[%s9962_s23 + $0x190] sm:$0xff]  ;;  %v791_v21 = vld [vmem:[%s9962_s23 + $0x198] sm:$0xff]  ;;  %v988_v54 = vld [vmem:[%s9954_s16 + $0x1c0] sm:$0xff] }
  0x39   : > { %v982_v24 = vld [vmem:[%s9954_s16 + $0x190] sm:$0xff]  ;;  %v983_v25 = vld [vmem:[%s9954_s16 + $0x198] sm:$0xff]  ;;  %v893_v26 = vpack.c.bf16 %v791_v21, %v790_v20  ;;  %v989_v55 = vld [vmem:[%s9954_s16 + $0x1c8] sm:$0xff] }
  0x3a   : > { %1394 = vrot.lane.b32.xlu1 %v1067_v50, %s9805_s27  ;;  %v776_v50 = vld [vmem:[%s9962_s23 + $0x120] sm:$0xff]  ;;  %v1085_v30 = vpack.c.bf16 %v983_v25, %v982_v24  ;;  %v794_v32 = vld [vmem:[%s9962_s23 + $0x1b0] sm:$0xff]  ;;  %v795_v33 = vld [vmem:[%s9962_s23 + $0x1b8] sm:$0xff]  ;;  %v1088_v60 = vpack.c.bf16 %v989_v55, %v988_v54 }
  0x3b   : > { %1392 = vrot.lane.b32.xlu0 %v1066_v51, %s9805_s27  ;;  %v777_v51 = vld [vmem:[%s9962_s23 + $0x128] sm:$0xff]  ;;  %v986_v36 = vld [vmem:[%s9954_s16 + $0x1b0] sm:$0xff]  ;;  %v987_v37 = vld [vmem:[%s9954_s16 + $0x1b8] sm:$0xff]  ;;  %v895_v38 = vpack.c.bf16 %v795_v33, %v794_v32 }
  0x3c   : > { %v886_v53 = vpack.c.bf16 %v777_v51, %v776_v50  ;;  %v1087_v42 = vpack.c.bf16 %v987_v37, %v986_v36  ;;  %v798_v44 = vld [vmem:[%s9962_s23 + $0x1d0] sm:$0xff]  ;;  %v799_v45 = vld [vmem:[%s9962_s23 + $0x1d8] sm:$0xff]  ;;  %v992_v14 = vld [vmem:[%s9954_s16 + $0x1e0] sm:$0xff] }
  0x3d   : > { %v990_v50 = vld [vmem:[%s9954_s16 + $0x1d0] sm:$0xff]  ;;  %v991_v51 = vld [vmem:[%s9954_s16 + $0x1d8] sm:$0xff]  ;;  %v993_v15 = vld [vmem:[%s9954_s16 + $0x1e8] sm:$0xff] }
  0x3e   : > { %1206 = vrot.lane.b32.xlu1 %v877_v56, %s9806_s29  ;;  %v968_v56 = vld [vmem:[%s9954_s16 + $0x120] sm:$0xff]  ;;  %v802_v61 = vld [vmem:[%s9962_s23 + $0x1f0] sm:$0xff]  ;;  %v1090_v21 = vpack.c.bf16 %v993_v15, %v992_v14  ;;  %v559_v37 = vld [vmem:[%s10133_s17 + $0x58] sm:$0xff] }
  0x3f   : > { %1204 = vrot.lane.b32.xlu0 %v876_v57, %s9806_s29  ;;  %v969_v57 = vld [vmem:[%s9954_s16 + $0x128] sm:$0xff]  ;;  %v994_v3 = vld [vmem:[%s9954_s16 + $0x1f0] sm:$0xff]  ;;  %v996_v33 = vld [vmem:[%s9954_s16 + $0x200] sm:$0xff] }
  0x40   : > { %v1078_v59 = vpack.c.bf16 %v969_v57, %v968_v56  ;;  %v550_v56 = vld [vmem:[%s10133_s17 + $0x10] sm:$0xff]  ;;  %v551_v57 = vld [vmem:[%s10133_s17 + $0x18] sm:$0xff]  ;;  %v812_v14 = vld [vmem:[%s9962_s23 + $0x240] sm:$0xff] }
  0x41   : > { %v558_v36 = vld [vmem:[%s10133_s17 + $0x50] sm:$0xff]  ;;  %v813_v15 = vld [vmem:[%s9962_s23 + $0x248] sm:$0xff] }
  0x42   : > { %1398 = vrot.lane.b32.xlu1 %v1069_v62, %s9805_s27  ;;  %v780_v62 = vld [vmem:[%s9962_s23 + $0x140] sm:$0xff] }
  0x43   : > { %1396 = vrot.lane.b32.xlu0 %v1068_v63, %s9805_s27  ;;  %v781_v63 = vld [vmem:[%s9962_s23 + $0x148] sm:$0xff] }
  0x44   : > { %v888_v1 = vpack.c.bf16 %v781_v63, %v780_v62  ;;  %v803_v62 = vld [vmem:[%s9962_s23 + $0x1f8] sm:$0xff] }
  0x46   : > { %1210 = vrot.lane.b32.xlu1 %v879_v4, %s9806_s29  ;;  %v972_v4 = vld [vmem:[%s9954_s16 + $0x140] sm:$0xff] }
  0x47   : > { %1208 = vrot.lane.b32.xlu0 %v878_v5, %s9806_s29  ;;  %v973_v5 = vld [vmem:[%s9954_s16 + $0x148] sm:$0xff] }
  0x48   : > { %v1080_v7 = vpack.c.bf16 %v973_v5, %v972_v4  ;;  %v995_v4 = vld [vmem:[%s9954_s16 + $0x1f8] sm:$0xff] }
  0x4a   : > { %1402 = vrot.lane.b32.xlu1 %v1071_v10, %s9805_s27  ;;  %v784_v10 = vld [vmem:[%s9962_s23 + $0x160] sm:$0xff] }
  0x4b   : > { %1400 = vrot.lane.b32.xlu0 %v1070_v11, %s9805_s27  ;;  %v785_v11 = vld [vmem:[%s9962_s23 + $0x168] sm:$0xff] }
  0x4c   : > { %v890_v13 = vpack.c.bf16 %v785_v11, %v784_v10  ;;  %v554_v10 = vld [vmem:[%s10133_s17 + $0x30] sm:$0xff]  ;;  %v555_v11 = vld [vmem:[%s10133_s17 + $0x38] sm:$0xff] }
  0x4d   : > { %v679_v24 = vpack.c.bf16 %v555_v11, %v554_v10  ;;  %v814_v10 = vld [vmem:[%s9962_s23 + $0x250] sm:$0xff]  ;;  %v815_v11 = vld [vmem:[%s9962_s23 + $0x258] sm:$0xff] }
  0x4e   : > { %1214 = vrot.lane.b32.xlu1 %v881_v16, %s9806_s29  ;;  %v976_v16 = vld [vmem:[%s9954_s16 + $0x160] sm:$0xff] }
  0x4f   : > { %1212 = vrot.lane.b32.xlu0 %v880_v17, %s9806_s29  ;;  %v977_v17 = vld [vmem:[%s9954_s16 + $0x168] sm:$0xff] }
  0x50   : > { %v1082_v19 = vpack.c.bf16 %v977_v17, %v976_v16  ;;  %v553_v17 = vld [vmem:[%s10133_s17 + $0x28] sm:$0xff] }
  0x52   : > { %1406 = vrot.lane.b32.xlu1 %v1073_v22, %s9805_s27  ;;  %v788_v22 = vld [vmem:[%s9962_s23 + $0x180] sm:$0xff] }
  0x53   : > { %1404 = vrot.lane.b32.xlu0 %v1072_v23, %s9805_s27  ;;  %v789_v23 = vld [vmem:[%s9962_s23 + $0x188] sm:$0xff] }
  0x54   : > { %v892_v27 = vpack.c.bf16 %v789_v23, %v788_v22  ;;  %v806_v22 = vld [vmem:[%s9962_s23 + $0x210] sm:$0xff]  ;;  %v807_v23 = vld [vmem:[%s9962_s23 + $0x218] sm:$0xff] }
  0x55   : > { %v901_v32 = vpack.c.bf16 %v807_v23, %v806_v22 }
  0x56   : > { %1218 = vrot.lane.b32.xlu1 %v883_v28, %s9806_s29  ;;  %v980_v28 = vld [vmem:[%s9954_s16 + $0x180] sm:$0xff] }
  0x57   : > { %1216 = vrot.lane.b32.xlu0 %v882_v29, %s9806_s29  ;;  %v981_v29 = vld [vmem:[%s9954_s16 + $0x188] sm:$0xff] }
  0x58   : > { %v1084_v31 = vpack.c.bf16 %v981_v29, %v980_v28 }
  0x5a   : > { %1410 = vrot.lane.b32.xlu1 %v1075_v34, %s9805_s27  ;;  %v792_v34 = vld [vmem:[%s9962_s23 + $0x1a0] sm:$0xff] }
  0x5b   : > { %1408 = vrot.lane.b32.xlu0 %v1074_v35, %s9805_s27  ;;  %v793_v35 = vld [vmem:[%s9962_s23 + $0x1a8] sm:$0xff] }
  0x5c   : > { %v894_v39 = vpack.c.bf16 %v793_v35, %v792_v34  ;;  %v997_v34 = vld [vmem:[%s9954_s16 + $0x208] sm:$0xff] }
  0x5e   : > { %1222 = vrot.lane.b32.xlu1 %v885_v40, %s9806_s29  ;;  %v984_v40 = vld [vmem:[%s9954_s16 + $0x1a0] sm:$0xff] }
  0x5f   : > { %1220 = vrot.lane.b32.xlu0 %v884_v41, %s9806_s29  ;;  %v985_v41 = vld [vmem:[%s9954_s16 + $0x1a8] sm:$0xff] }
  0x60   : > { %v1086_v43 = vpack.c.bf16 %v985_v41, %v984_v40  ;;  %v556_v40 = vld [vmem:[%s10133_s17 + $0x40] sm:$0xff]  ;;  %v557_v41 = vld [vmem:[%s10133_s17 + $0x48] sm:$0xff] }
  0x61   : > { %v680_v54 = vpack.c.bf16 %v557_v41, %v556_v40  ;;  %v816_v40 = vld [vmem:[%s9962_s23 + $0x260] sm:$0xff]  ;;  %v817_v41 = vld [vmem:[%s9962_s23 + $0x268] sm:$0xff] }
  0x62   : > { %1414 = vrot.lane.b32.xlu1 %v1077_v46, %s9805_s27  ;;  %v796_v46 = vld [vmem:[%s9962_s23 + $0x1c0] sm:$0xff] }
  0x63   : > { %1412 = vrot.lane.b32.xlu0 %v1076_v47, %s9805_s27  ;;  %v797_v47 = vld [vmem:[%s9962_s23 + $0x1c8] sm:$0xff] }
  0x66   : > { %1226 = vrot.lane.b32.xlu1 %v887_v52, %s9806_s29  ;;  %v897_v52 = vpack.c.bf16 %v799_v45, %v798_v44 }
  0x67   : > { %1224 = vrot.lane.b32.xlu0 %v886_v53, %s9806_s29  ;;  %v896_v53 = vpack.c.bf16 %v797_v47, %v796_v46  ;;  %v1092_v47 = vpack.c.bf16 %v997_v34, %v996_v33  ;;  %v565_v33 = vld [vmem:[%s10133_s17 + $0x88] sm:$0xff] }
  0x6a   : > { %1418 = vrot.lane.b32.xlu1 %v1079_v58, %s9805_s27  ;;  %v676_v58 = vpack.c.bf16 %v549_v49, %v548_v48  ;;  %v810_v48 = vld [vmem:[%s9962_s23 + $0x230] sm:$0xff]  ;;  %v811_v49 = vld [vmem:[%s9962_s23 + $0x238] sm:$0xff] }
  0x6b   : > { %1416 = vrot.lane.b32.xlu0 %v1078_v59, %s9805_s27  ;;  %v1089_v59 = vpack.c.bf16 %v991_v51, %v990_v50  ;;  %v681_v50 = vpack.c.bf16 %v559_v37, %v558_v36  ;;  %v818_v36 = vld [vmem:[%s9962_s23 + $0x270] sm:$0xff]  ;;  %v819_v37 = vld [vmem:[%s9962_s23 + $0x278] sm:$0xff] }
  0x6e   : > { %1230 = vrot.lane.b32.xlu1 %v889_v0, %s9806_s29  ;;  %v800_v0 = vld [vmem:[%s9962_s23 + $0x1e0] sm:$0xff] }
  0x6f   : > { %1228 = vrot.lane.b32.xlu0 %v888_v1, %s9806_s29  ;;  %v801_v1 = vld [vmem:[%s9962_s23 + $0x1e8] sm:$0xff] }
  0x70   : > { %v898_v9 = vpack.c.bf16 %v801_v1, %v800_v0 }
  0x72   : > { %1422 = vrot.lane.b32.xlu1 %v1081_v6, %s9805_s27  ;;  %v677_v6 = vpack.c.bf16 %v551_v57, %v550_v56  ;;  %v903_v56 = vpack.c.bf16 %v811_v49, %v810_v48 }
  0x73   : > { %1420 = vrot.lane.b32.xlu0 %v1080_v7, %s9805_s27  ;;  %v899_v7 = vpack.c.bf16 %v803_v62, %v802_v61  ;;  %v1000_v62 = vld [vmem:[%s9954_s16 + $0x220] sm:$0xff] }
  0x76   : > { %1234 = vrot.lane.b32.xlu1 %v891_v12, %s9806_s29 }
  0x77   : > { %1232 = vrot.lane.b32.xlu0 %v890_v13, %s9806_s29  ;;  %v552_v13 = vld [vmem:[%s10133_s17 + $0x20] sm:$0xff] }
  0x78   : > { %v678_v28 = vpack.c.bf16 %v553_v17, %v552_v13 }
  0x7a   : > { %1426 = vrot.lane.b32.xlu1 %v1083_v18, %s9805_s27 }
  0x7b   : > { %1424 = vrot.lane.b32.xlu0 %v1082_v19, %s9805_s27  ;;  %v1091_v19 = vpack.c.bf16 %v995_v4, %v994_v3  ;;  %v562_v3 = vld [vmem:[%s10133_s17 + $0x70] sm:$0xff]  ;;  %v563_v4 = vld [vmem:[%s10133_s17 + $0x78] sm:$0xff] }
  0x7e   : > { %1238 = vrot.lane.b32.xlu1 %v893_v26, %s9806_s29  ;;  %v804_v26 = vld [vmem:[%s9962_s23 + $0x200] sm:$0xff] }
  0x7f   : > { %1236 = vrot.lane.b32.xlu0 %v892_v27, %s9806_s29  ;;  %v805_v27 = vld [vmem:[%s9962_s23 + $0x208] sm:$0xff] }
  0x80   : > { %v900_v35 = vpack.c.bf16 %v805_v27, %v804_v26 }
  0x82   : > { %1430 = vrot.lane.b32.xlu1 %v1085_v30, %s9805_s27  ;;  %v998_v30 = vld [vmem:[%s9954_s16 + $0x210] sm:$0xff] }
  0x83   : > { %1428 = vrot.lane.b32.xlu0 %v1084_v31, %s9805_s27  ;;  %v999_v31 = vld [vmem:[%s9954_s16 + $0x218] sm:$0xff] }
  0x84   : > { %v1093_v46 = vpack.c.bf16 %v999_v31, %v998_v30  ;;  %v567_v30 = vld [vmem:[%s10133_s17 + $0x98] sm:$0xff] }
  0x86   : > { %1242 = vrot.lane.b32.xlu1 %v895_v38, %s9806_s29 }
  0x87   : > { %1240 = vrot.lane.b32.xlu0 %v894_v39, %s9806_s29 }
  0x8a   : > { %1434 = vrot.lane.b32.xlu1 %v1087_v42, %s9805_s27 }
  0x8b   : > { %1432 = vrot.lane.b32.xlu0 %v1086_v43, %s9805_s27 }
  0x8e   : > { %1246 = vrot.lane.b32.xlu1 %v897_v52, %s9806_s29  ;;  %v808_v52 = vld [vmem:[%s9962_s23 + $0x220] sm:$0xff] }
  0x8f   : > { %1244 = vrot.lane.b32.xlu0 %v896_v53, %s9806_s29  ;;  %v809_v53 = vld [vmem:[%s9962_s23 + $0x228] sm:$0xff] }
  0x90   : > { %v1381_v63 = vpop.permute.xlu1 %1380  ;;  %v902_v57 = vpack.c.bf16 %v809_v53, %v808_v52 }
  0x91   : > { %v1189_v2 = vpop.permute.xlu0 %1188 }
  0x92   : > { %v1511_v5 = vsel %vm1508_vm0, %v676_v58, %v1189_v2  ;;  %1438 = vrot.lane.b32.xlu1 %v1089_v59, %s9805_s27  ;;  %v1002_v58 = vld [vmem:[%s9954_s16 + $0x230] sm:$0xff]  ;;  %v1003_v59 = vld [vmem:[%s9954_s16 + $0x238] sm:$0xff] }
  0x93   : > { %1436 = vrot.lane.b32.xlu0 %v1088_v60, %s9805_s27  ;;  %v1703_v8 = vsel %vm1701_vm1, %v1511_v5, %v1381_v63  ;;  %v1001_v63 = vld [vmem:[%s9954_s16 + $0x228] sm:$0xff] }
  0x94   : > { %8785 = vmatprep.mubr.msk.bf16.mxu0 %vm1869_vm2, %v1703_v8  ;;  %v1383_v12 = vpop.permute.xlu1 %1382  ;;  %v1095_v8 = vpack.c.bf16 %v1003_v59, %v1002_v58  ;;  %v568_v58 = vld [vmem:[%s10133_s17 + $0xa0] sm:$0xff]  ;;  %v569_v59 = vld [vmem:[%s10133_s17 + $0xa8] sm:$0xff] }
  0x95   : > { %v1191_v16 = vpop.permute.xlu0 %1190 }
  0x96   : > { %v1514_v18 = vsel %vm1508_vm0, %v677_v6, %v1191_v16  ;;  %1250 = vrot.lane.b32.xlu1 %v899_v7, %s9806_s29  ;;  %v560_v6 = vld [vmem:[%s10133_s17 + $0x60] sm:$0xff]  ;;  %v561_v7 = vld [vmem:[%s10133_s17 + $0x68] sm:$0xff] }
  0x97   : > { %1248 = vrot.lane.b32.xlu0 %v898_v9, %s9806_s29  ;;  %v1705_v20 = vsel %vm1701_vm1, %v1514_v18, %v1383_v12  ;;  %v1094_v9 = vpack.c.bf16 %v1001_v63, %v1000_v62  ;;  %v683_v12 = vpack.c.bf16 %v563_v4, %v562_v3  ;;  %v682_v16 = vpack.c.bf16 %v561_v7, %v560_v6  ;;  %v822_v62 = vld [vmem:[%s9962_s23 + $0x290] sm:$0xff]  ;;  %v823_v63 = vld [vmem:[%s9962_s23 + $0x298] sm:$0xff]  ;;  %v821_v3 = vld [vmem:[%s9962_s23 + $0x288] sm:$0xff] }
  0x98   : > { %8786 = vmatmul.mubr.msk.bf16.vlgmr.msra.gmra.mrb[0].mxu0 %vm1869_vm2, %v1705_v20  ;;  %v1195_v25 = vpop.permute.xlu1 %1194  ;;  %v905_v18 = vpack.c.bf16 %v815_v11, %v814_v10  ;;  %v1006_v20 = vld [vmem:[%s9954_s16 + $0x250] sm:$0xff]  ;;  %v686_v4 = vpack.c.bf16 %v569_v59, %v568_v58  ;;  %v909_v6 = vpack.c.bf16 %v823_v63, %v822_v62 }
  0x99   : > { %v1193_v29 = vpop.permute.xlu0 %1192  ;;  %v1520_v38 = vsel %vm1508_vm0, %v679_v24, %v1195_v25  ;;  %v1004_v24 = vld [vmem:[%s9954_s16 + $0x240] sm:$0xff]  ;;  %v1005_v25 = vld [vmem:[%s9954_s16 + $0x248] sm:$0xff] }
  0x9a   : > { %1442 = vrot.lane.b32.xlu1 %v1091_v19, %s9805_s27  ;;  %v1517_v42 = vsel %vm1508_vm0, %v678_v28, %v1193_v29  ;;  %v904_v19 = vpack.c.bf16 %v813_v15, %v812_v14  ;;  %v566_v29 = vld [vmem:[%s10133_s17 + $0x90] sm:$0xff] }
  0x9b   : > { %1440 = vrot.lane.b32.xlu0 %v1090_v21, %s9805_s27  ;;  %v1007_v21 = vld [vmem:[%s9954_s16 + $0x258] sm:$0xff] }
  0x9c   : > { %v1387_v39 = vpop.permute.xlu1 %1386  ;;  %v1097_v34 = vpack.c.bf16 %v1007_v21, %v1006_v20  ;;  %v572_v20 = vld [vmem:[%s10133_s17 + $0xc0] sm:$0xff]  ;;  %v573_v21 = vld [vmem:[%s10133_s17 + $0xc8] sm:$0xff] }
  0x9d   : > { %v1709_v43 = vsel %vm1701_vm1, %v1520_v38, %v1387_v39  ;;  %v1385_v44 = vpop.permute.xlu0 %1384  ;;  %v685_v38 = vpack.c.bf16 %v567_v30, %v566_v29  ;;  %v825_v29 = vld [vmem:[%s9962_s23 + $0x2a8] sm:$0xff]  ;;  %v688_v30 = vpack.c.bf16 %v573_v21, %v572_v20  ;;  %v9696_v21 = vld [vmem:[%s12313_s7] sm:$0xff]  }
  0x9e   : > { %v1707_v45 = vsel %vm1701_vm1, %v1517_v42, %v1385_v44  ;;  %1254 = vrot.lane.b32.xlu1 %v901_v32, %s9806_s29  ;;  %v564_v32 = vld [vmem:[%s10133_s17 + $0x80] sm:$0xff]  ;;  %v907_v44 = vpack.c.bf16 %v819_v37, %v818_v36  ;;  %9057 = vmatprep.subr.bf16.mxu0 %v9696_v21 }
  0x9f   : > { %1252 = vrot.lane.b32.xlu0 %v900_v35, %s9806_s29  ;;  %8789 = vmatprep.mubr.msk.bf16.mxu0 %vm1869_vm2, %v1707_v45  ;;  %v1096_v35 = vpack.c.bf16 %v1005_v25, %v1004_v24  ;;  %v684_v42 = vpack.c.bf16 %v565_v33, %v564_v32  ;;  %v906_v45 = vpack.c.bf16 %v817_v41, %v816_v40  ;;  %v826_v24 = vld [vmem:[%s9962_s23 + $0x2b0] sm:$0xff]  ;;  %v827_v25 = vld [vmem:[%s9962_s23 + $0x2b8] sm:$0xff] }
  0xa0   : > { %8790 = vmatmul.mubr.msk.bf16.gmra.mrb[4].mxu0 %vm1869_vm2, %v1709_v43  ;;  %v1199_v51 = vpop.permute.xlu1 %1198  ;;  %v911_v32 = vpack.c.bf16 %v827_v25, %v826_v24  ;;  %v1027_v24 = vld [vmem:[%s9954_s16 + $0x2f8] sm:$0xff] }
  0xa1   : > { %v1197_v55 = vpop.permute.xlu0 %1196  ;;  %v1526_v60 = vsel %vm1508_vm0, %v681_v50, %v1199_v51  ;;  %v1008_v50 = vld [vmem:[%s9954_s16 + $0x260] sm:$0xff]  ;;  %v1009_v51 = vld [vmem:[%s9954_s16 + $0x268] sm:$0xff]  ;;  %9058 = vmatpush3.bf16.msra.mxu0 %v9696_v21 }
  0xa2   : > { %1446 = vrot.lane.b32.xlu1 %v1093_v46, %s9805_s27  ;;  %v1523_v0 = vsel %vm1508_vm0, %v680_v54, %v1197_v55  ;;  %v1010_v46 = vld [vmem:[%s9954_s16 + $0x270] sm:$0xff] }
  0xa3   : > { %1444 = vrot.lane.b32.xlu0 %v1092_v47, %s9805_s27  ;;  %v1011_v47 = vld [vmem:[%s9954_s16 + $0x278] sm:$0xff]  ;;  %v570_v55 = vld [vmem:[%s10133_s17 + $0xb0] sm:$0xff] }
  0xa4   : > { %v1391_v61 = vpop.permute.xlu1 %1390 }
  0xa5   : > { %v1713_v1 = vsel %vm1701_vm1, %v1526_v60, %v1391_v61  ;;  %v1389_v2 = vpop.permute.xlu0 %1388  ;;  %v1099_v60 = vpack.c.bf16 %v1011_v47, %v1010_v46  ;;  %v1098_v61 = vpack.c.bf16 %v1009_v51, %v1008_v50  ;;  %v576_v46 = vld [vmem:[%s10133_s17 + $0xe0] sm:$0xff]  ;;  %v577_v47 = vld [vmem:[%s10133_s17 + $0xe8] sm:$0xff]  ;;  %v830_v50 = vld [vmem:[%s9962_s23 + $0x2d0] sm:$0xff] }
  0xa6   : > { %v1711_v5 = vsel %vm1701_vm1, %v1523_v0, %v1389_v2  ;;  %1258 = vrot.lane.b32.xlu1 %v903_v56, %s9806_s29  ;;  %v571_v56 = vld [vmem:[%s10133_s17 + $0xb8] sm:$0xff]  ;;  %v820_v2 = vld [vmem:[%s9962_s23 + $0x280] sm:$0xff] }
  0xa7   : > { %1256 = vrot.lane.b32.xlu0 %v902_v57, %s9806_s29  ;;  %8793 = vmatprep.mubr.msk.bf16.mxu0 %vm1869_vm2, %v1711_v5  ;;  %v687_v0 = vpack.c.bf16 %v571_v56, %v570_v55  ;;  %v908_v7 = vpack.c.bf16 %v821_v3, %v820_v2  ;;  %v831_v51 = vld [vmem:[%s9962_s23 + $0x2d8] sm:$0xff]  ;;  %v829_v55 = vld [vmem:[%s9962_s23 + $0x2c8] sm:$0xff]  ;;  %v690_v56 = vpack.c.bf16 %v577_v47, %v576_v46 }
  0xa8   : > { %8794 = vmatmul.mubr.msk.bf16.gmra.mrb[8].mxu0 %vm1869_vm2, %v1713_v1  ;;  %v1203_v13 = vpop.permute.xlu1 %1202  ;;  %v913_v58 = vpack.c.bf16 %v831_v51, %v830_v50  ;;  %v1030_v51 = vld [vmem:[%s9954_s16 + $0x310] sm:$0xff] }
  0xa9   : > { %v1201_v17 = vpop.permute.xlu0 %1200  ;;  %v1532_v22 = vsel %vm1508_vm0, %v683_v12, %v1203_v13  ;;  %v1012_v12 = vld [vmem:[%s9954_s16 + $0x280] sm:$0xff]  ;;  %v1013_v13 = vld [vmem:[%s9954_s16 + $0x288] sm:$0xff] }
  0xaa   : > { %1450 = vrot.lane.b32.xlu1 %v1095_v8, %s9805_s27  ;;  %v1529_v26 = vsel %vm1508_vm0, %v682_v16, %v1201_v17  ;;  %v1014_v8 = vld [vmem:[%s9954_s16 + $0x290] sm:$0xff] }
  0xab   : > { %1448 = vrot.lane.b32.xlu0 %v1094_v9, %s9805_s27  ;;  %v1015_v9 = vld [vmem:[%s9954_s16 + $0x298] sm:$0xff]  ;;  %v574_v17 = vld [vmem:[%s10133_s17 + $0xd0] sm:$0xff] }
  0xac   : > { %v1395_v23 = vpop.permute.xlu1 %1394 }
  0xad   : > { %v1717_v27 = vsel %vm1701_vm1, %v1532_v22, %v1395_v23  ;;  %v1393_v28 = vpop.permute.xlu0 %1392  ;;  %v1101_v22 = vpack.c.bf16 %v1015_v9, %v1014_v8  ;;  %v1100_v23 = vpack.c.bf16 %v1013_v13, %v1012_v12  ;;  %v580_v8 = vld [vmem:[%s10133_s17 + $0x100] sm:$0xff]  ;;  %v581_v9 = vld [vmem:[%s10133_s17 + $0x108] sm:$0xff]  ;;  %v834_v12 = vld [vmem:[%s9962_s23 + $0x2f0] sm:$0xff] }
  0xae   : > { %v1715_v31 = vsel %vm1701_vm1, %v1529_v26, %v1393_v28  ;;  %1262 = vrot.lane.b32.xlu1 %v905_v18, %s9806_s29  ;;  %v575_v18 = vld [vmem:[%s10133_s17 + $0xd8] sm:$0xff]  ;;  %v824_v28 = vld [vmem:[%s9962_s23 + $0x2a0] sm:$0xff] }
  0xaf   : > { %1260 = vrot.lane.b32.xlu0 %v904_v19, %s9806_s29  ;;  %8797 = vmatprep.mubr.msk.bf16.mxu0 %vm1869_vm2, %v1715_v31  ;;  %v689_v26 = vpack.c.bf16 %v575_v18, %v574_v17  ;;  %v910_v33 = vpack.c.bf16 %v825_v29, %v824_v28  ;;  %v835_v13 = vld [vmem:[%s9962_s23 + $0x2f8] sm:$0xff]  ;;  %v833_v17 = vld [vmem:[%s9962_s23 + $0x2e8] sm:$0xff]  ;;  %v692_v18 = vpack.c.bf16 %v581_v9, %v580_v8  ;;  %v840_v8 = vld [vmem:[%s9962_s23 + $0x320] sm:$0xff] }
  0xb0   : > { %8798 = vmatmul.mubr.msk.bf16.gmra.mrb[12].mxu0 %vm1869_vm2, %v1717_v27  ;;  %v1207_v39 = vpop.permute.xlu1 %1206  ;;  %v915_v20 = vpack.c.bf16 %v835_v13, %v834_v12  ;;  %v1025_v28 = vld [vmem:[%s9954_s16 + $0x2e8] sm:$0xff]  ;;  %v9700_v12 = vld [vmem:[%s12311_s5 + $0x18] sm:$0xff]  }
  0xb1   : > { %v1205_v43 = vpop.permute.xlu0 %1204  ;;  %v1538_v48 = vsel %vm1508_vm0, %v685_v38, %v1207_v39  ;;  %v1016_v38 = vld [vmem:[%s9954_s16 + $0x2a0] sm:$0xff]  ;;  %v1017_v39 = vld [vmem:[%s9954_s16 + $0x2a8] sm:$0xff] }
  0xb2   : > { %1454 = vrot.lane.b32.xlu1 %v1097_v34, %s9805_s27  ;;  %v1535_v52 = vsel %vm1508_vm0, %v684_v42, %v1205_v43  ;;  %v1018_v34 = vld [vmem:[%s9954_s16 + $0x2b0] sm:$0xff]  ;;  %v841_v9 = vld [vmem:[%s9962_s23 + $0x328] sm:$0xff] }
  0xb3   : > { %1452 = vrot.lane.b32.xlu0 %v1096_v35, %s9805_s27  ;;  %v1019_v35 = vld [vmem:[%s9954_s16 + $0x2b8] sm:$0xff]  ;;  %v578_v43 = vld [vmem:[%s10133_s17 + $0xf0] sm:$0xff] }
  0xb4   : > { %v1399_v49 = vpop.permute.xlu1 %1398 }
  0xb5   : > { %v1721_v53 = vsel %vm1701_vm1, %v1538_v48, %v1399_v49  ;;  %v1397_v54 = vpop.permute.xlu0 %1396  ;;  %v1103_v48 = vpack.c.bf16 %v1019_v35, %v1018_v34  ;;  %v1102_v49 = vpack.c.bf16 %v1017_v39, %v1016_v38  ;;  %v9697_v34 = vld [vmem:[%s12311_s5] sm:$0xff]  }
  0xb6   : > { %v1719_v57 = vsel %vm1701_vm1, %v1535_v52, %v1397_v54  ;;  %1266 = vrot.lane.b32.xlu1 %v907_v44, %s9806_s29  ;;  %v579_v44 = vld [vmem:[%s10133_s17 + $0xf8] sm:$0xff]  ;;  %v828_v54 = vld [vmem:[%s9962_s23 + $0x2c0] sm:$0xff]  ;;  %8913 = vmatprep.subr.bf16.mxu1 %v9697_v34 }
  0xb7   : > { %1264 = vrot.lane.b32.xlu0 %v906_v45, %s9806_s29  ;;  %8801 = vmatprep.mubr.msk.bf16.mxu0 %vm1869_vm2, %v1719_v57  ;;  %v691_v52 = vpack.c.bf16 %v579_v44, %v578_v43  ;;  %v912_v59 = vpack.c.bf16 %v829_v55, %v828_v54  ;;  %v836_v44 = vld [vmem:[%s9962_s23 + $0x300] sm:$0xff] }
  0xb8   : > { %8802 = vmatmul.mubr.msk.bf16.gmra.mrb[16].mxu0 %vm1869_vm2, %v1721_v53  ;;  %v1211_v1 = vpop.permute.xlu1 %1210  ;;  %8914 = vmatpush3.bf16.msra.mxu1 %v9697_v34  ;;  %v1028_v55 = vld [vmem:[%s9954_s16 + $0x300] sm:$0xff] }
  0xb9   : > { %v1209_v5 = vpop.permute.xlu0 %1208  ;;  %v1544_v10 = vsel %vm1508_vm0, %v687_v0, %v1211_v1  ;;  %v1020_v0 = vld [vmem:[%s9954_s16 + $0x2c0] sm:$0xff]  ;;  %v1021_v1 = vld [vmem:[%s9954_s16 + $0x2c8] sm:$0xff] }
  0xba   : > { %1458 = vrot.lane.b32.xlu1 %v1099_v60, %s9805_s27  ;;  %v1541_v14 = vsel %vm1508_vm0, %v686_v4, %v1209_v5  ;;  %v1022_v60 = vld [vmem:[%s9954_s16 + $0x2d0] sm:$0xff] }
  0xbb   : > { %1456 = vrot.lane.b32.xlu0 %v1098_v61, %s9805_s27  ;;  %v1023_v61 = vld [vmem:[%s9954_s16 + $0x2d8] sm:$0xff]  ;;  %v582_v5 = vld [vmem:[%s10133_s17 + $0x110] sm:$0xff] }
  0xbc   : > { %v1403_v11 = vpop.permute.xlu1 %1402 }
  0xbd   : > { %v1725_v15 = vsel %vm1701_vm1, %v1544_v10, %v1403_v11  ;;  %v1401_v16 = vpop.permute.xlu0 %1400  ;;  %v1105_v10 = vpack.c.bf16 %v1023_v61, %v1022_v60  ;;  %v1104_v11 = vpack.c.bf16 %v1021_v1, %v1020_v0  ;;  %v590_v60 = vld [vmem:[%s10133_s17 + $0x150] sm:$0xff]  ;;  %v591_v61 = vld [vmem:[%s10133_s17 + $0x158] sm:$0xff]  ;;  %v588_v0 = vld [vmem:[%s10133_s17 + $0x140] sm:$0xff] }
  0xbe   : > { %v1723_v19 = vsel %vm1701_vm1, %v1541_v14, %v1401_v16  ;;  %1270 = vrot.lane.b32.xlu1 %v909_v6, %s9806_s29  ;;  %v583_v6 = vld [vmem:[%s10133_s17 + $0x118] sm:$0xff]  ;;  %v832_v16 = vld [vmem:[%s9962_s23 + $0x2e0] sm:$0xff]  ;;  %v589_v1 = vld [vmem:[%s10133_s17 + $0x148] sm:$0xff] }
  0xbf   : > { %1268 = vrot.lane.b32.xlu0 %v908_v7, %s9806_s29  ;;  %8805 = vmatprep.mubr.msk.bf16.mxu0 %vm1869_vm2, %v1723_v19  ;;  %v693_v14 = vpack.c.bf16 %v583_v6, %v582_v5  ;;  %v843_v5 = vld [vmem:[%s9962_s23 + $0x338] sm:$0xff]  ;;  %v697_v6 = vpack.c.bf16 %v591_v61, %v590_v60  ;;  %v850_v60 = vld [vmem:[%s9962_s23 + $0x370] sm:$0xff] }
  0xc0   : > { %8806 = vmatmul.mubr.msk.bf16.gmra.mrb[20].mxu0 %vm1869_vm2, %v1725_v15  ;;  %v1215_v27 = vpop.permute.xlu1 %1214  ;;  %v851_v61 = vld [vmem:[%s9962_s23 + $0x378] sm:$0xff] }
  0xc1   : > { %v1213_v31 = vpop.permute.xlu0 %1212  ;;  %v1550_v36 = vsel %vm1508_vm0, %v689_v26, %v1215_v27  ;;  %v1024_v27 = vld [vmem:[%s9954_s16 + $0x2e0] sm:$0xff] }
  0xc2   : > { %1462 = vrot.lane.b32.xlu1 %v1101_v22, %s9805_s27  ;;  %v1547_v40 = vsel %vm1508_vm0, %v688_v30, %v1213_v31  ;;  %v914_v22 = vpack.c.bf16 %v833_v17, %v832_v16  ;;  %v1106_v39 = vpack.c.bf16 %v1025_v28, %v1024_v27  ;;  %v1035_v16 = vld [vmem:[%s9954_s16 + $0x338] sm:$0xff]  ;;  %v592_v28 = vld [vmem:[%s10133_s17 + $0x160] sm:$0xff] }
  0xc3   : > { %1460 = vrot.lane.b32.xlu0 %v1100_v23, %s9805_s27  ;;  %v1026_v23 = vld [vmem:[%s9954_s16 + $0x2f0] sm:$0xff] }
  0xc4   : > { %v1407_v37 = vpop.permute.xlu1 %1406  ;;  %v1107_v38 = vpack.c.bf16 %v1027_v24, %v1026_v23  ;;  %v594_v24 = vld [vmem:[%s10133_s17 + $0x170] sm:$0xff] }
  0xc5   : > { %v1729_v41 = vsel %vm1701_vm1, %v1550_v36, %v1407_v37  ;;  %v1405_v42 = vpop.permute.xlu0 %1404  ;;  %v584_v36 = vld [vmem:[%s10133_s17 + $0x120] sm:$0xff]  ;;  %v585_v37 = vld [vmem:[%s10133_s17 + $0x128] sm:$0xff] }
  0xc6   : > { %v1727_v45 = vsel %vm1701_vm1, %v1547_v40, %v1405_v42  ;;  %1274 = vrot.lane.b32.xlu1 %v911_v32, %s9806_s29  ;;  %v586_v32 = vld [vmem:[%s10133_s17 + $0x130] sm:$0xff]  ;;  %v694_v46 = vpack.c.bf16 %v585_v37, %v584_v36  ;;  %v844_v36 = vld [vmem:[%s9962_s23 + $0x340] sm:$0xff]  ;;  %v845_v37 = vld [vmem:[%s9962_s23 + $0x348] sm:$0xff] }
  0xc7   : > { %1272 = vrot.lane.b32.xlu0 %v910_v33, %s9806_s29  ;;  %8809 = vmatprep.mubr.msk.bf16.mxu0 %vm1869_vm2, %v1727_v45  ;;  %v587_v33 = vld [vmem:[%s10133_s17 + $0x138] sm:$0xff]  ;;  %v838_v40 = vld [vmem:[%s9962_s23 + $0x310] sm:$0xff]  ;;  %v837_v45 = vld [vmem:[%s9962_s23 + $0x308] sm:$0xff] }
  0xc8   : > { %8810 = vmatmul.mubr.msk.bf16.gmra.mrb[24].mxu0 %vm1869_vm2, %v1729_v41  ;;  %v1219_v53 = vpop.permute.xlu1 %1218  ;;  %v839_v41 = vld [vmem:[%s9962_s23 + $0x318] sm:$0xff]  ;;  %v695_v42 = vpack.c.bf16 %v587_v33, %v586_v32  ;;  %v916_v50 = vpack.c.bf16 %v837_v45, %v836_v44  ;;  %v846_v32 = vld [vmem:[%s9962_s23 + $0x350] sm:$0xff] }
  0xc9   : > { %v1217_v57 = vpop.permute.xlu0 %1216  ;;  %v1556_v62 = vsel %vm1508_vm0, %v691_v52, %v1219_v53  ;;  %v1031_v52 = vld [vmem:[%s9954_s16 + $0x318] sm:$0xff] }
  0xca   : > { %1466 = vrot.lane.b32.xlu1 %v1103_v48, %s9805_s27  ;;  %v1553_v2 = vsel %vm1508_vm0, %v690_v56, %v1217_v57  ;;  %v9698_v48 = vld [vmem:[%s12311_s5 + $0x8] sm:$0xff]   ;;  %v847_v33 = vld [vmem:[%s9962_s23 + $0x358] sm:$0xff] }
  0xcb   : > { %1464 = vrot.lane.b32.xlu0 %v1102_v49, %s9805_s27  ;;  %v917_v49 = vpack.c.bf16 %v839_v41, %v838_v40  ;;  %8915 = vmatprep.subr.bf16.mxu1 %v9698_v48  ;;  %v1029_v56 = vld [vmem:[%s9954_s16 + $0x308] sm:$0xff]  ;;  %v921_v41 = vpack.c.bf16 %v847_v33, %v846_v32  ;;  %v1039_v44 = vld [vmem:[%s9954_s16 + $0x358] sm:$0xff] }
  0xcc   : > { %v1411_v63 = vpop.permute.xlu1 %1410  ;;  %8916 = vmatpush3.bf16.msra.mxu1 %v9698_v48  ;;  %v9702_v40 = vld [vmem:[%s12311_s5 + $0x28] sm:$0xff]  }
  0xcd   : > { %v1733_v3 = vsel %vm1701_vm1, %v1556_v62, %v1411_v63  ;;  %v1409_v4 = vpop.permute.xlu0 %1408  ;;  %v9699_v62 = vld [vmem:[%s12311_s5 + $0x10] sm:$0xff]   ;;  %v1037_v48 = vld [vmem:[%s9954_s16 + $0x348] sm:$0xff] }
  0xce   : > { %v1731_v7 = vsel %vm1701_vm1, %v1553_v2, %v1409_v4  ;;  %1278 = vrot.lane.b32.xlu1 %v913_v58, %s9806_s29  ;;  %v1109_v2 = vpack.c.bf16 %v1031_v52, %v1030_v51  ;;  %v842_v4 = vld [vmem:[%s9962_s23 + $0x330] sm:$0xff]  ;;  %8917 = vmatprep.subr.bf16.mxu1 %v9699_v62 }
  0xcf   : > { %1276 = vrot.lane.b32.xlu0 %v912_v59, %s9806_s29  ;;  %8813 = vmatprep.mubr.msk.bf16.mxu0 %vm1869_vm2, %v1731_v7  ;;  %v919_v13 = vpack.c.bf16 %v843_v5, %v842_v4  ;;  %v598_v52 = vld [vmem:[%s10133_s17 + $0x190] sm:$0xff]  ;;  %v9704_v4 = vld [vmem:[%s12311_s5 + $0x38] sm:$0xff]   ;;  %v541_v5 = vlaneseq }
  0xd0   : > { %8814 = vmatmul.mubr.msk.bf16.gmra.mrb[28].mxu0 %vm1869_vm2, %v1733_v3  ;;  %v1223_v15 = vpop.permute.xlu1 %1222  ;;  %v1108_v3 = vpack.c.bf16 %v1029_v56, %v1028_v55  ;;  %8918 = vmatpush3.bf16.msra.mxu1 %v9699_v62  ;;  %v596_v56 = vld [vmem:[%s10133_s17 + $0x180] sm:$0xff] }
  0xd1   : > { %v1221_v19 = vpop.permute.xlu0 %1220  ;;  %v1562_v25 = vsel %vm1508_vm0, %v693_v14, %v1223_v15  ;;  %v918_v14 = vpack.c.bf16 %v841_v9, %v840_v8  ;;  %v1034_v15 = vld [vmem:[%s9954_s16 + $0x330] sm:$0xff]  ;;  %8919 = vmatprep.subr.bf16.mxu1 %v9700_v12  ;;  %v1043_v9 = vld [vmem:[%s9954_s16 + $0x378] sm:$0xff] }
  0xd2   : > { %1470 = vrot.lane.b32.xlu1 %v1105_v10, %s9805_s27  ;;  %v1559_v29 = vsel %vm1508_vm0, %v692_v18, %v1221_v19  ;;  %v696_v10 = vpack.c.bf16 %v589_v1, %v588_v0  ;;  %v1032_v19 = vld [vmem:[%s9954_s16 + $0x320] sm:$0xff]  ;;  %v849_v1 = vld [vmem:[%s9962_s23 + $0x368] sm:$0xff]  ;;  %v1042_v8 = vld [vmem:[%s9954_s16 + $0x370] sm:$0xff] }
  0xd3   : > { %1468 = vrot.lane.b32.xlu0 %v1104_v11, %s9805_s27  ;;  %v848_v0 = vld [vmem:[%s9962_s23 + $0x360] sm:$0xff] }
  0xd4   : > { %v1415_v26 = vpop.permute.xlu1 %1414  ;;  %8920 = vmatpush3.bf16.msra.mxu1 %v9700_v12  ;;  %v1040_v12 = vld [vmem:[%s9954_s16 + $0x360] sm:$0xff] }
  0xd5   : > { %v1737_v30 = vsel %vm1701_vm1, %v1562_v25, %v1415_v26  ;;  %v1413_v31 = vpop.permute.xlu0 %1412  ;;  %v595_v25 = vld [vmem:[%s10133_s17 + $0x178] sm:$0xff]  ;;  %v9701_v26 = vld [vmem:[%s12311_s5 + $0x20] sm:$0xff]  }
  0xd6   : > { %v1735_v35 = vsel %vm1701_vm1, %v1559_v29, %v1413_v31  ;;  %1282 = vrot.lane.b32.xlu1 %v915_v20, %s9806_s29  ;;  %v1033_v20 = vld [vmem:[%s9954_s16 + $0x328] sm:$0xff]  ;;  %v699_v34 = vpack.c.bf16 %v595_v25, %v594_v24  ;;  %8921 = vmatprep.subr.bf16.mxu1 %v9701_v26  ;;  %v854_v25 = vld [vmem:[%s9962_s23 + $0x390] sm:$0xff] }
  0xd7   : > { %1280 = vrot.lane.b32.xlu0 %v914_v22, %s9806_s29  ;;  %8817 = vmatprep.mubr.msk.bf16.mxu0 %vm1869_vm2, %v1735_v35  ;;  %v593_v29 = vld [vmem:[%s10133_s17 + $0x168] sm:$0xff]  ;;  %v1110_v31 = vpack.c.bf16 %v1033_v20, %v1032_v19  ;;  %v10459_v19 = vand.u32 127, %v541_v5 }
  0xd8   : > { %8818 = vmatmul.mubr.msk.bf16.gmra.mrb[32].mxu0 %vm1869_vm2, %v1737_v30  ;;  %v1227_v43 = vpop.permute.xlu1 %1226  ;;  %v1111_v30 = vpack.c.bf16 %v1035_v16, %v1034_v15  ;;  %8922 = vmatpush3.bf16.msra.mxu1 %v9701_v26  ;;  %v855_v26 = vld [vmem:[%s9962_s23 + $0x398] sm:$0xff] }
  0xd9   : > { %v1225_v47 = vpop.permute.xlu0 %1224  ;;  %v1568_v53 = vsel %vm1508_vm0, %v695_v42, %v1227_v43  ;;  %v920_v42 = vpack.c.bf16 %v845_v37, %v844_v36  ;;  %v1038_v43 = vld [vmem:[%s9954_s16 + $0x350] sm:$0xff]  ;;  %8923 = vmatprep.subr.bf16.mxu1 %v9702_v40  ;;  %vm543_vm3 = vcmp.lt.s32.totalorder %v10459_v19, 32  ;;  %vm546_vm4 = vcmp.ge.s32.totalorder %v10459_v19, 64 }
  0xda   : > { %1474 = vrot.lane.b32.xlu1 %v1107_v38, %s9805_s27  ;;  %v1565_v57 = vsel %vm1508_vm0, %v694_v46, %v1225_v47  ;;  %v698_v38 = vpack.c.bf16 %v593_v29, %v592_v28  ;;  %v1036_v47 = vld [vmem:[%s9954_s16 + $0x340] sm:$0xff]  ;;  %vm10480_vm5 = vmor %vm543_vm3, %vm546_vm4  ;;  %v1046_v37 = vld [vmem:[%s9954_s16 + $0x390] sm:$0xff]  ;;  %vm544_vm6 = vcmp.ge.s32.totalorder %v10459_v19, 96 }
  0xdb   : > { %1472 = vrot.lane.b32.xlu0 %v1106_v39, %s9805_s27  ;;  %v852_v29 = vld [vmem:[%s9962_s23 + $0x380] sm:$0xff]  ;;  %vm10701_vm7 = vmor %vm543_vm3, %vm544_vm6 }
  0xdc   : > { %v1419_v54 = vpop.permute.xlu1 %1418  ;;  %8924 = vmatpush3.bf16.msra.mxu1 %v9702_v40 }
  0xdd   : > { %v1741_v58 = vsel %vm1701_vm1, %v1568_v53, %v1419_v54  ;;  %v1417_v59 = vpop.permute.xlu0 %1416  ;;  %v599_v53 = vld [vmem:[%s10133_s17 + $0x198] sm:$0xff]  ;;  %v9703_v54 = vld [vmem:[%s12311_s5 + $0x30] sm:$0xff]  }
  0xde   : > { %v1739_v63 = vsel %vm1701_vm1, %v1565_v57, %v1417_v59  ;;  %1286 = vrot.lane.b32.xlu1 %v917_v49, %s9806_s29  ;;  %v597_v57 = vld [vmem:[%s10133_s17 + $0x188] sm:$0xff]  ;;  %v1112_v59 = vpack.c.bf16 %v1037_v48, %v1036_v47  ;;  %v701_v62 = vpack.c.bf16 %v599_v53, %v598_v52  ;;  %8925 = vmatprep.subr.bf16.mxu1 %v9703_v54  ;;  %v607_v47 = vld [vmem:[%s10133_s17 + $0x1d8] sm:$0xff]  ;;  %v858_v53 = vld [vmem:[%s9962_s23 + $0x3b0] sm:$0xff] }
  0xdf   : > { %1284 = vrot.lane.b32.xlu0 %v916_v50, %s9806_s29  ;;  %8821 = vmatprep.mubr.msk.bf16.mxu0 %vm1869_vm2, %v1739_v63 }
  0xe0   : > { %8822 = vmatmul.mubr.msk.bf16.gmra.mrb[36].mxu0 %vm1869_vm2, %v1741_v58  ;;  %v1231_v7 = vpop.permute.xlu1 %1230  ;;  %v1113_v58 = vpack.c.bf16 %v1039_v44, %v1038_v43  ;;  %8926 = vmatpush3.bf16.msra.mxu1 %v9703_v54  ;;  %v859_v54 = vld [vmem:[%s9962_s23 + $0x3b8] sm:$0xff] }
  0xe1   : > { %v1229_v11 = vpop.permute.xlu0 %1228  ;;  %v1574_v17 = vsel %vm1508_vm0, %v697_v6, %v1231_v7  ;;  %v923_v6 = vpack.c.bf16 %v851_v61, %v850_v60  ;;  %v922_v7 = vpack.c.bf16 %v849_v1, %v848_v0  ;;  %8927 = vmatprep.subr.bf16.mxu1 %v9704_v4  ;;  %v927_v61 = vpack.c.bf16 %v859_v54, %v858_v53  ;;  %v1051_v0 = vld [vmem:[%s9954_s16 + $0x3b8] sm:$0xff]  ;;  %v1058_v53 = vld [vmem:[%s9954_s16 + $0x3f0] sm:$0xff] }
  0xe2   : > { %1478 = vrot.lane.b32.xlu1 %v1109_v2, %s9805_s27  ;;  %v1571_v21 = vsel %vm1508_vm0, %v696_v10, %v1229_v11  ;;  %v700_v2 = vpack.c.bf16 %v597_v57, %v596_v56  ;;  %v856_v57 = vld [vmem:[%s9962_s23 + $0x3a0] sm:$0xff]  ;;  %v1059_v54 = vld [vmem:[%s9954_s16 + $0x3f8] sm:$0xff] }
  0xe3   : > { %1476 = vrot.lane.b32.xlu0 %v1108_v3, %s9805_s27 }
  0xe4   : > { %v1423_v18 = vpop.permute.xlu1 %1422  ;;  %8928 = vmatpush3.bf16.msra.mxu1 %v9704_v4  ;;  %v1049_v4 = vld [vmem:[%s9954_s16 + $0x3a8] sm:$0xff] }
  0xe5   : > { %v1745_v22 = vsel %vm1701_vm1, %v1574_v17, %v1423_v18  ;;  %v1421_v23 = vpop.permute.xlu0 %1420  ;;  %v602_v17 = vld [vmem:[%s10133_s17 + $0x1b0] sm:$0xff]  ;;  %v603_v18 = vld [vmem:[%s10133_s17 + $0x1b8] sm:$0xff] }
  0xe6   : > { %v1743_v27 = vsel %vm1701_vm1, %v1571_v21, %v1421_v23  ;;  %1290 = vrot.lane.b32.xlu1 %v919_v13, %s9806_s29  ;;  %v1041_v13 = vld [vmem:[%s9954_s16 + $0x368] sm:$0xff]  ;;  %v600_v21 = vld [vmem:[%s10133_s17 + $0x1a0] sm:$0xff]  ;;  %v1115_v23 = vpack.c.bf16 %v1043_v9, %v1042_v8  ;;  %v610_v8 = vld [vmem:[%s10133_s17 + $0x1f0] sm:$0xff] }
  0xe7   : > { %1288 = vrot.lane.b32.xlu0 %v918_v14, %s9806_s29  ;;  %8825 = vmatprep.mubr.msk.bf16.mxu0 %vm1869_vm2, %v1743_v27  ;;  %v1114_v24 = vpack.c.bf16 %v1041_v13, %v1040_v12  ;;  %v703_v27 = vpack.c.bf16 %v603_v18, %v602_v17  ;;  %v611_v9 = vld [vmem:[%s10133_s17 + $0x1f8] sm:$0xff]  ;;  %v609_v12 = vld [vmem:[%s10133_s17 + $0x1e8] sm:$0xff] }
  0xe8   : > { %8826 = vmatmul.mubr.msk.bf16.gmra.mrb[40].mxu0 %vm1869_vm2, %v1745_v22  ;;  %v1235_v35 = vpop.permute.xlu1 %1234  ;;  %v601_v22 = vld [vmem:[%s10133_s17 + $0x1a8] sm:$0xff]  ;;  %v707_v17 = vpack.c.bf16 %v611_v9, %v610_v8 }
  0xe9   : > { %v1233_v39 = vpop.permute.xlu0 %1232  ;;  %v1580_v45 = vsel %vm1508_vm0, %v699_v34, %v1235_v35  ;;  %v702_v32 = vpack.c.bf16 %v601_v22, %v600_v21  ;;  %v925_v34 = vpack.c.bf16 %v855_v26, %v854_v25  ;;  %v861_v21 = vld [vmem:[%s9962_s23 + $0x3c8] sm:$0xff]  ;;  %v1054_v26 = vld [vmem:[%s9954_s16 + $0x3d0] sm:$0xff] }
  0xea   : > { %1482 = vrot.lane.b32.xlu1 %v1111_v30, %s9805_s27  ;;  %v1577_v49 = vsel %vm1508_vm0, %v698_v38, %v1233_v39  ;;  %v853_v30 = vld [vmem:[%s9962_s23 + $0x388] sm:$0xff]  ;;  %v1047_v38 = vld [vmem:[%s9954_s16 + $0x398] sm:$0xff] }
  0xeb   : > { %1480 = vrot.lane.b32.xlu0 %v1110_v31, %s9805_s27  ;;  %v9705_v31 = vld [vmem:[%s12313_s7 + $0x8] sm:$0xff]   ;;  %v924_v36 = vpack.c.bf16 %v853_v30, %v852_v29  ;;  %v1052_v30 = vld [vmem:[%s9954_s16 + $0x3c0] sm:$0xff] }
  0xec   : > { %v1427_v46 = vpop.permute.xlu1 %1426  ;;  %9059 = vmatprep.subr.bf16.mxu0 %v9705_v31 }
  0xed   : > { %v1749_v50 = vsel %vm1701_vm1, %v1580_v45, %v1427_v46  ;;  %v1425_v51 = vpop.permute.xlu0 %1424  ;;  %9060 = vmatpush3.bf16.msra.mxu0 %v9705_v31  ;;  %v606_v46 = vld [vmem:[%s10133_s17 + $0x1d0] sm:$0xff]  ;;  %v1053_v31 = vld [vmem:[%s9954_s16 + $0x3c8] sm:$0xff] }
  0xee   : > { %v1747_v55 = vsel %vm1701_vm1, %v1577_v49, %v1425_v51  ;;  %1294 = vrot.lane.b32.xlu1 %v921_v41, %s9806_s29  ;;  %v1044_v41 = vld [vmem:[%s9954_s16 + $0x380] sm:$0xff]  ;;  %v1117_v51 = vpack.c.bf16 %v1047_v38, %v1046_v37  ;;  %v615_v37 = vld [vmem:[%s10133_s17 + $0x218] sm:$0xff] }
  0xef   : > { %1292 = vrot.lane.b32.xlu0 %v920_v42, %s9806_s29  ;;  %8829 = vmatprep.mubr.msk.bf16.mxu0 %vm1869_vm2, %v1747_v55  ;;  %v1045_v42 = vld [vmem:[%s9954_s16 + $0x388] sm:$0xff]  ;;  %v604_v49 = vld [vmem:[%s10133_s17 + $0x1c0] sm:$0xff]  ;;  %v705_v55 = vpack.c.bf16 %v607_v47, %v606_v46 }
  0xf0   : > { %8830 = vmatmul.mubr.msk.bf16.gmra.mrb[44].mxu0 %vm1869_vm2, %v1749_v50  ;;  %v1239_v63 = vpop.permute.xlu1 %1238  ;;  %v605_v50 = vld [vmem:[%s10133_s17 + $0x1c8] sm:$0xff]  ;;  %v1116_v52 = vpack.c.bf16 %v1045_v42, %v1044_v41  ;;  %v1120_v42 = vpack.c.bf16 %v1053_v31, %v1052_v30  ;;  %v864_v47 = vld [vmem:[%s9962_s23 + $0x3e0] sm:$0xff]  ;;  %v626_v30 = vld [vmem:[%s10133_s17 + $0x270] sm:$0xff] }
  0xf1   : > { %v1237_v3 = vpop.permute.xlu0 %1236  ;;  %v1586_v10 = vsel %vm1508_vm0, %v701_v62, %v1239_v63  ;;  %v1050_v63 = vld [vmem:[%s9954_s16 + $0x3b0] sm:$0xff]  ;;  %v627_v31 = vld [vmem:[%s10133_s17 + $0x278] sm:$0xff] }
  0xf2   : > { %1486 = vrot.lane.b32.xlu1 %v1113_v58, %s9805_s27  ;;  %v1583_v14 = vsel %vm1508_vm0, %v700_v2, %v1237_v3  ;;  %v857_v58 = vld [vmem:[%s9962_s23 + $0x3a8] sm:$0xff]  ;;  %v1048_v3 = vld [vmem:[%s9954_s16 + $0x3a0] sm:$0xff]  ;;  %v1119_v13 = vpack.c.bf16 %v1051_v0, %v1050_v63  ;;  %v619_v63 = vld [vmem:[%s10133_s17 + $0x238] sm:$0xff] }
  0xf3   : > { %1484 = vrot.lane.b32.xlu0 %v1112_v59, %s9805_s27  ;;  %v704_v59 = vpack.c.bf16 %v605_v50, %v604_v49  ;;  %v926_v62 = vpack.c.bf16 %v857_v58, %v856_v57  ;;  %v1056_v57 = vld [vmem:[%s9954_s16 + $0x3e0] sm:$0xff]  ;;  %v1057_v58 = vld [vmem:[%s9954_s16 + $0x3e8] sm:$0xff] }
  0xf4   : > { %v1431_v11 = vpop.permute.xlu1 %1430 }
  0xf5   : > { %v1753_v15 = vsel %vm1701_vm1, %v1586_v10, %v1431_v11  ;;  %v1429_v16 = vpop.permute.xlu0 %1428  ;;  %v608_v11 = vld [vmem:[%s10133_s17 + $0x1e0] sm:$0xff] }
  0xf6   : > { %v1751_v20 = vsel %vm1701_vm1, %v1583_v14, %v1429_v16  ;;  %1298 = vrot.lane.b32.xlu1 %v923_v6, %s9806_s29  ;;  %v1118_v14 = vpack.c.bf16 %v1049_v4, %v1048_v3  ;;  %v863_v16 = vld [vmem:[%s9962_s23 + $0x3d8] sm:$0xff]  ;;  %v706_v22 = vpack.c.bf16 %v609_v12, %v608_v11  ;;  %v1123_v3 = vpack.c.bf16 %v1059_v54, %v1058_v53 }
  0xf7   : > { %1296 = vrot.lane.b32.xlu0 %v922_v7, %s9806_s29  ;;  %8833 = vmatprep.mubr.msk.bf16.mxu0 %vm1869_vm2, %v1751_v20  ;;  %v860_v20 = vld [vmem:[%s9962_s23 + $0x3c0] sm:$0xff]  ;;  %v1122_v4 = vpack.c.bf16 %v1057_v58, %v1056_v57 }
  0xf8   : > { %8834 = vmatmul.mubr.msk.bf16.gmra.mrb[48].mxu0 %vm1869_vm2, %v1753_v15  ;;  %v1243_v28 = vpop.permute.xlu1 %1242  ;;  %v862_v15 = vld [vmem:[%s9962_s23 + $0x3d0] sm:$0xff]  ;;  %v928_v25 = vpack.c.bf16 %v861_v21, %v860_v20  ;;  %v621_v20 = vld [vmem:[%s10133_s17 + $0x248] sm:$0xff] }
  0xf9   : > { %v1241_v33 = vpop.permute.xlu0 %1240  ;;  %v1592_v39 = vsel %vm1508_vm0, %v703_v27, %v1243_v28  ;;  %v1055_v27 = vld [vmem:[%s9954_s16 + $0x3d8] sm:$0xff]  ;;  %s12257_s16 = scalar_lea.hbm %s12321_s15, %s7965_s20 }
  0xfa   : > { %1490 = vrot.lane.b32.xlu1 %v1115_v23, %s9805_s27  ;;  %v1589_v43 = vsel %vm1508_vm0, %v702_v32, %v1241_v33  ;;  %v1121_v41 = vpack.c.bf16 %v1055_v27, %v1054_v26 }
  0xfb   : > { %1488 = vrot.lane.b32.xlu0 %v1114_v24, %s9805_s27  ;;  %v929_v24 = vpack.c.bf16 %v863_v16, %v862_v15  ;;  %v622_v15 = vld [vmem:[%s10133_s17 + $0x250] sm:$0xff]  ;;  %v623_v16 = vld [vmem:[%s10133_s17 + $0x258] sm:$0xff] }
  0xfc   : > { %v1435_v40 = vpop.permute.xlu1 %1434  ;;  %v713_v21 = vpack.c.bf16 %v623_v16, %v622_v15 }
  0xfd   : > { %v1757_v44 = vsel %vm1701_vm1, %v1592_v39, %v1435_v40  ;;  %v1433_v45 = vpop.permute.xlu0 %1432  ;;  %v612_v39 = vld [vmem:[%s10133_s17 + $0x200] sm:$0xff]  ;;  %v613_v40 = vld [vmem:[%s10133_s17 + $0x208] sm:$0xff] }
  0xfe   : > { %v1755_v48 = vsel %vm1701_vm1, %v1589_v43, %v1433_v45  ;;  %1302 = vrot.lane.b32.xlu1 %v925_v34, %s9806_s29  ;;  %v866_v43 = vld [vmem:[%s9962_s23 + $0x3f0] sm:$0xff]  ;;  %v708_v49 = vpack.c.bf16 %v613_v40, %v612_v39 }
  0xff   : > { %1300 = vrot.lane.b32.xlu0 %v924_v36, %s9806_s29  ;;  %8837 = vmatprep.mubr.msk.bf16.mxu0 %vm1869_vm2, %v1755_v48  ;;  %v614_v36 = vld [vmem:[%s10133_s17 + $0x210] sm:$0xff]  ;;  %v865_v48 = vld [vmem:[%s9962_s23 + $0x3e8] sm:$0xff] }
 0x100   : > { %8838 = vmatmul.mubr.msk.bf16.gmra.mrb[52].mxu0 %vm1869_vm2, %v1757_v44  ;;  %v1247_v56 = vpop.permute.xlu1 %1246  ;;  %v867_v44 = vld [vmem:[%s9962_s23 + $0x3f8] sm:$0xff]  ;;  %v709_v45 = vpack.c.bf16 %v615_v37, %v614_v36  ;;  %v715_v36 = vpack.c.bf16 %v627_v31, %v626_v30 }
 0x101   : > { %v1245_v60 = vpop.permute.xlu0 %1244  ;;  %v1598_v1 = vsel %vm1508_vm0, %v705_v55, %v1247_v56 }
 0x102   : > { %1494 = vrot.lane.b32.xlu1 %v1117_v51, %s9805_s27  ;;  %v1595_v5 = vsel %vm1508_vm0, %v704_v59, %v1245_v60  ;;  %v931_v51 = vpack.c.bf16 %v867_v44, %v866_v43 }
 0x103   : > { %1492 = vrot.lane.b32.xlu0 %v1116_v52, %s9805_s27  ;;  %v930_v52 = vpack.c.bf16 %v865_v48, %v864_v47  ;;  %v628_v48 = vld [vmem:[%s10133_s17 + $0x280] sm:$0xff] }
 0x104   : > { %v1439_v2 = vpop.permute.xlu1 %1438 }
 0x105   : > { %v1761_v6 = vsel %vm1701_vm1, %v1598_v1, %v1439_v2  ;;  %v1437_v7 = vpop.permute.xlu0 %1436  ;;  %v616_v1 = vld [vmem:[%s10133_s17 + $0x220] sm:$0xff]  ;;  %v617_v2 = vld [vmem:[%s10133_s17 + $0x228] sm:$0xff] }
 0x106   : > { %v1759_v10 = vsel %vm1701_vm1, %v1595_v5, %v1437_v7  ;;  %1306 = vrot.lane.b32.xlu1 %v927_v61, %s9806_s29  ;;  %v9706_v7 = vld [vmem:[%s12313_s7 + $0x10] sm:$0xff]   ;;  %v710_v8 = vpack.c.bf16 %v617_v2, %v616_v1  ;;  %v9707_v2 = vld [vmem:[%s12313_s7 + $0x18] sm:$0xff]  }
 0x107   : > { %1304 = vrot.lane.b32.xlu0 %v926_v62, %s9806_s29  ;;  %8841 = vmatprep.mubr.msk.bf16.mxu0 %vm1869_vm2, %v1759_v10  ;;  %v618_v62 = vld [vmem:[%s10133_s17 + $0x230] sm:$0xff] }
 0x108   : > { %8842 = vmatmul.mubr.msk.bf16.gmra.mrb[56].mxu0 %vm1869_vm2, %v1761_v6  ;;  %v1251_v18 = vpop.permute.xlu1 %1250  ;;  %v711_v5 = vpack.c.bf16 %v619_v63, %v618_v62  ;;  %9061 = vmatprep.subr.bf16.mxu0 %v9706_v7  ;;  %v632_v62 = vld [vmem:[%s10133_s17 + $0x2a0] sm:$0xff]  ;;  %v633_v63 = vld [vmem:[%s10133_s17 + $0x2a8] sm:$0xff] }
 0x109   : > { %v1249_v23 = vpop.permute.xlu0 %1248  ;;  %v1604_v28 = vsel %vm1508_vm0, %v707_v17, %v1251_v18  ;;  %9062 = vmatpush3.bf16.msra.mxu0 %v9706_v7  ;;  %v620_v18 = vld [vmem:[%s10133_s17 + $0x240] sm:$0xff] }
 0x10a   : > { %1498 = vrot.lane.b32.xlu1 %v1119_v13, %s9805_s27  ;;  %v1601_v32 = vsel %vm1508_vm0, %v706_v22, %v1249_v23  ;;  %v712_v23 = vpack.c.bf16 %v621_v20, %v620_v18  ;;  %9063 = vmatprep.subr.bf16.mxu0 %v9707_v2 }
 0x10b   : > { %1496 = vrot.lane.b32.xlu0 %v1118_v14, %s9805_s27 }
 0x10c   : > { %v1443_v29 = vpop.permute.xlu1 %1442 }
 0x10d   : > { %v1765_v33 = vsel %vm1701_vm1, %v1604_v28, %v1443_v29  ;;  %v1441_v34 = vpop.permute.xlu0 %1440  ;;  %9064 = vmatpush3.bf16.msra.mxu0 %v9707_v2 }
 0x10e   : > { %v1763_v38 = vsel %vm1701_vm1, %v1601_v32, %v1441_v34  ;;  %1310 = vrot.lane.b32.xlu1 %v929_v24, %s9806_s29  ;;  %v625_v34 = vld [vmem:[%s10133_s17 + $0x268] sm:$0xff] }
 0x10f   : > { %1308 = vrot.lane.b32.xlu0 %v928_v25, %s9806_s29  ;;  %8845 = vmatprep.mubr.msk.bf16.mxu0 %vm1869_vm2, %v1763_v38 }
 0x110   : > { %8846 = vmatmul.mubr.msk.bf16.gmra.mrb[60].mxu0 %vm1869_vm2, %v1765_v33  ;;  %v1255_v46 = vpop.permute.xlu1 %1254  ;;  %v624_v33 = vld [vmem:[%s10133_s17 + $0x260] sm:$0xff] }
 0x111   : > { %v1253_v50 = vpop.permute.xlu0 %1252  ;;  %v1610_v55 = vsel %vm1508_vm0, %v709_v45, %v1255_v46  ;;  %v714_v38 = vpack.c.bf16 %v625_v34, %v624_v33  ;;  %v630_v45 = vld [vmem:[%s10133_s17 + $0x290] sm:$0xff]  ;;  %v631_v46 = vld [vmem:[%s10133_s17 + $0x298] sm:$0xff] }
 0x112   : > { %1502 = vrot.lane.b32.xlu1 %v1121_v41, %s9805_s27  ;;  %v1607_v59 = vsel %vm1508_vm0, %v708_v49, %v1253_v50  ;;  %v629_v49 = vld [vmem:[%s10133_s17 + $0x288] sm:$0xff]  ;;  %v717_v50 = vpack.c.bf16 %v631_v46, %v630_v45 }
 0x113   : > { %1500 = vrot.lane.b32.xlu0 %v1120_v42, %s9805_s27 }
 0x114   : > { %v1447_v56 = vpop.permute.xlu1 %1446 }
 0x115   : > { %v1769_v60 = vsel %vm1701_vm1, %v1610_v55, %v1447_v56  ;;  %v1445_v61 = vpop.permute.xlu0 %1444 }
 0x116   : > { %v1767_v0 = vsel %vm1701_vm1, %v1607_v59, %v1445_v61  ;;  %1314 = vrot.lane.b32.xlu1 %v931_v51, %s9806_s29  ;;  %v634_v59 = vld [vmem:[%s10133_s17 + $0x2b0] sm:$0xff] }
 0x117   : > { %1312 = vrot.lane.b32.xlu0 %v930_v52, %s9806_s29  ;;  %8849 = vmatprep.mubr.msk.bf16.mxu0 %vm1869_vm2, %v1767_v0  ;;  %v716_v52 = vpack.c.bf16 %v629_v49, %v628_v48 }
 0x118   : > { %8850 = vmatmul.mubr.msk.bf16.gmra.mrb[64].mxu0 %vm1869_vm2, %v1769_v60  ;;  %v1259_v6 = vpop.permute.xlu1 %1258  ;;  %v635_v60 = vld [vmem:[%s10133_s17 + $0x2b8] sm:$0xff] }
 0x119   : > { %v1257_v9 = vpop.permute.xlu0 %1256  ;;  %v1616_v10 = vsel %vm1508_vm0, %v711_v5, %v1259_v6  ;;  %v719_v0 = vpack.c.bf16 %v635_v60, %v634_v59 }
 0x11a   : > { %1506 = vrot.lane.b32.xlu1 %v1123_v3, %s9805_s27  ;;  %v1613_v12 = vsel %vm1508_vm0, %v710_v8, %v1257_v9  ;;  %v718_v3 = vpack.c.bf16 %v633_v63, %v632_v62 }
 0x11b   : > { %1504 = vrot.lane.b32.xlu0 %v1122_v4, %s9805_s27  ;;  %s9807_s27 = smov [#allocation2]  }
 0x11c   : > { %v1451_v11 = vpop.permute.xlu1 %1450 }
 0x11d   : > { %v1773_v13 = vsel %vm1701_vm1, %v1616_v10, %v1451_v11  ;;  %v1449_v14 = vpop.permute.xlu0 %1448  ;;  %v638_v10 = vld [vmem:[%s10133_s17 + $0x2d0] sm:$0xff]  ;;  %v639_v11 = vld [vmem:[%s10133_s17 + $0x2d8] sm:$0xff] }
 0x11e   : > { %v1771_v17 = vsel %vm1701_vm1, %v1613_v12, %v1449_v14  ;;  %v637_v14 = vld [vmem:[%s10133_s17 + $0x2c8] sm:$0xff]  ;;  %v721_v15 = vpack.c.bf16 %v639_v11, %v638_v10 }
 0x11f   : > { %8853 = vmatprep.mubr.msk.bf16.mxu0 %vm1869_vm2, %v1771_v17 }
 0x120   : > { %8854 = vmatmul.mubr.msk.bf16.gmra.mrb[68].mxu0 %vm1869_vm2, %v1773_v13  ;;  %v1263_v22 = vpop.permute.xlu1 %1262  ;;  %v636_v13 = vld [vmem:[%s10133_s17 + $0x2c0] sm:$0xff] }
 0x121   : > { %v1261_v24 = vpop.permute.xlu0 %1260  ;;  %v1622_v25 = vsel %vm1508_vm0, %v713_v21, %v1263_v22  ;;  %v720_v17 = vpack.c.bf16 %v637_v14, %v636_v13 }
 0x122   : > { %v1619_v27 = vsel %vm1508_vm0, %v712_v23, %v1261_v24 }
 0x124   : > { %v1455_v26 = vpop.permute.xlu1 %1454 }
 0x125   : > { %v1777_v28 = vsel %vm1701_vm1, %v1622_v25, %v1455_v26  ;;  %v1453_v29 = vpop.permute.xlu0 %1452  ;;  %v642_v25 = vld [vmem:[%s10133_s17 + $0x2f0] sm:$0xff]  ;;  %v643_v26 = vld [vmem:[%s10133_s17 + $0x2f8] sm:$0xff] }
 0x126   : > { %v1775_v32 = vsel %vm1701_vm1, %v1619_v27, %v1453_v29  ;;  %v641_v29 = vld [vmem:[%s10133_s17 + $0x2e8] sm:$0xff]  ;;  %v723_v30 = vpack.c.bf16 %v643_v26, %v642_v25 }
 0x127   : > { %8857 = vmatprep.mubr.msk.bf16.mxu0 %vm1869_vm2, %v1775_v32 }
 0x128   : > { %8858 = vmatmul.mubr.msk.bf16.gmra.mrb[72].mxu0 %vm1869_vm2, %v1777_v28  ;;  %v1267_v37 = vpop.permute.xlu1 %1266  ;;  %v640_v28 = vld [vmem:[%s10133_s17 + $0x2e0] sm:$0xff] }
 0x129   : > { %v1265_v39 = vpop.permute.xlu0 %1264  ;;  %v1628_v40 = vsel %vm1508_vm0, %v715_v36, %v1267_v37  ;;  %v722_v32 = vpack.c.bf16 %v641_v29, %v640_v28  ;;  %v10681_v29 = vld [vmem:[%s12310_s4] ss:$0 sm:$0xff] }
 0x12a   : > { %v1625_v42 = vsel %vm1508_vm0, %v714_v38, %v1265_v39 }
 0x12c   : > { %v1459_v41 = vpop.permute.xlu1 %1458 }
 0x12d   : > { %v1781_v43 = vsel %vm1701_vm1, %v1628_v40, %v1459_v41  ;;  %v1457_v44 = vpop.permute.xlu0 %1456  ;;  %v646_v40 = vld [vmem:[%s10133_s17 + $0x310] sm:$0xff]  ;;  %v647_v41 = vld [vmem:[%s10133_s17 + $0x318] sm:$0xff] }
 0x12e   : > { %v1779_v47 = vsel %vm1701_vm1, %v1625_v42, %v1457_v44  ;;  %v645_v44 = vld [vmem:[%s10133_s17 + $0x308] sm:$0xff]  ;;  %v725_v45 = vpack.c.bf16 %v647_v41, %v646_v40  ;;  %v662_v41 = vld [vmem:[%s10133_s17 + $0x390] sm:$0xff] }
 0x12f   : > { %8861 = vmatprep.mubr.msk.bf16.mxu0 %vm1869_vm2, %v1779_v47 }
 0x130   : > { %8862 = vmatmul.mubr.msk.bf16.gmra.mrb[76].mxu0 %vm1869_vm2, %v1781_v43  ;;  %v1271_v51 = vpop.permute.xlu1 %1270  ;;  %v644_v43 = vld [vmem:[%s10133_s17 + $0x300] sm:$0xff] }
 0x131   : > { %v1269_v53 = vpop.permute.xlu0 %1268  ;;  %v1634_v54 = vsel %vm1508_vm0, %v717_v50, %v1271_v51  ;;  %v724_v47 = vpack.c.bf16 %v645_v44, %v644_v43 }
 0x132   : > { %v1631_v56 = vsel %vm1508_vm0, %v716_v52, %v1269_v53 }
 0x134   : > { %v1463_v55 = vpop.permute.xlu1 %1462 }
 0x135   : > { %v1785_v57 = vsel %vm1701_vm1, %v1634_v54, %v1463_v55  ;;  %v1461_v58 = vpop.permute.xlu0 %1460  ;;  %v650_v54 = vld [vmem:[%s10133_s17 + $0x330] sm:$0xff]  ;;  %v651_v55 = vld [vmem:[%s10133_s17 + $0x338] sm:$0xff] }
 0x136   : > { %v1783_v61 = vsel %vm1701_vm1, %v1631_v56, %v1461_v58  ;;  %v649_v58 = vld [vmem:[%s10133_s17 + $0x328] sm:$0xff]  ;;  %v727_v59 = vpack.c.bf16 %v651_v55, %v650_v54 }
 0x137   : > { %8865 = vmatprep.mubr.msk.bf16.mxu0 %vm1869_vm2, %v1783_v61  ;;  %v9708_v61 = vld [vmem:[%s12313_s7 + $0x20] sm:$0xff]  }
 0x138   : > { %8866 = vmatmul.mubr.msk.bf16.gmra.mrb[80].mxu0 %vm1869_vm2, %v1785_v57  ;;  %v1275_v1 = vpop.permute.xlu1 %1274  ;;  %v648_v57 = vld [vmem:[%s10133_s17 + $0x320] sm:$0xff]  ;;  %9065 = vmatprep.subr.bf16.mxu0 %v9708_v61 }
 0x139   : > { %v1273_v4 = vpop.permute.xlu0 %1272  ;;  %v1640_v5 = vsel %vm1508_vm0, %v719_v0, %v1275_v1  ;;  %v726_v62 = vpack.c.bf16 %v649_v58, %v648_v57  ;;  %9066 = vmatpush3.bf16.msra.mxu0 %v9708_v61 }
 0x13a   : > { %v1637_v7 = vsel %vm1508_vm0, %v718_v3, %v1273_v4 }
 0x13c   : > { %v1467_v6 = vpop.permute.xlu1 %1466 }
 0x13d   : > { %v1789_v8 = vsel %vm1701_vm1, %v1640_v5, %v1467_v6  ;;  %v1465_v9 = vpop.permute.xlu0 %1464  ;;  %v654_v5 = vld [vmem:[%s10133_s17 + $0x350] sm:$0xff]  ;;  %v655_v6 = vld [vmem:[%s10133_s17 + $0x358] sm:$0xff] }
 0x13e   : > { %v1787_v12 = vsel %vm1701_vm1, %v1637_v7, %v1465_v9  ;;  %v653_v9 = vld [vmem:[%s10133_s17 + $0x348] sm:$0xff]  ;;  %v729_v10 = vpack.c.bf16 %v655_v6, %v654_v5 }
 0x13f   : > { %8869 = vmatprep.mubr.msk.bf16.mxu0 %vm1869_vm2, %v1787_v12 }
 0x140   : > { %8870 = vmatmul.mubr.msk.bf16.gmra.mrb[84].mxu0 %vm1869_vm2, %v1789_v8  ;;  %v1279_v16 = vpop.permute.xlu1 %1278  ;;  %v652_v8 = vld [vmem:[%s10133_s17 + $0x340] sm:$0xff] }
 0x141   : > { %v1277_v18 = vpop.permute.xlu0 %1276  ;;  %v1646_v20 = vsel %vm1508_vm0, %v721_v15, %v1279_v16  ;;  %v728_v12 = vpack.c.bf16 %v653_v9, %v652_v8  ;;  %v666_v9 = vld [vmem:[%s10133_s17 + $0x3b0] sm:$0xff] }
 0x142   : > { %v1643_v22 = vsel %vm1508_vm0, %v720_v17, %v1277_v18 }
 0x144   : > { %v1471_v21 = vpop.permute.xlu1 %1470 }
 0x145   : > { %v1793_v23 = vsel %vm1701_vm1, %v1646_v20, %v1471_v21  ;;  %v1469_v24 = vpop.permute.xlu0 %1468  ;;  %v658_v20 = vld [vmem:[%s10133_s17 + $0x370] sm:$0xff]  ;;  %v659_v21 = vld [vmem:[%s10133_s17 + $0x378] sm:$0xff] }
 0x146   : > { %v1791_v27 = vsel %vm1701_vm1, %v1643_v22, %v1469_v24  ;;  %v657_v24 = vld [vmem:[%s10133_s17 + $0x368] sm:$0xff]  ;;  %v731_v25 = vpack.c.bf16 %v659_v21, %v658_v20 }
 0x147   : > { %8873 = vmatprep.mubr.msk.bf16.mxu0 %vm1869_vm2, %v1791_v27 }
 0x148   : > { %8874 = vmatmul.mubr.msk.bf16.gmra.mrb[88].mxu0 %vm1869_vm2, %v1793_v23  ;;  %v1283_v31 = vpop.permute.xlu1 %1282  ;;  %v656_v23 = vld [vmem:[%s10133_s17 + $0x360] sm:$0xff] }
 0x149   : > { %v1281_v33 = vpop.permute.xlu0 %1280  ;;  %v1652_v34 = vsel %vm1508_vm0, %v723_v30, %v1283_v31  ;;  %v730_v27 = vpack.c.bf16 %v657_v24, %v656_v23  ;;  %v9709_v23 = vld [vmem:[%s12313_s7 + $0x28] sm:$0xff]  }
 0x14a   : > { %v1649_v37 = vsel %vm1508_vm0, %v722_v32, %v1281_v33  ;;  %9067 = vmatprep.subr.bf16.mxu0 %v9709_v23 }
 0x14b   : > { %9068 = vmatpush3.bf16.msra.mxu0 %v9709_v23 }
 0x14c   : > { %v1475_v36 = vpop.permute.xlu1 %1474 }
 0x14d   : > { %v1797_v38 = vsel %vm1701_vm1, %v1652_v34, %v1475_v36  ;;  %v1473_v39 = vpop.permute.xlu0 %1472 }
 0x14e   : > { %v1795_v42 = vsel %vm1701_vm1, %v1649_v37, %v1473_v39 }
 0x14f   : > { %8877 = vmatprep.mubr.msk.bf16.mxu0 %vm1869_vm2, %v1795_v42  ;;  %v663_v42 = vld [vmem:[%s10133_s17 + $0x398] sm:$0xff] }
 0x150   : > { %8878 = vmatmul.mubr.msk.bf16.gmra.mrb[92].mxu0 %vm1869_vm2, %v1797_v38  ;;  %v1287_v46 = vpop.permute.xlu1 %1286 }
 0x151   : > { %v1285_v48 = vpop.permute.xlu0 %1284  ;;  %v1658_v49 = vsel %vm1508_vm0, %v725_v45, %v1287_v46 }
 0x152   : > { %v1655_v51 = vsel %vm1508_vm0, %v724_v47, %v1285_v48  ;;  %v660_v47 = vld [vmem:[%s10133_s17 + $0x380] sm:$0xff]  ;;  %v661_v48 = vld [vmem:[%s10133_s17 + $0x388] sm:$0xff] }
 0x153   : > { %v732_v55 = vpack.c.bf16 %v661_v48, %v660_v47 }
 0x154   : > { %v1479_v50 = vpop.permute.xlu1 %1478 }
 0x155   : > { %v1801_v52 = vsel %vm1701_vm1, %v1658_v49, %v1479_v50  ;;  %v1477_v53 = vpop.permute.xlu0 %1476 }
 0x156   : > { %v1799_v56 = vsel %vm1701_vm1, %v1655_v51, %v1477_v53  ;;  %v733_v53 = vpack.c.bf16 %v663_v42, %v662_v41 }
 0x157   : > { %8881 = vmatprep.mubr.msk.bf16.mxu0 %vm1869_vm2, %v1799_v56 }
 0x158   : > { %8882 = vmatmul.mubr.msk.bf16.gmra.mrb[96].mxu0 %vm1869_vm2, %v1801_v52  ;;  %v1291_v60 = vpop.permute.xlu1 %1290 }
 0x159   : > { %v1289_v63 = vpop.permute.xlu0 %1288  ;;  %v1664_v0 = vsel %vm1508_vm0, %v727_v59, %v1291_v60 }
 0x15a   : > { %v1661_v2 = vsel %vm1508_vm0, %v726_v62, %v1289_v63 }
 0x15c   : > { %v1483_v1 = vpop.permute.xlu1 %1482 }
 0x15d   : > { %v1805_v3 = vsel %vm1701_vm1, %v1664_v0, %v1483_v1  ;;  %v1481_v4 = vpop.permute.xlu0 %1480 }
 0x15e   : > { %v1803_v7 = vsel %vm1701_vm1, %v1661_v2, %v1481_v4 }
 0x15f   : > { %8885 = vmatprep.mubr.msk.bf16.mxu0 %vm1869_vm2, %v1803_v7 }
 0x160   : > { %8886 = vmatmul.mubr.msk.bf16.gmra.mrb[100].mxu0 %vm1869_vm2, %v1805_v3  ;;  %v1295_v11 = vpop.permute.xlu1 %1294 }
 0x161   : > { %v1293_v13 = vpop.permute.xlu0 %1292  ;;  %v1670_v14 = vsel %vm1508_vm0, %v729_v10, %v1295_v11  ;;  %v667_v10 = vld [vmem:[%s10133_s17 + $0x3b8] sm:$0xff] }
 0x162   : > { %v1667_v16 = vsel %vm1508_vm0, %v728_v12, %v1293_v13  ;;  %v735_v21 = vpack.c.bf16 %v667_v10, %v666_v9 }
 0x164   : > { %v1487_v15 = vpop.permute.xlu1 %1486 }
 0x165   : > { %v1809_v17 = vsel %vm1701_vm1, %v1670_v14, %v1487_v15  ;;  %v1485_v18 = vpop.permute.xlu0 %1484  ;;  %v664_v15 = vld [vmem:[%s10133_s17 + $0x3a0] sm:$0xff] }
 0x166   : > { %v1807_v22 = vsel %vm1701_vm1, %v1667_v16, %v1485_v18  ;;  %v665_v16 = vld [vmem:[%s10133_s17 + $0x3a8] sm:$0xff] }
 0x167   : > { %8889 = vmatprep.mubr.msk.bf16.mxu0 %vm1869_vm2, %v1807_v22 }
 0x168   : > { %8890 = vmatmul.mubr.msk.bf16.gmra.mrb[104].mxu0 %vm1869_vm2, %v1809_v17  ;;  %v1299_v26 = vpop.permute.xlu1 %1298 }
 0x169   : > { %v1297_v28 = vpop.permute.xlu0 %1296  ;;  %v1676_v31 = vsel %vm1508_vm0, %v731_v25, %v1299_v26  ;;  %v734_v25 = vpack.c.bf16 %v665_v16, %v664_v15 }
 0x16a   : > { %v1673_v36 = vsel %vm1508_vm0, %v730_v27, %v1297_v28 }
 0x16b   : > { %v8787_v30 = vpop.f32.mrb[0].mxu0 }
 0x16c   : > { %v2041_v32 = vadd.f32 %v8787_v30, %v10681_v29  ;;  %v2032_v33 = vpop.f32.mrb[1].mxu0  ;;  %v1491_v34 = vpop.permute.xlu1 %1490 }
 0x16d   : > { %v2033_v37 = vadd.f32 %v10681_v29, %v2032_v33  ;;  %v1813_v38 = vsel %vm1701_vm1, %v1676_v31, %v1491_v34  ;;  %v8788_v39 = vpop.f32.mrb[2].mxu0  ;;  %v1489_v40 = vpop.permute.xlu0 %1488 }
 0x16e   : > { %v2545_v43 = vmax.f32 %v2041_v32, 0.0  ;;  %v2044_v44 = vadd.f32 %v8788_v39, %v10681_v29  ;;  %v1811_v45 = vsel %vm1701_vm1, %v1673_v36, %v1489_v40  ;;  %v2035_v46 = vpop.f32.mrb[3].mxu0 }
 0x16f   : > { %v2036_v49 = vadd.f32 %v10681_v29, %v2035_v46  ;;  %8893 = vmatprep.mubr.msk.bf16.mxu0 %vm1869_vm2, %v1811_v45  ;;  %v2543_v51 = vmax.f32 %v2033_v37, 0.0  ;;  %v670_v45 = vld [vmem:[%s10133_s17 + $0x3d0] sm:$0xff]  ;;  %v671_v46 = vld [vmem:[%s10133_s17 + $0x3d8] sm:$0xff] }
 0x170   : > { %v2546_v52 = vmax.f32 %v2044_v44, 0.0  ;;  %8894 = vmatmul.mubr.msk.bf16.gmra.mrb[108].mxu0 %vm1869_vm2, %v1813_v38  ;;  %v1303_v54 = vpop.permute.xlu1 %1302  ;;  %v2673_v58 = vsel %vm10701_vm7, %v2545_v43, %v2041_v32 }
 0x171   : > { %v1301_v56 = vpop.permute.xlu0 %1300  ;;  %v2544_v57 = vmax.f32 %v2036_v49, 0.0  ;;  %v2671_v60 = vsel %vm10701_vm7, %v2543_v51, %v2033_v37  ;;  %v1682_v63 = vsel %vm1508_vm0, %v733_v53, %v1303_v54  ;;  %v669_v53 = vld [vmem:[%s10133_s17 + $0x3c8] sm:$0xff] }
 0x172   : > { %v2674_v19 = vsel %vm10701_vm7, %v2546_v52, %v2044_v44  ;;  %v1679_v4 = vsel %vm1508_vm0, %v732_v55, %v1301_v56  ;;  %v668_v52 = vld [vmem:[%s10133_s17 + $0x3c0] sm:$0xff] }
 0x173   : > { %v8791_v59 = vpop.f32.mrb[4].mxu0  ;;  %v2672_v61 = vsel %vm10701_vm7, %v2544_v57, %v2036_v49  ;;  %v2800_v62 = vpack.c.bf16 %v2674_v19, %v2673_v58  ;;  %v737_v57 = vpack.c.bf16 %v671_v46, %v670_v45 }
 0x174   : > { %v2057_v0 = vadd.f32 %v8791_v59, %v10681_v29  ;;  %v2048_v1 = vpop.f32.mrb[5].mxu0  ;;  %v1495_v2 = vpop.permute.xlu1 %1494  ;;  %v2799_v3 = vpack.c.bf16 %v2672_v61, %v2671_v60  ;;  %v736_v59 = vpack.c.bf16 %v669_v53, %v668_v52 }
 0x175   : > { %v2049_v5 = vadd.f32 %v10681_v29, %v2048_v1  ;;  %v1817_v6 = vsel %vm1701_vm1, %v1682_v63, %v1495_v2  ;;  %v8792_v7 = vpop.f32.mrb[6].mxu0  ;;  %v1493_v8 = vpop.permute.xlu0 %1492 }
 0x176   : > { %v2549_v11 = vmax.f32 %v2057_v0, 0.0  ;;  %v2060_v12 = vadd.f32 %v8792_v7, %v10681_v29  ;;  %v1815_v13 = vsel %vm1701_vm1, %v1679_v4, %v1493_v8  ;;  %v2051_v14 = vpop.f32.mrb[7].mxu0  ;;  %8929 = vmatprep.mubr.bf16.mxu1 %v2799_v3 }
 0x177   : > { %v2547_v17 = vmax.f32 %v2049_v5, 0.0  ;;  %v2052_v18 = vadd.f32 %v10681_v29, %v2051_v14  ;;  %8897 = vmatprep.mubr.msk.bf16.mxu0 %vm1869_vm2, %v1815_v13  ;;  %8930 = vmatmul.mubr.bf16.vlgmr.msra.gmra.mrb[0].mxu1 %v2800_v62  ;;  %v674_v13 = vld [vmem:[%s10133_s17 + $0x3f0] sm:$0xff]  ;;  %v675_v14 = vld [vmem:[%s10133_s17 + $0x3f8] sm:$0xff] }
 0x178   : > { %v2550_v20 = vmax.f32 %v2060_v12, 0.0  ;;  %8898 = vmatmul.mubr.msk.bf16.gmra.mrb[112].mxu0 %vm1869_vm2, %v1817_v6  ;;  %v1307_v22 = vpop.permute.xlu1 %1306  ;;  %v2677_v27 = vsel %vm10701_vm7, %v2549_v11, %v2057_v0 }
 0x179   : > { %v2548_v24 = vmax.f32 %v2052_v18, 0.0  ;;  %v1305_v26 = vpop.permute.xlu0 %1304  ;;  %v2675_v31 = vsel %vm10701_vm7, %v2547_v17, %v2049_v5  ;;  %v1688_v34 = vsel %vm1508_vm0, %v735_v21, %v1307_v22  ;;  %v673_v21 = vld [vmem:[%s10133_s17 + $0x3e8] sm:$0xff] }
 0x17a   : > { %v2678_v28 = vsel %vm10701_vm7, %v2550_v20, %v2060_v12  ;;  %v1685_v40 = vsel %vm1508_vm0, %v734_v25, %v1305_v26  ;;  %v672_v20 = vld [vmem:[%s10133_s17 + $0x3e0] sm:$0xff]  ;;  %v739_v25 = vpack.c.bf16 %v675_v14, %v674_v13  ;;  %s518_s17 = sand.u32 1, %s9795_s19  }
 0x17b   : > { %v8795_v30 = vpop.f32.mrb[8].mxu0  ;;  %v2676_v32 = vsel %vm10701_vm7, %v2548_v24, %v2052_v18  ;;  %v2802_v33 = vpack.c.bf16 %v2678_v28, %v2677_v27  ;;  %v738_v28 = vpack.c.bf16 %v673_v21, %v672_v20  ;;  %s7583_s29 = sshll.u32 %s518_s17, 9  ;;  %s12265_s22 = scalar_lea.sflag [#allocation3], %s518_s17 }
 0x17c   : > { %v2073_v36 = vadd.f32 %v8795_v30, %v10681_v29  ;;  %v2064_v37 = vpop.f32.mrb[9].mxu0  ;;  %v1499_v38 = vpop.permute.xlu1 %1498  ;;  %v2801_v39 = vpack.c.bf16 %v2676_v32, %v2675_v31  ;;  %s12056_s26 = scalar_lea.vmem [#allocation2], %s7583_s29  ;;  %s9745_s29 = sshll.u32 %s9807_s27, 4  ;;  %s9746_s29 = int_to_ptr.vmem [resolvable:$false] %s9745_s29 }
 0x17d   : > { %v2065_v41 = vadd.f32 %v10681_v29, %v2064_v37  ;;  %v1821_v42 = vsel %vm1701_vm1, %v1688_v34, %v1499_v38  ;;  %v8796_v43 = vpop.f32.mrb[10].mxu0  ;;  %v1497_v44 = vpop.permute.xlu0 %1496  ;;  %s7493_s24 = sshll.u32 %s12056_s26, 4  ;;  %s9747_s20 = scalar_lea.vmem %s9746_s29, 16384  ;;  %s12259_s24 = int_to_ptr.vmem [resolvable:$true] %s7493_s24 }
 0x17e   : > { %v2553_v47 = vmax.f32 %v2073_v36, 0.0  ;;  %v2076_v48 = vadd.f32 %v8796_v43, %v10681_v29  ;;  %v1819_v49 = vsel %vm1701_vm1, %v1685_v40, %v1497_v44  ;;  %v2067_v51 = vpop.f32.mrb[11].mxu0  ;;  %8933 = vmatprep.mubr.bf16.mxu1 %v2801_v39  ;;  %s9741_s23 = scalar_lea.vmem %s12259_s24, 8192  ;;  %p9748_p0 = scmp.lt.s32.totalorder %s12259_s24, %s9746_s29 }
 0x17f   : > { %v2551_v54 = vmax.f32 %v2065_v41, 0.0  ;;  %v2068_v55 = vadd.f32 %v10681_v29, %v2067_v51  ;;  %8901 = vmatprep.mubr.msk.bf16.mxu0 %vm1869_vm2, %v1819_v49  ;;  %8934 = vmatmul.mubr.bf16.gmra.mrb[4].mxu1 %v2802_v33  ;;  %p9742_p11 = scmp.ne.s32.totalorder %s12259_s24, %s9741_s23  ;;  %p9749_p1 = scmp.lt.s32.totalorder %s9747_s20, %s9741_s23 }
 0x180   : > { %v2554_v56 = vmax.f32 %v2076_v48, 0.0  ;;  %8902 = vmatmul.mubr.msk.bf16.gmra.mrb[116].mxu0 %vm1869_vm2, %v1821_v42  ;;  %v1311_v58 = vpop.permute.xlu1 %1310  ;;  %v2681_v61 = vsel %vm10701_vm7, %v2553_v47, %v2073_v36 }
 0x181   : > { %v2552_v19 = vmax.f32 %v2068_v55, 0.0  ;;  %v1309_v60 = vpop.permute.xlu0 %1308  ;;  %v2679_v0 = vsel %vm10701_vm7, %v2551_v54, %v2065_v41  ;;  %v1694_v3 = vsel %vm1508_vm0, %v737_v57, %v1311_v58  ;;  %p9743_p12 = pnand %p9742_p11, %p9928_p5  ;;  %p9750_p2 = por %p9749_p1, %p9748_p0 }
 0x182   : > { %v2682_v62 = vsel %vm10701_vm7, %v2554_v56, %v2076_v48  ;;  %v1691_v8 = vsel %vm1508_vm0, %v736_v59, %v1309_v60 }
 0x183   : > { %v8799_v63 = vpop.f32.mrb[12].mxu0  ;;  %v2680_v1 = vsel %vm10701_vm7, %v2552_v19, %v2068_v55  ;;  %v2804_v2 = vpack.c.bf16 %v2682_v62, %v2681_v61  ;;  %p9744_p13 = pneg %p9743_p12 }
 0x184   : > { %v2089_v4 = vadd.f32 %v8799_v63, %v10681_v29  ;;  %v2080_v5 = vpop.f32.mrb[13].mxu0  ;;  %v1503_v6 = vpop.permute.xlu1 %1502  ;;  %v2803_v7 = vpack.c.bf16 %v2680_v1, %v2679_v0 }
 0x185   : > { %v2081_v9 = vadd.f32 %v10681_v29, %v2080_v5  ;;  %v1825_v10 = vsel %vm1701_vm1, %v1694_v3, %v1503_v6  ;;  %v8800_v11 = vpop.f32.mrb[14].mxu0  ;;  %v1501_v12 = vpop.permute.xlu0 %1500  ;;  %p9751_p3 = pnand %p9750_p2, %p9744_p13 }
 0x186   : > { %v2557_v15 = vmax.f32 %v2089_v4, 0.0  ;;  %v2092_v16 = vadd.f32 %v8800_v11, %v10681_v29  ;;  %v1823_v17 = vsel %vm1701_vm1, %v1691_v8, %v1501_v12  ;;  %v2083_v18 = vpop.f32.mrb[15].mxu0  ;;  %8937 = vmatprep.mubr.bf16.mxu1 %v2803_v7 }
 0x187   : > { %v2555_v22 = vmax.f32 %v2081_v9, 0.0  ;;  %v2084_v23 = vadd.f32 %v10681_v29, %v2083_v18  ;;  %8905 = vmatprep.mubr.msk.bf16.mxu0 %vm1869_vm2, %v1823_v17  ;;  %8938 = vmatmul.mubr.bf16.gmra.mrb[8].mxu1 %v2804_v2 }
 0x188   : > { %v2558_v24 = vmax.f32 %v2092_v16, 0.0  ;;  %8906 = vmatmul.mubr.msk.bf16.gmra.mrb[120].mxu0 %vm1869_vm2, %v1825_v10  ;;  %v1315_v26 = vpop.permute.xlu1 %1314  ;;  %v2685_v31 = vsel %vm10701_vm7, %v2557_v15, %v2089_v4 }
 0x189   : > { %v2556_v27 = vmax.f32 %v2084_v23, 0.0  ;;  %v1313_v30 = vpop.permute.xlu0 %1312  ;;  %v2683_v34 = vsel %vm10701_vm7, %v2555_v22, %v2081_v9  ;;  %v1700_v38 = vsel %vm1508_vm0, %v739_v25, %v1315_v26  ;;  %v9710_v9 = vld [vmem:[%s12313_s7 + $0x30] sm:$0xff]  }
 0x18a   : > { %v2686_v32 = vsel %vm10701_vm7, %v2558_v24, %v2092_v16  ;;  %v1697_v43 = vsel %vm1508_vm0, %v738_v28, %v1313_v30  ;;  %9069 = vmatprep.subr.bf16.mxu0 %v9710_v9 }
 0x18b   : > { %v8803_v33 = vpop.f32.mrb[16].mxu0  ;;  %v2684_v36 = vsel %vm10701_vm7, %v2556_v27, %v2084_v23  ;;  %v2806_v37 = vpack.c.bf16 %v2686_v32, %v2685_v31  ;;  %9070 = vmatpush3.bf16.msra.mxu0 %v9710_v9 }
 0x18c   : > { %v2105_v39 = vadd.f32 %v8803_v33, %v10681_v29  ;;  %v2096_v40 = vpop.f32.mrb[17].mxu0  ;;  %v1507_v41 = vpop.permute.xlu1 %1506  ;;  %v2805_v42 = vpack.c.bf16 %v2684_v36, %v2683_v34 }
 0x18d   : > { %v2097_v44 = vadd.f32 %v10681_v29, %v2096_v40  ;;  %v1829_v45 = vsel %vm1701_vm1, %v1700_v38, %v1507_v41  ;;  %v8804_v46 = vpop.f32.mrb[18].mxu0  ;;  %v1505_v47 = vpop.permute.xlu0 %1504 }
 0x18e   : > { %v2561_v48 = vmax.f32 %v2105_v39, 0.0  ;;  %v2108_v49 = vadd.f32 %v8804_v46, %v10681_v29  ;;  %v1827_v51 = vsel %vm1701_vm1, %v1697_v43, %v1505_v47  ;;  %v2099_v52 = vpop.f32.mrb[19].mxu0  ;;  %8941 = vmatprep.mubr.bf16.mxu1 %v2805_v42 }
 0x18f   : > { %v2559_v53 = vmax.f32 %v2097_v44, 0.0  ;;  %v2100_v54 = vadd.f32 %v10681_v29, %v2099_v52  ;;  %8909 = vmatprep.mubr.msk.bf16.mxu0 %vm1869_vm2, %v1827_v51  ;;  %8942 = vmatmul.mubr.bf16.gmra.mrb[12].mxu1 %v2806_v37 }
 0x190   : > { %v2562_v55 = vmax.f32 %v2108_v49, 0.0  ;;  %8910 = vmatmul.mubr.msk.bf16.gmra.mrb[124].mxu0 %vm1869_vm2, %v1829_v45  ;;  %v2689_v57 = vsel %vm10701_vm7, %v2561_v48, %v2105_v39 }
 0x191   : > { %v2560_v56 = vmax.f32 %v2100_v54, 0.0  ;;  %v2687_v59 = vsel %vm10701_vm7, %v2559_v53, %v2097_v44 }
 0x192   : > { %v2690_v58 = vsel %vm10701_vm7, %v2562_v55, %v2108_v49 }
 0x193   : > { %v8807_v19 = vpop.f32.mrb[20].mxu0  ;;  %v2688_v60 = vsel %vm10701_vm7, %v2560_v56, %v2100_v54  ;;  %v2808_v61 = vpack.c.bf16 %v2690_v58, %v2689_v57 }
 0x194   : > { %v2121_v62 = vadd.f32 %v8807_v19, %v10681_v29  ;;  %v2112_v63 = vpop.f32.mrb[21].mxu0  ;;  %v2807_v0 = vpack.c.bf16 %v2688_v60, %v2687_v59 }
 0x195   : > { %v2113_v1 = vadd.f32 %v10681_v29, %v2112_v63  ;;  %v8808_v2 = vpop.f32.mrb[22].mxu0 }
 0x196   : > { %v2565_v3 = vmax.f32 %v2121_v62, 0.0  ;;  %v2124_v4 = vadd.f32 %v8808_v2, %v10681_v29  ;;  %v2115_v5 = vpop.f32.mrb[23].mxu0  ;;  %8945 = vmatprep.mubr.bf16.mxu1 %v2807_v0 }
 0x197   : > { %v2563_v6 = vmax.f32 %v2113_v1, 0.0  ;;  %v2116_v7 = vadd.f32 %v10681_v29, %v2115_v5  ;;  %8946 = vmatmul.mubr.bf16.gmra.mrb[16].mxu1 %v2808_v61 }
 0x198   : > { %v2566_v8 = vmax.f32 %v2124_v4, 0.0  ;;  %v2693_v11 = vsel %vm10701_vm7, %v2565_v3, %v2121_v62 }
 0x199   : > { %v2564_v10 = vmax.f32 %v2116_v7, 0.0  ;;  %v2691_v14 = vsel %vm10701_vm7, %v2563_v6, %v2113_v1 }
 0x19a   : > { %v2694_v12 = vsel %vm10701_vm7, %v2566_v8, %v2124_v4 }
 0x19b   : > { %v8811_v13 = vpop.f32.mrb[24].mxu0  ;;  %v2692_v15 = vsel %vm10701_vm7, %v2564_v10, %v2116_v7  ;;  %v2810_v16 = vpack.c.bf16 %v2694_v12, %v2693_v11 }
 0x19c   : > { %v2137_v17 = vadd.f32 %v8811_v13, %v10681_v29  ;;  %v2128_v18 = vpop.f32.mrb[25].mxu0  ;;  %v2809_v20 = vpack.c.bf16 %v2692_v15, %v2691_v14 }
 0x19d   : > { %v2129_v21 = vadd.f32 %v10681_v29, %v2128_v18  ;;  %v8812_v22 = vpop.f32.mrb[26].mxu0  ;;  %v9711_v18 = vld [vmem:[%s12315_s9] sm:$0xff]  }
 0x19e   : > { %v2569_v23 = vmax.f32 %v2137_v17, 0.0  ;;  %v2140_v24 = vadd.f32 %v8812_v22, %v10681_v29  ;;  %v2131_v25 = vpop.f32.mrb[27].mxu0  ;;  %8949 = vmatprep.mubr.bf16.mxu1 %v2809_v20  ;;  %9201 = vmatprep.subr.bf16.mxu1 %v9711_v18 }
 0x19f   : > { %v2567_v26 = vmax.f32 %v2129_v21, 0.0  ;;  %v2132_v27 = vadd.f32 %v10681_v29, %v2131_v25  ;;  %8950 = vmatmul.mubr.bf16.gmra.mrb[20].mxu1 %v2810_v16 }
 0x1a0   : > { %v2570_v28 = vmax.f32 %v2140_v24, 0.0  ;;  %v2697_v31 = vsel %vm10701_vm7, %v2569_v23, %v2137_v17  ;;  %v9712_v23 = vld [vmem:[%s12313_s7 + $0x38] sm:$0xff]   ;;  %9202 = vmatpush3.bf16.msra.mxu1 %v9711_v18 }
 0x1a1   : > { %v2568_v30 = vmax.f32 %v2132_v27, 0.0  ;;  %v2695_v34 = vsel %vm10701_vm7, %v2567_v26, %v2129_v21  ;;  %9071 = vmatprep.subr.bf16.mxu0 %v9712_v23 }
 0x1a2   : > { %v2698_v32 = vsel %vm10701_vm7, %v2570_v28, %v2140_v24  ;;  %9072 = vmatpush3.bf16.msra.mxu0 %v9712_v23 }
 0x1a3   : > { %v8815_v33 = vpop.f32.mrb[28].mxu0  ;;  %v2696_v36 = vsel %vm10701_vm7, %v2568_v30, %v2132_v27  ;;  %v2812_v37 = vpack.c.bf16 %v2698_v32, %v2697_v31 }
 0x1a4   : > { %v2153_v38 = vadd.f32 %v8815_v33, %v10681_v29  ;;  %v2144_v39 = vpop.f32.mrb[29].mxu0  ;;  %v2811_v40 = vpack.c.bf16 %v2696_v36, %v2695_v34 }
 0x1a5   : > { %v2145_v41 = vadd.f32 %v10681_v29, %v2144_v39  ;;  %v8816_v42 = vpop.f32.mrb[30].mxu0 }
 0x1a6   : > { %v2573_v43 = vmax.f32 %v2153_v38, 0.0  ;;  %v2156_v44 = vadd.f32 %v8816_v42, %v10681_v29  ;;  %v2147_v45 = vpop.f32.mrb[31].mxu0  ;;  %8953 = vmatprep.mubr.bf16.mxu1 %v2811_v40 }
 0x1a7   : > { %v2571_v46 = vmax.f32 %v2145_v41, 0.0  ;;  %v2148_v47 = vadd.f32 %v10681_v29, %v2147_v45  ;;  %8954 = vmatmul.mubr.bf16.gmra.mrb[24].mxu1 %v2812_v37 }
 0x1a8   : > { %v2574_v48 = vmax.f32 %v2156_v44, 0.0  ;;  %v2701_v51 = vsel %vm10701_vm7, %v2573_v43, %v2153_v38 }
 0x1a9   : > { %v2572_v49 = vmax.f32 %v2148_v47, 0.0  ;;  %v2699_v54 = vsel %vm10701_vm7, %v2571_v46, %v2145_v41 }
 0x1aa   : > { %v2702_v52 = vsel %vm10701_vm7, %v2574_v48, %v2156_v44 }
 0x1ab   : > { %v8819_v53 = vpop.f32.mrb[32].mxu0  ;;  %v2700_v55 = vsel %vm10701_vm7, %v2572_v49, %v2148_v47  ;;  %v2814_v56 = vpack.c.bf16 %v2702_v52, %v2701_v51 }
 0x1ac   : > { %v2169_v57 = vadd.f32 %v8819_v53, %v10681_v29  ;;  %v2160_v58 = vpop.f32.mrb[33].mxu0  ;;  %v2813_v19 = vpack.c.bf16 %v2700_v55, %v2699_v54 }
 0x1ad   : > { %v2161_v59 = vadd.f32 %v10681_v29, %v2160_v58  ;;  %v8820_v60 = vpop.f32.mrb[34].mxu0 }
 0x1ae   : > { %v2577_v61 = vmax.f32 %v2169_v57, 0.0  ;;  %v2172_v62 = vadd.f32 %v8820_v60, %v10681_v29  ;;  %v2163_v63 = vpop.f32.mrb[35].mxu0  ;;  %8957 = vmatprep.mubr.bf16.mxu1 %v2813_v19 }
 0x1af   : > { %v2575_v0 = vmax.f32 %v2161_v59, 0.0  ;;  %v2164_v1 = vadd.f32 %v10681_v29, %v2163_v63  ;;  %8958 = vmatmul.mubr.bf16.gmra.mrb[28].mxu1 %v2814_v56 }
 0x1b0   : > { %v2578_v2 = vmax.f32 %v2172_v62, 0.0  ;;  %v2705_v4 = vsel %vm10701_vm7, %v2577_v61, %v2169_v57 }
 0x1b1   : > { %v2576_v3 = vmax.f32 %v2164_v1, 0.0  ;;  %v2703_v7 = vsel %vm10701_vm7, %v2575_v0, %v2161_v59 }
 0x1b2   : > { %v2706_v5 = vsel %vm10701_vm7, %v2578_v2, %v2172_v62 }
 0x1b3   : > { %v8823_v6 = vpop.f32.mrb[36].mxu0  ;;  %v2704_v8 = vsel %vm10701_vm7, %v2576_v3, %v2164_v1  ;;  %v2816_v9 = vpack.c.bf16 %v2706_v5, %v2705_v4 }
 0x1b4   : > { %v2185_v10 = vadd.f32 %v8823_v6, %v10681_v29  ;;  %v2176_v11 = vpop.f32.mrb[37].mxu0  ;;  %v2815_v12 = vpack.c.bf16 %v2704_v8, %v2703_v7 }
 0x1b5   : > { %v2177_v13 = vadd.f32 %v10681_v29, %v2176_v11  ;;  %v8824_v14 = vpop.f32.mrb[38].mxu0 }
 0x1b6   : > { %v2581_v15 = vmax.f32 %v2185_v10, 0.0  ;;  %v2188_v16 = vadd.f32 %v8824_v14, %v10681_v29  ;;  %v2179_v17 = vpop.f32.mrb[39].mxu0  ;;  %8961 = vmatprep.mubr.bf16.mxu1 %v2815_v12 }
 0x1b7   : > { %v2579_v20 = vmax.f32 %v2177_v13, 0.0  ;;  %v2180_v21 = vadd.f32 %v10681_v29, %v2179_v17  ;;  %8962 = vmatmul.mubr.bf16.gmra.mrb[32].mxu1 %v2816_v9 }
 0x1b8   : > { %v2582_v22 = vmax.f32 %v2188_v16, 0.0  ;;  %v2709_v25 = vsel %vm10701_vm7, %v2581_v15, %v2185_v10 }
 0x1b9   : > { %v2580_v24 = vmax.f32 %v2180_v21, 0.0  ;;  %v2707_v28 = vsel %vm10701_vm7, %v2579_v20, %v2177_v13 }
 0x1ba   : > { %v2710_v26 = vsel %vm10701_vm7, %v2582_v22, %v2188_v16 }
 0x1bb   : > { %v8827_v27 = vpop.f32.mrb[40].mxu0  ;;  %v2708_v30 = vsel %vm10701_vm7, %v2580_v24, %v2180_v21  ;;  %v2818_v31 = vpack.c.bf16 %v2710_v26, %v2709_v25 }
 0x1bc   : > { %v2201_v32 = vadd.f32 %v8827_v27, %v10681_v29  ;;  %v2192_v33 = vpop.f32.mrb[41].mxu0  ;;  %v2817_v34 = vpack.c.bf16 %v2708_v30, %v2707_v28 }
 0x1bd   : > { %v2193_v36 = vadd.f32 %v10681_v29, %v2192_v33  ;;  %v8828_v37 = vpop.f32.mrb[42].mxu0  ;;  %v9713_v33 = vld [vmem:[%s12315_s9 + $0x8] sm:$0xff]  }
 0x1be   : > { %v2585_v38 = vmax.f32 %v2201_v32, 0.0  ;;  %v2204_v39 = vadd.f32 %v8828_v37, %v10681_v29  ;;  %v2195_v40 = vpop.f32.mrb[43].mxu0  ;;  %8965 = vmatprep.mubr.bf16.mxu1 %v2817_v34  ;;  %9203 = vmatprep.subr.bf16.mxu1 %v9713_v33 }
 0x1bf   : > { %v2583_v41 = vmax.f32 %v2193_v36, 0.0  ;;  %v2196_v42 = vadd.f32 %v10681_v29, %v2195_v40  ;;  %8966 = vmatmul.mubr.bf16.gmra.mrb[36].mxu1 %v2818_v31 }
 0x1c0   : > { %v2586_v43 = vmax.f32 %v2204_v39, 0.0  ;;  %v2713_v45 = vsel %vm10701_vm7, %v2585_v38, %v2201_v32  ;;  %9204 = vmatpush3.bf16.msra.mxu1 %v9713_v33 }
 0x1c1   : > { %v2584_v44 = vmax.f32 %v2196_v42, 0.0  ;;  %v2711_v48 = vsel %vm10701_vm7, %v2583_v41, %v2193_v36 }
 0x1c2   : > { %v2714_v46 = vsel %vm10701_vm7, %v2586_v43, %v2204_v39 }
 0x1c3   : > { %v8831_v47 = vpop.f32.mrb[44].mxu0  ;;  %v2712_v49 = vsel %vm10701_vm7, %v2584_v44, %v2196_v42  ;;  %v2820_v51 = vpack.c.bf16 %v2714_v46, %v2713_v45 }
 0x1c4   : > { %v2217_v52 = vadd.f32 %v8831_v47, %v10681_v29  ;;  %v2208_v53 = vpop.f32.mrb[45].mxu0  ;;  %v2819_v54 = vpack.c.bf16 %v2712_v49, %v2711_v48 }
 0x1c5   : > { %v2209_v55 = vadd.f32 %v10681_v29, %v2208_v53  ;;  %v8832_v56 = vpop.f32.mrb[46].mxu0 }
 0x1c6   : > { %v2589_v57 = vmax.f32 %v2217_v52, 0.0  ;;  %v2220_v58 = vadd.f32 %v8832_v56, %v10681_v29  ;;  %v2211_v19 = vpop.f32.mrb[47].mxu0  ;;  %8969 = vmatprep.mubr.bf16.mxu1 %v2819_v54 }
 0x1c7   : > { %v2587_v59 = vmax.f32 %v2209_v55, 0.0  ;;  %v2212_v60 = vadd.f32 %v10681_v29, %v2211_v19  ;;  %8970 = vmatmul.mubr.bf16.gmra.mrb[40].mxu1 %v2820_v51 }
 0x1c8   : > { %v2590_v61 = vmax.f32 %v2220_v58, 0.0  ;;  %v2717_v63 = vsel %vm10701_vm7, %v2589_v57, %v2217_v52 }
 0x1c9   : > { %v2588_v62 = vmax.f32 %v2212_v60, 0.0  ;;  %v2715_v2 = vsel %vm10701_vm7, %v2587_v59, %v2209_v55 }
 0x1ca   : > { %v2718_v0 = vsel %vm10701_vm7, %v2590_v61, %v2220_v58 }
 0x1cb   : > { %v8835_v1 = vpop.f32.mrb[48].mxu0  ;;  %v2716_v3 = vsel %vm10701_vm7, %v2588_v62, %v2212_v60  ;;  %v2822_v4 = vpack.c.bf16 %v2718_v0, %v2717_v63 }
 0x1cc   : > { %v2233_v5 = vadd.f32 %v8835_v1, %v10681_v29  ;;  %v2224_v6 = vpop.f32.mrb[49].mxu0  ;;  %v2821_v7 = vpack.c.bf16 %v2716_v3, %v2715_v2 }
 0x1cd   : > { %v2225_v8 = vadd.f32 %v10681_v29, %v2224_v6  ;;  %v8836_v9 = vpop.f32.mrb[50].mxu0 }
 0x1ce   : > { %v2593_v10 = vmax.f32 %v2233_v5, 0.0  ;;  %v2236_v11 = vadd.f32 %v8836_v9, %v10681_v29  ;;  %v2227_v12 = vpop.f32.mrb[51].mxu0  ;;  %8973 = vmatprep.mubr.bf16.mxu1 %v2821_v7 }
 0x1cf   : > { %v2591_v13 = vmax.f32 %v2225_v8, 0.0  ;;  %v2228_v14 = vadd.f32 %v10681_v29, %v2227_v12  ;;  %8974 = vmatmul.mubr.bf16.gmra.mrb[44].mxu1 %v2822_v4 }
 0x1d0   : > { %v2594_v15 = vmax.f32 %v2236_v11, 0.0  ;;  %v2721_v17 = vsel %vm10701_vm7, %v2593_v10, %v2233_v5 }
 0x1d1   : > { %v2592_v16 = vmax.f32 %v2228_v14, 0.0  ;;  %v2719_v21 = vsel %vm10701_vm7, %v2591_v13, %v2225_v8 }
 0x1d2   : > { %v2722_v18 = vsel %vm10701_vm7, %v2594_v15, %v2236_v11 }
 0x1d3   : > { %v8839_v20 = vpop.f32.mrb[52].mxu0  ;;  %v2720_v22 = vsel %vm10701_vm7, %v2592_v16, %v2228_v14  ;;  %v2824_v23 = vpack.c.bf16 %v2722_v18, %v2721_v17 }
 0x1d4   : > { %v2249_v24 = vadd.f32 %v8839_v20, %v10681_v29  ;;  %v2240_v25 = vpop.f32.mrb[53].mxu0  ;;  %v2823_v26 = vpack.c.bf16 %v2720_v22, %v2719_v21 }
 0x1d5   : > { %v2241_v27 = vadd.f32 %v10681_v29, %v2240_v25  ;;  %v8840_v28 = vpop.f32.mrb[54].mxu0 }
 0x1d6   : > { %v2597_v30 = vmax.f32 %v2249_v24, 0.0  ;;  %v2252_v31 = vadd.f32 %v8840_v28, %v10681_v29  ;;  %v2243_v32 = vpop.f32.mrb[55].mxu0  ;;  %8977 = vmatprep.mubr.bf16.mxu1 %v2823_v26 }
 0x1d7   : > { %v2595_v34 = vmax.f32 %v2241_v27, 0.0  ;;  %v2244_v36 = vadd.f32 %v10681_v29, %v2243_v32  ;;  %8978 = vmatmul.mubr.bf16.gmra.mrb[48].mxu1 %v2824_v23 }
 0x1d8   : > { %v2598_v37 = vmax.f32 %v2252_v31, 0.0  ;;  %v2725_v39 = vsel %vm10701_vm7, %v2597_v30, %v2249_v24 }
 0x1d9   : > { %v2596_v38 = vmax.f32 %v2244_v36, 0.0  ;;  %v2723_v42 = vsel %vm10701_vm7, %v2595_v34, %v2241_v27 }
 0x1da   : > { %v2726_v40 = vsel %vm10701_vm7, %v2598_v37, %v2252_v31 }
 0x1db   : > { %v8843_v41 = vpop.f32.mrb[56].mxu0  ;;  %v2724_v43 = vsel %vm10701_vm7, %v2596_v38, %v2244_v36  ;;  %v2826_v44 = vpack.c.bf16 %v2726_v40, %v2725_v39 }
 0x1dc   : > { %v2265_v45 = vadd.f32 %v8843_v41, %v10681_v29  ;;  %v2256_v46 = vpop.f32.mrb[57].mxu0  ;;  %v2825_v47 = vpack.c.bf16 %v2724_v43, %v2723_v42 }
 0x1dd   : > { %v2257_v48 = vadd.f32 %v10681_v29, %v2256_v46  ;;  %v8844_v49 = vpop.f32.mrb[58].mxu0  ;;  %v9714_v46 = vld [vmem:[%s12315_s9 + $0x10] sm:$0xff]  }
 0x1de   : > { %v2601_v51 = vmax.f32 %v2265_v45, 0.0  ;;  %v2268_v52 = vadd.f32 %v8844_v49, %v10681_v29  ;;  %v2259_v53 = vpop.f32.mrb[59].mxu0  ;;  %8981 = vmatprep.mubr.bf16.mxu1 %v2825_v47  ;;  %9205 = vmatprep.subr.bf16.mxu1 %v9714_v46 }
 0x1df   : > { %v2599_v54 = vmax.f32 %v2257_v48, 0.0  ;;  %v2260_v55 = vadd.f32 %v10681_v29, %v2259_v53  ;;  %8982 = vmatmul.mubr.bf16.gmra.mrb[52].mxu1 %v2826_v44 }
 0x1e0   : > { %v2602_v56 = vmax.f32 %v2268_v52, 0.0  ;;  %v2729_v58 = vsel %vm10701_vm7, %v2601_v51, %v2265_v45  ;;  %9206 = vmatpush3.bf16.msra.mxu1 %v9714_v46 }
 0x1e1   : > { %v2600_v57 = vmax.f32 %v2260_v55, 0.0  ;;  %v2727_v60 = vsel %vm10701_vm7, %v2599_v54, %v2257_v48 }
 0x1e2   : > { %v2730_v19 = vsel %vm10701_vm7, %v2602_v56, %v2268_v52 }
 0x1e3   : > { %v8847_v59 = vpop.f32.mrb[60].mxu0  ;;  %v2728_v61 = vsel %vm10701_vm7, %v2600_v57, %v2260_v55  ;;  %v2828_v62 = vpack.c.bf16 %v2730_v19, %v2729_v58 }
 0x1e4   : > { %v2281_v63 = vadd.f32 %v8847_v59, %v10681_v29  ;;  %v2272_v0 = vpop.f32.mrb[61].mxu0  ;;  %v2827_v1 = vpack.c.bf16 %v2728_v61, %v2727_v60 }
 0x1e5   : > { %v2273_v2 = vadd.f32 %v10681_v29, %v2272_v0  ;;  %v8848_v3 = vpop.f32.mrb[62].mxu0 }
 0x1e6   : > { %v2605_v4 = vmax.f32 %v2281_v63, 0.0  ;;  %v2284_v5 = vadd.f32 %v8848_v3, %v10681_v29  ;;  %v2275_v6 = vpop.f32.mrb[63].mxu0  ;;  %8985 = vmatprep.mubr.bf16.mxu1 %v2827_v1 }
 0x1e7   : > { %v2603_v7 = vmax.f32 %v2273_v2, 0.0  ;;  %v2276_v8 = vadd.f32 %v10681_v29, %v2275_v6  ;;  %8986 = vmatmul.mubr.bf16.gmra.mrb[56].mxu1 %v2828_v62 }
 0x1e8   : > { %v2606_v9 = vmax.f32 %v2284_v5, 0.0  ;;  %v2733_v11 = vsel %vm10701_vm7, %v2605_v4, %v2281_v63 }
 0x1e9   : > { %v2604_v10 = vmax.f32 %v2276_v8, 0.0  ;;  %v2731_v14 = vsel %vm10701_vm7, %v2603_v7, %v2273_v2 }
 0x1ea   : > { %v2734_v12 = vsel %vm10701_vm7, %v2606_v9, %v2284_v5 }
 0x1eb   : > { %v8851_v13 = vpop.f32.mrb[64].mxu0  ;;  %v2732_v15 = vsel %vm10701_vm7, %v2604_v10, %v2276_v8  ;;  %v2830_v16 = vpack.c.bf16 %v2734_v12, %v2733_v11 }
 0x1ec   : > { %v2297_v17 = vadd.f32 %v8851_v13, %v10681_v29  ;;  %v2288_v18 = vpop.f32.mrb[65].mxu0  ;;  %v2829_v20 = vpack.c.bf16 %v2732_v15, %v2731_v14 }
 0x1ed   : > { %v2289_v21 = vadd.f32 %v10681_v29, %v2288_v18  ;;  %v8852_v22 = vpop.f32.mrb[66].mxu0 }
 0x1ee   : > { %v2609_v23 = vmax.f32 %v2297_v17, 0.0  ;;  %v2300_v24 = vadd.f32 %v8852_v22, %v10681_v29  ;;  %v2291_v25 = vpop.f32.mrb[67].mxu0  ;;  %8989 = vmatprep.mubr.bf16.mxu1 %v2829_v20 }
 0x1ef   : > { %v2607_v26 = vmax.f32 %v2289_v21, 0.0  ;;  %v2292_v27 = vadd.f32 %v10681_v29, %v2291_v25  ;;  %8990 = vmatmul.mubr.bf16.gmra.mrb[60].mxu1 %v2830_v16 }
 0x1f0   : > { %v2610_v28 = vmax.f32 %v2300_v24, 0.0  ;;  %v2737_v31 = vsel %vm10701_vm7, %v2609_v23, %v2297_v17 }
 0x1f1   : > { %v2608_v30 = vmax.f32 %v2292_v27, 0.0  ;;  %v2735_v34 = vsel %vm10701_vm7, %v2607_v26, %v2289_v21 }
 0x1f2   : > { %v2738_v32 = vsel %vm10701_vm7, %v2610_v28, %v2300_v24 }
 0x1f3   : > { %v8855_v33 = vpop.f32.mrb[68].mxu0  ;;  %v2736_v36 = vsel %vm10701_vm7, %v2608_v30, %v2292_v27  ;;  %v2832_v37 = vpack.c.bf16 %v2738_v32, %v2737_v31 }
 0x1f4   : > { %v2313_v38 = vadd.f32 %v8855_v33, %v10681_v29  ;;  %v2304_v39 = vpop.f32.mrb[69].mxu0  ;;  %v2831_v40 = vpack.c.bf16 %v2736_v36, %v2735_v34 }
 0x1f5   : > { %v2305_v41 = vadd.f32 %v10681_v29, %v2304_v39  ;;  %v8856_v42 = vpop.f32.mrb[70].mxu0 }
 0x1f6   : > { %v2613_v43 = vmax.f32 %v2313_v38, 0.0  ;;  %v2316_v44 = vadd.f32 %v8856_v42, %v10681_v29  ;;  %v2307_v45 = vpop.f32.mrb[71].mxu0  ;;  %8993 = vmatprep.mubr.bf16.mxu1 %v2831_v40 }
 0x1f7   : > { %v2611_v47 = vmax.f32 %v2305_v41, 0.0  ;;  %v2308_v48 = vadd.f32 %v10681_v29, %v2307_v45  ;;  %8994 = vmatmul.mubr.bf16.gmra.mrb[64].mxu1 %v2832_v37 }
 0x1f8   : > { %v2614_v49 = vmax.f32 %v2316_v44, 0.0  ;;  %v2741_v52 = vsel %vm10701_vm7, %v2613_v43, %v2313_v38 }
 0x1f9   : > { %v2612_v51 = vmax.f32 %v2308_v48, 0.0  ;;  %v2739_v55 = vsel %vm10701_vm7, %v2611_v47, %v2305_v41 }
 0x1fa   : > { %v2742_v53 = vsel %vm10701_vm7, %v2614_v49, %v2316_v44 }
 0x1fb   : > { %v8859_v54 = vpop.f32.mrb[72].mxu0  ;;  %v2740_v56 = vsel %vm10701_vm7, %v2612_v51, %v2308_v48  ;;  %v2834_v57 = vpack.c.bf16 %v2742_v53, %v2741_v52 }
 0x1fc   : > { %v2329_v58 = vadd.f32 %v8859_v54, %v10681_v29  ;;  %v2320_v19 = vpop.f32.mrb[73].mxu0  ;;  %v2833_v59 = vpack.c.bf16 %v2740_v56, %v2739_v55  ;;  %v11012_v54 = vld [vmem:[%s12310_s4] ss:$0 sm:$0xff] }
 0x1fd   : > { %v2321_v60 = vadd.f32 %v10681_v29, %v2320_v19  ;;  %v8860_v61 = vpop.f32.mrb[74].mxu0 }
 0x1fe   : > { %v2617_v62 = vmax.f32 %v2329_v58, 0.0  ;;  %v2332_v63 = vadd.f32 %v8860_v61, %v10681_v29  ;;  %v2323_v0 = vpop.f32.mrb[75].mxu0  ;;  %8997 = vmatprep.mubr.bf16.mxu1 %v2833_v59  ;;  %v9715_v59 = vld [vmem:[%s12315_s9 + $0x18] sm:$0xff]  }
 0x1ff   : > { %v2615_v1 = vmax.f32 %v2321_v60, 0.0  ;;  %v2324_v2 = vadd.f32 %v10681_v29, %v2323_v0  ;;  %8998 = vmatmul.mubr.bf16.gmra.mrb[68].mxu1 %v2834_v57  ;;  %9207 = vmatprep.subr.bf16.mxu1 %v9715_v59 }
 0x200   : > { %v2618_v3 = vmax.f32 %v2332_v63, 0.0  ;;  %v2745_v5 = vsel %vm10701_vm7, %v2617_v62, %v2329_v58  ;;  %9208 = vmatpush3.bf16.msra.mxu1 %v9715_v59 }
 0x201   : > { %v2616_v4 = vmax.f32 %v2324_v2, 0.0  ;;  %v2743_v8 = vsel %vm10701_vm7, %v2615_v1, %v2321_v60 }
 0x202   : > { %v2746_v6 = vsel %vm10701_vm7, %v2618_v3, %v2332_v63 }
 0x203   : > { %v8863_v7 = vpop.f32.mrb[76].mxu0  ;;  %v2744_v9 = vsel %vm10701_vm7, %v2616_v4, %v2324_v2  ;;  %v2836_v10 = vpack.c.bf16 %v2746_v6, %v2745_v5 }
 0x204   : > { %v2345_v11 = vadd.f32 %v8863_v7, %v10681_v29  ;;  %v2336_v12 = vpop.f32.mrb[77].mxu0  ;;  %v2835_v13 = vpack.c.bf16 %v2744_v9, %v2743_v8 }
 0x205   : > { %v2337_v14 = vadd.f32 %v10681_v29, %v2336_v12  ;;  %v8864_v15 = vpop.f32.mrb[78].mxu0 }
 0x206   : > { %v2621_v16 = vmax.f32 %v2345_v11, 0.0  ;;  %v2348_v17 = vadd.f32 %v8864_v15, %v10681_v29  ;;  %v2339_v18 = vpop.f32.mrb[79].mxu0  ;;  %9001 = vmatprep.mubr.bf16.mxu1 %v2835_v13 }
 0x207   : > { %v2619_v20 = vmax.f32 %v2337_v14, 0.0  ;;  %v2340_v21 = vadd.f32 %v10681_v29, %v2339_v18  ;;  %9002 = vmatmul.mubr.bf16.gmra.mrb[72].mxu1 %v2836_v10 }
 0x208   : > { %v2622_v22 = vmax.f32 %v2348_v17, 0.0  ;;  %v2749_v24 = vsel %vm10701_vm7, %v2621_v16, %v2345_v11 }
 0x209   : > { %v2620_v23 = vmax.f32 %v2340_v21, 0.0  ;;  %v2747_v27 = vsel %vm10701_vm7, %v2619_v20, %v2337_v14 }
 0x20a   : > { %v2750_v25 = vsel %vm10701_vm7, %v2622_v22, %v2348_v17 }
 0x20b   : > { %v8867_v26 = vpop.f32.mrb[80].mxu0  ;;  %v2748_v28 = vsel %vm10701_vm7, %v2620_v23, %v2340_v21  ;;  %v2838_v30 = vpack.c.bf16 %v2750_v25, %v2749_v24 }
 0x20c   : > { %v2361_v31 = vadd.f32 %v8867_v26, %v10681_v29  ;;  %v2352_v32 = vpop.f32.mrb[81].mxu0  ;;  %v2837_v33 = vpack.c.bf16 %v2748_v28, %v2747_v27 }
 0x20d   : > { %v2353_v34 = vadd.f32 %v10681_v29, %v2352_v32  ;;  %v8868_v36 = vpop.f32.mrb[82].mxu0 }
 0x20e   : > { %v2625_v37 = vmax.f32 %v2361_v31, 0.0  ;;  %v2364_v38 = vadd.f32 %v8868_v36, %v10681_v29  ;;  %v2355_v39 = vpop.f32.mrb[83].mxu0  ;;  %9005 = vmatprep.mubr.bf16.mxu1 %v2837_v33 }
 0x20f   : > { %v2623_v40 = vmax.f32 %v2353_v34, 0.0  ;;  %v2356_v41 = vadd.f32 %v10681_v29, %v2355_v39  ;;  %9006 = vmatmul.mubr.bf16.gmra.mrb[76].mxu1 %v2838_v30 }
 0x210   : > { %v2626_v42 = vmax.f32 %v2364_v38, 0.0  ;;  %v2753_v44 = vsel %vm10701_vm7, %v2625_v37, %v2361_v31 }
 0x211   : > { %v2624_v43 = vmax.f32 %v2356_v41, 0.0  ;;  %v2751_v47 = vsel %vm10701_vm7, %v2623_v40, %v2353_v34 }
 0x212   : > { %v2754_v45 = vsel %vm10701_vm7, %v2626_v42, %v2364_v38 }
 0x213   : > { %v8871_v46 = vpop.f32.mrb[84].mxu0  ;;  %v2752_v48 = vsel %vm10701_vm7, %v2624_v43, %v2356_v41  ;;  %v2840_v49 = vpack.c.bf16 %v2754_v45, %v2753_v44 }
 0x214   : > { %v2377_v51 = vadd.f32 %v8871_v46, %v10681_v29  ;;  %v2368_v52 = vpop.f32.mrb[85].mxu0  ;;  %v2839_v53 = vpack.c.bf16 %v2752_v48, %v2751_v47 }
 0x215   : > { %v2369_v55 = vadd.f32 %v11012_v54, %v2368_v52  ;;  %v8872_v56 = vpop.f32.mrb[86].mxu0 }
 0x216   : > { %v2629_v57 = vmax.f32 %v2377_v51, 0.0  ;;  %v2380_v58 = vadd.f32 %v11012_v54, %v8872_v56  ;;  %v2371_v19 = vpop.f32.mrb[87].mxu0  ;;  %9009 = vmatprep.mubr.bf16.mxu1 %v2839_v53 }
 0x217   : > { %v2627_v29 = vmax.f32 %v2369_v55, 0.0  ;;  %v2372_v60 = vadd.f32 %v11012_v54, %v2371_v19  ;;  %9010 = vmatmul.mubr.bf16.gmra.mrb[80].mxu1 %v2840_v49 }
 0x218   : > { %v2630_v61 = vmax.f32 %v2380_v58, 0.0  ;;  %v2757_v63 = vsel %vm10701_vm7, %v2629_v57, %v2377_v51 }
 0x219   : > { %v2628_v62 = vmax.f32 %v2372_v60, 0.0  ;;  %v2755_v2 = vsel %vm10701_vm7, %v2627_v29, %v2369_v55 }
 0x21a   : > { %v2758_v0 = vsel %vm10701_vm7, %v2630_v61, %v2380_v58 }
 0x21b   : > { %v8875_v1 = vpop.f32.mrb[88].mxu0  ;;  %v2756_v3 = vsel %vm10701_vm7, %v2628_v62, %v2372_v60  ;;  %v2842_v4 = vpack.c.bf16 %v2758_v0, %v2757_v63 }
 0x21c   : > { %v2393_v5 = vadd.f32 %v11012_v54, %v8875_v1  ;;  %v2384_v6 = vpop.f32.mrb[89].mxu0  ;;  %v2841_v7 = vpack.c.bf16 %v2756_v3, %v2755_v2 }
 0x21d   : > { %v2385_v8 = vadd.f32 %v11012_v54, %v2384_v6  ;;  %v8876_v9 = vpop.f32.mrb[90].mxu0  ;;  %v9716_v6 = vld [vmem:[%s12315_s9 + $0x20] sm:$0xff]  }
 0x21e   : > { %v2633_v10 = vmax.f32 %v2393_v5, 0.0  ;;  %v2396_v11 = vadd.f32 %v11012_v54, %v8876_v9  ;;  %v2387_v12 = vpop.f32.mrb[91].mxu0  ;;  %9013 = vmatprep.mubr.bf16.mxu1 %v2841_v7  ;;  %9209 = vmatprep.subr.bf16.mxu1 %v9716_v6 }
 0x21f   : > { %v2631_v13 = vmax.f32 %v2385_v8, 0.0  ;;  %v2388_v14 = vadd.f32 %v11012_v54, %v2387_v12  ;;  %9014 = vmatmul.mubr.bf16.gmra.mrb[84].mxu1 %v2842_v4 }
 0x220   : > { %v2634_v15 = vmax.f32 %v2396_v11, 0.0  ;;  %v2761_v17 = vsel %vm10701_vm7, %v2633_v10, %v2393_v5  ;;  %9210 = vmatpush3.bf16.msra.mxu1 %v9716_v6 }
 0x221   : > { %v2632_v16 = vmax.f32 %v2388_v14, 0.0  ;;  %v2759_v21 = vsel %vm10701_vm7, %v2631_v13, %v2385_v8 }
 0x222   : > { %v2762_v18 = vsel %vm10701_vm7, %v2634_v15, %v2396_v11 }
 0x223   : > { %v8879_v20 = vpop.f32.mrb[92].mxu0  ;;  %v2760_v22 = vsel %vm10701_vm7, %v2632_v16, %v2388_v14  ;;  %v2844_v23 = vpack.c.bf16 %v2762_v18, %v2761_v17 }
 0x224   : > { %v2409_v24 = vadd.f32 %v11012_v54, %v8879_v20  ;;  %v2400_v25 = vpop.f32.mrb[93].mxu0  ;;  %v2843_v26 = vpack.c.bf16 %v2760_v22, %v2759_v21 }
 0x225   : > { %v2401_v27 = vadd.f32 %v11012_v54, %v2400_v25  ;;  %v8880_v28 = vpop.f32.mrb[94].mxu0 }
 0x226   : > { %v2637_v30 = vmax.f32 %v2409_v24, 0.0  ;;  %v2412_v31 = vadd.f32 %v11012_v54, %v8880_v28  ;;  %v2403_v32 = vpop.f32.mrb[95].mxu0  ;;  %9017 = vmatprep.mubr.bf16.mxu1 %v2843_v26 }
 0x227   : > { %v2635_v33 = vmax.f32 %v2401_v27, 0.0  ;;  %v2404_v34 = vadd.f32 %v11012_v54, %v2403_v32  ;;  %9018 = vmatmul.mubr.bf16.gmra.mrb[88].mxu1 %v2844_v23 }
 0x228   : > { %v2638_v36 = vmax.f32 %v2412_v31, 0.0  ;;  %v2765_v38 = vsel %vm10701_vm7, %v2637_v30, %v2409_v24 }
 0x229   : > { %v2636_v37 = vmax.f32 %v2404_v34, 0.0  ;;  %v2763_v41 = vsel %vm10701_vm7, %v2635_v33, %v2401_v27 }
 0x22a   : > { %v2766_v39 = vsel %vm10701_vm7, %v2638_v36, %v2412_v31 }
 0x22b   : > { %v8883_v40 = vpop.f32.mrb[96].mxu0  ;;  %v2764_v42 = vsel %vm10701_vm7, %v2636_v37, %v2404_v34  ;;  %v2846_v43 = vpack.c.bf16 %v2766_v39, %v2765_v38 }
 0x22c   : > { %v2425_v44 = vadd.f32 %v11012_v54, %v8883_v40  ;;  %v2416_v45 = vpop.f32.mrb[97].mxu0  ;;  %v2845_v46 = vpack.c.bf16 %v2764_v42, %v2763_v41 }
 0x22d   : > { %v2417_v47 = vadd.f32 %v11012_v54, %v2416_v45  ;;  %v8884_v48 = vpop.f32.mrb[98].mxu0 }
 0x22e   : > { %v2641_v49 = vmax.f32 %v2425_v44, 0.0  ;;  %v2428_v51 = vadd.f32 %v11012_v54, %v8884_v48  ;;  %v2419_v52 = vpop.f32.mrb[99].mxu0  ;;  %9021 = vmatprep.mubr.bf16.mxu1 %v2845_v46 }
 0x22f   : > { %v2639_v53 = vmax.f32 %v2417_v47, 0.0  ;;  %v2420_v55 = vadd.f32 %v11012_v54, %v2419_v52  ;;  %9022 = vmatmul.mubr.bf16.gmra.mrb[92].mxu1 %v2846_v43 }
 0x230   : > { %v2642_v56 = vmax.f32 %v2428_v51, 0.0  ;;  %v2769_v58 = vsel %vm10701_vm7, %v2641_v49, %v2425_v44  ;;  %v11098_v49 = vld [vmem:[%s12312_s6] ss:$0 sm:$0xff] }
 0x231   : > { %v2640_v57 = vmax.f32 %v2420_v55, 0.0  ;;  %v2767_v29 = vsel %vm10701_vm7, %v2639_v53, %v2417_v47 }
 0x232   : > { %v2770_v19 = vsel %vm10701_vm7, %v2642_v56, %v2428_v51 }
 0x233   : > { %v8887_v59 = vpop.f32.mrb[100].mxu0  ;;  %v2768_v60 = vsel %vm10701_vm7, %v2640_v57, %v2420_v55  ;;  %v2848_v61 = vpack.c.bf16 %v2770_v19, %v2769_v58 }
 0x234   : > { %v2441_v62 = vadd.f32 %v11012_v54, %v8887_v59  ;;  %v2432_v63 = vpop.f32.mrb[101].mxu0  ;;  %v2847_v0 = vpack.c.bf16 %v2768_v60, %v2767_v29 }
 0x235   : > { %v2433_v1 = vadd.f32 %v11012_v54, %v2432_v63  ;;  %v8888_v2 = vpop.f32.mrb[102].mxu0 }
 0x236   : > { %v2645_v3 = vmax.f32 %v2441_v62, 0.0  ;;  %v2444_v4 = vadd.f32 %v11012_v54, %v8888_v2  ;;  %v2435_v5 = vpop.f32.mrb[103].mxu0  ;;  %9025 = vmatprep.mubr.bf16.mxu1 %v2847_v0 }
 0x237   : > { %v2643_v7 = vmax.f32 %v2433_v1, 0.0  ;;  %v2436_v8 = vadd.f32 %v11012_v54, %v2435_v5  ;;  %9026 = vmatmul.mubr.bf16.gmra.mrb[96].mxu1 %v2848_v61 }
 0x238   : > { %v2646_v9 = vmax.f32 %v2444_v4, 0.0  ;;  %v2773_v11 = vsel %vm10701_vm7, %v2645_v3, %v2441_v62 }
 0x239   : > { %v2644_v10 = vmax.f32 %v2436_v8, 0.0  ;;  %v2771_v14 = vsel %vm10701_vm7, %v2643_v7, %v2433_v1 }
 0x23a   : > { %v2774_v12 = vsel %vm10701_vm7, %v2646_v9, %v2444_v4 }
 0x23b   : > { %v8891_v13 = vpop.f32.mrb[104].mxu0  ;;  %v2772_v15 = vsel %vm10701_vm7, %v2644_v10, %v2436_v8  ;;  %v2850_v16 = vpack.c.bf16 %v2774_v12, %v2773_v11 }
 0x23c   : > { %v2457_v17 = vadd.f32 %v11012_v54, %v8891_v13  ;;  %v2448_v18 = vpop.f32.mrb[105].mxu0  ;;  %v2849_v20 = vpack.c.bf16 %v2772_v15, %v2771_v14 }
 0x23d   : > { %v2449_v21 = vadd.f32 %v11012_v54, %v2448_v18  ;;  %v8892_v22 = vpop.f32.mrb[106].mxu0 }
 0x23e   : > { %v2649_v23 = vmax.f32 %v2457_v17, 0.0  ;;  %v2460_v24 = vadd.f32 %v11012_v54, %v8892_v22  ;;  %v2451_v25 = vpop.f32.mrb[107].mxu0  ;;  %9029 = vmatprep.mubr.bf16.mxu1 %v2849_v20 }
 0x23f   : > { %v2647_v26 = vmax.f32 %v2449_v21, 0.0  ;;  %v2452_v27 = vadd.f32 %v11012_v54, %v2451_v25  ;;  %9030 = vmatmul.mubr.bf16.gmra.mrb[100].mxu1 %v2850_v16 }
 0x240   : > { %v2650_v28 = vmax.f32 %v2460_v24, 0.0  ;;  %v2777_v31 = vsel %vm10701_vm7, %v2649_v23, %v2457_v17 }
 0x241   : > { %v2648_v30 = vmax.f32 %v2452_v27, 0.0  ;;  %v2775_v34 = vsel %vm10701_vm7, %v2647_v26, %v2449_v21 }
 0x242   : > { %v2778_v32 = vsel %vm10701_vm7, %v2650_v28, %v2460_v24 }
 0x243   : > { %v8895_v33 = vpop.f32.mrb[108].mxu0  ;;  %v2776_v36 = vsel %vm10701_vm7, %v2648_v30, %v2452_v27  ;;  %v2852_v37 = vpack.c.bf16 %v2778_v32, %v2777_v31 }
 0x244   : > { %v2473_v38 = vadd.f32 %v11012_v54, %v8895_v33  ;;  %v2464_v39 = vpop.f32.mrb[109].mxu0  ;;  %v2851_v40 = vpack.c.bf16 %v2776_v36, %v2775_v34 }
 0x245   : > { %v2465_v41 = vadd.f32 %v11012_v54, %v2464_v39  ;;  %v8896_v42 = vpop.f32.mrb[110].mxu0 }
 0x246   : > { %v2653_v43 = vmax.f32 %v2473_v38, 0.0  ;;  %v2476_v44 = vadd.f32 %v11012_v54, %v8896_v42  ;;  %v2467_v45 = vpop.f32.mrb[111].mxu0  ;;  %9033 = vmatprep.mubr.bf16.mxu1 %v2851_v40 }
 0x247   : > { %v2651_v46 = vmax.f32 %v2465_v41, 0.0  ;;  %v2468_v47 = vadd.f32 %v11012_v54, %v2467_v45  ;;  %9034 = vmatmul.mubr.bf16.gmra.mrb[104].mxu1 %v2852_v37 }
 0x248   : > { %v2654_v48 = vmax.f32 %v2476_v44, 0.0  ;;  %v2781_v53 = vsel %vm10701_vm7, %v2653_v43, %v2473_v38 }
 0x249   : > { %v2652_v51 = vmax.f32 %v2468_v47, 0.0  ;;  %v2779_v19 = vsel %vm10701_vm7, %v2651_v46, %v2465_v41 }
 0x24a   : > { %v8931_v52 = vpop.f32.mrb[0].mxu1  ;;  %v2782_v55 = vsel %vm10701_vm7, %v2654_v48, %v2476_v44 }
 0x24b   : > { %v2977_v56 = vadd.f32 %v8931_v52, %v11098_v49  ;;  %v8899_v57 = vpop.f32.mrb[112].mxu0  ;;  %v2968_v58 = vpop.f32.mrb[1].mxu1  ;;  %v2780_v59 = vsel %vm10701_vm7, %v2652_v51, %v2468_v47  ;;  %v2854_v29 = vpack.c.bf16 %v2782_v55, %v2781_v53  ;;  %v9717_v52 = vld [vmem:[%s12315_s9 + $0x28] sm:$0xff]  }
 0x24c   : > { %v2489_v60 = vadd.f32 %v11012_v54, %v8899_v57  ;;  %v2969_v61 = vadd.f32 %v11098_v49, %v2968_v58  ;;  %v2480_v62 = vpop.f32.mrb[113].mxu0  ;;  %v8932_v63 = vpop.f32.mrb[2].mxu1  ;;  %v2853_v0 = vpack.c.bf16 %v2780_v59, %v2779_v19  ;;  %9211 = vmatprep.subr.bf16.mxu1 %v9717_v52 }
 0x24d   : > { %v3481_v1 = vmax.f32 %v2977_v56, 0.0  ;;  %v2481_v2 = vadd.f32 %v11012_v54, %v2480_v62  ;;  %v2980_v3 = vadd.f32 %v8932_v63, %v11098_v49  ;;  %v8900_v4 = vpop.f32.mrb[114].mxu0  ;;  %v2971_v5 = vpop.f32.mrb[3].mxu1  ;;  %9212 = vmatpush3.bf16.msra.mxu1 %v9717_v52 }
 0x24e   : > { %v2657_v6 = vmax.f32 %v2489_v60, 0.0  ;;  %v3479_v7 = vmax.f32 %v2969_v61, 0.0  ;;  %v2492_v8 = vadd.f32 %v11012_v54, %v8900_v4  ;;  %v2972_v9 = vadd.f32 %v11098_v49, %v2971_v5  ;;  %v2483_v10 = vpop.f32.mrb[115].mxu0  ;;  %9037 = vmatprep.mubr.bf16.mxu1 %v2853_v0 }
 0x24f   : > { %v2655_v11 = vmax.f32 %v2481_v2, 0.0  ;;  %v3482_v12 = vmax.f32 %v2980_v3, 0.0  ;;  %v2484_v13 = vadd.f32 %v11012_v54, %v2483_v10  ;;  %9038 = vmatmul.mubr.bf16.gmra.mrb[108].mxu1 %v2854_v29  ;;  %v3609_v14 = vsel %vm10480_vm5, %v3481_v1, %v2977_v56 }
 0x250   : > { %v2658_v15 = vmax.f32 %v2492_v8, 0.0  ;;  %v3480_v16 = vmax.f32 %v2972_v9, 0.0  ;;  %v3607_v20 = vsel %vm10480_vm5, %v3479_v7, %v2969_v61  ;;  %v2785_v21 = vsel %vm10701_vm7, %v2657_v6, %v2489_v60 }
 0x251   : > { %v3610_v17 = vsel %vm10480_vm5, %v3482_v12, %v2980_v3  ;;  %v2656_v18 = vmax.f32 %v2484_v13, 0.0  ;;  %v2783_v25 = vsel %vm10701_vm7, %v2655_v11, %v2481_v2 }
 0x252   : > { %v3736_v22 = vpack.c.bf16 %v3610_v17, %v3609_v14  ;;  %v8935_v23 = vpop.f32.mrb[4].mxu1  ;;  %v3608_v24 = vsel %vm10480_vm5, %v3480_v16, %v2972_v9  ;;  %v2786_v26 = vsel %vm10701_vm7, %v2658_v15, %v2492_v8 }
 0x253   : > { %v2993_v27 = vadd.f32 %v8935_v23, %v11098_v49  ;;  %v8903_v28 = vpop.f32.mrb[116].mxu0  ;;  %v2984_v30 = vpop.f32.mrb[5].mxu1  ;;  %v3735_v31 = vpack.c.bf16 %v3608_v24, %v3607_v20  ;;  %v2784_v32 = vsel %vm10701_vm7, %v2656_v18, %v2484_v13  ;;  %v2856_v33 = vpack.c.bf16 %v2786_v26, %v2785_v21 }
 0x254   : > { %v2505_v34 = vadd.f32 %v11012_v54, %v8903_v28  ;;  %v2985_v36 = vadd.f32 %v11098_v49, %v2984_v30  ;;  %v2496_v37 = vpop.f32.mrb[117].mxu0  ;;  %v8936_v38 = vpop.f32.mrb[6].mxu1  ;;  %v2855_v39 = vpack.c.bf16 %v2784_v32, %v2783_v25 }
 0x255   : > { %v3485_v40 = vmax.f32 %v2993_v27, 0.0  ;;  %v2497_v41 = vadd.f32 %v11012_v54, %v2496_v37  ;;  %v2996_v42 = vadd.f32 %v8936_v38, %v11098_v49  ;;  %v8904_v43 = vpop.f32.mrb[118].mxu0  ;;  %v2987_v44 = vpop.f32.mrb[7].mxu1  ;;  %9073 = vmatprep.mubr.bf16.mxu0 %v3735_v31 }
 0x256   : > { %v2661_v45 = vmax.f32 %v2505_v34, 0.0  ;;  %v3483_v46 = vmax.f32 %v2985_v36, 0.0  ;;  %v2508_v47 = vadd.f32 %v11012_v54, %v8904_v43  ;;  %v2988_v48 = vadd.f32 %v11098_v49, %v2987_v44  ;;  %v2499_v51 = vpop.f32.mrb[119].mxu0  ;;  %9041 = vmatprep.mubr.bf16.mxu1 %v2855_v39  ;;  %9074 = vmatmul.mubr.bf16.vlgmr.msra.gmra.mrb[128].mxu0 %v3736_v22 }
 0x257   : > { %v2659_v53 = vmax.f32 %v2497_v41, 0.0  ;;  %v3486_v55 = vmax.f32 %v2996_v42, 0.0  ;;  %v2500_v56 = vadd.f32 %v11012_v54, %v2499_v51  ;;  %9042 = vmatmul.mubr.bf16.gmra.mrb[112].mxu1 %v2856_v33  ;;  %v3613_v19 = vsel %vm10480_vm5, %v3485_v40, %v2993_v27 }
 0x258   : > { %v2662_v57 = vmax.f32 %v2508_v47, 0.0  ;;  %v3484_v58 = vmax.f32 %v2988_v48, 0.0  ;;  %v3611_v29 = vsel %vm10480_vm5, %v3483_v46, %v2985_v36  ;;  %v2789_v61 = vsel %vm10701_vm7, %v2661_v45, %v2505_v34 }
 0x259   : > { %v2660_v59 = vmax.f32 %v2500_v56, 0.0  ;;  %v3614_v60 = vsel %vm10480_vm5, %v3486_v55, %v2996_v42  ;;  %v2787_v0 = vsel %vm10701_vm7, %v2659_v53, %v2497_v41 }
 0x25a   : > { %v8939_v62 = vpop.f32.mrb[8].mxu1  ;;  %v3612_v63 = vsel %vm10480_vm5, %v3484_v58, %v2988_v48  ;;  %v3738_v1 = vpack.c.bf16 %v3614_v60, %v3613_v19  ;;  %v2790_v2 = vsel %vm10701_vm7, %v2662_v57, %v2508_v47 }
 0x25b   : > { %v3009_v3 = vadd.f32 %v8939_v62, %v11098_v49  ;;  %v8907_v4 = vpop.f32.mrb[120].mxu0  ;;  %v3000_v5 = vpop.f32.mrb[9].mxu1  ;;  %v3737_v6 = vpack.c.bf16 %v3612_v63, %v3611_v29  ;;  %v2788_v7 = vsel %vm10701_vm7, %v2660_v59, %v2500_v56  ;;  %v2858_v8 = vpack.c.bf16 %v2790_v2, %v2789_v61 }
 0x25c   : > { %v2521_v9 = vadd.f32 %v11012_v54, %v8907_v4  ;;  %v3001_v10 = vadd.f32 %v11098_v49, %v3000_v5  ;;  %v2512_v11 = vpop.f32.mrb[121].mxu0  ;;  %v8940_v12 = vpop.f32.mrb[10].mxu1  ;;  %v2857_v13 = vpack.c.bf16 %v2788_v7, %v2787_v0 }
 0x25d   : > { %v3489_v14 = vmax.f32 %v3009_v3, 0.0  ;;  %v2513_v15 = vadd.f32 %v11012_v54, %v2512_v11  ;;  %v3012_v16 = vadd.f32 %v8940_v12, %v11098_v49  ;;  %v8908_v17 = vpop.f32.mrb[122].mxu0  ;;  %v3003_v18 = vpop.f32.mrb[11].mxu1  ;;  %9077 = vmatprep.mubr.bf16.mxu0 %v3737_v6 }
 0x25e   : > { %v2665_v20 = vmax.f32 %v2521_v9, 0.0  ;;  %v3487_v21 = vmax.f32 %v3001_v10, 0.0  ;;  %v2524_v22 = vadd.f32 %v11012_v54, %v8908_v17  ;;  %v3004_v23 = vadd.f32 %v11098_v49, %v3003_v18  ;;  %v2515_v24 = vpop.f32.mrb[123].mxu0  ;;  %9045 = vmatprep.mubr.bf16.mxu1 %v2857_v13  ;;  %9078 = vmatmul.mubr.bf16.gmra.mrb[132].mxu0 %v3738_v1 }
 0x25f   : > { %v2663_v25 = vmax.f32 %v2513_v15, 0.0  ;;  %v3490_v26 = vmax.f32 %v3012_v16, 0.0  ;;  %v2516_v27 = vadd.f32 %v11012_v54, %v2515_v24  ;;  %9046 = vmatmul.mubr.bf16.gmra.mrb[116].mxu1 %v2858_v8  ;;  %v3617_v31 = vsel %vm10480_vm5, %v3489_v14, %v3009_v3 }
 0x260   : > { %v2666_v28 = vmax.f32 %v2524_v22, 0.0  ;;  %v3488_v30 = vmax.f32 %v3004_v23, 0.0  ;;  %v3615_v33 = vsel %vm10480_vm5, %v3487_v21, %v3001_v10  ;;  %v2793_v36 = vsel %vm10701_vm7, %v2665_v20, %v2521_v9 }
 0x261   : > { %v2664_v32 = vmax.f32 %v2516_v27, 0.0  ;;  %v3618_v34 = vsel %vm10480_vm5, %v3490_v26, %v3012_v16  ;;  %v2791_v39 = vsel %vm10701_vm7, %v2663_v25, %v2513_v15 }
 0x262   : > { %v8943_v37 = vpop.f32.mrb[12].mxu1  ;;  %v3616_v38 = vsel %vm10480_vm5, %v3488_v30, %v3004_v23  ;;  %v3740_v40 = vpack.c.bf16 %v3618_v34, %v3617_v31  ;;  %v2794_v41 = vsel %vm10701_vm7, %v2666_v28, %v2524_v22 }
 0x263   : > { %v3025_v42 = vadd.f32 %v8943_v37, %v11098_v49  ;;  %v8911_v43 = vpop.f32.mrb[124].mxu0  ;;  %v3016_v44 = vpop.f32.mrb[13].mxu1  ;;  %v3739_v45 = vpack.c.bf16 %v3616_v38, %v3615_v33  ;;  %v2792_v46 = vsel %vm10701_vm7, %v2664_v32, %v2516_v27  ;;  %v2860_v47 = vpack.c.bf16 %v2794_v41, %v2793_v36 }
 0x264   : > { %v2537_v48 = vadd.f32 %v11012_v54, %v8911_v43  ;;  %v3017_v51 = vadd.f32 %v11098_v49, %v3016_v44  ;;  %v2528_v52 = vpop.f32.mrb[125].mxu0  ;;  %v8944_v53 = vpop.f32.mrb[14].mxu1  ;;  %v2859_v55 = vpack.c.bf16 %v2792_v46, %v2791_v39 }
 0x265   : > { %v3493_v56 = vmax.f32 %v3025_v42, 0.0  ;;  %v2529_v57 = vadd.f32 %v11012_v54, %v2528_v52  ;;  %v3028_v58 = vadd.f32 %v8944_v53, %v11098_v49  ;;  %v8912_v19 = vpop.f32.mrb[126].mxu0  ;;  %v3019_v59 = vpop.f32.mrb[15].mxu1  ;;  %9081 = vmatprep.mubr.bf16.mxu0 %v3739_v45 }
 0x266   : > { %v2669_v29 = vmax.f32 %v2537_v48, 0.0  ;;  %v3491_v60 = vmax.f32 %v3017_v51, 0.0  ;;  %v2540_v61 = vadd.f32 %v11012_v54, %v8912_v19  ;;  %v3020_v62 = vadd.f32 %v11098_v49, %v3019_v59  ;;  %v2531_v63 = vpop.f32.mrb[127].mxu0  ;;  %9049 = vmatprep.mubr.bf16.mxu1 %v2859_v55  ;;  %9082 = vmatmul.mubr.bf16.gmra.mrb[136].mxu0 %v3740_v40 }
 0x267   : > { %v2667_v0 = vmax.f32 %v2529_v57, 0.0  ;;  %v3494_v1 = vmax.f32 %v3028_v58, 0.0  ;;  %v2532_v2 = vadd.f32 %v11012_v54, %v2531_v63  ;;  %9050 = vmatmul.mubr.bf16.gmra.mrb[120].mxu1 %v2860_v47  ;;  %v3621_v5 = vsel %vm10480_vm5, %v3493_v56, %v3025_v42  ;;  %v9718_v47 = vld [vmem:[%s12315_s9 + $0x30] sm:$0xff]  }
 0x268   : > { %v2670_v3 = vmax.f32 %v2540_v61, 0.0  ;;  %v3492_v4 = vmax.f32 %v3020_v62, 0.0  ;;  %v3619_v7 = vsel %vm10480_vm5, %v3491_v60, %v3017_v51  ;;  %v2797_v9 = vsel %vm10701_vm7, %v2669_v29, %v2537_v48  ;;  %9213 = vmatprep.subr.bf16.mxu1 %v9718_v47 }
 0x269   : > { %v2668_v6 = vmax.f32 %v2532_v2, 0.0  ;;  %v3622_v8 = vsel %vm10480_vm5, %v3494_v1, %v3028_v58  ;;  %v2795_v11 = vsel %vm10701_vm7, %v2667_v0, %v2529_v57  ;;  %9214 = vmatpush3.bf16.msra.mxu1 %v9718_v47 }
 0x26a   : > { %v8947_v10 = vpop.f32.mrb[16].mxu1  ;;  %v3620_v54 = vsel %vm10480_vm5, %v3492_v4, %v3020_v62  ;;  %v3742_v12 = vpack.c.bf16 %v3622_v8, %v3621_v5  ;;  %v2798_v13 = vsel %vm10701_vm7, %v2670_v3, %v2540_v61 }
 0x26b   : > { %v3041_v14 = vadd.f32 %v8947_v10, %v11098_v49  ;;  %v3032_v15 = vpop.f32.mrb[17].mxu1  ;;  %v3741_v16 = vpack.c.bf16 %v3620_v54, %v3619_v7  ;;  %v2796_v17 = vsel %vm10701_vm7, %v2668_v6, %v2532_v2  ;;  %v2862_v18 = vpack.c.bf16 %v2798_v13, %v2797_v9 }
 0x26c   : > { %v3033_v20 = vadd.f32 %v11098_v49, %v3032_v15  ;;  %v8948_v21 = vpop.f32.mrb[18].mxu1  ;;  %v2861_v22 = vpack.c.bf16 %v2796_v17, %v2795_v11 }
 0x26d   : > { %v3497_v23 = vmax.f32 %v3041_v14, 0.0  ;;  %v3044_v24 = vadd.f32 %v8948_v21, %v11098_v49  ;;  %v3035_v25 = vpop.f32.mrb[19].mxu1  ;;  %9085 = vmatprep.mubr.bf16.mxu0 %v3741_v16 }
 0x26e   : > { %v3495_v26 = vmax.f32 %v3033_v20, 0.0  ;;  %v3036_v27 = vadd.f32 %v11098_v49, %v3035_v25  ;;  %9053 = vmatprep.mubr.bf16.mxu1 %v2861_v22  ;;  %9086 = vmatmul.mubr.bf16.gmra.mrb[140].mxu0 %v3742_v12 }
 0x26f   : > { %v3498_v28 = vmax.f32 %v3044_v24, 0.0  ;;  %9054 = vmatmul.mubr.bf16.gmra.mrb[124].mxu1 %v2862_v18  ;;  %v3625_v50 = vsel %vm10480_vm5, %v3497_v23, %v3041_v14 }
 0x270   : > { %v3496_v30 = vmax.f32 %v3036_v27, 0.0  ;;  %v3623_v33 = vsel %vm10480_vm5, %v3495_v26, %v3033_v20 }
 0x271   : > { %v3626_v31 = vsel %vm10480_vm5, %v3498_v28, %v3044_v24 }
 0x272   : > { %v8951_v32 = vpop.f32.mrb[20].mxu1  ;;  %v3624_v34 = vsel %vm10480_vm5, %v3496_v30, %v3036_v27  ;;  %v3744_v36 = vpack.c.bf16 %v3626_v31, %v3625_v50 }
 0x273   : > { %v3057_v37 = vadd.f32 %v8951_v32, %v11098_v49  ;;  %v3048_v38 = vpop.f32.mrb[21].mxu1  ;;  %v3743_v39 = vpack.c.bf16 %v3624_v34, %v3623_v33 }
 0x274   : > { %v3049_v40 = vadd.f32 %v11098_v49, %v3048_v38  ;;  %v8952_v41 = vpop.f32.mrb[22].mxu1 }
 0x275   : > { %v3501_v42 = vmax.f32 %v3057_v37, 0.0  ;;  %v3060_v43 = vadd.f32 %v8952_v41, %v11098_v49  ;;  %v3051_v44 = vpop.f32.mrb[23].mxu1  ;;  %9089 = vmatprep.mubr.bf16.mxu0 %v3743_v39 }
 0x276   : > { %v3499_v45 = vmax.f32 %v3049_v40, 0.0  ;;  %v3052_v46 = vadd.f32 %v11098_v49, %v3051_v44  ;;  %9090 = vmatmul.mubr.bf16.gmra.mrb[144].mxu0 %v3744_v36 }
 0x277   : > { %v3502_v48 = vmax.f32 %v3060_v43, 0.0  ;;  %v3629_v52 = vsel %vm10480_vm5, %v3501_v42, %v3057_v37  ;;  %v9719_v42 = vld [vmem:[%s12317_s11] sm:$0xff]  }
 0x278   : > { %v3500_v51 = vmax.f32 %v3052_v46, 0.0  ;;  %v3627_v56 = vsel %vm10480_vm5, %v3499_v45, %v3049_v40  ;;  %9345 = vmatprep.subr.bf16.mxu0 %v9719_v42 }
 0x279   : > { %v3630_v53 = vsel %vm10480_vm5, %v3502_v48, %v3060_v43  ;;  %9346 = vmatpush3.bf16.msra.mxu0 %v9719_v42 }
 0x27a   : > { %v8955_v55 = vpop.f32.mrb[24].mxu1  ;;  %v3628_v57 = vsel %vm10480_vm5, %v3500_v51, %v3052_v46  ;;  %v3746_v58 = vpack.c.bf16 %v3630_v53, %v3629_v52 }
 0x27b   : > { %v3073_v19 = vadd.f32 %v8955_v55, %v11098_v49  ;;  %v3064_v59 = vpop.f32.mrb[25].mxu1  ;;  %v3745_v29 = vpack.c.bf16 %v3628_v57, %v3627_v56 }
 0x27c   : > { %v3065_v60 = vadd.f32 %v11098_v49, %v3064_v59  ;;  %v8956_v61 = vpop.f32.mrb[26].mxu1 }
 0x27d   : > { %v3505_v62 = vmax.f32 %v3073_v19, 0.0  ;;  %v3076_v63 = vadd.f32 %v8956_v61, %v11098_v49  ;;  %v3067_v0 = vpop.f32.mrb[27].mxu1  ;;  %9093 = vmatprep.mubr.bf16.mxu0 %v3745_v29 }
 0x27e   : > { %v3503_v1 = vmax.f32 %v3065_v60, 0.0  ;;  %v3068_v2 = vadd.f32 %v11098_v49, %v3067_v0  ;;  %9094 = vmatmul.mubr.bf16.gmra.mrb[148].mxu0 %v3746_v58 }
 0x27f   : > { %v3506_v3 = vmax.f32 %v3076_v63, 0.0  ;;  %v3633_v5 = vsel %vm10480_vm5, %v3505_v62, %v3073_v19 }
 0x280   : > { %v3504_v4 = vmax.f32 %v3068_v2, 0.0  ;;  %v3631_v8 = vsel %vm10480_vm5, %v3503_v1, %v3065_v60  ;;  %v9720_v60 = vld [vmem:[%s12315_s9 + $0x38] sm:$0xff]  }
 0x281   : > { %v3634_v6 = vsel %vm10480_vm5, %v3506_v3, %v3076_v63  ;;  %9215 = vmatprep.subr.bf16.mxu1 %v9720_v60 }
 0x282   : > { %v8959_v7 = vpop.f32.mrb[28].mxu1  ;;  %v3632_v9 = vsel %vm10480_vm5, %v3504_v4, %v3068_v2  ;;  %v3748_v10 = vpack.c.bf16 %v3634_v6, %v3633_v5  ;;  %9216 = vmatpush3.bf16.msra.mxu1 %v9720_v60 }
 0x283   : > { %v3089_v54 = vadd.f32 %v8959_v7, %v11098_v49  ;;  %v3080_v11 = vpop.f32.mrb[29].mxu1  ;;  %v3747_v12 = vpack.c.bf16 %v3632_v9, %v3631_v8 }
 0x284   : > { %v3081_v13 = vadd.f32 %v11098_v49, %v3080_v11  ;;  %v8960_v14 = vpop.f32.mrb[30].mxu1 }
 0x285   : > { %v3509_v15 = vmax.f32 %v3089_v54, 0.0  ;;  %v3092_v16 = vadd.f32 %v8960_v14, %v11098_v49  ;;  %v3083_v17 = vpop.f32.mrb[31].mxu1  ;;  %9097 = vmatprep.mubr.bf16.mxu0 %v3747_v12 }
 0x286   : > { %v3507_v18 = vmax.f32 %v3081_v13, 0.0  ;;  %v3084_v20 = vadd.f32 %v11098_v49, %v3083_v17  ;;  %9098 = vmatmul.mubr.bf16.gmra.mrb[152].mxu0 %v3748_v10 }
 0x287   : > { %v3510_v21 = vmax.f32 %v3092_v16, 0.0  ;;  %v3637_v23 = vsel %vm10480_vm5, %v3509_v15, %v3089_v54 }
 0x288   : > { %v3508_v22 = vmax.f32 %v3084_v20, 0.0  ;;  %v3635_v26 = vsel %vm10480_vm5, %v3507_v18, %v3081_v13 }
 0x289   : > { %v3638_v24 = vsel %vm10480_vm5, %v3510_v21, %v3092_v16 }
 0x28a   : > { %v8963_v25 = vpop.f32.mrb[32].mxu1  ;;  %v3636_v27 = vsel %vm10480_vm5, %v3508_v22, %v3084_v20  ;;  %v3750_v28 = vpack.c.bf16 %v3638_v24, %v3637_v23 }
 0x28b   : > { %v3105_v30 = vadd.f32 %v8963_v25, %v11098_v49  ;;  %v3096_v50 = vpop.f32.mrb[33].mxu1  ;;  %v3749_v31 = vpack.c.bf16 %v3636_v27, %v3635_v26 }
 0x28c   : > { %v3097_v32 = vadd.f32 %v11098_v49, %v3096_v50  ;;  %v8964_v33 = vpop.f32.mrb[34].mxu1 }
 0x28d   : > { %v3513_v34 = vmax.f32 %v3105_v30, 0.0  ;;  %v3108_v36 = vadd.f32 %v8964_v33, %v11098_v49  ;;  %v3099_v37 = vpop.f32.mrb[35].mxu1  ;;  %9101 = vmatprep.mubr.bf16.mxu0 %v3749_v31 }
 0x28e   : > { %v3511_v38 = vmax.f32 %v3097_v32, 0.0  ;;  %v3100_v39 = vadd.f32 %v11098_v49, %v3099_v37  ;;  %9102 = vmatmul.mubr.bf16.gmra.mrb[156].mxu0 %v3750_v28 }
 0x28f   : > { %v3514_v40 = vmax.f32 %v3108_v36, 0.0  ;;  %v3641_v43 = vsel %vm10480_vm5, %v3513_v34, %v3105_v30 }
 0x290   : > { %v3512_v41 = vmax.f32 %v3100_v39, 0.0  ;;  %v3639_v46 = vsel %vm10480_vm5, %v3511_v38, %v3097_v32 }
 0x291   : > { %v3642_v44 = vsel %vm10480_vm5, %v3514_v40, %v3108_v36 }
 0x292   : > { %v8967_v45 = vpop.f32.mrb[36].mxu1  ;;  %v3640_v47 = vsel %vm10480_vm5, %v3512_v41, %v3100_v39  ;;  %v3752_v48 = vpack.c.bf16 %v3642_v44, %v3641_v43 }
 0x293   : > { %v3121_v51 = vadd.f32 %v8967_v45, %v11098_v49  ;;  %v3112_v52 = vpop.f32.mrb[37].mxu1  ;;  %v3751_v53 = vpack.c.bf16 %v3640_v47, %v3639_v46 }
 0x294   : > { %v3113_v55 = vadd.f32 %v11098_v49, %v3112_v52  ;;  %v8968_v56 = vpop.f32.mrb[38].mxu1 }
 0x295   : > { %v3517_v57 = vmax.f32 %v3121_v51, 0.0  ;;  %v3124_v58 = vadd.f32 %v8968_v56, %v11098_v49  ;;  %v3115_v19 = vpop.f32.mrb[39].mxu1  ;;  %9105 = vmatprep.mubr.bf16.mxu0 %v3751_v53 }
 0x296   : > { %v3515_v59 = vmax.f32 %v3113_v55, 0.0  ;;  %v3116_v29 = vadd.f32 %v11098_v49, %v3115_v19  ;;  %9106 = vmatmul.mubr.bf16.gmra.mrb[160].mxu0 %v3752_v48 }
 0x297   : > { %v3518_v61 = vmax.f32 %v3124_v58, 0.0  ;;  %v3645_v63 = vsel %vm10480_vm5, %v3517_v57, %v3121_v51 }
 0x298   : > { %v3516_v62 = vmax.f32 %v3116_v29, 0.0  ;;  %v3643_v2 = vsel %vm10480_vm5, %v3515_v59, %v3113_v55 }
 0x299   : > { %v3646_v0 = vsel %vm10480_vm5, %v3518_v61, %v3124_v58 }
 0x29a   : > { %v8971_v1 = vpop.f32.mrb[40].mxu1  ;;  %v3644_v3 = vsel %vm10480_vm5, %v3516_v62, %v3116_v29  ;;  %v3754_v4 = vpack.c.bf16 %v3646_v0, %v3645_v63 }
 0x29b   : > { %v3137_v5 = vadd.f32 %v8971_v1, %v11098_v49  ;;  %v3128_v6 = vpop.f32.mrb[41].mxu1  ;;  %v3753_v7 = vpack.c.bf16 %v3644_v3, %v3643_v2  ;;  %v9721_v2 = vld [vmem:[%s12317_s11 + $0x8] sm:$0xff]  }
 0x29c   : > { %v3129_v8 = vadd.f32 %v11098_v49, %v3128_v6  ;;  %v8972_v9 = vpop.f32.mrb[42].mxu1  ;;  %9347 = vmatprep.subr.bf16.mxu0 %v9721_v2 }
 0x29d   : > { %v3521_v10 = vmax.f32 %v3137_v5, 0.0  ;;  %v3140_v54 = vadd.f32 %v8972_v9, %v11098_v49  ;;  %v3131_v11 = vpop.f32.mrb[43].mxu1  ;;  %9109 = vmatprep.mubr.bf16.mxu0 %v3753_v7  ;;  %9348 = vmatpush3.bf16.msra.mxu0 %v9721_v2 }
 0x29e   : > { %v3519_v12 = vmax.f32 %v3129_v8, 0.0  ;;  %v3132_v13 = vadd.f32 %v11098_v49, %v3131_v11  ;;  %9110 = vmatmul.mubr.bf16.gmra.mrb[164].mxu0 %v3754_v4 }
 0x29f   : > { %v3522_v14 = vmax.f32 %v3140_v54, 0.0  ;;  %v3649_v16 = vsel %vm10480_vm5, %v3521_v10, %v3137_v5 }
 0x2a0   : > { %v3520_v15 = vmax.f32 %v3132_v13, 0.0  ;;  %v3647_v20 = vsel %vm10480_vm5, %v3519_v12, %v3129_v8 }
 0x2a1   : > { %v3650_v17 = vsel %vm10480_vm5, %v3522_v14, %v3140_v54 }
 0x2a2   : > { %v8975_v18 = vpop.f32.mrb[44].mxu1  ;;  %v3648_v21 = vsel %vm10480_vm5, %v3520_v15, %v3132_v13  ;;  %v3756_v22 = vpack.c.bf16 %v3650_v17, %v3649_v16 }
 0x2a3   : > { %v3153_v23 = vadd.f32 %v8975_v18, %v11098_v49  ;;  %v3144_v24 = vpop.f32.mrb[45].mxu1  ;;  %v3755_v25 = vpack.c.bf16 %v3648_v21, %v3647_v20 }
 0x2a4   : > { %v3145_v26 = vadd.f32 %v11098_v49, %v3144_v24  ;;  %v8976_v27 = vpop.f32.mrb[46].mxu1 }
 0x2a5   : > { %v3525_v28 = vmax.f32 %v3153_v23, 0.0  ;;  %v3156_v30 = vadd.f32 %v8976_v27, %v11098_v49  ;;  %v3147_v50 = vpop.f32.mrb[47].mxu1  ;;  %9113 = vmatprep.mubr.bf16.mxu0 %v3755_v25 }
 0x2a6   : > { %v3523_v31 = vmax.f32 %v3145_v26, 0.0  ;;  %v3148_v32 = vadd.f32 %v11098_v49, %v3147_v50  ;;  %9114 = vmatmul.mubr.bf16.gmra.mrb[168].mxu0 %v3756_v22 }
 0x2a7   : > { %v3526_v33 = vmax.f32 %v3156_v30, 0.0  ;;  %v3653_v36 = vsel %vm10480_vm5, %v3525_v28, %v3153_v23 }
 0x2a8   : > { %v3524_v34 = vmax.f32 %v3148_v32, 0.0  ;;  %v3651_v39 = vsel %vm10480_vm5, %v3523_v31, %v3145_v26 }
 0x2a9   : > { %v3654_v37 = vsel %vm10480_vm5, %v3526_v33, %v3156_v30 }
 0x2aa   : > { %v8979_v38 = vpop.f32.mrb[48].mxu1  ;;  %v3652_v40 = vsel %vm10480_vm5, %v3524_v34, %v3148_v32  ;;  %v3758_v41 = vpack.c.bf16 %v3654_v37, %v3653_v36 }
 0x2ab   : > { %v3169_v42 = vadd.f32 %v8979_v38, %v11098_v49  ;;  %v3160_v43 = vpop.f32.mrb[49].mxu1  ;;  %v3757_v44 = vpack.c.bf16 %v3652_v40, %v3651_v39 }
 0x2ac   : > { %v3161_v45 = vadd.f32 %v11098_v49, %v3160_v43  ;;  %v8980_v46 = vpop.f32.mrb[50].mxu1 }
 0x2ad   : > { %v3529_v47 = vmax.f32 %v3169_v42, 0.0  ;;  %v3172_v48 = vadd.f32 %v8980_v46, %v11098_v49  ;;  %v3163_v51 = vpop.f32.mrb[51].mxu1  ;;  %9117 = vmatprep.mubr.bf16.mxu0 %v3757_v44 }
 0x2ae   : > { %v3527_v52 = vmax.f32 %v3161_v45, 0.0  ;;  %v3164_v53 = vadd.f32 %v11098_v49, %v3163_v51  ;;  %9118 = vmatmul.mubr.bf16.gmra.mrb[172].mxu0 %v3758_v41 }
 0x2af   : > { %v3530_v55 = vmax.f32 %v3172_v48, 0.0  ;;  %v3657_v57 = vsel %vm10480_vm5, %v3529_v47, %v3169_v42 }
 0x2b0   : > { %v3528_v56 = vmax.f32 %v3164_v53, 0.0  ;;  %v3655_v59 = vsel %vm10480_vm5, %v3527_v52, %v3161_v45 }
 0x2b1   : > { %v3658_v58 = vsel %vm10480_vm5, %v3530_v55, %v3172_v48 }
 0x2b2   : > { %v8983_v19 = vpop.f32.mrb[52].mxu1  ;;  %v3656_v29 = vsel %vm10480_vm5, %v3528_v56, %v3164_v53  ;;  %v3760_v60 = vpack.c.bf16 %v3658_v58, %v3657_v57 }
 0x2b3   : > { %v3185_v61 = vadd.f32 %v8983_v19, %v11098_v49  ;;  %v3176_v62 = vpop.f32.mrb[53].mxu1  ;;  %v3759_v63 = vpack.c.bf16 %v3656_v29, %v3655_v59 }
 0x2b4   : > { %v3177_v0 = vadd.f32 %v11098_v49, %v3176_v62  ;;  %v8984_v1 = vpop.f32.mrb[54].mxu1 }
 0x2b5   : > { %v3533_v3 = vmax.f32 %v3185_v61, 0.0  ;;  %v3188_v4 = vadd.f32 %v8984_v1, %v11098_v49  ;;  %v3179_v5 = vpop.f32.mrb[55].mxu1  ;;  %9121 = vmatprep.mubr.bf16.mxu0 %v3759_v63 }
 0x2b6   : > { %v3531_v6 = vmax.f32 %v3177_v0, 0.0  ;;  %v3180_v7 = vadd.f32 %v11098_v49, %v3179_v5  ;;  %9122 = vmatmul.mubr.bf16.gmra.mrb[176].mxu0 %v3760_v60 }
 0x2b7   : > { %v3534_v8 = vmax.f32 %v3188_v4, 0.0  ;;  %v3661_v10 = vsel %vm10480_vm5, %v3533_v3, %v3185_v61 }
 0x2b8   : > { %v3532_v9 = vmax.f32 %v3180_v7, 0.0  ;;  %v3659_v12 = vsel %vm10480_vm5, %v3531_v6, %v3177_v0 }
 0x2b9   : > { %v3662_v54 = vsel %vm10480_vm5, %v3534_v8, %v3188_v4 }
 0x2ba   : > { %v8987_v11 = vpop.f32.mrb[56].mxu1  ;;  %v3660_v13 = vsel %vm10480_vm5, %v3532_v9, %v3180_v7  ;;  %v3762_v14 = vpack.c.bf16 %v3662_v54, %v3661_v10 }
 0x2bb   : > { %v3201_v15 = vadd.f32 %v8987_v11, %v11098_v49  ;;  %v3192_v16 = vpop.f32.mrb[57].mxu1  ;;  %v3761_v17 = vpack.c.bf16 %v3660_v13, %v3659_v12  ;;  %v9722_v12 = vld [vmem:[%s12317_s11 + $0x10] sm:$0xff]  }
 0x2bc   : > { %v3193_v18 = vadd.f32 %v11098_v49, %v3192_v16  ;;  %v8988_v20 = vpop.f32.mrb[58].mxu1  ;;  %9349 = vmatprep.subr.bf16.mxu0 %v9722_v12 }
 0x2bd   : > { %v3537_v21 = vmax.f32 %v3201_v15, 0.0  ;;  %v3204_v22 = vadd.f32 %v8988_v20, %v11098_v49  ;;  %v3195_v23 = vpop.f32.mrb[59].mxu1  ;;  %9125 = vmatprep.mubr.bf16.mxu0 %v3761_v17  ;;  %9350 = vmatpush3.bf16.msra.mxu0 %v9722_v12 }
 0x2be   : > { %v3535_v24 = vmax.f32 %v3193_v18, 0.0  ;;  %v3196_v25 = vadd.f32 %v11098_v49, %v3195_v23  ;;  %9126 = vmatmul.mubr.bf16.gmra.mrb[180].mxu0 %v3762_v14 }
 0x2bf   : > { %v3538_v26 = vmax.f32 %v3204_v22, 0.0  ;;  %v3665_v28 = vsel %vm10480_vm5, %v3537_v21, %v3201_v15 }
 0x2c0   : > { %v3536_v27 = vmax.f32 %v3196_v25, 0.0  ;;  %v3663_v31 = vsel %vm10480_vm5, %v3535_v24, %v3193_v18 }
 0x2c1   : > { %v3666_v30 = vsel %vm10480_vm5, %v3538_v26, %v3204_v22 }
 0x2c2   : > { %v8991_v50 = vpop.f32.mrb[60].mxu1  ;;  %v3664_v32 = vsel %vm10480_vm5, %v3536_v27, %v3196_v25  ;;  %v3764_v33 = vpack.c.bf16 %v3666_v30, %v3665_v28 }
 0x2c3   : > { %v3217_v34 = vadd.f32 %v8991_v50, %v11098_v49  ;;  %v3208_v36 = vpop.f32.mrb[61].mxu1  ;;  %v3763_v37 = vpack.c.bf16 %v3664_v32, %v3663_v31 }
 0x2c4   : > { %v3209_v38 = vadd.f32 %v11098_v49, %v3208_v36  ;;  %v8992_v39 = vpop.f32.mrb[62].mxu1 }
 0x2c5   : > { %v3541_v40 = vmax.f32 %v3217_v34, 0.0  ;;  %v3220_v41 = vadd.f32 %v8992_v39, %v11098_v49  ;;  %v3211_v42 = vpop.f32.mrb[63].mxu1  ;;  %9129 = vmatprep.mubr.bf16.mxu0 %v3763_v37 }
 0x2c6   : > { %v3539_v43 = vmax.f32 %v3209_v38, 0.0  ;;  %v3212_v44 = vadd.f32 %v11098_v49, %v3211_v42  ;;  %9130 = vmatmul.mubr.bf16.gmra.mrb[184].mxu0 %v3764_v33 }
 0x2c7   : > { %v3542_v45 = vmax.f32 %v3220_v41, 0.0  ;;  %v3669_v47 = vsel %vm10480_vm5, %v3541_v40, %v3217_v34 }
 0x2c8   : > { %v3540_v46 = vmax.f32 %v3212_v44, 0.0  ;;  %v3667_v52 = vsel %vm10480_vm5, %v3539_v43, %v3209_v38 }
 0x2c9   : > { %v3670_v48 = vsel %vm10480_vm5, %v3542_v45, %v3220_v41 }
 0x2ca   : > { %v8995_v51 = vpop.f32.mrb[64].mxu1  ;;  %v3668_v53 = vsel %vm10480_vm5, %v3540_v46, %v3212_v44  ;;  %v3766_v55 = vpack.c.bf16 %v3670_v48, %v3669_v47 }
 0x2cb   : > { %v3233_v56 = vadd.f32 %v8995_v51, %v11098_v49  ;;  %v3224_v57 = vpop.f32.mrb[65].mxu1  ;;  %v3765_v58 = vpack.c.bf16 %v3668_v53, %v3667_v52 }
 0x2cc   : > { %v3225_v19 = vadd.f32 %v11098_v49, %v3224_v57  ;;  %v8996_v59 = vpop.f32.mrb[66].mxu1 }
 0x2cd   : > { %v3545_v29 = vmax.f32 %v3233_v56, 0.0  ;;  %v3236_v60 = vadd.f32 %v8996_v59, %v11098_v49  ;;  %v3227_v61 = vpop.f32.mrb[67].mxu1  ;;  %9133 = vmatprep.mubr.bf16.mxu0 %v3765_v58 }
 0x2ce   : > { %v3543_v62 = vmax.f32 %v3225_v19, 0.0  ;;  %v3228_v63 = vadd.f32 %v11098_v49, %v3227_v61  ;;  %9134 = vmatmul.mubr.bf16.gmra.mrb[188].mxu0 %v3766_v55 }
 0x2cf   : > { %v3546_v0 = vmax.f32 %v3236_v60, 0.0  ;;  %v3673_v2 = vsel %vm10480_vm5, %v3545_v29, %v3233_v56 }
 0x2d0   : > { %v3544_v1 = vmax.f32 %v3228_v63, 0.0  ;;  %v3671_v5 = vsel %vm10480_vm5, %v3543_v62, %v3225_v19 }
 0x2d1   : > { %v3674_v3 = vsel %vm10480_vm5, %v3546_v0, %v3236_v60 }
 0x2d2   : > { %v8999_v4 = vpop.f32.mrb[68].mxu1  ;;  %v3672_v6 = vsel %vm10480_vm5, %v3544_v1, %v3228_v63  ;;  %v3768_v7 = vpack.c.bf16 %v3674_v3, %v3673_v2 }
 0x2d3   : > { %v3249_v8 = vadd.f32 %v8999_v4, %v11098_v49  ;;  %v3240_v9 = vpop.f32.mrb[69].mxu1  ;;  %v3767_v10 = vpack.c.bf16 %v3672_v6, %v3671_v5 }
 0x2d4   : > { %v3241_v54 = vadd.f32 %v11098_v49, %v3240_v9  ;;  %v9000_v11 = vpop.f32.mrb[70].mxu1 }
 0x2d5   : > { %v3549_v13 = vmax.f32 %v3249_v8, 0.0  ;;  %v3252_v14 = vadd.f32 %v9000_v11, %v11098_v49  ;;  %v3243_v15 = vpop.f32.mrb[71].mxu1  ;;  %9137 = vmatprep.mubr.bf16.mxu0 %v3767_v10 }
 0x2d6   : > { %v3547_v16 = vmax.f32 %v3241_v54, 0.0  ;;  %v3244_v17 = vadd.f32 %v11098_v49, %v3243_v15  ;;  %9138 = vmatmul.mubr.bf16.gmra.mrb[192].mxu0 %v3768_v7  ;;  %v11419_v7 = vld [vmem:[%s12312_s6] ss:$0 sm:$0xff] }
 0x2d7   : > { %v3550_v18 = vmax.f32 %v3252_v14, 0.0  ;;  %v3677_v21 = vsel %vm10480_vm5, %v3549_v13, %v3249_v8 }
 0x2d8   : > { %v3548_v20 = vmax.f32 %v3244_v17, 0.0  ;;  %v3675_v24 = vsel %vm10480_vm5, %v3547_v16, %v3241_v54 }
 0x2d9   : > { %v3678_v22 = vsel %vm10480_vm5, %v3550_v18, %v3252_v14 }
 0x2da   : > { %v9003_v23 = vpop.f32.mrb[72].mxu1  ;;  %v3676_v25 = vsel %vm10480_vm5, %v3548_v20, %v3244_v17  ;;  %v3770_v26 = vpack.c.bf16 %v3678_v22, %v3677_v21 }
 0x2db   : > { %v3265_v27 = vadd.f32 %v9003_v23, %v11098_v49  ;;  %v3256_v28 = vpop.f32.mrb[73].mxu1  ;;  %v3769_v30 = vpack.c.bf16 %v3676_v25, %v3675_v24  ;;  %v9723_v24 = vld [vmem:[%s12317_s11 + $0x18] sm:$0xff]  }
 0x2dc   : > { %v3257_v50 = vadd.f32 %v11098_v49, %v3256_v28  ;;  %v9004_v31 = vpop.f32.mrb[74].mxu1  ;;  %9351 = vmatprep.subr.bf16.mxu0 %v9723_v24 }
 0x2dd   : > { %v3553_v32 = vmax.f32 %v3265_v27, 0.0  ;;  %v3268_v33 = vadd.f32 %v9004_v31, %v11098_v49  ;;  %v3259_v34 = vpop.f32.mrb[75].mxu1  ;;  %9141 = vmatprep.mubr.bf16.mxu0 %v3769_v30  ;;  %9352 = vmatpush3.bf16.msra.mxu0 %v9723_v24 }
 0x2de   : > { %v3551_v36 = vmax.f32 %v3257_v50, 0.0  ;;  %v3260_v37 = vadd.f32 %v11098_v49, %v3259_v34  ;;  %9142 = vmatmul.mubr.bf16.gmra.mrb[196].mxu0 %v3770_v26 }
 0x2df   : > { %v3554_v38 = vmax.f32 %v3268_v33, 0.0  ;;  %v3681_v40 = vsel %vm10480_vm5, %v3553_v32, %v3265_v27 }
 0x2e0   : > { %v3552_v39 = vmax.f32 %v3260_v37, 0.0  ;;  %v3679_v43 = vsel %vm10480_vm5, %v3551_v36, %v3257_v50 }
 0x2e1   : > { %v3682_v41 = vsel %vm10480_vm5, %v3554_v38, %v3268_v33 }
 0x2e2   : > { %v9007_v42 = vpop.f32.mrb[76].mxu1  ;;  %v3680_v44 = vsel %vm10480_vm5, %v3552_v39, %v3260_v37  ;;  %v3772_v45 = vpack.c.bf16 %v3682_v41, %v3681_v40 }
 0x2e3   : > { %v3281_v46 = vadd.f32 %v9007_v42, %v11098_v49  ;;  %v3272_v47 = vpop.f32.mrb[77].mxu1  ;;  %v3771_v48 = vpack.c.bf16 %v3680_v44, %v3679_v43 }
 0x2e4   : > { %v3273_v51 = vadd.f32 %v11098_v49, %v3272_v47  ;;  %v9008_v52 = vpop.f32.mrb[78].mxu1 }
 0x2e5   : > { %v3557_v53 = vmax.f32 %v3281_v46, 0.0  ;;  %v3284_v55 = vadd.f32 %v9008_v52, %v11098_v49  ;;  %v3275_v56 = vpop.f32.mrb[79].mxu1  ;;  %9145 = vmatprep.mubr.bf16.mxu0 %v3771_v48 }
 0x2e6   : > { %v3555_v57 = vmax.f32 %v3273_v51, 0.0  ;;  %v3276_v58 = vadd.f32 %v11098_v49, %v3275_v56  ;;  %9146 = vmatmul.mubr.bf16.gmra.mrb[200].mxu0 %v3772_v45 }
 0x2e7   : > { %v3558_v19 = vmax.f32 %v3284_v55, 0.0  ;;  %v3685_v29 = vsel %vm10480_vm5, %v3557_v53, %v3281_v46 }
 0x2e8   : > { %v3556_v59 = vmax.f32 %v3276_v58, 0.0  ;;  %v3683_v62 = vsel %vm10480_vm5, %v3555_v57, %v3273_v51 }
 0x2e9   : > { %v3686_v60 = vsel %vm10480_vm5, %v3558_v19, %v3284_v55 }
 0x2ea   : > { %v9011_v61 = vpop.f32.mrb[80].mxu1  ;;  %v3684_v63 = vsel %vm10480_vm5, %v3556_v59, %v3276_v58  ;;  %v3774_v0 = vpack.c.bf16 %v3686_v60, %v3685_v29 }
 0x2eb   : > { %v3297_v1 = vadd.f32 %v9011_v61, %v11098_v49  ;;  %v3288_v2 = vpop.f32.mrb[81].mxu1  ;;  %v3773_v3 = vpack.c.bf16 %v3684_v63, %v3683_v62 }
 0x2ec   : > { %v3289_v4 = vadd.f32 %v11098_v49, %v3288_v2  ;;  %v9012_v5 = vpop.f32.mrb[82].mxu1 }
 0x2ed   : > { %v3561_v6 = vmax.f32 %v3297_v1, 0.0  ;;  %v3300_v8 = vadd.f32 %v11419_v7, %v9012_v5  ;;  %v3291_v9 = vpop.f32.mrb[83].mxu1  ;;  %9149 = vmatprep.mubr.bf16.mxu0 %v3773_v3 }
 0x2ee   : > { %v3559_v10 = vmax.f32 %v3289_v4, 0.0  ;;  %v3292_v54 = vadd.f32 %v11419_v7, %v3291_v9  ;;  %9150 = vmatmul.mubr.bf16.gmra.mrb[204].mxu0 %v3774_v0 }
 0x2ef   : > { %v3562_v11 = vmax.f32 %v3300_v8, 0.0  ;;  %v3689_v49 = vsel %vm10480_vm5, %v3561_v6, %v3297_v1 }
 0x2f0   : > { %v3560_v12 = vmax.f32 %v3292_v54, 0.0  ;;  %v3687_v15 = vsel %vm10480_vm5, %v3559_v10, %v3289_v4 }
 0x2f1   : > { %v3690_v13 = vsel %vm10480_vm5, %v3562_v11, %v3300_v8 }
 0x2f2   : > { %v9015_v14 = vpop.f32.mrb[84].mxu1  ;;  %v3688_v16 = vsel %vm10480_vm5, %v3560_v12, %v3292_v54  ;;  %v3776_v17 = vpack.c.bf16 %v3690_v13, %v3689_v49 }
 0x2f3   : > { %v3313_v18 = vadd.f32 %v11419_v7, %v9015_v14  ;;  %v3304_v20 = vpop.f32.mrb[85].mxu1  ;;  %v3775_v21 = vpack.c.bf16 %v3688_v16, %v3687_v15 }
 0x2f4   : > { %v3305_v22 = vadd.f32 %v11419_v7, %v3304_v20  ;;  %v9016_v23 = vpop.f32.mrb[86].mxu1 }
 0x2f5   : > { %v3565_v25 = vmax.f32 %v3313_v18, 0.0  ;;  %v3316_v26 = vadd.f32 %v11419_v7, %v9016_v23  ;;  %v3307_v27 = vpop.f32.mrb[87].mxu1  ;;  %9153 = vmatprep.mubr.bf16.mxu0 %v3775_v21 }
 0x2f6   : > { %v3563_v28 = vmax.f32 %v3305_v22, 0.0  ;;  %v3308_v30 = vadd.f32 %v11419_v7, %v3307_v27  ;;  %9154 = vmatmul.mubr.bf16.gmra.mrb[208].mxu0 %v3776_v17 }
 0x2f7   : > { %v3566_v50 = vmax.f32 %v3316_v26, 0.0  ;;  %v3693_v32 = vsel %vm10480_vm5, %v3565_v25, %v3313_v18 }
 0x2f8   : > { %v3564_v31 = vmax.f32 %v3308_v30, 0.0  ;;  %v3691_v36 = vsel %vm10480_vm5, %v3563_v28, %v3305_v22 }
 0x2f9   : > { %v3694_v33 = vsel %vm10480_vm5, %v3566_v50, %v3316_v26 }
 0x2fa   : > { %v9019_v34 = vpop.f32.mrb[88].mxu1  ;;  %v3692_v37 = vsel %vm10480_vm5, %v3564_v31, %v3308_v30  ;;  %v3778_v38 = vpack.c.bf16 %v3694_v33, %v3693_v32 }
 0x2fb   : > { %v3329_v39 = vadd.f32 %v11419_v7, %v9019_v34  ;;  %v3320_v40 = vpop.f32.mrb[89].mxu1  ;;  %v3777_v41 = vpack.c.bf16 %v3692_v37, %v3691_v36  ;;  %v9724_v36 = vld [vmem:[%s12317_s11 + $0x20] sm:$0xff]  }
 0x2fc   : > { %v3321_v42 = vadd.f32 %v11419_v7, %v3320_v40  ;;  %v9020_v43 = vpop.f32.mrb[90].mxu1  ;;  %9353 = vmatprep.subr.bf16.mxu0 %v9724_v36 }
 0x2fd   : > { %v3569_v44 = vmax.f32 %v3329_v39, 0.0  ;;  %v3332_v45 = vadd.f32 %v11419_v7, %v9020_v43  ;;  %v3323_v46 = vpop.f32.mrb[91].mxu1  ;;  %9157 = vmatprep.mubr.bf16.mxu0 %v3777_v41  ;;  %9354 = vmatpush3.bf16.msra.mxu0 %v9724_v36 }
 0x2fe   : > { %v3567_v47 = vmax.f32 %v3321_v42, 0.0  ;;  %v3324_v48 = vadd.f32 %v11419_v7, %v3323_v46  ;;  %9158 = vmatmul.mubr.bf16.gmra.mrb[212].mxu0 %v3778_v38 }
 0x2ff   : > { %v3570_v51 = vmax.f32 %v3332_v45, 0.0  ;;  %v3697_v53 = vsel %vm10480_vm5, %v3569_v44, %v3329_v39 }
 0x300   : > { %v3568_v52 = vmax.f32 %v3324_v48, 0.0  ;;  %v3695_v57 = vsel %vm10480_vm5, %v3567_v47, %v3321_v42 }
 0x301   : > { %v3698_v55 = vsel %vm10480_vm5, %v3570_v51, %v3332_v45 }
 0x302   : > { %v9023_v56 = vpop.f32.mrb[92].mxu1  ;;  %v3696_v58 = vsel %vm10480_vm5, %v3568_v52, %v3324_v48  ;;  %v3780_v19 = vpack.c.bf16 %v3698_v55, %v3697_v53 }
 0x303   : > { %v3345_v59 = vadd.f32 %v11419_v7, %v9023_v56  ;;  %v3336_v29 = vpop.f32.mrb[93].mxu1  ;;  %v3779_v60 = vpack.c.bf16 %v3696_v58, %v3695_v57 }
 0x304   : > { %v3337_v61 = vadd.f32 %v11419_v7, %v3336_v29  ;;  %v9024_v62 = vpop.f32.mrb[94].mxu1 }
 0x305   : > { %v3573_v63 = vmax.f32 %v3345_v59, 0.0  ;;  %v3348_v0 = vadd.f32 %v11419_v7, %v9024_v62  ;;  %v3339_v1 = vpop.f32.mrb[95].mxu1  ;;  %9161 = vmatprep.mubr.bf16.mxu0 %v3779_v60 }
 0x306   : > { %v3571_v2 = vmax.f32 %v3337_v61, 0.0  ;;  %v3340_v3 = vadd.f32 %v11419_v7, %v3339_v1  ;;  %9162 = vmatmul.mubr.bf16.gmra.mrb[216].mxu0 %v3780_v19 }
 0x307   : > { %v3574_v4 = vmax.f32 %v3348_v0, 0.0  ;;  %v3701_v6 = vsel %vm10480_vm5, %v3573_v63, %v3345_v59 }
 0x308   : > { %v3572_v5 = vmax.f32 %v3340_v3, 0.0  ;;  %v3699_v10 = vsel %vm10480_vm5, %v3571_v2, %v3337_v61 }
 0x309   : > { %v3702_v8 = vsel %vm10480_vm5, %v3574_v4, %v3348_v0 }
 0x30a   : > { %v9027_v9 = vpop.f32.mrb[96].mxu1  ;;  %v3700_v54 = vsel %vm10480_vm5, %v3572_v5, %v3340_v3  ;;  %v3782_v11 = vpack.c.bf16 %v3702_v8, %v3701_v6 }
 0x30b   : > { %v3361_v12 = vadd.f32 %v11419_v7, %v9027_v9  ;;  %v3352_v49 = vpop.f32.mrb[97].mxu1  ;;  %v3781_v13 = vpack.c.bf16 %v3700_v54, %v3699_v10 }
 0x30c   : > { %v3353_v14 = vadd.f32 %v11419_v7, %v3352_v49  ;;  %v9028_v15 = vpop.f32.mrb[98].mxu1 }
 0x30d   : > { %v3577_v16 = vmax.f32 %v3361_v12, 0.0  ;;  %v3364_v17 = vadd.f32 %v11419_v7, %v9028_v15  ;;  %v3355_v18 = vpop.f32.mrb[99].mxu1  ;;  %9165 = vmatprep.mubr.bf16.mxu0 %v3781_v13  ;;  %v11516_v15 = vld [vmem:[%s12314_s8] ss:$0 sm:$0xff] }
 0x30e   : > { %v3575_v20 = vmax.f32 %v3353_v14, 0.0  ;;  %v3356_v21 = vadd.f32 %v11419_v7, %v3355_v18  ;;  %9166 = vmatmul.mubr.bf16.gmra.mrb[220].mxu0 %v3782_v11 }
 0x30f   : > { %v3578_v22 = vmax.f32 %v3364_v17, 0.0  ;;  %v3705_v24 = vsel %vm10480_vm5, %v3577_v16, %v3361_v12 }
 0x310   : > { %v3576_v23 = vmax.f32 %v3356_v21, 0.0  ;;  %v3703_v27 = vsel %vm10480_vm5, %v3575_v20, %v3353_v14 }
 0x311   : > { %v3706_v25 = vsel %vm10480_vm5, %v3578_v22, %v3364_v17 }
 0x312   : > { %v9031_v26 = vpop.f32.mrb[100].mxu1  ;;  %v3704_v28 = vsel %vm10480_vm5, %v3576_v23, %v3356_v21  ;;  %v3784_v30 = vpack.c.bf16 %v3706_v25, %v3705_v24 }
 0x313   : > { %v3377_v50 = vadd.f32 %v11419_v7, %v9031_v26  ;;  %v3368_v31 = vpop.f32.mrb[101].mxu1  ;;  %v3783_v32 = vpack.c.bf16 %v3704_v28, %v3703_v27 }
 0x314   : > { %v3369_v33 = vadd.f32 %v11419_v7, %v3368_v31  ;;  %v9032_v34 = vpop.f32.mrb[102].mxu1 }
 0x315   : > { %v3581_v37 = vmax.f32 %v3377_v50, 0.0  ;;  %v3380_v38 = vadd.f32 %v11419_v7, %v9032_v34  ;;  %v3371_v39 = vpop.f32.mrb[103].mxu1  ;;  %9169 = vmatprep.mubr.bf16.mxu0 %v3783_v32 }
 0x316   : > { %v3579_v40 = vmax.f32 %v3369_v33, 0.0  ;;  %v3372_v41 = vadd.f32 %v11419_v7, %v3371_v39  ;;  %9170 = vmatmul.mubr.bf16.gmra.mrb[224].mxu0 %v3784_v30 }
 0x317   : > { %v3582_v42 = vmax.f32 %v3380_v38, 0.0  ;;  %v3709_v44 = vsel %vm10480_vm5, %v3581_v37, %v3377_v50 }
 0x318   : > { %v3580_v43 = vmax.f32 %v3372_v41, 0.0  ;;  %v3707_v47 = vsel %vm10480_vm5, %v3579_v40, %v3369_v33 }
 0x319   : > { %v3710_v45 = vsel %vm10480_vm5, %v3582_v42, %v3380_v38 }
 0x31a   : > { %v9035_v46 = vpop.f32.mrb[104].mxu1  ;;  %v3708_v48 = vsel %vm10480_vm5, %v3580_v43, %v3372_v41  ;;  %v3786_v51 = vpack.c.bf16 %v3710_v45, %v3709_v44 }
 0x31b   : > { %v3393_v52 = vadd.f32 %v11419_v7, %v9035_v46  ;;  %v3384_v53 = vpop.f32.mrb[105].mxu1  ;;  %v3785_v55 = vpack.c.bf16 %v3708_v48, %v3707_v47 }
 0x31c   : > { %v3385_v56 = vadd.f32 %v11419_v7, %v3384_v53  ;;  %v9036_v57 = vpop.f32.mrb[106].mxu1 }
 0x31d   : > { %v3585_v58 = vmax.f32 %v3393_v52, 0.0  ;;  %v3396_v19 = vadd.f32 %v11419_v7, %v9036_v57  ;;  %v3387_v59 = vpop.f32.mrb[107].mxu1  ;;  %9173 = vmatprep.mubr.bf16.mxu0 %v3785_v55 }
 0x31e   : > { %v3583_v29 = vmax.f32 %v3385_v56, 0.0  ;;  %v3388_v60 = vadd.f32 %v11419_v7, %v3387_v59  ;;  %9174 = vmatmul.mubr.bf16.gmra.mrb[228].mxu0 %v3786_v51 }
 0x31f   : > { %v3586_v61 = vmax.f32 %v3396_v19, 0.0  ;;  %v3713_v63 = vsel %vm10480_vm5, %v3585_v58, %v3393_v52 }
 0x320   : > { %v3584_v62 = vmax.f32 %v3388_v60, 0.0  ;;  %v3711_v2 = vsel %vm10480_vm5, %v3583_v29, %v3385_v56 }
 0x321   : > { %v3714_v0 = vsel %vm10480_vm5, %v3586_v61, %v3396_v19 }
 0x322   : > { %v9039_v1 = vpop.f32.mrb[108].mxu1  ;;  %v3712_v3 = vsel %vm10480_vm5, %v3584_v62, %v3388_v60  ;;  %v3788_v4 = vpack.c.bf16 %v3714_v0, %v3713_v63 }
 0x323   : > { %v3409_v5 = vadd.f32 %v11419_v7, %v9039_v1  ;;  %v3400_v6 = vpop.f32.mrb[109].mxu1  ;;  %v3787_v8 = vpack.c.bf16 %v3712_v3, %v3711_v2 }
 0x324   : > { %v3401_v9 = vadd.f32 %v11419_v7, %v3400_v6  ;;  %v9040_v10 = vpop.f32.mrb[110].mxu1  ;;  %v9725_v6 = vld [vmem:[%s12317_s11 + $0x28] sm:$0xff]  }
 0x325   : > { %v3589_v54 = vmax.f32 %v3409_v5, 0.0  ;;  %v3412_v11 = vadd.f32 %v11419_v7, %v9040_v10  ;;  %v3403_v12 = vpop.f32.mrb[111].mxu1  ;;  %9177 = vmatprep.mubr.bf16.mxu0 %v3787_v8  ;;  %9355 = vmatprep.subr.bf16.mxu0 %v9725_v6 }
 0x326   : > { %v3587_v49 = vmax.f32 %v3401_v9, 0.0  ;;  %v3404_v13 = vadd.f32 %v11419_v7, %v3403_v12  ;;  %9178 = vmatmul.mubr.bf16.gmra.mrb[232].mxu0 %v3788_v4 }
 0x327   : > { %v3590_v14 = vmax.f32 %v3412_v11, 0.0  ;;  %v3717_v18 = vsel %vm10480_vm5, %v3589_v54, %v3409_v5  ;;  %9356 = vmatpush3.bf16.msra.mxu0 %v9725_v6 }
 0x328   : > { %v3588_v16 = vmax.f32 %v3404_v13, 0.0  ;;  %v3715_v24 = vsel %vm10480_vm5, %v3587_v49, %v3401_v9 }
 0x329   : > { %v9075_v17 = vpop.f32.mrb[128].mxu0  ;;  %v3718_v20 = vsel %vm10480_vm5, %v3590_v14, %v3412_v11 }
 0x32a   : > { %v3913_v21 = vadd.f32 %v9075_v17, %v11516_v15  ;;  %v9043_v22 = vpop.f32.mrb[112].mxu1  ;;  %v3904_v23 = vpop.f32.mrb[129].mxu0  ;;  %v3716_v25 = vsel %vm10480_vm5, %v3588_v16, %v3404_v13  ;;  %v3790_v26 = vpack.c.bf16 %v3718_v20, %v3717_v18 }
 0x32b   : > { %v3425_v27 = vadd.f32 %v11419_v7, %v9043_v22  ;;  %v3905_v28 = vadd.f32 %v11516_v15, %v3904_v23  ;;  %v3416_v30 = vpop.f32.mrb[113].mxu1  ;;  %v9076_v50 = vpop.f32.mrb[130].mxu0  ;;  %v3789_v31 = vpack.c.bf16 %v3716_v25, %v3715_v24 }
 0x32c   : > { %v3417_v32 = vadd.f32 %v11419_v7, %v3416_v30  ;;  %v3916_v33 = vadd.f32 %v9076_v50, %v11516_v15  ;;  %v9044_v34 = vpop.f32.mrb[114].mxu1  ;;  %v3907_v36 = vpop.f32.mrb[131].mxu0  ;;  %v4417_v41 = vmax.f32 %v3913_v21, 0.0 }
 0x32d   : > { %v3593_v37 = vmax.f32 %v3425_v27, 0.0  ;;  %v3428_v38 = vadd.f32 %v11419_v7, %v9044_v34  ;;  %v3908_v39 = vadd.f32 %v11516_v15, %v3907_v36  ;;  %v3419_v40 = vpop.f32.mrb[115].mxu1  ;;  %9181 = vmatprep.mubr.bf16.mxu0 %v3789_v31  ;;  %v4415_v45 = vmax.f32 %v3905_v28, 0.0 }
 0x32e   : > { %v3591_v42 = vmax.f32 %v3417_v32, 0.0  ;;  %v4418_v43 = vmax.f32 %v3916_v33, 0.0  ;;  %v3420_v44 = vadd.f32 %v11419_v7, %v3419_v40  ;;  %9182 = vmatmul.mubr.bf16.gmra.mrb[236].mxu0 %v3790_v26 }
 0x32f   : > { %v3594_v46 = vmax.f32 %v3428_v38, 0.0  ;;  %v4416_v47 = vmax.f32 %v3908_v39, 0.0  ;;  %v3721_v55 = vsel %vm10480_vm5, %v3593_v37, %v3425_v27 }
 0x330   : > { %v4544_v48 = vpack.c.bf16 %v4418_v43, %v4417_v41  ;;  %v3592_v51 = vmax.f32 %v3420_v44, 0.0  ;;  %v3719_v59 = vsel %vm10480_vm5, %v3591_v42, %v3417_v32 }
 0x331   : > { %v9079_v52 = vpop.f32.mrb[132].mxu0  ;;  %v4543_v53 = vpack.c.bf16 %v4416_v47, %v4415_v45  ;;  %v3722_v56 = vsel %vm10480_vm5, %v3594_v46, %v3428_v38 }
 0x332   : > { %v3929_v57 = vadd.f32 %v9079_v52, %v11516_v15  ;;  %v9047_v58 = vpop.f32.mrb[116].mxu1  ;;  %v3920_v19 = vpop.f32.mrb[133].mxu0  ;;  %v3720_v29 = vsel %vm10480_vm5, %v3592_v51, %v3420_v44  ;;  %v3792_v60 = vpack.c.bf16 %v3722_v56, %v3721_v55 }
 0x333   : > { %v3441_v61 = vadd.f32 %v11419_v7, %v9047_v58  ;;  %v3921_v62 = vadd.f32 %v11516_v15, %v3920_v19  ;;  %v3432_v63 = vpop.f32.mrb[117].mxu1  ;;  %v9080_v0 = vpop.f32.mrb[134].mxu0  ;;  %9217 = vmatprep.mubr.bf16.mxu1 %v4543_v53  ;;  %v3791_v1 = vpack.c.bf16 %v3720_v29, %v3719_v59 }
 0x334   : > { %v3433_v2 = vadd.f32 %v11419_v7, %v3432_v63  ;;  %v3932_v3 = vadd.f32 %v9080_v0, %v11516_v15  ;;  %v9048_v4 = vpop.f32.mrb[118].mxu1  ;;  %v3923_v5 = vpop.f32.mrb[135].mxu0  ;;  %9218 = vmatmul.mubr.bf16.vlgmr.msra.gmra.mrb[128].mxu1 %v4544_v48  ;;  %v4421_v11 = vmax.f32 %v3929_v57, 0.0 }
 0x335   : > { %v3597_v8 = vmax.f32 %v3441_v61, 0.0  ;;  %v3444_v9 = vadd.f32 %v11419_v7, %v9048_v4  ;;  %v3924_v10 = vadd.f32 %v11516_v15, %v3923_v5  ;;  %v3435_v54 = vpop.f32.mrb[119].mxu1  ;;  %9185 = vmatprep.mubr.bf16.mxu0 %v3791_v1  ;;  %v4419_v14 = vmax.f32 %v3921_v62, 0.0 }
 0x336   : > { %v3595_v12 = vmax.f32 %v3433_v2, 0.0  ;;  %v4422_v49 = vmax.f32 %v3932_v3, 0.0  ;;  %v3436_v13 = vadd.f32 %v11419_v7, %v3435_v54  ;;  %9186 = vmatmul.mubr.bf16.gmra.mrb[240].mxu0 %v3792_v60 }
 0x337   : > { %v3598_v16 = vmax.f32 %v3444_v9, 0.0  ;;  %v4420_v17 = vmax.f32 %v3924_v10, 0.0  ;;  %v3725_v23 = vsel %vm10480_vm5, %v3597_v8, %v3441_v61 }
 0x338   : > { %v4546_v18 = vpack.c.bf16 %v4422_v49, %v4421_v11  ;;  %v3596_v20 = vmax.f32 %v3436_v13, 0.0  ;;  %v3723_v28 = vsel %vm10480_vm5, %v3595_v12, %v3433_v2 }
 0x339   : > { %v4545_v21 = vpack.c.bf16 %v4420_v17, %v4419_v14  ;;  %v9083_v22 = vpop.f32.mrb[136].mxu0  ;;  %v3726_v24 = vsel %vm10480_vm5, %v3598_v16, %v3444_v9 }
 0x33a   : > { %v3945_v25 = vadd.f32 %v9083_v22, %v11516_v15  ;;  %v9051_v26 = vpop.f32.mrb[120].mxu1  ;;  %v3936_v27 = vpop.f32.mrb[137].mxu0  ;;  %v3724_v30 = vsel %vm10480_vm5, %v3596_v20, %v3436_v13  ;;  %v3794_v50 = vpack.c.bf16 %v3726_v24, %v3725_v23 }
 0x33b   : > { %v3457_v31 = vadd.f32 %v11419_v7, %v9051_v26  ;;  %v3937_v32 = vadd.f32 %v11516_v15, %v3936_v27  ;;  %v3448_v33 = vpop.f32.mrb[121].mxu1  ;;  %v9084_v34 = vpop.f32.mrb[138].mxu0  ;;  %9221 = vmatprep.mubr.bf16.mxu1 %v4545_v21  ;;  %v3793_v36 = vpack.c.bf16 %v3724_v30, %v3723_v28 }
 0x33c   : > { %v3449_v37 = vadd.f32 %v11419_v7, %v3448_v33  ;;  %v3948_v38 = vadd.f32 %v9084_v34, %v11516_v15  ;;  %v9052_v39 = vpop.f32.mrb[122].mxu1  ;;  %v3939_v40 = vpop.f32.mrb[139].mxu0  ;;  %9222 = vmatmul.mubr.bf16.gmra.mrb[132].mxu1 %v4546_v18  ;;  %v4425_v45 = vmax.f32 %v3945_v25, 0.0 }
 0x33d   : > { %v3601_v41 = vmax.f32 %v3457_v31, 0.0  ;;  %v3460_v42 = vadd.f32 %v11419_v7, %v9052_v39  ;;  %v3940_v43 = vadd.f32 %v11516_v15, %v3939_v40  ;;  %v3451_v44 = vpop.f32.mrb[123].mxu1  ;;  %9189 = vmatprep.mubr.bf16.mxu0 %v3793_v36  ;;  %v4423_v51 = vmax.f32 %v3937_v32, 0.0 }
 0x33e   : > { %v3599_v46 = vmax.f32 %v3449_v37, 0.0  ;;  %v4426_v47 = vmax.f32 %v3948_v38, 0.0  ;;  %v3452_v48 = vadd.f32 %v11419_v7, %v3451_v44  ;;  %9190 = vmatmul.mubr.bf16.gmra.mrb[244].mxu0 %v3794_v50 }
 0x33f   : > { %v3602_v52 = vmax.f32 %v3460_v42, 0.0  ;;  %v4424_v53 = vmax.f32 %v3940_v43, 0.0  ;;  %v3729_v19 = vsel %vm10480_vm5, %v3601_v41, %v3457_v31 }
 0x340   : > { %v4548_v55 = vpack.c.bf16 %v4426_v47, %v4425_v45  ;;  %v3600_v56 = vmax.f32 %v3452_v48, 0.0  ;;  %v3727_v62 = vsel %vm10480_vm5, %v3599_v46, %v3449_v37 }
 0x341   : > { %v4547_v57 = vpack.c.bf16 %v4424_v53, %v4423_v51  ;;  %v9087_v58 = vpop.f32.mrb[140].mxu0  ;;  %v3730_v59 = vsel %vm10480_vm5, %v3602_v52, %v3460_v42  ;;  %v9726_v53 = vld [vmem:[%s12317_s11 + $0x30] sm:$0xff]  }
 0x342   : > { %v3961_v29 = vadd.f32 %v9087_v58, %v11516_v15  ;;  %v9055_v60 = vpop.f32.mrb[124].mxu1  ;;  %v3952_v61 = vpop.f32.mrb[141].mxu0  ;;  %v3728_v63 = vsel %vm10480_vm5, %v3600_v56, %v3452_v48  ;;  %v3796_v0 = vpack.c.bf16 %v3730_v59, %v3729_v19  ;;  %9357 = vmatprep.subr.bf16.mxu0 %v9726_v53 }
 0x343   : > { %v3473_v1 = vadd.f32 %v11419_v7, %v9055_v60  ;;  %v3953_v2 = vadd.f32 %v11516_v15, %v3952_v61  ;;  %v3464_v3 = vpop.f32.mrb[125].mxu1  ;;  %v9088_v4 = vpop.f32.mrb[142].mxu0  ;;  %9225 = vmatprep.mubr.bf16.mxu1 %v4547_v57  ;;  %v3795_v5 = vpack.c.bf16 %v3728_v63, %v3727_v62  ;;  %9358 = vmatpush3.bf16.msra.mxu0 %v9726_v53 }
 0x344   : > { %v3465_v6 = vadd.f32 %v11419_v7, %v3464_v3  ;;  %v3964_v8 = vadd.f32 %v9088_v4, %v11516_v15  ;;  %v9056_v9 = vpop.f32.mrb[126].mxu1  ;;  %v3955_v10 = vpop.f32.mrb[143].mxu0  ;;  %9226 = vmatmul.mubr.bf16.gmra.mrb[136].mxu1 %v4548_v55  ;;  %v4429_v13 = vmax.f32 %v3961_v29, 0.0 }
 0x345   : > { %v3605_v54 = vmax.f32 %v3473_v1, 0.0  ;;  %v3476_v11 = vadd.f32 %v11419_v7, %v9056_v9  ;;  %v3956_v12 = vadd.f32 %v11516_v15, %v3955_v10  ;;  %v3467_v49 = vpop.f32.mrb[127].mxu1  ;;  %9193 = vmatprep.mubr.bf16.mxu0 %v3795_v5  ;;  %v4427_v18 = vmax.f32 %v3953_v2, 0.0 }
 0x346   : > { %v3603_v14 = vmax.f32 %v3465_v6, 0.0  ;;  %v4430_v16 = vmax.f32 %v3964_v8, 0.0  ;;  %v3468_v17 = vadd.f32 %v11419_v7, %v3467_v49  ;;  %9194 = vmatmul.mubr.bf16.gmra.mrb[248].mxu0 %v3796_v0 }
 0x347   : > { %v3606_v20 = vmax.f32 %v3476_v11, 0.0  ;;  %v4428_v21 = vmax.f32 %v3956_v12, 0.0  ;;  %v3733_v26 = vsel %vm10480_vm5, %v3605_v54, %v3473_v1 }
 0x348   : > { %v4550_v22 = vpack.c.bf16 %v4430_v16, %v4429_v13  ;;  %v3604_v23 = vmax.f32 %v3468_v17, 0.0  ;;  %v3731_v7 = vsel %vm10480_vm5, %v3603_v14, %v3465_v6 }
 0x349   : > { %v4549_v24 = vpack.c.bf16 %v4428_v21, %v4427_v18  ;;  %v9091_v25 = vpop.f32.mrb[144].mxu0  ;;  %v3734_v27 = vsel %vm10480_vm5, %v3606_v20, %v3476_v11 }
 0x34a   : > { %v3977_v28 = vadd.f32 %v9091_v25, %v11516_v15  ;;  %v3968_v30 = vpop.f32.mrb[145].mxu0  ;;  %v3732_v50 = vsel %vm10480_vm5, %v3604_v23, %v3468_v17  ;;  %v3798_v31 = vpack.c.bf16 %v3734_v27, %v3733_v26 }
 0x34b   : > { %v3969_v32 = vadd.f32 %v11516_v15, %v3968_v30  ;;  %v9092_v33 = vpop.f32.mrb[146].mxu0  ;;  %9229 = vmatprep.mubr.bf16.mxu1 %v4549_v24  ;;  %v3797_v34 = vpack.c.bf16 %v3732_v50, %v3731_v7 }
 0x34c   : > { %v3980_v36 = vadd.f32 %v9092_v33, %v11516_v15  ;;  %v3971_v37 = vpop.f32.mrb[147].mxu0  ;;  %9230 = vmatmul.mubr.bf16.gmra.mrb[140].mxu1 %v4550_v22  ;;  %v4433_v39 = vmax.f32 %v3977_v28, 0.0 }
 0x34d   : > { %v3972_v38 = vadd.f32 %v11516_v15, %v3971_v37  ;;  %9197 = vmatprep.mubr.bf16.mxu0 %v3797_v34  ;;  %v4431_v41 = vmax.f32 %v3969_v32, 0.0 }
 0x34e   : > { %v4434_v40 = vmax.f32 %v3980_v36, 0.0  ;;  %9198 = vmatmul.mubr.bf16.gmra.mrb[252].mxu0 %v3798_v31 }
 0x34f   : > { %v4432_v42 = vmax.f32 %v3972_v38, 0.0 }
 0x350   : > { %v4552_v35 = vpack.c.bf16 %v4434_v40, %v4433_v39 }
 0x351   : > { %v4551_v43 = vpack.c.bf16 %v4432_v42, %v4431_v41  ;;  %v9095_v44 = vpop.f32.mrb[148].mxu0 }
 0x352   : > { %v3993_v45 = vadd.f32 %v9095_v44, %v11516_v15  ;;  %v3984_v46 = vpop.f32.mrb[149].mxu0 }
 0x353   : > { %v3985_v47 = vadd.f32 %v11516_v15, %v3984_v46  ;;  %v9096_v48 = vpop.f32.mrb[150].mxu0  ;;  %9233 = vmatprep.mubr.bf16.mxu1 %v4551_v43 }
 0x354   : > { %v3996_v51 = vadd.f32 %v9096_v48, %v11516_v15  ;;  %v3987_v52 = vpop.f32.mrb[151].mxu0  ;;  %9234 = vmatmul.mubr.bf16.gmra.mrb[144].mxu1 %v4552_v35  ;;  %v4437_v56 = vmax.f32 %v3993_v45, 0.0  ;;  %v9727_v45 = vld [vmem:[%s12317_s11 + $0x38] sm:$0xff]  }
 0x355   : > { %v3988_v55 = vadd.f32 %v11516_v15, %v3987_v52  ;;  %v4435_v58 = vmax.f32 %v3985_v47, 0.0  ;;  %9359 = vmatprep.subr.bf16.mxu0 %v9727_v45 }
 0x356   : > { %v4438_v57 = vmax.f32 %v3996_v51, 0.0  ;;  %9360 = vmatpush3.bf16.msra.mxu0 %v9727_v45 }
 0x357   : > { %v4436_v19 = vmax.f32 %v3988_v55, 0.0 }
 0x358   : > { %v4554_v59 = vpack.c.bf16 %v4438_v57, %v4437_v56  ;;  %v11626_v57 = vld [vmem:[%s12319_s13] sm:$0xff]  }
 0x359   : > { %v4553_v29 = vpack.c.bf16 %v4436_v19, %v4435_v58  ;;  %v9099_v60 = vpop.f32.mrb[152].mxu0  ;;  %9633 = vmatprep.subr.bf16.mxu1 %v11626_v57  ;;  %9489 = vmatprep.subr.bf16.mxu0 %v11626_v57 }
 0x35a   : > { %v4009_v61 = vadd.f32 %v9099_v60, %v11516_v15  ;;  %v4000_v62 = vpop.f32.mrb[153].mxu0  ;;  %9641 = vmatpush3.bf16.msra.mxu1 %v11626_v57 }
 0x35b   : > { %v4001_v63 = vadd.f32 %v11516_v15, %v4000_v62  ;;  %v9100_v0 = vpop.f32.mrb[154].mxu0  ;;  %9237 = vmatprep.mubr.bf16.mxu1 %v4553_v29 }
 0x35c   : > { %v4012_v1 = vadd.f32 %v9100_v0, %v11516_v15  ;;  %v4003_v2 = vpop.f32.mrb[155].mxu0  ;;  %9238 = vmatmul.mubr.bf16.gmra.mrb[148].mxu1 %v4554_v59  ;;  %v4441_v4 = vmax.f32 %v4009_v61, 0.0 }
 0x35d   : > { %v4004_v3 = vadd.f32 %v11516_v15, %v4003_v2  ;;  %v4439_v6 = vmax.f32 %v4001_v63, 0.0 }
 0x35e   : > { %v4442_v5 = vmax.f32 %v4012_v1, 0.0 }
 0x35f   : > { %v4440_v8 = vmax.f32 %v4004_v3, 0.0 }
 0x360   : > { %v4556_v9 = vpack.c.bf16 %v4442_v5, %v4441_v4 }
 0x361   : > { %v4555_v10 = vpack.c.bf16 %v4440_v8, %v4439_v6  ;;  %v9103_v54 = vpop.f32.mrb[156].mxu0 }
 0x362   : > { %v4025_v11 = vadd.f32 %v9103_v54, %v11516_v15  ;;  %v4016_v12 = vpop.f32.mrb[157].mxu0 }
 0x363   : > { %v4017_v49 = vadd.f32 %v11516_v15, %v4016_v12  ;;  %v9104_v13 = vpop.f32.mrb[158].mxu0  ;;  %9241 = vmatprep.mubr.bf16.mxu1 %v4555_v10 }
 0x364   : > { %v4028_v14 = vadd.f32 %v9104_v13, %v11516_v15  ;;  %v4019_v16 = vpop.f32.mrb[159].mxu0  ;;  %9242 = vmatmul.mubr.bf16.gmra.mrb[152].mxu1 %v4556_v9  ;;  %v4445_v18 = vmax.f32 %v4025_v11, 0.0 }
 0x365   : > { %v4020_v17 = vadd.f32 %v11516_v15, %v4019_v16  ;;  %v4443_v21 = vmax.f32 %v4017_v49, 0.0 }
 0x366   : > { %v4446_v20 = vmax.f32 %v4028_v14, 0.0 }
 0x367   : > { %v4444_v22 = vmax.f32 %v4020_v17, 0.0 }
 0x368   : > { %v4558_v23 = vpack.c.bf16 %v4446_v20, %v4445_v18 }
 0x369   : > { %v4557_v24 = vpack.c.bf16 %v4444_v22, %v4443_v21  ;;  %v9107_v25 = vpop.f32.mrb[160].mxu0 }
 0x36a   : > { %v4041_v26 = vadd.f32 %v9107_v25, %v11516_v15  ;;  %v4032_v27 = vpop.f32.mrb[161].mxu0 }
 0x36b   : > { %v4033_v28 = vadd.f32 %v11516_v15, %v4032_v27  ;;  %v9108_v30 = vpop.f32.mrb[162].mxu0  ;;  %9245 = vmatprep.mubr.bf16.mxu1 %v4557_v24 }
 0x36c   : > { %v4044_v7 = vadd.f32 %v9108_v30, %v11516_v15  ;;  %v4035_v50 = vpop.f32.mrb[163].mxu0  ;;  %9246 = vmatmul.mubr.bf16.gmra.mrb[156].mxu1 %v4558_v23  ;;  %v4449_v32 = vmax.f32 %v4041_v26, 0.0 }
 0x36d   : > { %v4036_v31 = vadd.f32 %v11516_v15, %v4035_v50  ;;  %v4447_v34 = vmax.f32 %v4033_v28, 0.0 }
 0x36e   : > { %v4450_v33 = vmax.f32 %v4044_v7, 0.0 }
 0x36f   : > { %v4448_v36 = vmax.f32 %v4036_v31, 0.0 }
 0x370   : > { %v4560_v37 = vpack.c.bf16 %v4450_v33, %v4449_v32 }
 0x371   : > { %v4559_v38 = vpack.c.bf16 %v4448_v36, %v4447_v34  ;;  %v9111_v39 = vpop.f32.mrb[164].mxu0 }
 0x372   : > { %v4057_v40 = vadd.f32 %v9111_v39, %v11516_v15  ;;  %v4048_v41 = vpop.f32.mrb[165].mxu0 }
 0x373   : > { %v4049_v42 = vadd.f32 %v11516_v15, %v4048_v41  ;;  %v9112_v35 = vpop.f32.mrb[166].mxu0  ;;  %9249 = vmatprep.mubr.bf16.mxu1 %v4559_v38 }
 0x374   : > { %v4060_v43 = vadd.f32 %v9112_v35, %v11516_v15  ;;  %v4051_v44 = vpop.f32.mrb[167].mxu0  ;;  %9250 = vmatmul.mubr.bf16.gmra.mrb[160].mxu1 %v4560_v37  ;;  %v4453_v47 = vmax.f32 %v4057_v40, 0.0 }
 0x375   : > { %v4052_v46 = vadd.f32 %v11516_v15, %v4051_v44  ;;  %v4451_v51 = vmax.f32 %v4049_v42, 0.0 }
 0x376   : > { %v4454_v48 = vmax.f32 %v4060_v43, 0.0 }
 0x377   : > { %v4452_v52 = vmax.f32 %v4052_v46, 0.0 }
 0x378   : > { %v4562_v53 = vpack.c.bf16 %v4454_v48, %v4453_v47 }
 0x379   : > { %v4561_v55 = vpack.c.bf16 %v4452_v52, %v4451_v51  ;;  %v9115_v56 = vpop.f32.mrb[168].mxu0  ;;  %v11651_v52 = vld [vmem:[%s12319_s13 + $0x8] sm:$0xff]  }
 0x37a   : > { %v4073_v58 = vadd.f32 %v9115_v56, %v11516_v15  ;;  %v4064_v19 = vpop.f32.mrb[169].mxu0  ;;  %9634 = vmatprep.subr.bf16.mxu1 %v11651_v52 }
 0x37b   : > { %v4065_v59 = vadd.f32 %v11516_v15, %v4064_v19  ;;  %v9116_v29 = vpop.f32.mrb[170].mxu0  ;;  %9253 = vmatprep.mubr.bf16.mxu1 %v4561_v55  ;;  %9642 = vmatpush3.bf16.msra.mxu1 %v11651_v52 }
 0x37c   : > { %v4076_v60 = vadd.f32 %v9116_v29, %v11516_v15  ;;  %v4067_v61 = vpop.f32.mrb[171].mxu0  ;;  %9254 = vmatmul.mubr.bf16.gmra.mrb[164].mxu1 %v4562_v53  ;;  %v4457_v63 = vmax.f32 %v4073_v58, 0.0 }
 0x37d   : > { %v4068_v62 = vadd.f32 %v11516_v15, %v4067_v61  ;;  %v4455_v1 = vmax.f32 %v4065_v59, 0.0 }
 0x37e   : > { %v4458_v0 = vmax.f32 %v4076_v60, 0.0 }
 0x37f   : > { %v4456_v2 = vmax.f32 %v4068_v62, 0.0 }
 0x380   : > { %v4564_v3 = vpack.c.bf16 %v4458_v0, %v4457_v63 }
 0x381   : > { %v4563_v4 = vpack.c.bf16 %v4456_v2, %v4455_v1  ;;  %v9119_v5 = vpop.f32.mrb[172].mxu0 }
 0x382   : > { %v4089_v6 = vadd.f32 %v9119_v5, %v11516_v15  ;;  %v4080_v8 = vpop.f32.mrb[173].mxu0 }
 0x383   : > { %v4081_v9 = vadd.f32 %v11516_v15, %v4080_v8  ;;  %v9120_v10 = vpop.f32.mrb[174].mxu0  ;;  %9257 = vmatprep.mubr.bf16.mxu1 %v4563_v4 }
 0x384   : > { %v4092_v54 = vadd.f32 %v9120_v10, %v11516_v15  ;;  %v4083_v11 = vpop.f32.mrb[175].mxu0  ;;  %9258 = vmatmul.mubr.bf16.gmra.mrb[168].mxu1 %v4564_v3  ;;  %v4461_v49 = vmax.f32 %v4089_v6, 0.0 }
 0x385   : > { %v4084_v12 = vadd.f32 %v11516_v15, %v4083_v11  ;;  %v4459_v14 = vmax.f32 %v4081_v9, 0.0 }
 0x386   : > { %v4462_v13 = vmax.f32 %v4092_v54, 0.0 }
 0x387   : > { %v4460_v16 = vmax.f32 %v4084_v12, 0.0 }
 0x388   : > { %v4566_v17 = vpack.c.bf16 %v4462_v13, %v4461_v49 }
 0x389   : > { %v4565_v18 = vpack.c.bf16 %v4460_v16, %v4459_v14  ;;  %v9123_v20 = vpop.f32.mrb[176].mxu0 }
 0x38a   : > { %v4105_v21 = vadd.f32 %v9123_v20, %v11516_v15  ;;  %v4096_v22 = vpop.f32.mrb[177].mxu0 }
 0x38b   : > { %v4097_v23 = vadd.f32 %v11516_v15, %v4096_v22  ;;  %v9124_v24 = vpop.f32.mrb[178].mxu0  ;;  %9261 = vmatprep.mubr.bf16.mxu1 %v4565_v18 }
 0x38c   : > { %v4108_v25 = vadd.f32 %v9124_v24, %v11516_v15  ;;  %v4099_v26 = vpop.f32.mrb[179].mxu0  ;;  %9262 = vmatmul.mubr.bf16.gmra.mrb[172].mxu1 %v4566_v17  ;;  %v4465_v28 = vmax.f32 %v4105_v21, 0.0 }
 0x38d   : > { %v4100_v27 = vadd.f32 %v11516_v15, %v4099_v26  ;;  %v4463_v7 = vmax.f32 %v4097_v23, 0.0 }
 0x38e   : > { %v4466_v30 = vmax.f32 %v4108_v25, 0.0 }
 0x38f   : > { %v4464_v50 = vmax.f32 %v4100_v27, 0.0 }
 0x390   : > { %v4568_v31 = vpack.c.bf16 %v4466_v30, %v4465_v28 }
 0x391   : > { %v4567_v32 = vpack.c.bf16 %v4464_v50, %v4463_v7  ;;  %v9127_v33 = vpop.f32.mrb[180].mxu0 }
 0x392   : > { %v4121_v34 = vadd.f32 %v9127_v33, %v11516_v15  ;;  %v4112_v36 = vpop.f32.mrb[181].mxu0 }
 0x393   : > { %v4113_v37 = vadd.f32 %v11516_v15, %v4112_v36  ;;  %v9128_v38 = vpop.f32.mrb[182].mxu0  ;;  %9265 = vmatprep.mubr.bf16.mxu1 %v4567_v32 }
 0x394   : > { %v4124_v39 = vadd.f32 %v9128_v38, %v11516_v15  ;;  %v4115_v40 = vpop.f32.mrb[183].mxu0  ;;  %9266 = vmatmul.mubr.bf16.gmra.mrb[176].mxu1 %v4568_v31  ;;  %v4469_v42 = vmax.f32 %v4121_v34, 0.0 }
 0x395   : > { %v4116_v41 = vadd.f32 %v11516_v15, %v4115_v40  ;;  %v4467_v43 = vmax.f32 %v4113_v37, 0.0 }
 0x396   : > { %v4470_v35 = vmax.f32 %v4124_v39, 0.0 }
 0x397   : > { %v4468_v44 = vmax.f32 %v4116_v41, 0.0 }
 0x398   : > { %v4570_v45 = vpack.c.bf16 %v4470_v35, %v4469_v42 }
 0x399   : > { %v4569_v46 = vpack.c.bf16 %v4468_v44, %v4467_v43  ;;  %v9131_v47 = vpop.f32.mrb[184].mxu0 }
 0x39a   : > { %v4137_v48 = vadd.f32 %v9131_v47, %v11516_v15  ;;  %v4128_v51 = vpop.f32.mrb[185].mxu0 }
 0x39b   : > { %v4129_v53 = vadd.f32 %v11516_v15, %v4128_v51  ;;  %v9132_v55 = vpop.f32.mrb[186].mxu0  ;;  %9269 = vmatprep.mubr.bf16.mxu1 %v4569_v46 }
 0x39c   : > { %v4140_v56 = vadd.f32 %v9132_v55, %v11516_v15  ;;  %v4131_v58 = vpop.f32.mrb[187].mxu0  ;;  %9270 = vmatmul.mubr.bf16.gmra.mrb[180].mxu1 %v4570_v45  ;;  %v4473_v59 = vmax.f32 %v4137_v48, 0.0  ;;  %v11674_v45 = vld [vmem:[%s12319_s13 + $0x10] sm:$0xff]  }
 0x39d   : > { %v4132_v19 = vadd.f32 %v11516_v15, %v4131_v58  ;;  %v4471_v60 = vmax.f32 %v4129_v53, 0.0  ;;  %9635 = vmatprep.subr.bf16.mxu1 %v11674_v45 }
 0x39e   : > { %v4474_v29 = vmax.f32 %v4140_v56, 0.0  ;;  %9643 = vmatpush3.bf16.msra.mxu1 %v11674_v45 }
 0x39f   : > { %v4472_v61 = vmax.f32 %v4132_v19, 0.0 }
 0x3a0   : > { %v4572_v62 = vpack.c.bf16 %v4474_v29, %v4473_v59 }
 0x3a1   : > { %v4571_v63 = vpack.c.bf16 %v4472_v61, %v4471_v60  ;;  %v9135_v0 = vpop.f32.mrb[188].mxu0 }
 0x3a2   : > { %v4153_v1 = vadd.f32 %v9135_v0, %v11516_v15  ;;  %v4144_v2 = vpop.f32.mrb[189].mxu0 }
 0x3a3   : > { %v4145_v3 = vadd.f32 %v11516_v15, %v4144_v2  ;;  %v9136_v4 = vpop.f32.mrb[190].mxu0  ;;  %9273 = vmatprep.mubr.bf16.mxu1 %v4571_v63 }
 0x3a4   : > { %v4156_v5 = vadd.f32 %v9136_v4, %v11516_v15  ;;  %v4147_v6 = vpop.f32.mrb[191].mxu0  ;;  %9274 = vmatmul.mubr.bf16.gmra.mrb[184].mxu1 %v4572_v62  ;;  %v4477_v9 = vmax.f32 %v4153_v1, 0.0 }
 0x3a5   : > { %v4148_v8 = vadd.f32 %v11516_v15, %v4147_v6  ;;  %v4475_v54 = vmax.f32 %v4145_v3, 0.0 }
 0x3a6   : > { %v4478_v10 = vmax.f32 %v4156_v5, 0.0 }
 0x3a7   : > { %v4476_v11 = vmax.f32 %v4148_v8, 0.0 }
 0x3a8   : > { %v4574_v12 = vpack.c.bf16 %v4478_v10, %v4477_v9 }
 0x3a9   : > { %v4573_v49 = vpack.c.bf16 %v4476_v11, %v4475_v54  ;;  %v9139_v13 = vpop.f32.mrb[192].mxu0 }
 0x3aa   : > { %v4169_v14 = vadd.f32 %v9139_v13, %v11516_v15  ;;  %v4160_v16 = vpop.f32.mrb[193].mxu0 }
 0x3ab   : > { %v4161_v17 = vadd.f32 %v11516_v15, %v4160_v16  ;;  %v9140_v18 = vpop.f32.mrb[194].mxu0  ;;  %9277 = vmatprep.mubr.bf16.mxu1 %v4573_v49 }
 0x3ac   : > { %v4172_v20 = vadd.f32 %v9140_v18, %v11516_v15  ;;  %v4163_v21 = vpop.f32.mrb[195].mxu0  ;;  %9278 = vmatmul.mubr.bf16.gmra.mrb[188].mxu1 %v4574_v12  ;;  %v4481_v23 = vmax.f32 %v4169_v14, 0.0 }
 0x3ad   : > { %v4164_v22 = vadd.f32 %v11516_v15, %v4163_v21  ;;  %v4479_v25 = vmax.f32 %v4161_v17, 0.0 }
 0x3ae   : > { %v4482_v24 = vmax.f32 %v4172_v20, 0.0 }
 0x3af   : > { %v4480_v26 = vmax.f32 %v4164_v22, 0.0 }
 0x3b0   : > { %v4576_v27 = vpack.c.bf16 %v4482_v24, %v4481_v23 }
 0x3b1   : > { %v4575_v28 = vpack.c.bf16 %v4480_v26, %v4479_v25  ;;  %v9143_v30 = vpop.f32.mrb[196].mxu0 }
 0x3b2   : > { %v4185_v7 = vadd.f32 %v9143_v30, %v11516_v15  ;;  %v4176_v50 = vpop.f32.mrb[197].mxu0 }
 0x3b3   : > { %v4177_v31 = vadd.f32 %v11516_v15, %v4176_v50  ;;  %v9144_v32 = vpop.f32.mrb[198].mxu0  ;;  %9281 = vmatprep.mubr.bf16.mxu1 %v4575_v28 }
 0x3b4   : > { %v4188_v33 = vadd.f32 %v9144_v32, %v11516_v15  ;;  %v4179_v34 = vpop.f32.mrb[199].mxu0  ;;  %9282 = vmatmul.mubr.bf16.gmra.mrb[192].mxu1 %v4576_v27  ;;  %v4485_v37 = vmax.f32 %v4185_v7, 0.0 }
 0x3b5   : > { %v4180_v36 = vadd.f32 %v11516_v15, %v4179_v34  ;;  %v4483_v39 = vmax.f32 %v4177_v31, 0.0 }
 0x3b6   : > { %v4486_v38 = vmax.f32 %v4188_v33, 0.0 }
 0x3b7   : > { %v4484_v40 = vmax.f32 %v4180_v36, 0.0 }
 0x3b8   : > { %v4578_v41 = vpack.c.bf16 %v4486_v38, %v4485_v37 }
 0x3b9   : > { %v4577_v42 = vpack.c.bf16 %v4484_v40, %v4483_v39  ;;  %v9147_v35 = vpop.f32.mrb[200].mxu0 }
 0x3ba   : > { %v4201_v43 = vadd.f32 %v9147_v35, %v11516_v15  ;;  %v4192_v44 = vpop.f32.mrb[201].mxu0 }
 0x3bb   : > { %v4193_v46 = vadd.f32 %v11516_v15, %v4192_v44  ;;  %v9148_v47 = vpop.f32.mrb[202].mxu0  ;;  %9285 = vmatprep.mubr.bf16.mxu1 %v4577_v42  ;;  %v11697_v42 = vld [vmem:[%s12319_s13 + $0x18] sm:$0xff]  }
 0x3bc   : > { %v4204_v48 = vadd.f32 %v9148_v47, %v11516_v15  ;;  %v4195_v51 = vpop.f32.mrb[203].mxu0  ;;  %9286 = vmatmul.mubr.bf16.gmra.mrb[196].mxu1 %v4578_v41  ;;  %v4489_v55 = vmax.f32 %v4201_v43, 0.0  ;;  %9636 = vmatprep.subr.bf16.mxu1 %v11697_v42 }
 0x3bd   : > { %v4196_v53 = vadd.f32 %v11516_v15, %v4195_v51  ;;  %v4487_v58 = vmax.f32 %v4193_v46, 0.0  ;;  %9644 = vmatpush3.bf16.msra.mxu1 %v11697_v42 }
 0x3be   : > { %v4490_v56 = vmax.f32 %v4204_v48, 0.0 }
 0x3bf   : > { %v4488_v19 = vmax.f32 %v4196_v53, 0.0 }
 0x3c0   : > { %v4580_v59 = vpack.c.bf16 %v4490_v56, %v4489_v55 }
 0x3c1   : > { %v4579_v29 = vpack.c.bf16 %v4488_v19, %v4487_v58  ;;  %v9151_v60 = vpop.f32.mrb[204].mxu0 }
 0x3c2   : > { %v4217_v61 = vadd.f32 %v9151_v60, %v11516_v15  ;;  %v4208_v62 = vpop.f32.mrb[205].mxu0 }
 0x3c3   : > { %v4209_v63 = vadd.f32 %v11516_v15, %v4208_v62  ;;  %v9152_v0 = vpop.f32.mrb[206].mxu0  ;;  %9289 = vmatprep.mubr.bf16.mxu1 %v4579_v29 }
 0x3c4   : > { %v4220_v1 = vadd.f32 %v9152_v0, %v11516_v15  ;;  %v4211_v2 = vpop.f32.mrb[207].mxu0  ;;  %9290 = vmatmul.mubr.bf16.gmra.mrb[200].mxu1 %v4580_v59  ;;  %v4493_v4 = vmax.f32 %v4217_v61, 0.0 }
 0x3c5   : > { %v4212_v3 = vadd.f32 %v11516_v15, %v4211_v2  ;;  %v4491_v6 = vmax.f32 %v4209_v63, 0.0 }
 0x3c6   : > { %v4494_v5 = vmax.f32 %v4220_v1, 0.0 }
 0x3c7   : > { %v4492_v8 = vmax.f32 %v4212_v3, 0.0 }
 0x3c8   : > { %v4582_v9 = vpack.c.bf16 %v4494_v5, %v4493_v4 }
 0x3c9   : > { %v4581_v10 = vpack.c.bf16 %v4492_v8, %v4491_v6  ;;  %v9155_v54 = vpop.f32.mrb[208].mxu0 }
 0x3ca   : > { %v4233_v11 = vadd.f32 %v9155_v54, %v11516_v15  ;;  %v4224_v12 = vpop.f32.mrb[209].mxu0 }
 0x3cb   : > { %v4225_v49 = vadd.f32 %v11516_v15, %v4224_v12  ;;  %v9156_v13 = vpop.f32.mrb[210].mxu0  ;;  %9293 = vmatprep.mubr.bf16.mxu1 %v4581_v10 }
 0x3cc   : > { %v4236_v14 = vadd.f32 %v9156_v13, %v11516_v15  ;;  %v4227_v16 = vpop.f32.mrb[211].mxu0  ;;  %9294 = vmatmul.mubr.bf16.gmra.mrb[204].mxu1 %v4582_v9  ;;  %v4497_v18 = vmax.f32 %v4233_v11, 0.0 }
 0x3cd   : > { %v4228_v17 = vadd.f32 %v11516_v15, %v4227_v16  ;;  %v4495_v21 = vmax.f32 %v4225_v49, 0.0 }
 0x3ce   : > { %v4498_v20 = vmax.f32 %v4236_v14, 0.0 }
 0x3cf   : > { %v4496_v22 = vmax.f32 %v4228_v17, 0.0 }
 0x3d0   : > { %v4584_v23 = vpack.c.bf16 %v4498_v20, %v4497_v18 }
 0x3d1   : > { %v4583_v24 = vpack.c.bf16 %v4496_v22, %v4495_v21  ;;  %v9159_v25 = vpop.f32.mrb[212].mxu0 }
 0x3d2   : > { %v4249_v26 = vadd.f32 %v9159_v25, %v11516_v15  ;;  %v4240_v27 = vpop.f32.mrb[213].mxu0  ;;  %v11716_v25 = vld [vmem:[%s12314_s8] ss:$0 sm:$0xff] }
 0x3d3   : > { %v4241_v28 = vadd.f32 %v11516_v15, %v4240_v27  ;;  %v9160_v30 = vpop.f32.mrb[214].mxu0  ;;  %9297 = vmatprep.mubr.bf16.mxu1 %v4583_v24 }
 0x3d4   : > { %v4252_v7 = vadd.f32 %v9160_v30, %v11516_v15  ;;  %v4243_v50 = vpop.f32.mrb[215].mxu0  ;;  %9298 = vmatmul.mubr.bf16.gmra.mrb[208].mxu1 %v4584_v23  ;;  %v4501_v32 = vmax.f32 %v4249_v26, 0.0 }
 0x3d5   : > { %v4244_v31 = vadd.f32 %v11516_v15, %v4243_v50  ;;  %v4499_v34 = vmax.f32 %v4241_v28, 0.0 }
 0x3d6   : > { %v4502_v33 = vmax.f32 %v4252_v7, 0.0 }
 0x3d7   : > { %v4500_v36 = vmax.f32 %v4244_v31, 0.0 }
 0x3d8   : > { %v4586_v37 = vpack.c.bf16 %v4502_v33, %v4501_v32 }
 0x3d9   : > { %v4585_v38 = vpack.c.bf16 %v4500_v36, %v4499_v34  ;;  %v9163_v39 = vpop.f32.mrb[216].mxu0 }
 0x3da   : > { %v4265_v40 = vadd.f32 %v9163_v39, %v11516_v15  ;;  %v4256_v41 = vpop.f32.mrb[217].mxu0  ;;  %v11725_v39 = vld [vmem:[%s12319_s13 + $0x20] sm:$0xff]  }
 0x3db   : > { %v4257_v35 = vadd.f32 %v11516_v15, %v4256_v41  ;;  %v9164_v43 = vpop.f32.mrb[218].mxu0  ;;  %9301 = vmatprep.mubr.bf16.mxu1 %v4585_v38  ;;  %9637 = vmatprep.subr.bf16.mxu1 %v11725_v39 }
 0x3dc   : > { %v4268_v44 = vadd.f32 %v9164_v43, %v11516_v15  ;;  %v4259_v46 = vpop.f32.mrb[219].mxu0  ;;  %9302 = vmatmul.mubr.bf16.gmra.mrb[212].mxu1 %v4586_v37  ;;  %v4505_v48 = vmax.f32 %v4265_v40, 0.0 }
 0x3dd   : > { %v4260_v47 = vadd.f32 %v11516_v15, %v4259_v46  ;;  %v4503_v53 = vmax.f32 %v4257_v35, 0.0  ;;  %9645 = vmatpush3.bf16.msra.mxu1 %v11725_v39 }
 0x3de   : > { %v4506_v51 = vmax.f32 %v4268_v44, 0.0 }
 0x3df   : > { %v4504_v55 = vmax.f32 %v4260_v47, 0.0 }
 0x3e0   : > { %v4588_v56 = vpack.c.bf16 %v4506_v51, %v4505_v48 }
 0x3e1   : > { %v4587_v58 = vpack.c.bf16 %v4504_v55, %v4503_v53  ;;  %v9167_v19 = vpop.f32.mrb[220].mxu0 }
 0x3e2   : > { %v4281_v59 = vadd.f32 %v9167_v19, %v11516_v15  ;;  %v4272_v29 = vpop.f32.mrb[221].mxu0 }
 0x3e3   : > { %v4273_v60 = vadd.f32 %v11516_v15, %v4272_v29  ;;  %v9168_v61 = vpop.f32.mrb[222].mxu0  ;;  %9305 = vmatprep.mubr.bf16.mxu1 %v4587_v58 }
 0x3e4   : > { %v4284_v62 = vadd.f32 %v9168_v61, %v11516_v15  ;;  %v4275_v63 = vpop.f32.mrb[223].mxu0  ;;  %9306 = vmatmul.mubr.bf16.gmra.mrb[216].mxu1 %v4588_v56  ;;  %v4509_v1 = vmax.f32 %v4281_v59, 0.0 }
 0x3e5   : > { %v4276_v0 = vadd.f32 %v11516_v15, %v4275_v63  ;;  %v4507_v3 = vmax.f32 %v4273_v60, 0.0  ;;  %v11739_v63 = vld [vmem:[%s12316_s10] ss:$0 sm:$0xff] }
 0x3e6   : > { %v4510_v2 = vmax.f32 %v4284_v62, 0.0 }
 0x3e7   : > { %v4508_v4 = vmax.f32 %v4276_v0, 0.0 }
 0x3e8   : > { %v4590_v5 = vpack.c.bf16 %v4510_v2, %v4509_v1 }
 0x3e9   : > { %v4589_v6 = vpack.c.bf16 %v4508_v4, %v4507_v3  ;;  %v9171_v8 = vpop.f32.mrb[224].mxu0 }
 0x3ea   : > { %v4297_v9 = vadd.f32 %v9171_v8, %v11516_v15  ;;  %v4288_v10 = vpop.f32.mrb[225].mxu0 }
 0x3eb   : > { %v4289_v54 = vadd.f32 %v11516_v15, %v4288_v10  ;;  %v9172_v11 = vpop.f32.mrb[226].mxu0  ;;  %9309 = vmatprep.mubr.bf16.mxu1 %v4589_v6 }
 0x3ec   : > { %v4300_v12 = vadd.f32 %v9172_v11, %v11516_v15  ;;  %v4291_v49 = vpop.f32.mrb[227].mxu0  ;;  %9310 = vmatmul.mubr.bf16.gmra.mrb[220].mxu1 %v4590_v5  ;;  %v4513_v14 = vmax.f32 %v4297_v9, 0.0 }
 0x3ed   : > { %v4292_v13 = vadd.f32 %v11516_v15, %v4291_v49  ;;  %v4511_v17 = vmax.f32 %v4289_v54, 0.0 }
 0x3ee   : > { %v4514_v16 = vmax.f32 %v4300_v12, 0.0 }
 0x3ef   : > { %v4512_v18 = vmax.f32 %v4292_v13, 0.0 }
 0x3f0   : > { %v4592_v20 = vpack.c.bf16 %v4514_v16, %v4513_v14 }
 0x3f1   : > { %v4591_v21 = vpack.c.bf16 %v4512_v18, %v4511_v17  ;;  %v9175_v22 = vpop.f32.mrb[228].mxu0 }
 0x3f2   : > { %v4313_v23 = vadd.f32 %v9175_v22, %v11516_v15  ;;  %v4304_v24 = vpop.f32.mrb[229].mxu0 }
 0x3f3   : > { %v4305_v26 = vadd.f32 %v11716_v25, %v4304_v24  ;;  %v9176_v27 = vpop.f32.mrb[230].mxu0  ;;  %9313 = vmatprep.mubr.bf16.mxu1 %v4591_v21 }
 0x3f4   : > { %v4316_v28 = vadd.f32 %v11716_v25, %v9176_v27  ;;  %v4307_v30 = vpop.f32.mrb[231].mxu0  ;;  %9314 = vmatmul.mubr.bf16.gmra.mrb[224].mxu1 %v4592_v20  ;;  %v4517_v50 = vmax.f32 %v4313_v23, 0.0 }
 0x3f5   : > { %v4308_v7 = vadd.f32 %v11716_v25, %v4307_v30  ;;  %v4515_v32 = vmax.f32 %v4305_v26, 0.0 }
 0x3f6   : > { %v4518_v31 = vmax.f32 %v4316_v28, 0.0 }
 0x3f7   : > { %v4516_v15 = vmax.f32 %v4308_v7, 0.0 }
 0x3f8   : > { %v4594_v33 = vpack.c.bf16 %v4518_v31, %v4517_v50 }
 0x3f9   : > { %v4593_v34 = vpack.c.bf16 %v4516_v15, %v4515_v32  ;;  %v9179_v36 = vpop.f32.mrb[232].mxu0 }
 0x3fa   : > { %v4329_v37 = vadd.f32 %v11716_v25, %v9179_v36  ;;  %v4320_v38 = vpop.f32.mrb[233].mxu0 }
 0x3fb   : > { %v4321_v40 = vadd.f32 %v11716_v25, %v4320_v38  ;;  %v9180_v41 = vpop.f32.mrb[234].mxu0  ;;  %9317 = vmatprep.mubr.bf16.mxu1 %v4593_v34 }
 0x3fc   : > { %v4332_v35 = vadd.f32 %v11716_v25, %v9180_v41  ;;  %v4323_v43 = vpop.f32.mrb[235].mxu0  ;;  %9318 = vmatmul.mubr.bf16.gmra.mrb[228].mxu1 %v4594_v33  ;;  %v4521_v46 = vmax.f32 %v4329_v37, 0.0 }
 0x3fd   : > { %v4324_v44 = vadd.f32 %v11716_v25, %v4323_v43  ;;  %v4519_v48 = vmax.f32 %v4321_v40, 0.0 }
 0x3fe   : > { %v4522_v47 = vmax.f32 %v4332_v35, 0.0 }
 0x3ff   : > { %v4520_v51 = vmax.f32 %v4324_v44, 0.0 }
 0x400   : > { %v4596_v53 = vpack.c.bf16 %v4522_v47, %v4521_v46 }
 0x401   : > { %v4595_v55 = vpack.c.bf16 %v4520_v51, %v4519_v48  ;;  %v9183_v56 = vpop.f32.mrb[236].mxu0 }
 0x402   : > { %v4345_v58 = vadd.f32 %v11716_v25, %v9183_v56  ;;  %v4336_v19 = vpop.f32.mrb[237].mxu0 }
 0x403   : > { %v4337_v59 = vadd.f32 %v11716_v25, %v4336_v19  ;;  %v9184_v29 = vpop.f32.mrb[238].mxu0  ;;  %9321 = vmatprep.mubr.bf16.mxu1 %v4595_v55 }
 0x404   : > { %v4348_v60 = vadd.f32 %v11716_v25, %v9184_v29  ;;  %v4339_v61 = vpop.f32.mrb[239].mxu0  ;;  %9322 = vmatmul.mubr.bf16.gmra.mrb[232].mxu1 %v4596_v53  ;;  %v4525_v0 = vmax.f32 %v4345_v58, 0.0 }
 0x405   : > { %v4340_v62 = vadd.f32 %v11716_v25, %v4339_v61  ;;  %v4523_v2 = vmax.f32 %v4337_v59, 0.0 }
 0x406   : > { %v4526_v1 = vmax.f32 %v4348_v60, 0.0 }
 0x407   : > { %v4524_v3 = vmax.f32 %v4340_v62, 0.0  ;;  %v9219_v4 = vpop.f32.mrb[128].mxu1 }
 0x408   : > { %v4598_v5 = vpack.c.bf16 %v4526_v1, %v4525_v0  ;;  %v4721_v6 = vadd.f32 %v9219_v4, %v11739_v63  ;;  %v4712_v8 = vpop.f32.mrb[129].mxu1 }
 0x409   : > { %v4597_v9 = vpack.c.bf16 %v4524_v3, %v4523_v2  ;;  %v4713_v10 = vadd.f32 %v11739_v63, %v4712_v8  ;;  %v9187_v54 = vpop.f32.mrb[240].mxu0  ;;  %v9220_v11 = vpop.f32.mrb[130].mxu1 }
 0x40a   : > { %v4361_v12 = vadd.f32 %v11716_v25, %v9187_v54  ;;  %v4724_v49 = vadd.f32 %v9220_v11, %v11739_v63  ;;  %v4352_v13 = vpop.f32.mrb[241].mxu0  ;;  %v4715_v14 = vpop.f32.mrb[131].mxu1  ;;  %v5225_v20 = vmax.f32 %v4721_v6, 0.0 }
 0x40b   : > { %v4353_v16 = vadd.f32 %v11716_v25, %v4352_v13  ;;  %v4716_v17 = vadd.f32 %v11739_v63, %v4715_v14  ;;  %v9188_v18 = vpop.f32.mrb[242].mxu0  ;;  %9325 = vmatprep.mubr.bf16.mxu1 %v4597_v9  ;;  %v5223_v24 = vmax.f32 %v4713_v10, 0.0 }
 0x40c   : > { %v5226_v21 = vmax.f32 %v4724_v49, 0.0  ;;  %v4364_v22 = vadd.f32 %v11716_v25, %v9188_v18  ;;  %v4355_v23 = vpop.f32.mrb[243].mxu0  ;;  %9326 = vmatmul.mubr.bf16.gmra.mrb[236].mxu1 %v4598_v5  ;;  %v4529_v28 = vmax.f32 %v4361_v12, 0.0 }
 0x40d   : > { %v5224_v26 = vmax.f32 %v4716_v17, 0.0  ;;  %v4356_v27 = vadd.f32 %v11716_v25, %v4355_v23  ;;  %v4527_v50 = vmax.f32 %v4353_v16, 0.0 }
 0x40e   : > { %v5352_v30 = vpack.c.bf16 %v5226_v21, %v5225_v20  ;;  %v4530_v7 = vmax.f32 %v4364_v22, 0.0 }
 0x40f   : > { %v5351_v31 = vpack.c.bf16 %v5224_v26, %v5223_v24  ;;  %v4528_v32 = vmax.f32 %v4356_v27, 0.0  ;;  %v9223_v15 = vpop.f32.mrb[132].mxu1 }
 0x410   : > { %v4600_v33 = vpack.c.bf16 %v4530_v7, %v4529_v28  ;;  %v4737_v34 = vadd.f32 %v9223_v15, %v11739_v63  ;;  %v4728_v36 = vpop.f32.mrb[133].mxu1 }
 0x411   : > { %v4599_v37 = vpack.c.bf16 %v4528_v32, %v4527_v50  ;;  %v4729_v38 = vadd.f32 %v11739_v63, %v4728_v36  ;;  %v9191_v40 = vpop.f32.mrb[244].mxu0  ;;  %v9224_v41 = vpop.f32.mrb[134].mxu1  ;;  %9361 = vmatprep.mubr.bf16.mxu0 %v5351_v31 }
 0x412   : > { %v4377_v35 = vadd.f32 %v11716_v25, %v9191_v40  ;;  %v4740_v43 = vadd.f32 %v9224_v41, %v11739_v63  ;;  %v4368_v44 = vpop.f32.mrb[245].mxu0  ;;  %v4731_v46 = vpop.f32.mrb[135].mxu1  ;;  %9362 = vmatmul.mubr.bf16.vlgmr.msra.gmra.mrb[0].mxu0 %v5352_v30  ;;  %v5229_v53 = vmax.f32 %v4737_v34, 0.0 }
 0x413   : > { %v4369_v47 = vadd.f32 %v11716_v25, %v4368_v44  ;;  %v4732_v48 = vadd.f32 %v11739_v63, %v4731_v46  ;;  %v9192_v51 = vpop.f32.mrb[246].mxu0  ;;  %9329 = vmatprep.mubr.bf16.mxu1 %v4599_v37  ;;  %9490 = vmatpush3.bf16.msra.mxu0 %v11626_v57  ;;  %v5227_v19 = vmax.f32 %v4729_v38, 0.0 }
 0x414   : > { %v5230_v55 = vmax.f32 %v4740_v43, 0.0  ;;  %v4380_v56 = vadd.f32 %v11716_v25, %v9192_v51  ;;  %v4371_v58 = vpop.f32.mrb[247].mxu0  ;;  %9330 = vmatmul.mubr.bf16.gmra.mrb[240].mxu1 %v4600_v33  ;;  %9491 = vmatprep.subr.bf16.mxu0 %v11651_v52  ;;  %v4533_v60 = vmax.f32 %v4377_v35, 0.0 }
 0x415   : > { %v5228_v59 = vmax.f32 %v4732_v48, 0.0  ;;  %v4372_v29 = vadd.f32 %v11716_v25, %v4371_v58  ;;  %v4531_v0 = vmax.f32 %v4369_v47, 0.0 }
 0x416   : > { %v5354_v61 = vpack.c.bf16 %v5230_v55, %v5229_v53  ;;  %v4534_v62 = vmax.f32 %v4380_v56, 0.0 }
 0x417   : > { %v5353_v1 = vpack.c.bf16 %v5228_v59, %v5227_v19  ;;  %v4532_v2 = vmax.f32 %v4372_v29, 0.0  ;;  %v9227_v3 = vpop.f32.mrb[136].mxu1  ;;  %9492 = vmatpush3.bf16.msra.mxu0 %v11651_v52  ;;  %v9733_v52 = vld [vmem:[%s12319_s13 + $0x28] sm:$0xff]  }
 0x418   : > { %v4602_v57 = vpack.c.bf16 %v4534_v62, %v4533_v60  ;;  %v4753_v4 = vadd.f32 %v9227_v3, %v11739_v63  ;;  %v4744_v5 = vpop.f32.mrb[137].mxu1  ;;  %9493 = vmatprep.subr.bf16.mxu0 %v11674_v45  ;;  %9638 = vmatprep.subr.bf16.mxu1 %v9733_v52 }
 0x419   : > { %v4601_v6 = vpack.c.bf16 %v4532_v2, %v4531_v0  ;;  %v4745_v8 = vadd.f32 %v11739_v63, %v4744_v5  ;;  %v9195_v9 = vpop.f32.mrb[248].mxu0  ;;  %v9228_v10 = vpop.f32.mrb[138].mxu1  ;;  %9365 = vmatprep.mubr.bf16.mxu0 %v5353_v1  ;;  %9646 = vmatpush3.bf16.msra.mxu1 %v9733_v52 }
 0x41a   : > { %v4393_v54 = vadd.f32 %v11716_v25, %v9195_v9  ;;  %v4756_v11 = vadd.f32 %v9228_v10, %v11739_v63  ;;  %v4384_v12 = vpop.f32.mrb[249].mxu0  ;;  %v4747_v49 = vpop.f32.mrb[139].mxu1  ;;  %9366 = vmatmul.mubr.bf16.gmra.mrb[4].mxu0 %v5354_v61  ;;  %v5233_v17 = vmax.f32 %v4753_v4, 0.0 }
 0x41b   : > { %v4385_v13 = vadd.f32 %v11716_v25, %v4384_v12  ;;  %v4748_v14 = vadd.f32 %v11739_v63, %v4747_v49  ;;  %v9196_v16 = vpop.f32.mrb[250].mxu0  ;;  %9333 = vmatprep.mubr.bf16.mxu1 %v4601_v6  ;;  %9494 = vmatpush3.bf16.msra.mxu0 %v11674_v45  ;;  %v5231_v22 = vmax.f32 %v4745_v8, 0.0 }
 0x41c   : > { %v5234_v18 = vmax.f32 %v4756_v11, 0.0  ;;  %v4396_v20 = vadd.f32 %v11716_v25, %v9196_v16  ;;  %v4387_v21 = vpop.f32.mrb[251].mxu0  ;;  %9334 = vmatmul.mubr.bf16.gmra.mrb[244].mxu1 %v4602_v57  ;;  %9495 = vmatprep.subr.bf16.mxu0 %v11697_v42  ;;  %v4537_v26 = vmax.f32 %v4393_v54, 0.0 }
 0x41d   : > { %v5232_v23 = vmax.f32 %v4748_v14, 0.0  ;;  %v4388_v24 = vadd.f32 %v11716_v25, %v4387_v21  ;;  %v4535_v30 = vmax.f32 %v4385_v13, 0.0 }
 0x41e   : > { %v5356_v27 = vpack.c.bf16 %v5234_v18, %v5233_v17  ;;  %v4538_v28 = vmax.f32 %v4396_v20, 0.0 }
 0x41f   : > { %v5355_v7 = vpack.c.bf16 %v5232_v23, %v5231_v22  ;;  %v4536_v45 = vmax.f32 %v4388_v24, 0.0  ;;  %v9231_v50 = vpop.f32.mrb[140].mxu1  ;;  %9496 = vmatpush3.bf16.msra.mxu0 %v11697_v42 }
 0x420   : > { %v4604_v31 = vpack.c.bf16 %v4538_v28, %v4537_v26  ;;  %v4769_v32 = vadd.f32 %v9231_v50, %v11739_v63  ;;  %v4760_v15 = vpop.f32.mrb[141].mxu1  ;;  %9497 = vmatprep.subr.bf16.mxu0 %v11725_v39 }
 0x421   : > { %v4603_v33 = vpack.c.bf16 %v4536_v45, %v4535_v30  ;;  %v4761_v34 = vadd.f32 %v11739_v63, %v4760_v15  ;;  %v9199_v36 = vpop.f32.mrb[252].mxu0  ;;  %v9232_v37 = vpop.f32.mrb[142].mxu1  ;;  %9369 = vmatprep.mubr.bf16.mxu0 %v5355_v7 }
 0x422   : > { %v4409_v38 = vadd.f32 %v11716_v25, %v9199_v36  ;;  %v4772_v40 = vadd.f32 %v9232_v37, %v11739_v63  ;;  %v4400_v41 = vpop.f32.mrb[253].mxu0  ;;  %v4763_v35 = vpop.f32.mrb[143].mxu1  ;;  %9370 = vmatmul.mubr.bf16.gmra.mrb[8].mxu0 %v5356_v27  ;;  %v5237_v46 = vmax.f32 %v4769_v32, 0.0  ;;  %v9734_v32 = vld [vmem:[%s12319_s13 + $0x30] sm:$0xff]  }
 0x423   : > { %v4401_v42 = vadd.f32 %v11716_v25, %v4400_v41  ;;  %v4764_v43 = vadd.f32 %v11739_v63, %v4763_v35  ;;  %v9200_v44 = vpop.f32.mrb[254].mxu0  ;;  %9337 = vmatprep.mubr.bf16.mxu1 %v4603_v33  ;;  %9498 = vmatpush3.bf16.msra.mxu0 %v11725_v39  ;;  %v5235_v53 = vmax.f32 %v4761_v34, 0.0 }
 0x424   : > { %v5238_v47 = vmax.f32 %v4772_v40, 0.0  ;;  %v4412_v48 = vadd.f32 %v11716_v25, %v9200_v44  ;;  %v4403_v51 = vpop.f32.mrb[255].mxu0  ;;  %9338 = vmatmul.mubr.bf16.gmra.mrb[248].mxu1 %v4604_v31  ;;  %9499 = vmatprep.subr.bf16.mxu0 %v9733_v52  ;;  %v4541_v58 = vmax.f32 %v4409_v38, 0.0 }
 0x425   : > { %v5236_v55 = vmax.f32 %v4764_v43, 0.0  ;;  %v4404_v56 = vadd.f32 %v11716_v25, %v4403_v51  ;;  %v4539_v29 = vmax.f32 %v4401_v42, 0.0  ;;  %9639 = vmatprep.subr.bf16.mxu1 %v9734_v32 }
 0x426   : > { %v5358_v19 = vpack.c.bf16 %v5238_v47, %v5237_v46  ;;  %v4542_v59 = vmax.f32 %v4412_v48, 0.0  ;;  %9647 = vmatpush3.bf16.msra.mxu1 %v9734_v32 }
 0x427   : > { %v5357_v60 = vpack.c.bf16 %v5236_v55, %v5235_v53  ;;  %v4540_v61 = vmax.f32 %v4404_v56, 0.0  ;;  %v9235_v62 = vpop.f32.mrb[144].mxu1  ;;  %9500 = vmatpush3.bf16.msra.mxu0 %v9733_v52 }
 0x428   : > { %v4606_v39 = vpack.c.bf16 %v4542_v59, %v4541_v58  ;;  %v4785_v0 = vadd.f32 %v9235_v62, %v11739_v63  ;;  %v4776_v1 = vpop.f32.mrb[145].mxu1  ;;  %9501 = vmatprep.subr.bf16.mxu0 %v9734_v32 }
 0x429   : > { %v4605_v2 = vpack.c.bf16 %v4540_v61, %v4539_v29  ;;  %v4777_v3 = vadd.f32 %v11739_v63, %v4776_v1  ;;  %v9236_v57 = vpop.f32.mrb[146].mxu1  ;;  %9373 = vmatprep.mubr.bf16.mxu0 %v5357_v60 }
 0x42a   : > { %v4788_v4 = vadd.f32 %v9236_v57, %v11739_v63  ;;  %v4779_v25 = vpop.f32.mrb[147].mxu1  ;;  %9374 = vmatmul.mubr.bf16.gmra.mrb[12].mxu0 %v5358_v19  ;;  %v5241_v6 = vmax.f32 %v4785_v0, 0.0 }
 0x42b   : > { %v4780_v5 = vadd.f32 %v11739_v63, %v4779_v25  ;;  %9341 = vmatprep.mubr.bf16.mxu1 %v4605_v2  ;;  %v5239_v9 = vmax.f32 %v4777_v3, 0.0  ;;  %9502 = vmatpush3.bf16.msra.mxu0 %v9734_v32 }
 0x42c   : > { %v5242_v8 = vmax.f32 %v4788_v4, 0.0  ;;  %9342 = vmatmul.mubr.bf16.gmra.mrb[252].mxu1 %v4606_v39 }
 0x42d   : > { %v5240_v10 = vmax.f32 %v4780_v5, 0.0 }
 0x42e   : > { %v5360_v54 = vpack.c.bf16 %v5242_v8, %v5241_v6 }
 0x42f   : > { %v5359_v11 = vpack.c.bf16 %v5240_v10, %v5239_v9  ;;  %v9239_v12 = vpop.f32.mrb[148].mxu1 }
 0x430   : > { %v4801_v49 = vadd.f32 %v9239_v12, %v11739_v63  ;;  %v4792_v52 = vpop.f32.mrb[149].mxu1 }
 0x431   : > { %v4793_v13 = vadd.f32 %v11739_v63, %v4792_v52  ;;  %v9240_v14 = vpop.f32.mrb[150].mxu1  ;;  %9377 = vmatprep.mubr.bf16.mxu0 %v5359_v11 }
 0x432   : > { %v4804_v16 = vadd.f32 %v9240_v14, %v11739_v63  ;;  %v4795_v17 = vpop.f32.mrb[151].mxu1  ;;  %9378 = vmatmul.mubr.bf16.gmra.mrb[16].mxu0 %v5360_v54  ;;  %v5245_v20 = vmax.f32 %v4801_v49, 0.0 }
 0x433   : > { %v4796_v18 = vadd.f32 %v11739_v63, %v4795_v17  ;;  %v5243_v22 = vmax.f32 %v4793_v13, 0.0 }
 0x434   : > { %v5246_v21 = vmax.f32 %v4804_v16, 0.0 }
 0x435   : > { %v5244_v23 = vmax.f32 %v4796_v18, 0.0 }
 0x436   : > { %v5362_v24 = vpack.c.bf16 %v5246_v21, %v5245_v20 }
 0x437   : > { %v5361_v26 = vpack.c.bf16 %v5244_v23, %v5243_v22  ;;  %v9243_v27 = vpop.f32.mrb[152].mxu1 }
 0x438   : > { %v4817_v28 = vadd.f32 %v9243_v27, %v11739_v63  ;;  %v4808_v30 = vpop.f32.mrb[153].mxu1 }
 0x439   : > { %v4809_v7 = vadd.f32 %v11739_v63, %v4808_v30  ;;  %v9244_v45 = vpop.f32.mrb[154].mxu1  ;;  %9381 = vmatprep.mubr.bf16.mxu0 %v5361_v26 }
 0x43a   : > { %v4820_v50 = vadd.f32 %v9244_v45, %v11739_v63  ;;  %v4811_v31 = vpop.f32.mrb[155].mxu1  ;;  %9382 = vmatmul.mubr.bf16.gmra.mrb[20].mxu0 %v5362_v24  ;;  %v5249_v33 = vmax.f32 %v4817_v28, 0.0  ;;  %v9735_v28 = vld [vmem:[%s12319_s13 + $0x38] sm:$0xff]  }
 0x43b   : > { %v4812_v15 = vadd.f32 %v11739_v63, %v4811_v31  ;;  %v5247_v36 = vmax.f32 %v4809_v7, 0.0  ;;  %9640 = vmatprep.subr.bf16.mxu1 %v9735_v28  ;;  %9503 = vmatprep.subr.bf16.mxu0 %v9735_v28 }
 0x43c   : > { %v5250_v34 = vmax.f32 %v4820_v50, 0.0  ;;  %9648 = vmatpush3.bf16.msra.mxu1 %v9735_v28  ;;  %9504 = vmatpush3.bf16.msra.mxu0 %v9735_v28 }
 0x43d   : > { %v5248_v37 = vmax.f32 %v4812_v15, 0.0 }
 0x43e   : > { %v5364_v38 = vpack.c.bf16 %v5250_v34, %v5249_v33 }
 0x43f   : > { %v5363_v40 = vpack.c.bf16 %v5248_v37, %v5247_v36  ;;  %v9247_v41 = vpop.f32.mrb[156].mxu1 }
 0x440   : > { %v4833_v35 = vadd.f32 %v9247_v41, %v11739_v63  ;;  %v4824_v42 = vpop.f32.mrb[157].mxu1 }
 0x441   : > { %v4825_v43 = vadd.f32 %v11739_v63, %v4824_v42  ;;  %v9248_v44 = vpop.f32.mrb[158].mxu1  ;;  %9385 = vmatprep.mubr.bf16.mxu0 %v5363_v40 }
 0x442   : > { %v4836_v46 = vadd.f32 %v9248_v44, %v11739_v63  ;;  %v4827_v47 = vpop.f32.mrb[159].mxu1  ;;  %9386 = vmatmul.mubr.bf16.gmra.mrb[24].mxu0 %v5364_v38  ;;  %v5253_v51 = vmax.f32 %v4833_v35, 0.0 }
 0x443   : > { %v4828_v48 = vadd.f32 %v11739_v63, %v4827_v47  ;;  %v5251_v55 = vmax.f32 %v4825_v43, 0.0 }
 0x444   : > { %v5254_v53 = vmax.f32 %v4836_v46, 0.0 }
 0x445   : > { %v5252_v56 = vmax.f32 %v4828_v48, 0.0 }
 0x446   : > { %v5366_v58 = vpack.c.bf16 %v5254_v53, %v5253_v51 }
 0x447   : > { %v5365_v19 = vpack.c.bf16 %v5252_v56, %v5251_v55  ;;  %v9251_v59 = vpop.f32.mrb[160].mxu1 }
 0x448   : > { %v4849_v29 = vadd.f32 %v9251_v59, %v11739_v63  ;;  %v4840_v60 = vpop.f32.mrb[161].mxu1 }
 0x449   : > { %v4841_v61 = vadd.f32 %v11739_v63, %v4840_v60  ;;  %v9252_v62 = vpop.f32.mrb[162].mxu1  ;;  %9389 = vmatprep.mubr.bf16.mxu0 %v5365_v19 }
 0x44a   : > { %v4852_v39 = vadd.f32 %v9252_v62, %v11739_v63  ;;  %v4843_v0 = vpop.f32.mrb[163].mxu1  ;;  %9390 = vmatmul.mubr.bf16.gmra.mrb[28].mxu0 %v5366_v58  ;;  %v5257_v2 = vmax.f32 %v4849_v29, 0.0 }
 0x44b   : > { %v4844_v1 = vadd.f32 %v11739_v63, %v4843_v0  ;;  %v5255_v57 = vmax.f32 %v4841_v61, 0.0 }
 0x44c   : > { %v5258_v3 = vmax.f32 %v4852_v39, 0.0 }
 0x44d   : > { %v5256_v4 = vmax.f32 %v4844_v1, 0.0 }
 0x44e   : > { %v5368_v25 = vpack.c.bf16 %v5258_v3, %v5257_v2 }
 0x44f   : > { %v5367_v5 = vpack.c.bf16 %v5256_v4, %v5255_v57  ;;  %v9255_v6 = vpop.f32.mrb[164].mxu1 }
 0x450   : > { %v4865_v8 = vadd.f32 %v9255_v6, %v11739_v63  ;;  %v4856_v9 = vpop.f32.mrb[165].mxu1 }
 0x451   : > { %v4857_v10 = vadd.f32 %v11739_v63, %v4856_v9  ;;  %v9256_v54 = vpop.f32.mrb[166].mxu1  ;;  %9393 = vmatprep.mubr.bf16.mxu0 %v5367_v5 }
 0x452   : > { %v4868_v11 = vadd.f32 %v9256_v54, %v11739_v63  ;;  %v4859_v12 = vpop.f32.mrb[167].mxu1  ;;  %9394 = vmatmul.mubr.bf16.gmra.mrb[32].mxu0 %v5368_v25  ;;  %v5261_v52 = vmax.f32 %v4865_v8, 0.0 }
 0x453   : > { %v4860_v49 = vadd.f32 %v11739_v63, %v4859_v12  ;;  %v5259_v14 = vmax.f32 %v4857_v10, 0.0 }
 0x454   : > { %v5262_v13 = vmax.f32 %v4868_v11, 0.0 }
 0x455   : > { %v5260_v16 = vmax.f32 %v4860_v49, 0.0 }
 0x456   : > { %v5370_v17 = vpack.c.bf16 %v5262_v13, %v5261_v52 }
 0x457   : > { %v5369_v18 = vpack.c.bf16 %v5260_v16, %v5259_v14  ;;  %v9259_v20 = vpop.f32.mrb[168].mxu1 }
 0x458   : > { %v4881_v21 = vadd.f32 %v9259_v20, %v11739_v63  ;;  %v4872_v22 = vpop.f32.mrb[169].mxu1 }
 0x459   : > { %v4873_v23 = vadd.f32 %v11739_v63, %v4872_v22  ;;  %v9260_v24 = vpop.f32.mrb[170].mxu1  ;;  %9397 = vmatprep.mubr.bf16.mxu0 %v5369_v18 }
 0x45a   : > { %v4884_v26 = vadd.f32 %v9260_v24, %v11739_v63  ;;  %v4875_v27 = vpop.f32.mrb[171].mxu1  ;;  %9398 = vmatmul.mubr.bf16.gmra.mrb[36].mxu0 %v5370_v17  ;;  %v5265_v7 = vmax.f32 %v4881_v21, 0.0 }
 0x45b   : > { %v4876_v30 = vadd.f32 %v11739_v63, %v4875_v27  ;;  %v5263_v50 = vmax.f32 %v4873_v23, 0.0 }
 0x45c   : > { %v5266_v45 = vmax.f32 %v4884_v26, 0.0 }
 0x45d   : > { %v5264_v31 = vmax.f32 %v4876_v30, 0.0 }
 0x45e   : > { %v5372_v32 = vpack.c.bf16 %v5266_v45, %v5265_v7 }
 0x45f   : > { %v5371_v15 = vpack.c.bf16 %v5264_v31, %v5263_v50  ;;  %v9263_v33 = vpop.f32.mrb[172].mxu1 }
 0x460   : > { %v4897_v34 = vadd.f32 %v9263_v33, %v11739_v63  ;;  %v4888_v36 = vpop.f32.mrb[173].mxu1 }
 0x461   : > { %v4889_v37 = vadd.f32 %v11739_v63, %v4888_v36  ;;  %v9264_v38 = vpop.f32.mrb[174].mxu1  ;;  %9401 = vmatprep.mubr.bf16.mxu0 %v5371_v15 }
 0x462   : > { %v4900_v40 = vadd.f32 %v9264_v38, %v11739_v63  ;;  %v4891_v41 = vpop.f32.mrb[175].mxu1  ;;  %9402 = vmatmul.mubr.bf16.gmra.mrb[40].mxu0 %v5372_v32  ;;  %v5269_v42 = vmax.f32 %v4897_v34, 0.0 }
 0x463   : > { %v4892_v35 = vadd.f32 %v11739_v63, %v4891_v41  ;;  %v5267_v44 = vmax.f32 %v4889_v37, 0.0 }
 0x464   : > { %v5270_v43 = vmax.f32 %v4900_v40, 0.0 }
 0x465   : > { %v5268_v46 = vmax.f32 %v4892_v35, 0.0 }
 0x466   : > { %v5374_v47 = vpack.c.bf16 %v5270_v43, %v5269_v42 }
 0x467   : > { %v5373_v48 = vpack.c.bf16 %v5268_v46, %v5267_v44  ;;  %v9267_v51 = vpop.f32.mrb[176].mxu1 }
 0x468   : > { %v4913_v53 = vadd.f32 %v9267_v51, %v11739_v63  ;;  %v4904_v55 = vpop.f32.mrb[177].mxu1 }
 0x469   : > { %v4905_v56 = vadd.f32 %v11739_v63, %v4904_v55  ;;  %v9268_v58 = vpop.f32.mrb[178].mxu1  ;;  %9405 = vmatprep.mubr.bf16.mxu0 %v5373_v48 }
 0x46a   : > { %v4916_v19 = vadd.f32 %v9268_v58, %v11739_v63  ;;  %v4907_v59 = vpop.f32.mrb[179].mxu1  ;;  %9406 = vmatmul.mubr.bf16.gmra.mrb[44].mxu0 %v5374_v47  ;;  %v5273_v60 = vmax.f32 %v4913_v53, 0.0 }
 0x46b   : > { %v4908_v29 = vadd.f32 %v11739_v63, %v4907_v59  ;;  %v5271_v62 = vmax.f32 %v4905_v56, 0.0 }
 0x46c   : > { %v5274_v61 = vmax.f32 %v4916_v19, 0.0 }
 0x46d   : > { %v5272_v39 = vmax.f32 %v4908_v29, 0.0 }
 0x46e   : > { %v5376_v0 = vpack.c.bf16 %v5274_v61, %v5273_v60 }
 0x46f   : > { %v5375_v1 = vpack.c.bf16 %v5272_v39, %v5271_v62  ;;  %v9271_v2 = vpop.f32.mrb[180].mxu1 }
 0x470   : > { %v4929_v3 = vadd.f32 %v9271_v2, %v11739_v63  ;;  %v4920_v57 = vpop.f32.mrb[181].mxu1 }
 0x471   : > { %v4921_v4 = vadd.f32 %v11739_v63, %v4920_v57  ;;  %v9272_v25 = vpop.f32.mrb[182].mxu1  ;;  %9409 = vmatprep.mubr.bf16.mxu0 %v5375_v1 }
 0x472   : > { %v4932_v5 = vadd.f32 %v9272_v25, %v11739_v63  ;;  %v4923_v6 = vpop.f32.mrb[183].mxu1  ;;  %9410 = vmatmul.mubr.bf16.gmra.mrb[48].mxu0 %v5376_v0  ;;  %v5277_v9 = vmax.f32 %v4929_v3, 0.0 }
 0x473   : > { %v4924_v8 = vadd.f32 %v11739_v63, %v4923_v6  ;;  %v5275_v54 = vmax.f32 %v4921_v4, 0.0 }
 0x474   : > { %v5278_v10 = vmax.f32 %v4932_v5, 0.0 }
 0x475   : > { %v5276_v11 = vmax.f32 %v4924_v8, 0.0 }
 0x476   : > { %v5378_v12 = vpack.c.bf16 %v5278_v10, %v5277_v9 }
 0x477   : > { %v5377_v49 = vpack.c.bf16 %v5276_v11, %v5275_v54  ;;  %v9275_v52 = vpop.f32.mrb[184].mxu1 }
 0x478   : > { %v4945_v13 = vadd.f32 %v9275_v52, %v11739_v63  ;;  %v4936_v14 = vpop.f32.mrb[185].mxu1 }
 0x479   : > { %v4937_v16 = vadd.f32 %v11739_v63, %v4936_v14  ;;  %v9276_v17 = vpop.f32.mrb[186].mxu1  ;;  %9413 = vmatprep.mubr.bf16.mxu0 %v5377_v49 }
 0x47a   : > { %v4948_v18 = vadd.f32 %v9276_v17, %v11739_v63  ;;  %v4939_v20 = vpop.f32.mrb[187].mxu1  ;;  %9414 = vmatmul.mubr.bf16.gmra.mrb[52].mxu0 %v5378_v12  ;;  %v5281_v22 = vmax.f32 %v4945_v13, 0.0 }
 0x47b   : > { %v4940_v21 = vadd.f32 %v11739_v63, %v4939_v20  ;;  %v5279_v24 = vmax.f32 %v4937_v16, 0.0 }
 0x47c   : > { %v5282_v23 = vmax.f32 %v4948_v18, 0.0 }
 0x47d   : > { %v5280_v26 = vmax.f32 %v4940_v21, 0.0 }
 0x47e   : > { %v5380_v27 = vpack.c.bf16 %v5282_v23, %v5281_v22 }
 0x47f   : > { %v5379_v28 = vpack.c.bf16 %v5280_v26, %v5279_v24  ;;  %v9279_v30 = vpop.f32.mrb[188].mxu1 }
 0x480   : > { %v4961_v7 = vadd.f32 %v9279_v30, %v11739_v63  ;;  %v4952_v45 = vpop.f32.mrb[189].mxu1 }
 0x481   : > { %v4953_v50 = vadd.f32 %v11739_v63, %v4952_v45  ;;  %v9280_v31 = vpop.f32.mrb[190].mxu1  ;;  %9417 = vmatprep.mubr.bf16.mxu0 %v5379_v28 }
 0x482   : > { %v4964_v32 = vadd.f32 %v9280_v31, %v11739_v63  ;;  %v4955_v15 = vpop.f32.mrb[191].mxu1  ;;  %9418 = vmatmul.mubr.bf16.gmra.mrb[56].mxu0 %v5380_v27  ;;  %v5285_v34 = vmax.f32 %v4961_v7, 0.0 }
 0x483   : > { %v4956_v33 = vadd.f32 %v11739_v63, %v4955_v15  ;;  %v5283_v37 = vmax.f32 %v4953_v50, 0.0 }
 0x484   : > { %v5286_v36 = vmax.f32 %v4964_v32, 0.0 }
 0x485   : > { %v5284_v38 = vmax.f32 %v4956_v33, 0.0 }
 0x486   : > { %v5382_v40 = vpack.c.bf16 %v5286_v36, %v5285_v34 }
 0x487   : > { %v5381_v41 = vpack.c.bf16 %v5284_v38, %v5283_v37  ;;  %v9283_v35 = vpop.f32.mrb[192].mxu1 }
 0x488   : > { %v4977_v42 = vadd.f32 %v9283_v35, %v11739_v63  ;;  %v4968_v43 = vpop.f32.mrb[193].mxu1 }
 0x489   : > { %v4969_v44 = vadd.f32 %v11739_v63, %v4968_v43  ;;  %v9284_v46 = vpop.f32.mrb[194].mxu1  ;;  %9421 = vmatprep.mubr.bf16.mxu0 %v5381_v41 }
 0x48a   : > { %v4980_v47 = vadd.f32 %v9284_v46, %v11739_v63  ;;  %v4971_v48 = vpop.f32.mrb[195].mxu1  ;;  %9422 = vmatmul.mubr.bf16.gmra.mrb[60].mxu0 %v5382_v40  ;;  %v5289_v53 = vmax.f32 %v4977_v42, 0.0 }
 0x48b   : > { %v4972_v51 = vadd.f32 %v11739_v63, %v4971_v48  ;;  %v5287_v56 = vmax.f32 %v4969_v44, 0.0 }
 0x48c   : > { %v5290_v55 = vmax.f32 %v4980_v47, 0.0 }
 0x48d   : > { %v5288_v58 = vmax.f32 %v4972_v51, 0.0 }
 0x48e   : > { %v5384_v19 = vpack.c.bf16 %v5290_v55, %v5289_v53 }
 0x48f   : > { %v5383_v59 = vpack.c.bf16 %v5288_v58, %v5287_v56  ;;  %v9287_v29 = vpop.f32.mrb[196].mxu1 }
 0x490   : > { %v4993_v60 = vadd.f32 %v9287_v29, %v11739_v63  ;;  %v4984_v61 = vpop.f32.mrb[197].mxu1 }
 0x491   : > { %v4985_v62 = vadd.f32 %v11739_v63, %v4984_v61  ;;  %v9288_v39 = vpop.f32.mrb[198].mxu1  ;;  %9425 = vmatprep.mubr.bf16.mxu0 %v5383_v59 }
 0x492   : > { %v4996_v0 = vadd.f32 %v9288_v39, %v11739_v63  ;;  %v4987_v1 = vpop.f32.mrb[199].mxu1  ;;  %9426 = vmatmul.mubr.bf16.gmra.mrb[64].mxu0 %v5384_v19  ;;  %v5293_v3 = vmax.f32 %v4993_v60, 0.0 }
 0x493   : > { %v4988_v2 = vadd.f32 %v11739_v63, %v4987_v1  ;;  %v5291_v4 = vmax.f32 %v4985_v62, 0.0 }
 0x494   : > { %v5294_v57 = vmax.f32 %v4996_v0, 0.0 }
 0x495   : > { %v5292_v25 = vmax.f32 %v4988_v2, 0.0 }
 0x496   : > { %v5386_v5 = vpack.c.bf16 %v5294_v57, %v5293_v3 }
 0x497   : > { %v5385_v6 = vpack.c.bf16 %v5292_v25, %v5291_v4  ;;  %v9291_v8 = vpop.f32.mrb[200].mxu1 }
 0x498   : > { %v5009_v9 = vadd.f32 %v9291_v8, %v11739_v63  ;;  %v5000_v10 = vpop.f32.mrb[201].mxu1 }
 0x499   : > { %v5001_v54 = vadd.f32 %v11739_v63, %v5000_v10  ;;  %v9292_v11 = vpop.f32.mrb[202].mxu1  ;;  %9429 = vmatprep.mubr.bf16.mxu0 %v5385_v6 }
 0x49a   : > { %v5012_v12 = vadd.f32 %v9292_v11, %v11739_v63  ;;  %v5003_v49 = vpop.f32.mrb[203].mxu1  ;;  %9430 = vmatmul.mubr.bf16.gmra.mrb[68].mxu0 %v5386_v5  ;;  %v5297_v13 = vmax.f32 %v5009_v9, 0.0 }
 0x49b   : > { %v5004_v52 = vadd.f32 %v11739_v63, %v5003_v49  ;;  %v5295_v16 = vmax.f32 %v5001_v54, 0.0 }
 0x49c   : > { %v5298_v14 = vmax.f32 %v5012_v12, 0.0 }
 0x49d   : > { %v5296_v17 = vmax.f32 %v5004_v52, 0.0 }
 0x49e   : > { %v5388_v18 = vpack.c.bf16 %v5298_v14, %v5297_v13 }
 0x49f   : > { %v5387_v20 = vpack.c.bf16 %v5296_v17, %v5295_v16  ;;  %v9295_v21 = vpop.f32.mrb[204].mxu1 }
 0x4a0   : > { %v5025_v22 = vadd.f32 %v9295_v21, %v11739_v63  ;;  %v5016_v23 = vpop.f32.mrb[205].mxu1 }
 0x4a1   : > { %v5017_v24 = vadd.f32 %v11739_v63, %v5016_v23  ;;  %v9296_v26 = vpop.f32.mrb[206].mxu1  ;;  %9433 = vmatprep.mubr.bf16.mxu0 %v5387_v20 }
 0x4a2   : > { %v5028_v27 = vadd.f32 %v9296_v26, %v11739_v63  ;;  %v5019_v28 = vpop.f32.mrb[207].mxu1  ;;  %9434 = vmatmul.mubr.bf16.gmra.mrb[72].mxu0 %v5388_v18  ;;  %v5301_v7 = vmax.f32 %v5025_v22, 0.0 }
 0x4a3   : > { %v5020_v30 = vadd.f32 %v11739_v63, %v5019_v28  ;;  %v5299_v50 = vmax.f32 %v5017_v24, 0.0 }
 0x4a4   : > { %v5302_v45 = vmax.f32 %v5028_v27, 0.0 }
 0x4a5   : > { %v5300_v31 = vmax.f32 %v5020_v30, 0.0 }
 0x4a6   : > { %v5390_v32 = vpack.c.bf16 %v5302_v45, %v5301_v7 }
 0x4a7   : > { %v5389_v15 = vpack.c.bf16 %v5300_v31, %v5299_v50  ;;  %v9299_v33 = vpop.f32.mrb[208].mxu1 }
 0x4a8   : > { %v5041_v34 = vadd.f32 %v9299_v33, %v11739_v63  ;;  %v5032_v36 = vpop.f32.mrb[209].mxu1 }
 0x4a9   : > { %v5033_v37 = vadd.f32 %v11739_v63, %v5032_v36  ;;  %v9300_v38 = vpop.f32.mrb[210].mxu1  ;;  %9437 = vmatprep.mubr.bf16.mxu0 %v5389_v15 }
 0x4aa   : > { %v5044_v40 = vadd.f32 %v9300_v38, %v11739_v63  ;;  %v5035_v41 = vpop.f32.mrb[211].mxu1  ;;  %9438 = vmatmul.mubr.bf16.gmra.mrb[76].mxu0 %v5390_v32  ;;  %v5305_v42 = vmax.f32 %v5041_v34, 0.0 }
 0x4ab   : > { %v5036_v35 = vadd.f32 %v11739_v63, %v5035_v41  ;;  %v5303_v44 = vmax.f32 %v5033_v37, 0.0 }
 0x4ac   : > { %v5306_v43 = vmax.f32 %v5044_v40, 0.0 }
 0x4ad   : > { %v5304_v46 = vmax.f32 %v5036_v35, 0.0 }
 0x4ae   : > { %v5392_v47 = vpack.c.bf16 %v5306_v43, %v5305_v42 }
 0x4af   : > { %v5391_v48 = vpack.c.bf16 %v5304_v46, %v5303_v44  ;;  %v9303_v51 = vpop.f32.mrb[212].mxu1 }
 0x4b0   : > { %v5057_v53 = vadd.f32 %v9303_v51, %v11739_v63  ;;  %v5048_v55 = vpop.f32.mrb[213].mxu1 }
 0x4b1   : > { %v5049_v56 = vadd.f32 %v11739_v63, %v5048_v55  ;;  %v9304_v58 = vpop.f32.mrb[214].mxu1  ;;  %9441 = vmatprep.mubr.bf16.mxu0 %v5391_v48 }
 0x4b2   : > { %v5060_v19 = vadd.f32 %v9304_v58, %v11739_v63  ;;  %v5051_v59 = vpop.f32.mrb[215].mxu1  ;;  %9442 = vmatmul.mubr.bf16.gmra.mrb[80].mxu0 %v5392_v47  ;;  %v5309_v60 = vmax.f32 %v5057_v53, 0.0 }
 0x4b3   : > { %v5052_v29 = vadd.f32 %v11739_v63, %v5051_v59  ;;  %v5307_v62 = vmax.f32 %v5049_v56, 0.0 }
 0x4b4   : > { %v5310_v61 = vmax.f32 %v5060_v19, 0.0 }
 0x4b5   : > { %v5308_v39 = vmax.f32 %v5052_v29, 0.0 }
 0x4b6   : > { %v5394_v0 = vpack.c.bf16 %v5310_v61, %v5309_v60  ;;  %v11882_v60 = vld [vmem:[%s12316_s10] ss:$0 sm:$0xff] }
 0x4b7   : > { %v5393_v1 = vpack.c.bf16 %v5308_v39, %v5307_v62  ;;  %v9307_v2 = vpop.f32.mrb[216].mxu1 }
 0x4b8   : > { %v5073_v3 = vadd.f32 %v9307_v2, %v11739_v63  ;;  %v5064_v57 = vpop.f32.mrb[217].mxu1 }
 0x4b9   : > { %v5065_v4 = vadd.f32 %v11739_v63, %v5064_v57  ;;  %v9308_v25 = vpop.f32.mrb[218].mxu1  ;;  %9445 = vmatprep.mubr.bf16.mxu0 %v5393_v1 }
 0x4ba   : > { %v5076_v5 = vadd.f32 %v9308_v25, %v11739_v63  ;;  %v5067_v6 = vpop.f32.mrb[219].mxu1  ;;  %9446 = vmatmul.mubr.bf16.gmra.mrb[84].mxu0 %v5394_v0  ;;  %v5313_v9 = vmax.f32 %v5073_v3, 0.0 }
 0x4bb   : > { %v5068_v8 = vadd.f32 %v11739_v63, %v5067_v6  ;;  %v5311_v54 = vmax.f32 %v5065_v4, 0.0 }
 0x4bc   : > { %v5314_v10 = vmax.f32 %v5076_v5, 0.0 }
 0x4bd   : > { %v5312_v11 = vmax.f32 %v5068_v8, 0.0 }
 0x4be   : > { %v5396_v12 = vpack.c.bf16 %v5314_v10, %v5313_v9 }
 0x4bf   : > { %v5395_v49 = vpack.c.bf16 %v5312_v11, %v5311_v54  ;;  %v9311_v52 = vpop.f32.mrb[220].mxu1 }
 0x4c0   : > { %v5089_v13 = vadd.f32 %v9311_v52, %v11739_v63  ;;  %v5080_v14 = vpop.f32.mrb[221].mxu1 }
 0x4c1   : > { %v5081_v16 = vadd.f32 %v11739_v63, %v5080_v14  ;;  %v9312_v17 = vpop.f32.mrb[222].mxu1  ;;  %9449 = vmatprep.mubr.bf16.mxu0 %v5395_v49 }
 0x4c2   : > { %v5092_v18 = vadd.f32 %v9312_v17, %v11739_v63  ;;  %v5083_v20 = vpop.f32.mrb[223].mxu1  ;;  %9450 = vmatmul.mubr.bf16.gmra.mrb[88].mxu0 %v5396_v12  ;;  %v5317_v22 = vmax.f32 %v5089_v13, 0.0  ;;  %v11895_v13 = vld [vmem:[%s12318_s12] ss:$0 sm:$0xff] }
 0x4c3   : > { %v5084_v21 = vadd.f32 %v11739_v63, %v5083_v20  ;;  %v5315_v24 = vmax.f32 %v5081_v16, 0.0 }
 0x4c4   : > { %v5318_v23 = vmax.f32 %v5092_v18, 0.0 }
 0x4c5   : > { %v5316_v26 = vmax.f32 %v5084_v21, 0.0 }
 0x4c6   : > { %v5398_v27 = vpack.c.bf16 %v5318_v23, %v5317_v22 }
 0x4c7   : > { %v5397_v28 = vpack.c.bf16 %v5316_v26, %v5315_v24  ;;  %v9315_v30 = vpop.f32.mrb[224].mxu1 }
 0x4c8   : > { %v5105_v7 = vadd.f32 %v9315_v30, %v11739_v63  ;;  %v5096_v45 = vpop.f32.mrb[225].mxu1 }
 0x4c9   : > { %v5097_v50 = vadd.f32 %v11739_v63, %v5096_v45  ;;  %v9316_v31 = vpop.f32.mrb[226].mxu1  ;;  %9453 = vmatprep.mubr.bf16.mxu0 %v5397_v28 }
 0x4ca   : > { %v5108_v32 = vadd.f32 %v9316_v31, %v11739_v63  ;;  %v5099_v15 = vpop.f32.mrb[227].mxu1  ;;  %9454 = vmatmul.mubr.bf16.gmra.mrb[92].mxu0 %v5398_v27  ;;  %v5321_v34 = vmax.f32 %v5105_v7, 0.0 }
 0x4cb   : > { %v5100_v33 = vadd.f32 %v11739_v63, %v5099_v15  ;;  %v5319_v37 = vmax.f32 %v5097_v50, 0.0 }
 0x4cc   : > { %v5322_v36 = vmax.f32 %v5108_v32, 0.0 }
 0x4cd   : > { %v5320_v38 = vmax.f32 %v5100_v33, 0.0 }
 0x4ce   : > { %v5400_v40 = vpack.c.bf16 %v5322_v36, %v5321_v34 }
 0x4cf   : > { %v5399_v41 = vpack.c.bf16 %v5320_v38, %v5319_v37  ;;  %v9319_v35 = vpop.f32.mrb[228].mxu1 }
 0x4d0   : > { %v5121_v42 = vadd.f32 %v9319_v35, %v11739_v63  ;;  %v5112_v43 = vpop.f32.mrb[229].mxu1 }
 0x4d1   : > { %v5113_v44 = vadd.f32 %v11739_v63, %v5112_v43  ;;  %v9320_v46 = vpop.f32.mrb[230].mxu1  ;;  %9457 = vmatprep.mubr.bf16.mxu0 %v5399_v41 }
 0x4d2   : > { %v5124_v47 = vadd.f32 %v9320_v46, %v11739_v63  ;;  %v5115_v48 = vpop.f32.mrb[231].mxu1  ;;  %9458 = vmatmul.mubr.bf16.gmra.mrb[96].mxu0 %v5400_v40  ;;  %v5325_v53 = vmax.f32 %v5121_v42, 0.0 }
 0x4d3   : > { %v5116_v51 = vadd.f32 %v11739_v63, %v5115_v48  ;;  %v5323_v56 = vmax.f32 %v5113_v44, 0.0 }
 0x4d4   : > { %v5326_v55 = vmax.f32 %v5124_v47, 0.0 }
 0x4d5   : > { %v5324_v58 = vmax.f32 %v5116_v51, 0.0 }
 0x4d6   : > { %v5402_v19 = vpack.c.bf16 %v5326_v55, %v5325_v53 }
 0x4d7   : > { %v5401_v59 = vpack.c.bf16 %v5324_v58, %v5323_v56  ;;  %v9323_v29 = vpop.f32.mrb[232].mxu1 }
 0x4d8   : > { %v5137_v61 = vadd.f32 %v11882_v60, %v9323_v29  ;;  %v5128_v62 = vpop.f32.mrb[233].mxu1 }
 0x4d9   : > { %v5129_v39 = vadd.f32 %v11882_v60, %v5128_v62  ;;  %v9324_v0 = vpop.f32.mrb[234].mxu1  ;;  %9461 = vmatprep.mubr.bf16.mxu0 %v5401_v59 }
 0x4da   : > { %v5140_v63 = vadd.f32 %v11882_v60, %v9324_v0  ;;  %v5131_v1 = vpop.f32.mrb[235].mxu1  ;;  %9462 = vmatmul.mubr.bf16.gmra.mrb[100].mxu0 %v5402_v19  ;;  %v5329_v3 = vmax.f32 %v5137_v61, 0.0 }
 0x4db   : > { %v5132_v2 = vadd.f32 %v11882_v60, %v5131_v1  ;;  %v5327_v4 = vmax.f32 %v5129_v39, 0.0 }
 0x4dc   : > { %v5330_v57 = vmax.f32 %v5140_v63, 0.0 }
 0x4dd   : > { %v5328_v25 = vmax.f32 %v5132_v2, 0.0 }
 0x4de   : > { %v5404_v5 = vpack.c.bf16 %v5330_v57, %v5329_v3 }
 0x4df   : > { %v5403_v6 = vpack.c.bf16 %v5328_v25, %v5327_v4  ;;  %v9327_v8 = vpop.f32.mrb[236].mxu1 }
 0x4e0   : > { %v5153_v9 = vadd.f32 %v11882_v60, %v9327_v8  ;;  %v5144_v10 = vpop.f32.mrb[237].mxu1 }
 0x4e1   : > { %v5145_v54 = vadd.f32 %v11882_v60, %v5144_v10  ;;  %v9328_v11 = vpop.f32.mrb[238].mxu1  ;;  %9465 = vmatprep.mubr.bf16.mxu0 %v5403_v6 }
 0x4e2   : > { %v5156_v12 = vadd.f32 %v11882_v60, %v9328_v11  ;;  %v5147_v49 = vpop.f32.mrb[239].mxu1  ;;  %9466 = vmatmul.mubr.bf16.gmra.mrb[104].mxu0 %v5404_v5  ;;  %v5333_v14 = vmax.f32 %v5153_v9, 0.0 }
 0x4e3   : > { %v5148_v52 = vadd.f32 %v11882_v60, %v5147_v49  ;;  %v5331_v17 = vmax.f32 %v5145_v54, 0.0 }
 0x4e4   : > { %v5334_v16 = vmax.f32 %v5156_v12, 0.0 }
 0x4e5   : > { %v5332_v18 = vmax.f32 %v5148_v52, 0.0  ;;  %v9363_v20 = vpop.f32.mrb[0].mxu0 }
 0x4e6   : > { %v5406_v21 = vpack.c.bf16 %v5334_v16, %v5333_v14  ;;  %v5529_v22 = vadd.f32 %v9363_v20, %v11895_v13  ;;  %v5520_v23 = vpop.f32.mrb[1].mxu0 }
 0x4e7   : > { %v5405_v24 = vpack.c.bf16 %v5332_v18, %v5331_v17  ;;  %v5521_v26 = vadd.f32 %v11895_v13, %v5520_v23  ;;  %v9331_v27 = vpop.f32.mrb[240].mxu1  ;;  %v9364_v28 = vpop.f32.mrb[2].mxu0 }
 0x4e8   : > { %v5169_v30 = vadd.f32 %v11882_v60, %v9331_v27  ;;  %v5532_v7 = vadd.f32 %v9364_v28, %v11895_v13  ;;  %v5160_v45 = vpop.f32.mrb[241].mxu1  ;;  %v5523_v50 = vpop.f32.mrb[3].mxu0  ;;  %v6033_v33 = vmax.f32 %v5529_v22, 0.0 }
 0x4e9   : > { %v5161_v31 = vadd.f32 %v11882_v60, %v5160_v45  ;;  %v5524_v32 = vadd.f32 %v11895_v13, %v5523_v50  ;;  %v9332_v15 = vpop.f32.mrb[242].mxu1  ;;  %9469 = vmatprep.mubr.bf16.mxu0 %v5405_v24  ;;  %v6031_v38 = vmax.f32 %v5521_v26, 0.0 }
 0x4ea   : > { %v6034_v34 = vmax.f32 %v5532_v7, 0.0  ;;  %v5172_v36 = vadd.f32 %v11882_v60, %v9332_v15  ;;  %v5163_v37 = vpop.f32.mrb[243].mxu1  ;;  %9470 = vmatmul.mubr.bf16.gmra.mrb[108].mxu0 %v5406_v21  ;;  %v5337_v35 = vmax.f32 %v5169_v30, 0.0 }
 0x4eb   : > { %v6032_v40 = vmax.f32 %v5524_v32, 0.0  ;;  %v5164_v41 = vadd.f32 %v11882_v60, %v5163_v37  ;;  %v5335_v44 = vmax.f32 %v5161_v31, 0.0 }
 0x4ec   : > { %v11905_v42 = vpack.c.bf16 %v6034_v34, %v6033_v33  ;;  %v5338_v43 = vmax.f32 %v5172_v36, 0.0 }
 0x4ed   : > { %v11907_v46 = vpack.c.bf16 %v6032_v40, %v6031_v38  ;;  %v5336_v47 = vmax.f32 %v5164_v41, 0.0  ;;  %v9367_v48 = vpop.f32.mrb[4].mxu0 }
 0x4ee   : > { %v5408_v51 = vpack.c.bf16 %v5338_v43, %v5337_v35  ;;  %v5545_v53 = vadd.f32 %v9367_v48, %v11895_v13  ;;  %v5536_v55 = vpop.f32.mrb[5].mxu0 }
 0x4ef   : > { %v5407_v56 = vpack.c.bf16 %v5336_v47, %v5335_v44  ;;  %v5537_v58 = vadd.f32 %v11895_v13, %v5536_v55  ;;  %v9335_v19 = vpop.f32.mrb[244].mxu1  ;;  %v9368_v59 = vpop.f32.mrb[6].mxu0 }
 0x4f0   : > { %v5185_v29 = vadd.f32 %v11882_v60, %v9335_v19  ;;  %v5548_v61 = vadd.f32 %v9368_v59, %v11895_v13  ;;  %v5176_v62 = vpop.f32.mrb[245].mxu1  ;;  %v5539_v39 = vpop.f32.mrb[7].mxu0  ;;  %v6037_v2 = vmax.f32 %v5545_v53, 0.0 }
 0x4f1   : > { %v5177_v0 = vadd.f32 %v11882_v60, %v5176_v62  ;;  %v5540_v63 = vadd.f32 %v11895_v13, %v5539_v39  ;;  %v9336_v1 = vpop.f32.mrb[246].mxu1  ;;  %9473 = vmatprep.mubr.bf16.mxu0 %v5407_v56  ;;  %v6035_v25 = vmax.f32 %v5537_v58, 0.0 }
 0x4f2   : > { %v6038_v3 = vmax.f32 %v5548_v61, 0.0  ;;  %v5188_v57 = vadd.f32 %v11882_v60, %v9336_v1  ;;  %v5179_v4 = vpop.f32.mrb[247].mxu1  ;;  %9474 = vmatmul.mubr.bf16.gmra.mrb[112].mxu0 %v5408_v51  ;;  %v5341_v8 = vmax.f32 %v5185_v29, 0.0 }
 0x4f3   : > { %v6036_v5 = vmax.f32 %v5540_v63, 0.0  ;;  %v5180_v6 = vadd.f32 %v11882_v60, %v5179_v4  ;;  %v5339_v54 = vmax.f32 %v5177_v0, 0.0 }
 0x4f4   : > { %v6162_v9 = vpack.c.bf16 %v6038_v3, %v6037_v2  ;;  %v5342_v10 = vmax.f32 %v5188_v57, 0.0 }
 0x4f5   : > { %v6161_v11 = vpack.c.bf16 %v6036_v5, %v6035_v25  ;;  %v5340_v12 = vmax.f32 %v5180_v6, 0.0  ;;  %v9371_v49 = vpop.f32.mrb[8].mxu0 }
 0x4f6   : > { %v5410_v52 = vpack.c.bf16 %v5342_v10, %v5341_v8  ;;  %v5561_v14 = vadd.f32 %v9371_v49, %v11895_v13  ;;  %v5552_v16 = vpop.f32.mrb[9].mxu0 }
 0x4f7   : > { %v5409_v17 = vpack.c.bf16 %v5340_v12, %v5339_v54  ;;  %v5553_v18 = vadd.f32 %v11895_v13, %v5552_v16  ;;  %v9339_v20 = vpop.f32.mrb[248].mxu1  ;;  %v9372_v21 = vpop.f32.mrb[10].mxu0  ;;  %9509 = vmatprep.mubr.bf16.mxu1 %v6161_v11 }
 0x4f8   : > { %v5201_v22 = vadd.f32 %v11882_v60, %v9339_v20  ;;  %v5564_v23 = vadd.f32 %v9372_v21, %v11895_v13  ;;  %v5192_v24 = vpop.f32.mrb[249].mxu1  ;;  %v5555_v26 = vpop.f32.mrb[11].mxu0  ;;  %9510 = vmatmul.mubr.bf16.vlgmr.msra.gmra.mrb[0].mxu1 %v6162_v9  ;;  %v6041_v7 = vmax.f32 %v5561_v14, 0.0 }
 0x4f9   : > { %v5193_v27 = vadd.f32 %v11882_v60, %v5192_v24  ;;  %v5556_v28 = vadd.f32 %v11895_v13, %v5555_v26  ;;  %v9340_v30 = vpop.f32.mrb[250].mxu1  ;;  %9477 = vmatprep.mubr.bf16.mxu0 %v5409_v17  ;;  %v6039_v32 = vmax.f32 %v5553_v18, 0.0 }
 0x4fa   : > { %v6042_v45 = vmax.f32 %v5564_v23, 0.0  ;;  %v5204_v50 = vadd.f32 %v11882_v60, %v9340_v30  ;;  %v5195_v31 = vpop.f32.mrb[251].mxu1  ;;  %9478 = vmatmul.mubr.bf16.gmra.mrb[116].mxu0 %v5410_v52  ;;  %v5345_v34 = vmax.f32 %v5201_v22, 0.0 }
 0x4fb   : > { %v6040_v15 = vmax.f32 %v5556_v28, 0.0  ;;  %v5196_v33 = vadd.f32 %v11882_v60, %v5195_v31  ;;  %v5343_v38 = vmax.f32 %v5193_v27, 0.0 }
 0x4fc   : > { %v6164_v36 = vpack.c.bf16 %v6042_v45, %v6041_v7  ;;  %v5346_v37 = vmax.f32 %v5204_v50, 0.0 }
 0x4fd   : > { %v6163_v40 = vpack.c.bf16 %v6040_v15, %v6039_v32  ;;  %v5344_v41 = vmax.f32 %v5196_v33, 0.0  ;;  %v9375_v35 = vpop.f32.mrb[12].mxu0 }
 0x4fe   : > { %v5412_v43 = vpack.c.bf16 %v5346_v37, %v5345_v34  ;;  %v5577_v44 = vadd.f32 %v9375_v35, %v11895_v13  ;;  %v5568_v47 = vpop.f32.mrb[13].mxu0 }
 0x4ff   : > { %v5411_v48 = vpack.c.bf16 %v5344_v41, %v5343_v38  ;;  %v5569_v51 = vadd.f32 %v11895_v13, %v5568_v47  ;;  %v9343_v53 = vpop.f32.mrb[252].mxu1  ;;  %v9376_v55 = vpop.f32.mrb[14].mxu0  ;;  %9513 = vmatprep.mubr.bf16.mxu1 %v6163_v40 }
 0x500   : > { %v5217_v56 = vadd.f32 %v11882_v60, %v9343_v53  ;;  %v5580_v58 = vadd.f32 %v9376_v55, %v11895_v13  ;;  %v5208_v19 = vpop.f32.mrb[253].mxu1  ;;  %v5571_v59 = vpop.f32.mrb[15].mxu0  ;;  %9514 = vmatmul.mubr.bf16.gmra.mrb[4].mxu1 %v6164_v36  ;;  %v6045_v39 = vmax.f32 %v5577_v44, 0.0 }
 0x501   : > { %v5209_v29 = vadd.f32 %v11882_v60, %v5208_v19  ;;  %v5572_v61 = vadd.f32 %v11895_v13, %v5571_v59  ;;  %v9344_v62 = vpop.f32.mrb[254].mxu1  ;;  %9481 = vmatprep.mubr.bf16.mxu0 %v5411_v48  ;;  %v6043_v2 = vmax.f32 %v5569_v51, 0.0 }
 0x502   : > { %v6046_v0 = vmax.f32 %v5580_v58, 0.0  ;;  %v5220_v63 = vadd.f32 %v11882_v60, %v9344_v62  ;;  %v5211_v1 = vpop.f32.mrb[255].mxu1  ;;  %9482 = vmatmul.mubr.bf16.gmra.mrb[120].mxu0 %v5412_v43  ;;  %v5349_v4 = vmax.f32 %v5217_v56, 0.0 }
 0x503   : > { %v6044_v3 = vmax.f32 %v5572_v61, 0.0  ;;  %v5212_v57 = vadd.f32 %v11882_v60, %v5211_v1  ;;  %v5347_v6 = vmax.f32 %v5209_v29, 0.0 }
 0x504   : > { %v6166_v25 = vpack.c.bf16 %v6046_v0, %v6045_v39  ;;  %v5350_v5 = vmax.f32 %v5220_v63, 0.0 }
 0x505   : > { %v6165_v8 = vpack.c.bf16 %v6044_v3, %v6043_v2  ;;  %v5348_v9 = vmax.f32 %v5212_v57, 0.0  ;;  %v9379_v10 = vpop.f32.mrb[16].mxu0 }
 0x506   : > { %v5414_v54 = vpack.c.bf16 %v5350_v5, %v5349_v4  ;;  %v5593_v11 = vadd.f32 %v9379_v10, %v11895_v13  ;;  %v5584_v12 = vpop.f32.mrb[17].mxu0 }
 0x507   : > { %v5413_v49 = vpack.c.bf16 %v5348_v9, %v5347_v6  ;;  %v5585_v52 = vadd.f32 %v11895_v13, %v5584_v12  ;;  %v9380_v14 = vpop.f32.mrb[18].mxu0  ;;  %9517 = vmatprep.mubr.bf16.mxu1 %v6165_v8 }
 0x508   : > { %v5596_v16 = vadd.f32 %v9380_v14, %v11895_v13  ;;  %v5587_v17 = vpop.f32.mrb[19].mxu0  ;;  %9518 = vmatmul.mubr.bf16.gmra.mrb[8].mxu1 %v6166_v25  ;;  %v6049_v18 = vmax.f32 %v5593_v11, 0.0 }
 0x509   : > { %v5588_v60 = vadd.f32 %v11895_v13, %v5587_v17  ;;  %9485 = vmatprep.mubr.bf16.mxu0 %v5413_v49  ;;  %v6047_v21 = vmax.f32 %v5585_v52, 0.0 }
 0x50a   : > { %v6050_v20 = vmax.f32 %v5596_v16, 0.0  ;;  %9486 = vmatmul.mubr.bf16.gmra.mrb[124].mxu0 %v5414_v54 }
 0x50b   : > { %v6048_v22 = vmax.f32 %v5588_v60, 0.0  ;;  %9505 = vmatprep.mubr.bf16.mxu0 %v11907_v46 }
 0x50c   : > { %v6168_v23 = vpack.c.bf16 %v6050_v20, %v6049_v18 }
 0x50d   : > { %v6167_v24 = vpack.c.bf16 %v6048_v22, %v6047_v21  ;;  %v9383_v26 = vpop.f32.mrb[20].mxu0 }
 0x50e   : > { %v5609_v27 = vadd.f32 %v9383_v26, %v11895_v13  ;;  %v5600_v28 = vpop.f32.mrb[21].mxu0 }
 0x50f   : > { %v5601_v30 = vadd.f32 %v11895_v13, %v5600_v28  ;;  %v9384_v7 = vpop.f32.mrb[22].mxu0  ;;  %9521 = vmatprep.mubr.bf16.mxu1 %v6167_v24 }
 0x510   : > { %v5612_v45 = vadd.f32 %v9384_v7, %v11895_v13  ;;  %v5603_v50 = vpop.f32.mrb[23].mxu0  ;;  %9522 = vmatmul.mubr.bf16.gmra.mrb[12].mxu1 %v6168_v23  ;;  %v6053_v32 = vmax.f32 %v5609_v27, 0.0 }
 0x511   : > { %v5604_v31 = vadd.f32 %v11895_v13, %v5603_v50  ;;  %v6051_v46 = vmax.f32 %v5601_v30, 0.0 }
 0x512   : > { %v6054_v15 = vmax.f32 %v5612_v45, 0.0  ;;  %9506 = vmatmul.mubr.bf16.vlgmr.msra.gmra.mrb[128].mxu0 %v11905_v42 }
 0x513   : > { %v6052_v33 = vmax.f32 %v5604_v31, 0.0 }
 0x514   : > { %v6170_v34 = vpack.c.bf16 %v6054_v15, %v6053_v32 }
 0x515   : > { %v6169_v36 = vpack.c.bf16 %v6052_v33, %v6051_v46  ;;  %v9387_v37 = vpop.f32.mrb[24].mxu0 }
 0x516   : > { %v5625_v38 = vadd.f32 %v9387_v37, %v11895_v13  ;;  %v5616_v40 = vpop.f32.mrb[25].mxu0 }
 0x517   : > { %v5617_v41 = vadd.f32 %v11895_v13, %v5616_v40  ;;  %v9388_v35 = vpop.f32.mrb[26].mxu0  ;;  %9525 = vmatprep.mubr.bf16.mxu1 %v6169_v36 }
 0x518   : > { %v5628_v43 = vadd.f32 %v9388_v35, %v11895_v13  ;;  %v5619_v44 = vpop.f32.mrb[27].mxu0  ;;  %9526 = vmatmul.mubr.bf16.gmra.mrb[16].mxu1 %v6170_v34  ;;  %v6057_v48 = vmax.f32 %v5625_v38, 0.0 }
 0x519   : > { %v5620_v47 = vadd.f32 %v11895_v13, %v5619_v44  ;;  %v6055_v51 = vmax.f32 %v5617_v41, 0.0 }
 0x51a   : > { %v6058_v42 = vmax.f32 %v5628_v43, 0.0 }
 0x51b   : > { %v6056_v53 = vmax.f32 %v5620_v47, 0.0 }
 0x51c   : > { %v6172_v55 = vpack.c.bf16 %v6058_v42, %v6057_v48 }
 0x51d   : > { %v6171_v56 = vpack.c.bf16 %v6056_v53, %v6055_v51  ;;  %v9391_v58 = vpop.f32.mrb[28].mxu0 }
 0x51e   : > { %v5641_v19 = vadd.f32 %v9391_v58, %v11895_v13  ;;  %v5632_v59 = vpop.f32.mrb[29].mxu0 }
 0x51f   : > { %v5633_v29 = vadd.f32 %v11895_v13, %v5632_v59  ;;  %v9392_v61 = vpop.f32.mrb[30].mxu0  ;;  %9529 = vmatprep.mubr.bf16.mxu1 %v6171_v56 }
 0x520   : > { %v5644_v62 = vadd.f32 %v9392_v61, %v11895_v13  ;;  %v5635_v39 = vpop.f32.mrb[31].mxu0  ;;  %9530 = vmatmul.mubr.bf16.gmra.mrb[20].mxu1 %v6172_v55  ;;  %v6061_v63 = vmax.f32 %v5641_v19, 0.0 }
 0x521   : > { %v5636_v0 = vadd.f32 %v11895_v13, %v5635_v39  ;;  %v6059_v2 = vmax.f32 %v5633_v29, 0.0 }
 0x522   : > { %v6062_v1 = vmax.f32 %v5644_v62, 0.0 }
 0x523   : > { %v6060_v3 = vmax.f32 %v5636_v0, 0.0 }
 0x524   : > { %v6174_v57 = vpack.c.bf16 %v6062_v1, %v6061_v63 }
 0x525   : > { %v6173_v4 = vpack.c.bf16 %v6060_v3, %v6059_v2  ;;  %v9395_v25 = vpop.f32.mrb[32].mxu0 }
 0x526   : > { %v5657_v5 = vadd.f32 %v9395_v25, %v11895_v13  ;;  %v5648_v6 = vpop.f32.mrb[33].mxu0 }
 0x527   : > { %v5649_v8 = vadd.f32 %v11895_v13, %v5648_v6  ;;  %v9396_v9 = vpop.f32.mrb[34].mxu0  ;;  %9533 = vmatprep.mubr.bf16.mxu1 %v6173_v4 }
 0x528   : > { %v5660_v10 = vadd.f32 %v9396_v9, %v11895_v13  ;;  %v5651_v54 = vpop.f32.mrb[35].mxu0  ;;  %9534 = vmatmul.mubr.bf16.gmra.mrb[24].mxu1 %v6174_v57  ;;  %v6065_v12 = vmax.f32 %v5657_v5, 0.0 }
 0x529   : > { %v5652_v11 = vadd.f32 %v11895_v13, %v5651_v54  ;;  %v6063_v52 = vmax.f32 %v5649_v8, 0.0 }
 0x52a   : > { %v6066_v49 = vmax.f32 %v5660_v10, 0.0 }
 0x52b   : > { %v6064_v14 = vmax.f32 %v5652_v11, 0.0 }
 0x52c   : > { %v6176_v16 = vpack.c.bf16 %v6066_v49, %v6065_v12 }
 0x52d   : > { %v6175_v17 = vpack.c.bf16 %v6064_v14, %v6063_v52  ;;  %v9399_v60 = vpop.f32.mrb[36].mxu0 }
 0x52e   : > { %v5673_v18 = vadd.f32 %v9399_v60, %v11895_v13  ;;  %v5664_v20 = vpop.f32.mrb[37].mxu0 }
 0x52f   : > { %v5665_v21 = vadd.f32 %v11895_v13, %v5664_v20  ;;  %v9400_v22 = vpop.f32.mrb[38].mxu0  ;;  %9537 = vmatprep.mubr.bf16.mxu1 %v6175_v17 }
 0x530   : > { %v5676_v23 = vadd.f32 %v9400_v22, %v11895_v13  ;;  %v5667_v24 = vpop.f32.mrb[39].mxu0  ;;  %9538 = vmatmul.mubr.bf16.gmra.mrb[28].mxu1 %v6176_v16  ;;  %v6069_v27 = vmax.f32 %v5673_v18, 0.0 }
 0x531   : > { %v5668_v26 = vadd.f32 %v11895_v13, %v5667_v24  ;;  %v6067_v30 = vmax.f32 %v5665_v21, 0.0 }
 0x532   : > { %v6070_v28 = vmax.f32 %v5676_v23, 0.0 }
 0x533   : > { %v6068_v7 = vmax.f32 %v5668_v26, 0.0 }
 0x534   : > { %v6178_v45 = vpack.c.bf16 %v6070_v28, %v6069_v27 }
 0x535   : > { %v6177_v50 = vpack.c.bf16 %v6068_v7, %v6067_v30  ;;  %v9403_v31 = vpop.f32.mrb[40].mxu0 }
 0x536   : > { %v5689_v32 = vadd.f32 %v9403_v31, %v11895_v13  ;;  %v5680_v15 = vpop.f32.mrb[41].mxu0 }
 0x537   : > { %v5681_v46 = vadd.f32 %v11895_v13, %v5680_v15  ;;  %v9404_v33 = vpop.f32.mrb[42].mxu0  ;;  %9541 = vmatprep.mubr.bf16.mxu1 %v6177_v50 }
 0x538   : > { %v5692_v34 = vadd.f32 %v9404_v33, %v11895_v13  ;;  %v5683_v36 = vpop.f32.mrb[43].mxu0  ;;  %9542 = vmatmul.mubr.bf16.gmra.mrb[32].mxu1 %v6178_v45  ;;  %v6073_v38 = vmax.f32 %v5689_v32, 0.0 }
 0x539   : > { %v5684_v37 = vadd.f32 %v11895_v13, %v5683_v36  ;;  %v6071_v41 = vmax.f32 %v5681_v46, 0.0 }
 0x53a   : > { %v6074_v40 = vmax.f32 %v5692_v34, 0.0 }
 0x53b   : > { %v6072_v35 = vmax.f32 %v5684_v37, 0.0 }
 0x53c   : > { %v6180_v43 = vpack.c.bf16 %v6074_v40, %v6073_v38 }
 0x53d   : > { %v6179_v44 = vpack.c.bf16 %v6072_v35, %v6071_v41  ;;  %v9407_v47 = vpop.f32.mrb[44].mxu0 }
 0x53e   : > { %v5705_v48 = vadd.f32 %v9407_v47, %v11895_v13  ;;  %v5696_v42 = vpop.f32.mrb[45].mxu0 }
 0x53f   : > { %v5697_v51 = vadd.f32 %v11895_v13, %v5696_v42  ;;  %v9408_v53 = vpop.f32.mrb[46].mxu0  ;;  %9545 = vmatprep.mubr.bf16.mxu1 %v6179_v44 }
 0x540   : > { %v5708_v55 = vadd.f32 %v9408_v53, %v11895_v13  ;;  %v5699_v56 = vpop.f32.mrb[47].mxu0  ;;  %9546 = vmatmul.mubr.bf16.gmra.mrb[36].mxu1 %v6180_v43  ;;  %v6077_v19 = vmax.f32 %v5705_v48, 0.0 }
 0x541   : > { %v5700_v58 = vadd.f32 %v11895_v13, %v5699_v56  ;;  %v6075_v29 = vmax.f32 %v5697_v51, 0.0 }
 0x542   : > { %v6078_v59 = vmax.f32 %v5708_v55, 0.0 }
 0x543   : > { %v6076_v61 = vmax.f32 %v5700_v58, 0.0 }
 0x544   : > { %v6182_v62 = vpack.c.bf16 %v6078_v59, %v6077_v19 }
 0x545   : > { %v6181_v39 = vpack.c.bf16 %v6076_v61, %v6075_v29  ;;  %v9411_v0 = vpop.f32.mrb[48].mxu0 }
 0x546   : > { %v5721_v63 = vadd.f32 %v9411_v0, %v11895_v13  ;;  %v5712_v1 = vpop.f32.mrb[49].mxu0 }
 0x547   : > { %v5713_v2 = vadd.f32 %v11895_v13, %v5712_v1  ;;  %v9412_v3 = vpop.f32.mrb[50].mxu0  ;;  %9549 = vmatprep.mubr.bf16.mxu1 %v6181_v39 }
 0x548   : > { %v5724_v57 = vadd.f32 %v9412_v3, %v11895_v13  ;;  %v5715_v4 = vpop.f32.mrb[51].mxu0  ;;  %9550 = vmatmul.mubr.bf16.gmra.mrb[40].mxu1 %v6182_v62  ;;  %v6081_v5 = vmax.f32 %v5721_v63, 0.0 }
 0x549   : > { %v5716_v25 = vadd.f32 %v11895_v13, %v5715_v4  ;;  %v6079_v8 = vmax.f32 %v5713_v2, 0.0 }
 0x54a   : > { %v6082_v6 = vmax.f32 %v5724_v57, 0.0 }
 0x54b   : > { %v6080_v9 = vmax.f32 %v5716_v25, 0.0 }
 0x54c   : > { %v6184_v10 = vpack.c.bf16 %v6082_v6, %v6081_v5 }
 0x54d   : > { %v6183_v54 = vpack.c.bf16 %v6080_v9, %v6079_v8  ;;  %v9415_v11 = vpop.f32.mrb[52].mxu0 }
 0x54e   : > { %v5737_v12 = vadd.f32 %v9415_v11, %v11895_v13  ;;  %v5728_v49 = vpop.f32.mrb[53].mxu0 }
 0x54f   : > { %v5729_v52 = vadd.f32 %v11895_v13, %v5728_v49  ;;  %v9416_v14 = vpop.f32.mrb[54].mxu0  ;;  %9553 = vmatprep.mubr.bf16.mxu1 %v6183_v54 }
 0x550   : > { %v5740_v16 = vadd.f32 %v9416_v14, %v11895_v13  ;;  %v5731_v17 = vpop.f32.mrb[55].mxu0  ;;  %9554 = vmatmul.mubr.bf16.gmra.mrb[44].mxu1 %v6184_v10  ;;  %v6085_v18 = vmax.f32 %v5737_v12, 0.0 }
 0x551   : > { %v5732_v60 = vadd.f32 %v11895_v13, %v5731_v17  ;;  %v6083_v21 = vmax.f32 %v5729_v52, 0.0 }
 0x552   : > { %v6086_v20 = vmax.f32 %v5740_v16, 0.0 }
 0x553   : > { %v6084_v22 = vmax.f32 %v5732_v60, 0.0 }
 0x554   : > { %v6186_v23 = vpack.c.bf16 %v6086_v20, %v6085_v18 }
 0x555   : > { %v6185_v24 = vpack.c.bf16 %v6084_v22, %v6083_v21  ;;  %v9419_v26 = vpop.f32.mrb[56].mxu0 }
 0x556   : > { %v5753_v27 = vadd.f32 %v9419_v26, %v11895_v13  ;;  %v5744_v28 = vpop.f32.mrb[57].mxu0 }
 0x557   : > { %v5745_v30 = vadd.f32 %v11895_v13, %v5744_v28  ;;  %v9420_v7 = vpop.f32.mrb[58].mxu0  ;;  %9557 = vmatprep.mubr.bf16.mxu1 %v6185_v24 }
 0x558   : > { %v5756_v45 = vadd.f32 %v9420_v7, %v11895_v13  ;;  %v5747_v50 = vpop.f32.mrb[59].mxu0  ;;  %9558 = vmatmul.mubr.bf16.gmra.mrb[48].mxu1 %v6186_v23  ;;  %v6089_v32 = vmax.f32 %v5753_v27, 0.0 }
 0x559   : > { %v5748_v31 = vadd.f32 %v11895_v13, %v5747_v50  ;;  %v6087_v46 = vmax.f32 %v5745_v30, 0.0 }
 0x55a   : > { %v6090_v15 = vmax.f32 %v5756_v45, 0.0 }
 0x55b   : > { %v6088_v33 = vmax.f32 %v5748_v31, 0.0 }
 0x55c   : > { %v6188_v34 = vpack.c.bf16 %v6090_v15, %v6089_v32 }
 0x55d   : > { %v6187_v36 = vpack.c.bf16 %v6088_v33, %v6087_v46  ;;  %v9423_v37 = vpop.f32.mrb[60].mxu0 }
 0x55e   : > { %v5769_v38 = vadd.f32 %v9423_v37, %v11895_v13  ;;  %v5760_v40 = vpop.f32.mrb[61].mxu0 }
 0x55f   : > { %v5761_v41 = vadd.f32 %v11895_v13, %v5760_v40  ;;  %v9424_v35 = vpop.f32.mrb[62].mxu0  ;;  %9561 = vmatprep.mubr.bf16.mxu1 %v6187_v36 }
 0x560   : > { %v5772_v43 = vadd.f32 %v9424_v35, %v11895_v13  ;;  %v5763_v44 = vpop.f32.mrb[63].mxu0  ;;  %9562 = vmatmul.mubr.bf16.gmra.mrb[52].mxu1 %v6188_v34  ;;  %v6093_v48 = vmax.f32 %v5769_v38, 0.0 }
 0x561   : > { %v5764_v47 = vadd.f32 %v11895_v13, %v5763_v44  ;;  %v6091_v51 = vmax.f32 %v5761_v41, 0.0 }
 0x562   : > { %v6094_v42 = vmax.f32 %v5772_v43, 0.0 }
 0x563   : > { %v6092_v53 = vmax.f32 %v5764_v47, 0.0 }
 0x564   : > { %v6190_v55 = vpack.c.bf16 %v6094_v42, %v6093_v48 }
 0x565   : > { %v6189_v56 = vpack.c.bf16 %v6092_v53, %v6091_v51  ;;  %v9427_v58 = vpop.f32.mrb[64].mxu0 }
 0x566   : > { %v5785_v19 = vadd.f32 %v9427_v58, %v11895_v13  ;;  %v5776_v59 = vpop.f32.mrb[65].mxu0 }
 0x567   : > { %v5777_v29 = vadd.f32 %v11895_v13, %v5776_v59  ;;  %v9428_v61 = vpop.f32.mrb[66].mxu0  ;;  %9565 = vmatprep.mubr.bf16.mxu1 %v6189_v56 }
 0x568   : > { %v5788_v62 = vadd.f32 %v9428_v61, %v11895_v13  ;;  %v5779_v39 = vpop.f32.mrb[67].mxu0  ;;  %9566 = vmatmul.mubr.bf16.gmra.mrb[56].mxu1 %v6190_v55  ;;  %v6097_v63 = vmax.f32 %v5785_v19, 0.0 }
 0x569   : > { %v5780_v0 = vadd.f32 %v11895_v13, %v5779_v39  ;;  %v6095_v2 = vmax.f32 %v5777_v29, 0.0 }
 0x56a   : > { %v6098_v1 = vmax.f32 %v5788_v62, 0.0 }
 0x56b   : > { %v6096_v3 = vmax.f32 %v5780_v0, 0.0 }
 0x56c   : > { %v6192_v57 = vpack.c.bf16 %v6098_v1, %v6097_v63 }
 0x56d   : > { %v6191_v4 = vpack.c.bf16 %v6096_v3, %v6095_v2  ;;  %v9431_v25 = vpop.f32.mrb[68].mxu0 }
 0x56e   : > { %v5801_v5 = vadd.f32 %v9431_v25, %v11895_v13  ;;  %v5792_v6 = vpop.f32.mrb[69].mxu0 }
 0x56f   : > { %v5793_v8 = vadd.f32 %v11895_v13, %v5792_v6  ;;  %v9432_v9 = vpop.f32.mrb[70].mxu0  ;;  %9569 = vmatprep.mubr.bf16.mxu1 %v6191_v4 }
 0x570   : > { %v5804_v10 = vadd.f32 %v9432_v9, %v11895_v13  ;;  %v5795_v54 = vpop.f32.mrb[71].mxu0  ;;  %9570 = vmatmul.mubr.bf16.gmra.mrb[60].mxu1 %v6192_v57  ;;  %v6101_v12 = vmax.f32 %v5801_v5, 0.0 }
 0x571   : > { %v5796_v11 = vadd.f32 %v11895_v13, %v5795_v54  ;;  %v6099_v52 = vmax.f32 %v5793_v8, 0.0 }
 0x572   : > { %v6102_v49 = vmax.f32 %v5804_v10, 0.0 }
 0x573   : > { %v6100_v14 = vmax.f32 %v5796_v11, 0.0 }
 0x574   : > { %v6194_v16 = vpack.c.bf16 %v6102_v49, %v6101_v12 }
 0x575   : > { %v6193_v17 = vpack.c.bf16 %v6100_v14, %v6099_v52  ;;  %v9435_v60 = vpop.f32.mrb[72].mxu0 }
 0x576   : > { %v5817_v18 = vadd.f32 %v9435_v60, %v11895_v13  ;;  %v5808_v20 = vpop.f32.mrb[73].mxu0 }
 0x577   : > { %v5809_v21 = vadd.f32 %v11895_v13, %v5808_v20  ;;  %v9436_v22 = vpop.f32.mrb[74].mxu0  ;;  %9573 = vmatprep.mubr.bf16.mxu1 %v6193_v17 }
 0x578   : > { %v5820_v23 = vadd.f32 %v9436_v22, %v11895_v13  ;;  %v5811_v24 = vpop.f32.mrb[75].mxu0  ;;  %9574 = vmatmul.mubr.bf16.gmra.mrb[64].mxu1 %v6194_v16  ;;  %v6105_v27 = vmax.f32 %v5817_v18, 0.0 }
 0x579   : > { %v5812_v26 = vadd.f32 %v11895_v13, %v5811_v24  ;;  %v6103_v30 = vmax.f32 %v5809_v21, 0.0 }
 0x57a   : > { %v6106_v28 = vmax.f32 %v5820_v23, 0.0 }
 0x57b   : > { %v6104_v7 = vmax.f32 %v5812_v26, 0.0 }
 0x57c   : > { %v6196_v45 = vpack.c.bf16 %v6106_v28, %v6105_v27 }
 0x57d   : > { %v6195_v50 = vpack.c.bf16 %v6104_v7, %v6103_v30  ;;  %v9439_v31 = vpop.f32.mrb[76].mxu0 }
 0x57e   : > { %v5833_v32 = vadd.f32 %v9439_v31, %v11895_v13  ;;  %v5824_v15 = vpop.f32.mrb[77].mxu0 }
 0x57f   : > { %v5825_v46 = vadd.f32 %v11895_v13, %v5824_v15  ;;  %v9440_v33 = vpop.f32.mrb[78].mxu0  ;;  %9577 = vmatprep.mubr.bf16.mxu1 %v6195_v50 }
 0x580   : > { %v5836_v34 = vadd.f32 %v9440_v33, %v11895_v13  ;;  %v5827_v36 = vpop.f32.mrb[79].mxu0  ;;  %9578 = vmatmul.mubr.bf16.gmra.mrb[68].mxu1 %v6196_v45  ;;  %v6109_v38 = vmax.f32 %v5833_v32, 0.0 }
 0x581   : > { %v5828_v37 = vadd.f32 %v11895_v13, %v5827_v36  ;;  %v6107_v41 = vmax.f32 %v5825_v46, 0.0 }
 0x582   : > { %v6110_v40 = vmax.f32 %v5836_v34, 0.0 }
 0x583   : > { %v6108_v35 = vmax.f32 %v5828_v37, 0.0 }
 0x584   : > { %v6198_v43 = vpack.c.bf16 %v6110_v40, %v6109_v38 }
 0x585   : > { %v6197_v44 = vpack.c.bf16 %v6108_v35, %v6107_v41  ;;  %v9443_v47 = vpop.f32.mrb[80].mxu0 }
 0x586   : > { %v5849_v48 = vadd.f32 %v9443_v47, %v11895_v13  ;;  %v5840_v42 = vpop.f32.mrb[81].mxu0 }
 0x587   : > { %v5841_v51 = vadd.f32 %v11895_v13, %v5840_v42  ;;  %v9444_v53 = vpop.f32.mrb[82].mxu0  ;;  %9581 = vmatprep.mubr.bf16.mxu1 %v6197_v44 }
 0x588   : > { %v5852_v55 = vadd.f32 %v9444_v53, %v11895_v13  ;;  %v5843_v56 = vpop.f32.mrb[83].mxu0  ;;  %9582 = vmatmul.mubr.bf16.gmra.mrb[72].mxu1 %v6198_v43  ;;  %v6113_v19 = vmax.f32 %v5849_v48, 0.0 }
 0x589   : > { %v5844_v58 = vadd.f32 %v11895_v13, %v5843_v56  ;;  %v6111_v29 = vmax.f32 %v5841_v51, 0.0 }
 0x58a   : > { %v6114_v59 = vmax.f32 %v5852_v55, 0.0 }
 0x58b   : > { %v6112_v61 = vmax.f32 %v5844_v58, 0.0 }
 0x58c   : > { %v6200_v62 = vpack.c.bf16 %v6114_v59, %v6113_v19 }
 0x58d   : > { %v6199_v39 = vpack.c.bf16 %v6112_v61, %v6111_v29  ;;  %v9447_v0 = vpop.f32.mrb[84].mxu0 }
 0x58e   : > { %v5865_v63 = vadd.f32 %v9447_v0, %v11895_v13  ;;  %v5856_v1 = vpop.f32.mrb[85].mxu0 }
 0x58f   : > { %v5857_v2 = vadd.f32 %v11895_v13, %v5856_v1  ;;  %v9448_v3 = vpop.f32.mrb[86].mxu0  ;;  %9585 = vmatprep.mubr.bf16.mxu1 %v6199_v39 }
 0x590   : > { %v5868_v57 = vadd.f32 %v9448_v3, %v11895_v13  ;;  %v5859_v4 = vpop.f32.mrb[87].mxu0  ;;  %9586 = vmatmul.mubr.bf16.gmra.mrb[76].mxu1 %v6200_v62  ;;  %v6117_v5 = vmax.f32 %v5865_v63, 0.0 }
 0x591   : > { %v5860_v25 = vadd.f32 %v11895_v13, %v5859_v4  ;;  %v6115_v8 = vmax.f32 %v5857_v2, 0.0 }
 0x592   : > { %v6118_v6 = vmax.f32 %v5868_v57, 0.0 }
 0x593   : > { %v6116_v9 = vmax.f32 %v5860_v25, 0.0 }
 0x594   : > { %v6202_v10 = vpack.c.bf16 %v6118_v6, %v6117_v5 }
 0x595   : > { %v6201_v54 = vpack.c.bf16 %v6116_v9, %v6115_v8  ;;  %v9451_v11 = vpop.f32.mrb[88].mxu0 }
 0x596   : > { %v5881_v12 = vadd.f32 %v9451_v11, %v11895_v13  ;;  %v5872_v49 = vpop.f32.mrb[89].mxu0 }
 0x597   : > { %v5873_v52 = vadd.f32 %v11895_v13, %v5872_v49  ;;  %v9452_v14 = vpop.f32.mrb[90].mxu0  ;;  %9589 = vmatprep.mubr.bf16.mxu1 %v6201_v54 }
 0x598   : > { %v5884_v16 = vadd.f32 %v9452_v14, %v11895_v13  ;;  %v5875_v17 = vpop.f32.mrb[91].mxu0  ;;  %9590 = vmatmul.mubr.bf16.gmra.mrb[80].mxu1 %v6202_v10  ;;  %v6121_v18 = vmax.f32 %v5881_v12, 0.0 }
 0x599   : > { %v5876_v60 = vadd.f32 %v11895_v13, %v5875_v17  ;;  %v6119_v21 = vmax.f32 %v5873_v52, 0.0 }
 0x59a   : > { %v6122_v20 = vmax.f32 %v5884_v16, 0.0 }
 0x59b   : > { %v6120_v22 = vmax.f32 %v5876_v60, 0.0 }
 0x59c   : > { %v6204_v23 = vpack.c.bf16 %v6122_v20, %v6121_v18 }
 0x59d   : > { %v6203_v24 = vpack.c.bf16 %v6120_v22, %v6119_v21  ;;  %v9455_v26 = vpop.f32.mrb[92].mxu0 }
 0x59e   : > { %v5897_v27 = vadd.f32 %v9455_v26, %v11895_v13  ;;  %v5888_v28 = vpop.f32.mrb[93].mxu0  ;;  %v12033_v26 = vld [vmem:[%s12318_s12] ss:$0 sm:$0xff] }
 0x59f   : > { %v5889_v30 = vadd.f32 %v11895_v13, %v5888_v28  ;;  %v9456_v7 = vpop.f32.mrb[94].mxu0  ;;  %9593 = vmatprep.mubr.bf16.mxu1 %v6203_v24 }
 0x5a0   : > { %v5900_v45 = vadd.f32 %v9456_v7, %v11895_v13  ;;  %v5891_v50 = vpop.f32.mrb[95].mxu0  ;;  %9594 = vmatmul.mubr.bf16.gmra.mrb[84].mxu1 %v6204_v23  ;;  %v6125_v32 = vmax.f32 %v5897_v27, 0.0 }
 0x5a1   : > { %v5892_v31 = vadd.f32 %v11895_v13, %v5891_v50  ;;  %v6123_v46 = vmax.f32 %v5889_v30, 0.0 }
 0x5a2   : > { %v6126_v15 = vmax.f32 %v5900_v45, 0.0 }
 0x5a3   : > { %v6124_v33 = vmax.f32 %v5892_v31, 0.0 }
 0x5a4   : > { %v6206_v34 = vpack.c.bf16 %v6126_v15, %v6125_v32 }
 0x5a5   : > { %v6205_v36 = vpack.c.bf16 %v6124_v33, %v6123_v46  ;;  %v9459_v37 = vpop.f32.mrb[96].mxu0 }
 0x5a6   : > { %v5913_v38 = vadd.f32 %v9459_v37, %v11895_v13  ;;  %v5904_v40 = vpop.f32.mrb[97].mxu0 }
 0x5a7   : > { %v5905_v41 = vadd.f32 %v11895_v13, %v5904_v40  ;;  %v9460_v35 = vpop.f32.mrb[98].mxu0  ;;  %9597 = vmatprep.mubr.bf16.mxu1 %v6205_v36 }
 0x5a8   : > { %v5916_v43 = vadd.f32 %v9460_v35, %v11895_v13  ;;  %v5907_v44 = vpop.f32.mrb[99].mxu0  ;;  %9598 = vmatmul.mubr.bf16.gmra.mrb[88].mxu1 %v6206_v34  ;;  %v6129_v48 = vmax.f32 %v5913_v38, 0.0 }
 0x5a9   : > { %v5908_v47 = vadd.f32 %v11895_v13, %v5907_v44  ;;  %v6127_v51 = vmax.f32 %v5905_v41, 0.0 }
 0x5aa   : > { %v6130_v42 = vmax.f32 %v5916_v43, 0.0  ;;  %v12044_v43 = vld [vmem:[%s12320_s14] ss:$0 sm:$0xff] }
 0x5ab   : > { %v6128_v53 = vmax.f32 %v5908_v47, 0.0 }
 0x5ac   : > { %v6208_v55 = vpack.c.bf16 %v6130_v42, %v6129_v48 }
 0x5ad   : > { %v6207_v56 = vpack.c.bf16 %v6128_v53, %v6127_v51  ;;  %v9463_v58 = vpop.f32.mrb[100].mxu0 }
 0x5ae   : > { %v5929_v19 = vadd.f32 %v9463_v58, %v11895_v13  ;;  %v5920_v59 = vpop.f32.mrb[101].mxu0 }
 0x5af   : > { %v5921_v29 = vadd.f32 %v11895_v13, %v5920_v59  ;;  %v9464_v61 = vpop.f32.mrb[102].mxu0  ;;  %9601 = vmatprep.mubr.bf16.mxu1 %v6207_v56 }
 0x5b0   : > { %v5932_v62 = vadd.f32 %v9464_v61, %v11895_v13  ;;  %v5923_v39 = vpop.f32.mrb[103].mxu0  ;;  %9602 = vmatmul.mubr.bf16.gmra.mrb[92].mxu1 %v6208_v55  ;;  %v6133_v63 = vmax.f32 %v5929_v19, 0.0 }
 0x5b1   : > { %v5924_v0 = vadd.f32 %v11895_v13, %v5923_v39  ;;  %v6131_v2 = vmax.f32 %v5921_v29, 0.0 }
 0x5b2   : > { %v6134_v1 = vmax.f32 %v5932_v62, 0.0 }
 0x5b3   : > { %v6132_v3 = vmax.f32 %v5924_v0, 0.0 }
 0x5b4   : > { %v6210_v57 = vpack.c.bf16 %v6134_v1, %v6133_v63 }
 0x5b5   : > { %v6209_v4 = vpack.c.bf16 %v6132_v3, %v6131_v2  ;;  %v9467_v25 = vpop.f32.mrb[104].mxu0 }
 0x5b6   : > { %v5945_v5 = vadd.f32 %v9467_v25, %v11895_v13  ;;  %v5936_v6 = vpop.f32.mrb[105].mxu0 }
 0x5b7   : > { %v5937_v8 = vadd.f32 %v11895_v13, %v5936_v6  ;;  %v9468_v9 = vpop.f32.mrb[106].mxu0  ;;  %9605 = vmatprep.mubr.bf16.mxu1 %v6209_v4 }
 0x5b8   : > { %v5948_v10 = vadd.f32 %v9468_v9, %v11895_v13  ;;  %v5939_v54 = vpop.f32.mrb[107].mxu0  ;;  %9606 = vmatmul.mubr.bf16.gmra.mrb[96].mxu1 %v6210_v57  ;;  %v6137_v12 = vmax.f32 %v5945_v5, 0.0 }
 0x5b9   : > { %v5940_v11 = vadd.f32 %v11895_v13, %v5939_v54  ;;  %v6135_v52 = vmax.f32 %v5937_v8, 0.0 }
 0x5ba   : > { %v6138_v49 = vmax.f32 %v5948_v10, 0.0 }
 0x5bb   : > { %v6136_v14 = vmax.f32 %v5940_v11, 0.0 }
 0x5bc   : > { %v6212_v16 = vpack.c.bf16 %v6138_v49, %v6137_v12 }
 0x5bd   : > { %v6211_v17 = vpack.c.bf16 %v6136_v14, %v6135_v52  ;;  %v9471_v60 = vpop.f32.mrb[108].mxu0 }
 0x5be   : > { %v5961_v18 = vadd.f32 %v9471_v60, %v11895_v13  ;;  %v5952_v20 = vpop.f32.mrb[109].mxu0 }
 0x5bf   : > { %v5953_v21 = vadd.f32 %v11895_v13, %v5952_v20  ;;  %v9472_v22 = vpop.f32.mrb[110].mxu0  ;;  %9609 = vmatprep.mubr.bf16.mxu1 %v6211_v17 }
 0x5c0   : > { %v5964_v23 = vadd.f32 %v9472_v22, %v11895_v13  ;;  %v5955_v24 = vpop.f32.mrb[111].mxu0  ;;  %9610 = vmatmul.mubr.bf16.gmra.mrb[100].mxu1 %v6212_v16  ;;  %v6141_v28 = vmax.f32 %v5961_v18, 0.0 }
 0x5c1   : > { %v5956_v27 = vadd.f32 %v12033_v26, %v5955_v24  ;;  %v6139_v7 = vmax.f32 %v5953_v21, 0.0 }
 0x5c2   : > { %v6142_v30 = vmax.f32 %v5964_v23, 0.0 }
 0x5c3   : > { %v6140_v45 = vmax.f32 %v5956_v27, 0.0 }
 0x5c4   : > { %v6214_v50 = vpack.c.bf16 %v6142_v30, %v6141_v28 }
 0x5c5   : > { %v6213_v31 = vpack.c.bf16 %v6140_v45, %v6139_v7  ;;  %v9475_v32 = vpop.f32.mrb[112].mxu0 }
 0x5c6   : > { %v5977_v15 = vadd.f32 %v12033_v26, %v9475_v32  ;;  %v5968_v13 = vpop.f32.mrb[113].mxu0 }
 0x5c7   : > { %v5969_v46 = vadd.f32 %v12033_v26, %v5968_v13  ;;  %v9476_v33 = vpop.f32.mrb[114].mxu0  ;;  %9613 = vmatprep.mubr.bf16.mxu1 %v6213_v31 }
 0x5c8   : > { %v5980_v34 = vadd.f32 %v12033_v26, %v9476_v33  ;;  %v5971_v36 = vpop.f32.mrb[115].mxu0  ;;  %9614 = vmatmul.mubr.bf16.gmra.mrb[104].mxu1 %v6214_v50  ;;  %v6145_v38 = vmax.f32 %v5977_v15, 0.0 }
 0x5c9   : > { %v5972_v37 = vadd.f32 %v12033_v26, %v5971_v36  ;;  %v6143_v41 = vmax.f32 %v5969_v46, 0.0 }
 0x5ca   : > { %v6146_v40 = vmax.f32 %v5980_v34, 0.0 }
 0x5cb   : > { %v6144_v35 = vmax.f32 %v5972_v37, 0.0  ;;  %v9511_v44 = vpop.f32.mrb[0].mxu1 }
 0x5cc   : > { %v6216_v47 = vpack.c.bf16 %v6146_v40, %v6145_v38  ;;  %v6344_v48 = vpop.f32.mrb[1].mxu1  ;;  %v6353_v55 = vadd.f32 %v9511_v44, %v12044_v43 }
 0x5cd   : > { %v6215_v42 = vpack.c.bf16 %v6144_v35, %v6143_v41  ;;  %v9479_v51 = vpop.f32.mrb[116].mxu0  ;;  %v9512_v53 = vpop.f32.mrb[2].mxu1  ;;  %v6345_v29 = vadd.f32 %v12044_v43, %v6344_v48 }
 0x5ce   : > { %v5993_v56 = vadd.f32 %v12033_v26, %v9479_v51  ;;  %v6356_v58 = vadd.f32 %v9512_v53, %v12044_v43  ;;  %v5984_v19 = vpop.f32.mrb[117].mxu0  ;;  %v6347_v59 = vpop.f32.mrb[3].mxu1 }
 0x5cf   : > { %v5985_v61 = vadd.f32 %v12033_v26, %v5984_v19  ;;  %v6348_v62 = vadd.f32 %v12044_v43, %v6347_v59  ;;  %v9480_v39 = vpop.f32.mrb[118].mxu0  ;;  %9617 = vmatprep.mubr.bf16.mxu1 %v6215_v42 }
 0x5d0   : > { %v7984_v0 = vpack.c.bf16 %v6356_v58, %v6353_v55  ;;  %v5996_v63 = vadd.f32 %v12033_v26, %v9480_v39  ;;  %v5987_v1 = vpop.f32.mrb[119].mxu0  ;;  %9618 = vmatmul.mubr.bf16.gmra.mrb[108].mxu1 %v6216_v47  ;;  %v6149_v57 = vmax.f32 %v5993_v56, 0.0 }
 0x5d1   : > { %v7979_v2 = vpack.c.bf16 %v6348_v62, %v6345_v29  ;;  %v5988_v3 = vadd.f32 %v12033_v26, %v5987_v1  ;;  %v6147_v25 = vmax.f32 %v5985_v61, 0.0 }
 0x5d2   : > { %8288 = vst [vmem:[%s12056_s26 + $0x18] sm:$0xff] %v7984_v0   ;;  %v6150_v4 = vmax.f32 %v5996_v63, 0.0 }
 0x5d3   : > { %8287 = vst [vmem:[%s12056_s26 + $0x10] sm:$0xff] %v7979_v2   ;;  %v6148_v5 = vmax.f32 %v5988_v3, 0.0  ;;  %v9515_v6 = vpop.f32.mrb[4].mxu1 }
 0x5d4   : > { %v6218_v8 = vpack.c.bf16 %v6150_v4, %v6149_v57  ;;  %v6360_v9 = vpop.f32.mrb[5].mxu1  ;;  %v6369_v12 = vadd.f32 %v9515_v6, %v12044_v43 }
 0x5d5   : > { %v6217_v10 = vpack.c.bf16 %v6148_v5, %v6147_v25  ;;  %v9483_v54 = vpop.f32.mrb[120].mxu0  ;;  %v9516_v11 = vpop.f32.mrb[6].mxu1  ;;  %v6361_v17 = vadd.f32 %v12044_v43, %v6360_v9 }
 0x5d6   : > { %v6009_v49 = vadd.f32 %v12033_v26, %v9483_v54  ;;  %v6372_v52 = vadd.f32 %v9516_v11, %v12044_v43  ;;  %v6000_v14 = vpop.f32.mrb[121].mxu0  ;;  %v6363_v16 = vpop.f32.mrb[7].mxu1 }
 0x5d7   : > { %v6001_v60 = vadd.f32 %v12033_v26, %v6000_v14  ;;  %v6364_v18 = vadd.f32 %v12044_v43, %v6363_v16  ;;  %v9484_v20 = vpop.f32.mrb[122].mxu0  ;;  %9621 = vmatprep.mubr.bf16.mxu1 %v6217_v10 }
 0x5d8   : > { %v7994_v21 = vpack.c.bf16 %v6372_v52, %v6369_v12  ;;  %v6012_v22 = vadd.f32 %v12033_v26, %v9484_v20  ;;  %v6003_v23 = vpop.f32.mrb[123].mxu0  ;;  %9622 = vmatmul.mubr.bf16.gmra.mrb[112].mxu1 %v6218_v8  ;;  %v6153_v28 = vmax.f32 %v6009_v49, 0.0 }
 0x5d9   : > { %v7989_v24 = vpack.c.bf16 %v6364_v18, %v6361_v17  ;;  %v6004_v27 = vadd.f32 %v12033_v26, %v6003_v23  ;;  %v6151_v7 = vmax.f32 %v6001_v60, 0.0 }
 0x5da   : > { %8290 = vst [vmem:[%s12056_s26 + $0x28] sm:$0xff] %v7994_v21   ;;  %v6154_v30 = vmax.f32 %v6012_v22, 0.0 }
 0x5db   : > { %8289 = vst [vmem:[%s12056_s26 + $0x20] sm:$0xff] %v7989_v24   ;;  %v6152_v45 = vmax.f32 %v6004_v27, 0.0  ;;  %v9519_v50 = vpop.f32.mrb[8].mxu1 }
 0x5dc   : > { %v6220_v31 = vpack.c.bf16 %v6154_v30, %v6153_v28  ;;  %v6376_v32 = vpop.f32.mrb[9].mxu1  ;;  %v6385_v33 = vadd.f32 %v9519_v50, %v12044_v43 }
 0x5dd   : > { %v6219_v15 = vpack.c.bf16 %v6152_v45, %v6151_v7  ;;  %v9487_v13 = vpop.f32.mrb[124].mxu0  ;;  %v9520_v46 = vpop.f32.mrb[10].mxu1  ;;  %v6377_v40 = vadd.f32 %v12044_v43, %v6376_v32 }
 0x5de   : > { %v6025_v34 = vadd.f32 %v12033_v26, %v9487_v13  ;;  %v6388_v36 = vadd.f32 %v9520_v46, %v12044_v43  ;;  %v6016_v37 = vpop.f32.mrb[125].mxu0  ;;  %v6379_v38 = vpop.f32.mrb[11].mxu1 }
 0x5df   : > { %v6017_v41 = vadd.f32 %v12033_v26, %v6016_v37  ;;  %v6380_v35 = vadd.f32 %v12044_v43, %v6379_v38  ;;  %v9488_v44 = vpop.f32.mrb[126].mxu0  ;;  %9625 = vmatprep.mubr.bf16.mxu1 %v6219_v15 }
 0x5e0   : > { %v8004_v47 = vpack.c.bf16 %v6388_v36, %v6385_v33  ;;  %v6028_v48 = vadd.f32 %v12033_v26, %v9488_v44  ;;  %v6019_v42 = vpop.f32.mrb[127].mxu0  ;;  %9626 = vmatmul.mubr.bf16.gmra.mrb[116].mxu1 %v6220_v31  ;;  %v6157_v55 = vmax.f32 %v6025_v34, 0.0 }
 0x5e1   : > { %v7999_v51 = vpack.c.bf16 %v6380_v35, %v6377_v40  ;;  %v6020_v53 = vadd.f32 %v12033_v26, %v6019_v42  ;;  %v6155_v58 = vmax.f32 %v6017_v41, 0.0 }
 0x5e2   : > { %8292 = vst [vmem:[%s12056_s26 + $0x38] sm:$0xff] %v8004_v47   ;;  %v6158_v56 = vmax.f32 %v6028_v48, 0.0 }
 0x5e3   : > { %8291 = vst [vmem:[%s12056_s26 + $0x30] sm:$0xff] %v7999_v51   ;;  %v6156_v19 = vmax.f32 %v6020_v53, 0.0  ;;  %v9523_v59 = vpop.f32.mrb[12].mxu1 }
 0x5e4   : > { %v6222_v29 = vpack.c.bf16 %v6158_v56, %v6157_v55  ;;  %v6392_v61 = vpop.f32.mrb[13].mxu1  ;;  %v6401_v63 = vadd.f32 %v9523_v59, %v12044_v43 }
 0x5e5   : > { %v6221_v62 = vpack.c.bf16 %v6156_v19, %v6155_v58  ;;  %v9507_v39 = vpop.f32.mrb[128].mxu0  ;;  %v9524_v0 = vpop.f32.mrb[14].mxu1  ;;  %v6393_v3 = vadd.f32 %v12044_v43, %v6392_v61 }
 0x5e6   : > { %v6404_v1 = vadd.f32 %v9524_v0, %v12044_v43  ;;  %v6328_v2 = vpop.f32.mrb[129].mxu0  ;;  %v6395_v26 = vpop.f32.mrb[15].mxu1  ;;  %v6337_v25 = vadd.f32 %v9507_v39, %v12044_v43 }
 0x5e7   : > { %v6396_v57 = vadd.f32 %v12044_v43, %v6395_v26  ;;  %v9508_v4 = vpop.f32.mrb[130].mxu0  ;;  %9629 = vmatprep.mubr.bf16.mxu1 %v6221_v62  ;;  %v6329_v9 = vadd.f32 %v12044_v43, %v6328_v2 }
 0x5e8   : > { %v8014_v5 = vpack.c.bf16 %v6404_v1, %v6401_v63  ;;  %v6340_v6 = vadd.f32 %v9508_v4, %v12044_v43  ;;  %v6331_v8 = vpop.f32.mrb[131].mxu0  ;;  %9630 = vmatmul.mubr.bf16.gmra.mrb[120].mxu1 %v6222_v29 }
 0x5e9   : > { %v8009_v10 = vpack.c.bf16 %v6396_v57, %v6393_v3  ;;  %v6332_v54 = vadd.f32 %v12044_v43, %v6331_v8 }
 0x5ea   : > { %8294 = vst [vmem:[%s12056_s26 + $0x48] sm:$0xff] %v8014_v5   ;;  %v7974_v11 = vpack.c.bf16 %v6340_v6, %v6337_v25 }
 0x5eb   : > { %8293 = vst [vmem:[%s12056_s26 + $0x40] sm:$0xff] %v8009_v10   ;;  %v7969_v12 = vpack.c.bf16 %v6332_v54, %v6329_v9  ;;  %v9527_v49 = vpop.f32.mrb[16].mxu1 }
 0x5ec   : > { %8286 = vst [vmem:[%s12056_s26 + $0x8] sm:$0xff] %v7974_v11   ;;  %v6408_v52 = vpop.f32.mrb[17].mxu1  ;;  %v6417_v16 = vadd.f32 %v9527_v49, %v12044_v43 }
 0x5ed   : > { %7970 = vst [vmem:[%s12056_s26] sm:$0xff] %v7969_v12   ;;  %v9528_v14 = vpop.f32.mrb[18].mxu1  ;;  %v6409_v18 = vadd.f32 %v12044_v43, %v6408_v52 }
 0x5ee   : > { %v6420_v17 = vadd.f32 %v9528_v14, %v12044_v43  ;;  %v6411_v60 = vpop.f32.mrb[19].mxu1 }
 0x5ef   : > { %v6412_v20 = vadd.f32 %v12044_v43, %v6411_v60 }
 0x5f0   : > { %v8024_v21 = vpack.c.bf16 %v6420_v17, %v6417_v16 }
 0x5f1   : > { %v8019_v22 = vpack.c.bf16 %v6412_v20, %v6409_v18 }
 0x5f2   : > { %8296 = vst [vmem:[%s12056_s26 + $0x58] sm:$0xff] %v8024_v21  }
 0x5f3   : > { %8295 = vst [vmem:[%s12056_s26 + $0x50] sm:$0xff] %v8019_v22   ;;  %v9531_v23 = vpop.f32.mrb[20].mxu1 }
 0x5f4   : > { %v6424_v24 = vpop.f32.mrb[21].mxu1  ;;  %v6433_v28 = vadd.f32 %v9531_v23, %v12044_v43 }
 0x5f5   : > { %v9532_v27 = vpop.f32.mrb[22].mxu1  ;;  %v6425_v45 = vadd.f32 %v12044_v43, %v6424_v24 }
 0x5f6   : > { %v6436_v30 = vadd.f32 %v9532_v27, %v12044_v43  ;;  %v6427_v7 = vpop.f32.mrb[23].mxu1 }
 0x5f7   : > { %v6428_v50 = vadd.f32 %v12044_v43, %v6427_v7 }
 0x5f8   : > { %v8034_v31 = vpack.c.bf16 %v6436_v30, %v6433_v28 }
 0x5f9   : > { %v8029_v32 = vpack.c.bf16 %v6428_v50, %v6425_v45 }
 0x5fa   : > { %8298 = vst [vmem:[%s12056_s26 + $0x68] sm:$0xff] %v8034_v31  }
 0x5fb   : > { %8297 = vst [vmem:[%s12056_s26 + $0x60] sm:$0xff] %v8029_v32   ;;  %v9535_v15 = vpop.f32.mrb[24].mxu1 }
 0x5fc   : > { %v6440_v13 = vpop.f32.mrb[25].mxu1  ;;  %v6449_v33 = vadd.f32 %v9535_v15, %v12044_v43 }
 0x5fd   : > { %v9536_v46 = vpop.f32.mrb[26].mxu1  ;;  %v6441_v37 = vadd.f32 %v12044_v43, %v6440_v13 }
 0x5fe   : > { %v6452_v34 = vadd.f32 %v9536_v46, %v12044_v43  ;;  %v6443_v36 = vpop.f32.mrb[27].mxu1 }
 0x5ff   : > { %v6444_v38 = vadd.f32 %v12044_v43, %v6443_v36 }
 0x600   : > { %v8044_v40 = vpack.c.bf16 %v6452_v34, %v6449_v33 }
 0x601   : > { %v8039_v41 = vpack.c.bf16 %v6444_v38, %v6441_v37 }
 0x602   : > { %8300 = vst [vmem:[%s12056_s26 + $0x78] sm:$0xff] %v8044_v40  }
 0x603   : > { %8299 = vst [vmem:[%s12056_s26 + $0x70] sm:$0xff] %v8039_v41   ;;  %v9539_v35 = vpop.f32.mrb[28].mxu1 }
 0x604   : > { %v6456_v44 = vpop.f32.mrb[29].mxu1  ;;  %v6465_v48 = vadd.f32 %v9539_v35, %v12044_v43 }
 0x605   : > { %v9540_v47 = vpop.f32.mrb[30].mxu1  ;;  %v6457_v53 = vadd.f32 %v12044_v43, %v6456_v44 }
 0x606   : > { %v6468_v42 = vadd.f32 %v9540_v47, %v12044_v43  ;;  %v6459_v51 = vpop.f32.mrb[31].mxu1 }
 0x607   : > { %v6460_v55 = vadd.f32 %v12044_v43, %v6459_v51 }
 0x608   : > { %v8054_v56 = vpack.c.bf16 %v6468_v42, %v6465_v48 }
 0x609   : > { %v8049_v58 = vpack.c.bf16 %v6460_v55, %v6457_v53 }
 0x60a   : > { %8302 = vst [vmem:[%s12056_s26 + $0x88] sm:$0xff] %v8054_v56  }
 0x60b   : > { %8301 = vst [vmem:[%s12056_s26 + $0x80] sm:$0xff] %v8049_v58   ;;  %v9543_v19 = vpop.f32.mrb[32].mxu1 }
 0x60c   : > { %v6472_v59 = vpop.f32.mrb[33].mxu1  ;;  %v6481_v61 = vadd.f32 %v9543_v19, %v12044_v43 }
 0x60d   : > { %v9544_v29 = vpop.f32.mrb[34].mxu1  ;;  %v6473_v0 = vadd.f32 %v12044_v43, %v6472_v59 }
 0x60e   : > { %v6484_v62 = vadd.f32 %v9544_v29, %v12044_v43  ;;  %v6475_v39 = vpop.f32.mrb[35].mxu1 }
 0x60f   : > { %v6476_v63 = vadd.f32 %v12044_v43, %v6475_v39 }
 0x610   : > { %v8064_v1 = vpack.c.bf16 %v6484_v62, %v6481_v61 }
 0x611   : > { %v8059_v2 = vpack.c.bf16 %v6476_v63, %v6473_v0 }
 0x612   : > { %8304 = vst [vmem:[%s12056_s26 + $0x98] sm:$0xff] %v8064_v1  }
 0x613   : > { %8303 = vst [vmem:[%s12056_s26 + $0x90] sm:$0xff] %v8059_v2   ;;  %v9547_v26 = vpop.f32.mrb[36].mxu1 }
 0x614   : > { %v6488_v3 = vpop.f32.mrb[37].mxu1  ;;  %v6497_v4 = vadd.f32 %v9547_v26, %v12044_v43 }
 0x615   : > { %v9548_v57 = vpop.f32.mrb[38].mxu1  ;;  %v6489_v6 = vadd.f32 %v12044_v43, %v6488_v3 }
 0x616   : > { %v6500_v25 = vadd.f32 %v9548_v57, %v12044_v43  ;;  %v6491_v5 = vpop.f32.mrb[39].mxu1 }
 0x617   : > { %v6492_v8 = vadd.f32 %v12044_v43, %v6491_v5 }
 0x618   : > { %v8074_v9 = vpack.c.bf16 %v6500_v25, %v6497_v4 }
 0x619   : > { %v8069_v10 = vpack.c.bf16 %v6492_v8, %v6489_v6 }
 0x61a   : > { %8306 = vst [vmem:[%s12056_s26 + $0xa8] sm:$0xff] %v8074_v9  }
 0x61b   : > { %8305 = vst [vmem:[%s12056_s26 + $0xa0] sm:$0xff] %v8069_v10   ;;  %v9551_v54 = vpop.f32.mrb[40].mxu1 }
 0x61c   : > { %v6504_v11 = vpop.f32.mrb[41].mxu1  ;;  %v6513_v49 = vadd.f32 %v9551_v54, %v12044_v43 }
 0x61d   : > { %v9552_v12 = vpop.f32.mrb[42].mxu1  ;;  %v6505_v16 = vadd.f32 %v12044_v43, %v6504_v11 }
 0x61e   : > { %v6516_v52 = vadd.f32 %v9552_v12, %v12044_v43  ;;  %v6507_v14 = vpop.f32.mrb[43].mxu1 }
 0x61f   : > { %v6508_v17 = vadd.f32 %v12044_v43, %v6507_v14 }
 0x620   : > { %v8084_v60 = vpack.c.bf16 %v6516_v52, %v6513_v49 }
 0x621   : > { %v8079_v18 = vpack.c.bf16 %v6508_v17, %v6505_v16 }
 0x622   : > { %8308 = vst [vmem:[%s12056_s26 + $0xb8] sm:$0xff] %v8084_v60  }
 0x623   : > { %8307 = vst [vmem:[%s12056_s26 + $0xb0] sm:$0xff] %v8079_v18   ;;  %v9555_v20 = vpop.f32.mrb[44].mxu1 }
 0x624   : > { %v6520_v21 = vpop.f32.mrb[45].mxu1  ;;  %v6529_v23 = vadd.f32 %v9555_v20, %v12044_v43 }
 0x625   : > { %v9556_v22 = vpop.f32.mrb[46].mxu1  ;;  %v6521_v28 = vadd.f32 %v12044_v43, %v6520_v21 }
 0x626   : > { %v6532_v24 = vadd.f32 %v9556_v22, %v12044_v43  ;;  %v6523_v27 = vpop.f32.mrb[47].mxu1 }
 0x627   : > { %v6524_v30 = vadd.f32 %v12044_v43, %v6523_v27 }
 0x628   : > { %v8094_v7 = vpack.c.bf16 %v6532_v24, %v6529_v23 }
 0x629   : > { %v8089_v45 = vpack.c.bf16 %v6524_v30, %v6521_v28 }
 0x62a   : > { %8310 = vst [vmem:[%s12056_s26 + $0xc8] sm:$0xff] %v8094_v7  }
 0x62b   : > { %8309 = vst [vmem:[%s12056_s26 + $0xc0] sm:$0xff] %v8089_v45   ;;  %v9559_v50 = vpop.f32.mrb[48].mxu1 }
 0x62c   : > { %v6536_v31 = vpop.f32.mrb[49].mxu1  ;;  %v6545_v15 = vadd.f32 %v9559_v50, %v12044_v43 }
 0x62d   : > { %v9560_v32 = vpop.f32.mrb[50].mxu1  ;;  %v6537_v33 = vadd.f32 %v12044_v43, %v6536_v31 }
 0x62e   : > { %v6548_v13 = vadd.f32 %v9560_v32, %v12044_v43  ;;  %v6539_v46 = vpop.f32.mrb[51].mxu1 }
 0x62f   : > { %v6540_v34 = vadd.f32 %v12044_v43, %v6539_v46 }
 0x630   : > { %v8104_v36 = vpack.c.bf16 %v6548_v13, %v6545_v15 }
 0x631   : > { %v8099_v37 = vpack.c.bf16 %v6540_v34, %v6537_v33 }
 0x632   : > { %8312 = vst [vmem:[%s12056_s26 + $0xd8] sm:$0xff] %v8104_v36  }
 0x633   : > { %8311 = vst [vmem:[%s12056_s26 + $0xd0] sm:$0xff] %v8099_v37   ;;  %v9563_v38 = vpop.f32.mrb[52].mxu1 }
 0x634   : > { %v6552_v40 = vpop.f32.mrb[53].mxu1  ;;  %v6561_v35 = vadd.f32 %v9563_v38, %v12044_v43 }
 0x635   : > { %v9564_v41 = vpop.f32.mrb[54].mxu1  ;;  %v6553_v48 = vadd.f32 %v12044_v43, %v6552_v40 }
 0x636   : > { %v6564_v44 = vadd.f32 %v9564_v41, %v12044_v43  ;;  %v6555_v47 = vpop.f32.mrb[55].mxu1 }
 0x637   : > { %v6556_v42 = vadd.f32 %v12044_v43, %v6555_v47 }
 0x638   : > { %v8114_v51 = vpack.c.bf16 %v6564_v44, %v6561_v35 }
 0x639   : > { %v8109_v53 = vpack.c.bf16 %v6556_v42, %v6553_v48 }
 0x63a   : > { %8314 = vst [vmem:[%s12056_s26 + $0xe8] sm:$0xff] %v8114_v51  }
 0x63b   : > { %8313 = vst [vmem:[%s12056_s26 + $0xe0] sm:$0xff] %v8109_v53   ;;  %v9567_v55 = vpop.f32.mrb[56].mxu1 }
 0x63c   : > { %v6568_v56 = vpop.f32.mrb[57].mxu1  ;;  %v6577_v19 = vadd.f32 %v9567_v55, %v12044_v43 }
 0x63d   : > { %v9568_v58 = vpop.f32.mrb[58].mxu1  ;;  %v6569_v61 = vadd.f32 %v12044_v43, %v6568_v56 }
 0x63e   : > { %v6580_v59 = vadd.f32 %v9568_v58, %v12044_v43  ;;  %v6571_v29 = vpop.f32.mrb[59].mxu1 }
 0x63f   : > { %v6572_v62 = vadd.f32 %v12044_v43, %v6571_v29 }
 0x640   : > { %v8124_v39 = vpack.c.bf16 %v6580_v59, %v6577_v19 }
 0x641   : > { %v8119_v0 = vpack.c.bf16 %v6572_v62, %v6569_v61 }
 0x642   : > { %8316 = vst [vmem:[%s12056_s26 + $0xf8] sm:$0xff] %v8124_v39  }
 0x643   : > { %8315 = vst [vmem:[%s12056_s26 + $0xf0] sm:$0xff] %v8119_v0   ;;  %v9571_v63 = vpop.f32.mrb[60].mxu1 }
 0x644   : > { %v6584_v1 = vpop.f32.mrb[61].mxu1  ;;  %v6593_v26 = vadd.f32 %v9571_v63, %v12044_v43 }
 0x645   : > { %v9572_v2 = vpop.f32.mrb[62].mxu1  ;;  %v6585_v4 = vadd.f32 %v12044_v43, %v6584_v1 }
 0x646   : > { %v6596_v3 = vadd.f32 %v9572_v2, %v12044_v43  ;;  %v6587_v57 = vpop.f32.mrb[63].mxu1 }
 0x647   : > { %v6588_v25 = vadd.f32 %v12044_v43, %v6587_v57 }
 0x648   : > { %v8134_v5 = vpack.c.bf16 %v6596_v3, %v6593_v26 }
 0x649   : > { %v8129_v6 = vpack.c.bf16 %v6588_v25, %v6585_v4 }
 0x64a   : > { %8318 = vst [vmem:[%s12056_s26 + $0x108] sm:$0xff] %v8134_v5  }
 0x64b   : > { %8317 = vst [vmem:[%s12056_s26 + $0x100] sm:$0xff] %v8129_v6   ;;  %v9575_v8 = vpop.f32.mrb[64].mxu1 }
 0x64c   : > { %v6600_v9 = vpop.f32.mrb[65].mxu1  ;;  %v6609_v54 = vadd.f32 %v9575_v8, %v12044_v43 }
 0x64d   : > { %v9576_v10 = vpop.f32.mrb[66].mxu1  ;;  %v6601_v49 = vadd.f32 %v12044_v43, %v6600_v9 }
 0x64e   : > { %v6612_v11 = vadd.f32 %v9576_v10, %v12044_v43  ;;  %v6603_v12 = vpop.f32.mrb[67].mxu1 }
 0x64f   : > { %v6604_v52 = vadd.f32 %v12044_v43, %v6603_v12 }
 0x650   : > { %v8144_v14 = vpack.c.bf16 %v6612_v11, %v6609_v54 }
 0x651   : > { %v8139_v16 = vpack.c.bf16 %v6604_v52, %v6601_v49 }
 0x652   : > { %8320 = vst [vmem:[%s12056_s26 + $0x118] sm:$0xff] %v8144_v14  }
 0x653   : > { %8319 = vst [vmem:[%s12056_s26 + $0x110] sm:$0xff] %v8139_v16   ;;  %v9579_v17 = vpop.f32.mrb[68].mxu1 }
 0x654   : > { %v6616_v60 = vpop.f32.mrb[69].mxu1  ;;  %v6625_v20 = vadd.f32 %v9579_v17, %v12044_v43 }
 0x655   : > { %v9580_v18 = vpop.f32.mrb[70].mxu1  ;;  %v6617_v23 = vadd.f32 %v12044_v43, %v6616_v60 }
 0x656   : > { %v6628_v21 = vadd.f32 %v9580_v18, %v12044_v43  ;;  %v6619_v22 = vpop.f32.mrb[71].mxu1 }
 0x657   : > { %v6620_v24 = vadd.f32 %v12044_v43, %v6619_v22 }
 0x658   : > { %v8154_v27 = vpack.c.bf16 %v6628_v21, %v6625_v20 }
 0x659   : > { %v8149_v28 = vpack.c.bf16 %v6620_v24, %v6617_v23 }
 0x65a   : > { %8322 = vst [vmem:[%s12056_s26 + $0x128] sm:$0xff] %v8154_v27  }
 0x65b   : > { %8321 = vst [vmem:[%s12056_s26 + $0x120] sm:$0xff] %v8149_v28   ;;  %v9583_v30 = vpop.f32.mrb[72].mxu1 }
 0x65c   : > { %v6632_v7 = vpop.f32.mrb[73].mxu1  ;;  %v6641_v50 = vadd.f32 %v9583_v30, %v12044_v43 }
 0x65d   : > { %v9584_v45 = vpop.f32.mrb[74].mxu1  ;;  %v6633_v15 = vadd.f32 %v12044_v43, %v6632_v7 }
 0x65e   : > { %v6644_v31 = vadd.f32 %v9584_v45, %v12044_v43  ;;  %v6635_v32 = vpop.f32.mrb[75].mxu1 }
 0x65f   : > { %v6636_v13 = vadd.f32 %v12044_v43, %v6635_v32 }
 0x660   : > { %v8164_v46 = vpack.c.bf16 %v6644_v31, %v6641_v50 }
 0x661   : > { %v8159_v33 = vpack.c.bf16 %v6636_v13, %v6633_v15 }
 0x662   : > { %8324 = vst [vmem:[%s12056_s26 + $0x138] sm:$0xff] %v8164_v46  }
 0x663   : > { %8323 = vst [vmem:[%s12056_s26 + $0x130] sm:$0xff] %v8159_v33   ;;  %v9587_v34 = vpop.f32.mrb[76].mxu1 }
 0x664   : > { %v6648_v36 = vpop.f32.mrb[77].mxu1  ;;  %v6657_v38 = vadd.f32 %v9587_v34, %v12044_v43 }
 0x665   : > { %v9588_v37 = vpop.f32.mrb[78].mxu1  ;;  %v6649_v35 = vadd.f32 %v12044_v43, %v6648_v36 }
 0x666   : > { %v6660_v40 = vadd.f32 %v9588_v37, %v12044_v43  ;;  %v6651_v41 = vpop.f32.mrb[79].mxu1 }
 0x667   : > { %v6652_v44 = vadd.f32 %v12044_v43, %v6651_v41 }
 0x668   : > { %v8174_v47 = vpack.c.bf16 %v6660_v40, %v6657_v38 }
 0x669   : > { %v8169_v48 = vpack.c.bf16 %v6652_v44, %v6649_v35 }
 0x66a   : > { %8326 = vst [vmem:[%s12056_s26 + $0x148] sm:$0xff] %v8174_v47  }
 0x66b   : > { %8325 = vst [vmem:[%s12056_s26 + $0x140] sm:$0xff] %v8169_v48   ;;  %v9591_v42 = vpop.f32.mrb[80].mxu1 }
 0x66c   : > { %v6664_v51 = vpop.f32.mrb[81].mxu1  ;;  %v6673_v55 = vadd.f32 %v9591_v42, %v12044_v43 }
 0x66d   : > { %v9592_v53 = vpop.f32.mrb[82].mxu1  ;;  %v6665_v19 = vadd.f32 %v12044_v43, %v6664_v51 }
 0x66e   : > { %v6676_v56 = vadd.f32 %v9592_v53, %v12044_v43  ;;  %v6667_v58 = vpop.f32.mrb[83].mxu1 }
 0x66f   : > { %v6668_v59 = vadd.f32 %v12044_v43, %v6667_v58 }
 0x670   : > { %v8184_v29 = vpack.c.bf16 %v6676_v56, %v6673_v55 }
 0x671   : > { %v8179_v61 = vpack.c.bf16 %v6668_v59, %v6665_v19 }
 0x672   : > { %8328 = vst [vmem:[%s12056_s26 + $0x158] sm:$0xff] %v8184_v29  }
 0x673   : > { %8327 = vst [vmem:[%s12056_s26 + $0x150] sm:$0xff] %v8179_v61   ;;  %v9595_v62 = vpop.f32.mrb[84].mxu1 }
 0x674   : > { %v6680_v39 = vpop.f32.mrb[85].mxu1  ;;  %v6689_v63 = vadd.f32 %v9595_v62, %v12044_v43 }
 0x675   : > { %v9596_v0 = vpop.f32.mrb[86].mxu1  ;;  %v6681_v26 = vadd.f32 %v12044_v43, %v6680_v39 }
 0x676   : > { %v6692_v1 = vadd.f32 %v9596_v0, %v12044_v43  ;;  %v6683_v2 = vpop.f32.mrb[87].mxu1 }
 0x677   : > { %v6684_v3 = vadd.f32 %v12044_v43, %v6683_v2 }
 0x678   : > { %v8194_v57 = vpack.c.bf16 %v6692_v1, %v6689_v63 }
 0x679   : > { %v8189_v4 = vpack.c.bf16 %v6684_v3, %v6681_v26 }
 0x67a   : > { %8330 = vst [vmem:[%s12056_s26 + $0x168] sm:$0xff] %v8194_v57  }
 0x67b   : > { %8329 = vst [vmem:[%s12056_s26 + $0x160] sm:$0xff] %v8189_v4   ;;  %v9599_v25 = vpop.f32.mrb[88].mxu1 }
 0x67c   : > { %v6696_v5 = vpop.f32.mrb[89].mxu1  ;;  %v6705_v8 = vadd.f32 %v9599_v25, %v12044_v43 }
 0x67d   : > { %v9600_v6 = vpop.f32.mrb[90].mxu1  ;;  %v6697_v54 = vadd.f32 %v12044_v43, %v6696_v5 }
 0x67e   : > { %v6708_v9 = vadd.f32 %v9600_v6, %v12044_v43  ;;  %v6699_v10 = vpop.f32.mrb[91].mxu1 }
 0x67f   : > { %v6700_v11 = vadd.f32 %v12044_v43, %v6699_v10 }
 0x680   : > { %v8204_v12 = vpack.c.bf16 %v6708_v9, %v6705_v8 }
 0x681   : > { %v8199_v49 = vpack.c.bf16 %v6700_v11, %v6697_v54 }
 0x682   : > { %8332 = vst [vmem:[%s12056_s26 + $0x178] sm:$0xff] %v8204_v12  }
 0x683   : > { %8331 = vst [vmem:[%s12056_s26 + $0x170] sm:$0xff] %v8199_v49   ;;  %v9603_v52 = vpop.f32.mrb[92].mxu1 }
 0x684   : > { %v6712_v14 = vpop.f32.mrb[93].mxu1  ;;  %v6721_v17 = vadd.f32 %v9603_v52, %v12044_v43 }
 0x685   : > { %v9604_v16 = vpop.f32.mrb[94].mxu1  ;;  %v6713_v20 = vadd.f32 %v12044_v43, %v6712_v14 }
 0x686   : > { %v6724_v60 = vadd.f32 %v9604_v16, %v12044_v43  ;;  %v6715_v18 = vpop.f32.mrb[95].mxu1 }
 0x687   : > { %v6716_v21 = vadd.f32 %v12044_v43, %v6715_v18 }
 0x688   : > { %v8214_v22 = vpack.c.bf16 %v6724_v60, %v6721_v17 }
 0x689   : > { %v8209_v23 = vpack.c.bf16 %v6716_v21, %v6713_v20 }
 0x68a   : > { %8334 = vst [vmem:[%s12056_s26 + $0x188] sm:$0xff] %v8214_v22  }
 0x68b   : > { %8333 = vst [vmem:[%s12056_s26 + $0x180] sm:$0xff] %v8209_v23   ;;  %v9607_v24 = vpop.f32.mrb[96].mxu1 }
 0x68c   : > { %v6728_v27 = vpop.f32.mrb[97].mxu1  ;;  %v6737_v30 = vadd.f32 %v9607_v24, %v12044_v43 }
 0x68d   : > { %v9608_v28 = vpop.f32.mrb[98].mxu1  ;;  %v6729_v50 = vadd.f32 %v12044_v43, %v6728_v27 }
 0x68e   : > { %v6740_v7 = vadd.f32 %v9608_v28, %v12044_v43  ;;  %v6731_v45 = vpop.f32.mrb[99].mxu1 }
 0x68f   : > { %v6732_v31 = vadd.f32 %v12044_v43, %v6731_v45 }
 0x690   : > { %v8224_v32 = vpack.c.bf16 %v6740_v7, %v6737_v30 }
 0x691   : > { %v8219_v15 = vpack.c.bf16 %v6732_v31, %v6729_v50 }
 0x692   : > { %8336 = vst [vmem:[%s12056_s26 + $0x198] sm:$0xff] %v8224_v32  }
 0x693   : > { %8335 = vst [vmem:[%s12056_s26 + $0x190] sm:$0xff] %v8219_v15   ;;  %v9611_v13 = vpop.f32.mrb[100].mxu1 }
 0x694   : > { %v6744_v46 = vpop.f32.mrb[101].mxu1  ;;  %v6753_v34 = vadd.f32 %v9611_v13, %v12044_v43 }
 0x695   : > { %v9612_v33 = vpop.f32.mrb[102].mxu1  ;;  %v6745_v38 = vadd.f32 %v12044_v43, %v6744_v46 }
 0x696   : > { %v6756_v36 = vadd.f32 %v9612_v33, %v12044_v43  ;;  %v6747_v37 = vpop.f32.mrb[103].mxu1 }
 0x697   : > { %v6748_v40 = vadd.f32 %v12044_v43, %v6747_v37 }
 0x698   : > { %v8234_v41 = vpack.c.bf16 %v6756_v36, %v6753_v34 }
 0x699   : > { %v8229_v35 = vpack.c.bf16 %v6748_v40, %v6745_v38 }
 0x69a   : > { %8338 = vst [vmem:[%s12056_s26 + $0x1a8] sm:$0xff] %v8234_v41  }
 0x69b   : > { %8337 = vst [vmem:[%s12056_s26 + $0x1a0] sm:$0xff] %v8229_v35   ;;  %v9615_v44 = vpop.f32.mrb[104].mxu1 }
 0x69c   : > { %v6760_v47 = vpop.f32.mrb[105].mxu1  ;;  %v6769_v42 = vadd.f32 %v9615_v44, %v12044_v43 }
 0x69d   : > { %v9616_v48 = vpop.f32.mrb[106].mxu1  ;;  %v6761_v55 = vadd.f32 %v12044_v43, %v6760_v47 }
 0x69e   : > { %v6772_v51 = vadd.f32 %v9616_v48, %v12044_v43  ;;  %v6763_v53 = vpop.f32.mrb[107].mxu1 }
 0x69f   : > { %v6764_v56 = vadd.f32 %v12044_v43, %v6763_v53 }
 0x6a0   : > { %v8244_v58 = vpack.c.bf16 %v6772_v51, %v6769_v42 }
 0x6a1   : > { %v8239_v19 = vpack.c.bf16 %v6764_v56, %v6761_v55 }
 0x6a2   : > { %8340 = vst [vmem:[%s12056_s26 + $0x1b8] sm:$0xff] %v8244_v58  }
 0x6a3   : > { %8339 = vst [vmem:[%s12056_s26 + $0x1b0] sm:$0xff] %v8239_v19   ;;  %v9619_v59 = vpop.f32.mrb[108].mxu1 }
 0x6a4   : > { %v6776_v29 = vpop.f32.mrb[109].mxu1  ;;  %v6785_v62 = vadd.f32 %v9619_v59, %v12044_v43 }
 0x6a5   : > { %v9620_v61 = vpop.f32.mrb[110].mxu1  ;;  %v6777_v63 = vadd.f32 %v12044_v43, %v6776_v29 }
 0x6a6   : > { %v6788_v39 = vadd.f32 %v9620_v61, %v12044_v43  ;;  %v6779_v0 = vpop.f32.mrb[111].mxu1 }
 0x6a7   : > { %v6780_v1 = vadd.f32 %v12044_v43, %v6779_v0 }
 0x6a8   : > { %v8254_v2 = vpack.c.bf16 %v6788_v39, %v6785_v62 }
 0x6a9   : > { %v8249_v26 = vpack.c.bf16 %v6780_v1, %v6777_v63 }
 0x6aa   : > { %8342 = vst [vmem:[%s12056_s26 + $0x1c8] sm:$0xff] %v8254_v2  }
 0x6ab   : > { %8341 = vst [vmem:[%s12056_s26 + $0x1c0] sm:$0xff] %v8249_v26   ;;  %v9623_v3 = vpop.f32.mrb[112].mxu1 }
 0x6ac   : > { %v6792_v57 = vpop.f32.mrb[113].mxu1  ;;  %v6801_v25 = vadd.f32 %v9623_v3, %v12044_v43 }
 0x6ad   : > { %v9624_v4 = vpop.f32.mrb[114].mxu1  ;;  %v6793_v8 = vadd.f32 %v12044_v43, %v6792_v57 }
 0x6ae   : > { %v6804_v5 = vadd.f32 %v9624_v4, %v12044_v43  ;;  %v6795_v6 = vpop.f32.mrb[115].mxu1 }
 0x6af   : > { %v6796_v9 = vadd.f32 %v12044_v43, %v6795_v6 }
 0x6b0   : > { %v8264_v10 = vpack.c.bf16 %v6804_v5, %v6801_v25 }
 0x6b1   : > { %v8259_v54 = vpack.c.bf16 %v6796_v9, %v6793_v8 }
 0x6b2   : > { %8344 = vst [vmem:[%s12056_s26 + $0x1d8] sm:$0xff] %v8264_v10  }
 0x6b3   : > { %8343 = vst [vmem:[%s12056_s26 + $0x1d0] sm:$0xff] %v8259_v54   ;;  %v9627_v11 = vpop.f32.mrb[116].mxu1 }
 0x6b4   : > { %v6808_v12 = vpop.f32.mrb[117].mxu1  ;;  %v6817_v52 = vadd.f32 %v9627_v11, %v12044_v43 }
 0x6b5   : > { %v9628_v49 = vpop.f32.mrb[118].mxu1  ;;  %v6809_v17 = vadd.f32 %v12044_v43, %v6808_v12 }
 0x6b6   : > { %v6820_v14 = vadd.f32 %v9628_v49, %v12044_v43  ;;  %v6811_v16 = vpop.f32.mrb[119].mxu1 }
 0x6b7   : > { %v6812_v60 = vadd.f32 %v12044_v43, %v6811_v16 }
 0x6b8   : > { %v8274_v18 = vpack.c.bf16 %v6820_v14, %v6817_v52 }
 0x6b9   : > { %v8269_v20 = vpack.c.bf16 %v6812_v60, %v6809_v17 }
 0x6ba   : > { %8346 = vst [vmem:[%s12056_s26 + $0x1e8] sm:$0xff] %v8274_v18  }
 0x6bb   : > { %8345 = vst [vmem:[%s12056_s26 + $0x1e0] sm:$0xff] %v8269_v20   ;;  %v9631_v21 = vpop.f32.mrb[120].mxu1 }
 0x6bc   : > { %v6824_v22 = vpop.f32.mrb[121].mxu1  ;;  %v6833_v24 = vadd.f32 %v9631_v21, %v12044_v43 }
 0x6bd   : > { %v9632_v23 = vpop.f32.mrb[122].mxu1  ;;  %v6825_v30 = vadd.f32 %v12044_v43, %v6824_v22 }
 0x6be   : > { %v6836_v27 = vadd.f32 %v9632_v23, %v12044_v43  ;;  %v6827_v28 = vpop.f32.mrb[123].mxu1 }
 0x6bf   : > { %v6828_v7 = vadd.f32 %v12044_v43, %v6827_v28 }
 0x6c0   : > { %v8284_v45 = vpack.c.bf16 %v6836_v27, %v6833_v24 }
 0x6c1   : > { %v8279_v50 = vpack.c.bf16 %v6828_v7, %v6825_v30 }
 0x6c2   : > { %8348 = vst [vmem:[%s12056_s26 + $0x1f8] sm:$0xff] %v8284_v45  }
 0x6c3   : > { %8347 = vst [vmem:[%s12056_s26 + $0x1f0] sm:$0xff] %v8279_v50  }
 0x6c4   : > { %9754 = shalt.err (!%p9751_p3)
}
 0x6c5   : > { %s9755_s17 = scalar_lea.hbm %s12257_s16, 8192  ;;  %s9759_s30 = scalar_lea.hbm %s12321_s15, 65536 }
 0x6c6   : > { %p9756_p4 = scmp.ne.s32.totalorder %s12257_s16, %s9755_s17  ;;  %p9760_p9 = scmp.lt.u32.totalorder %s12257_s16, %s12321_s15 }
 0x6c7   : > { %p9761_p10 = scmp.lt.u32.totalorder %s9759_s30, %s9755_s17  ;;  %p9763_p12 = scmp.lt.u32.totalorder %s9755_s17, %s12257_s16 }
 0x6c8   : > { %p9757_p7 = pnand %p9756_p4, %p9928_p5 }
 0x6c9   : > { %p9762_p11 = por %p9761_p10, %p9760_p9 }
 0x6ca   : > { %p9758_p8 = pneg %p9757_p7 }
 0x6cb   : > { %p9764_p13 = por %p9763_p12, %p9762_p11 }
 0x6cd   : > { %p9765_p0 = pnand %p9764_p13, %p9758_p8 }
 0x6cf   : > { %9768 = shalt.err (!%p9765_p0)
}
 0x6d0   : > { %s9808_s23 = smov 64   ;;  %s9809_s20 = smov 4  }
 0x6d1   : > { %9649 = dma.vmem_to_hbm [thread:$0]  (%p9928_p5), %s12259_s24, 8192, %s12257_s16, %s12265_s22, %s9808_s23, %s9808_s23, %s9809_s20  }
 0x6d2 PF: > { %p9655_p1 = scmp.ge.s32.totalorder %s9803_s21, 2  ;;  %s7508_s25 = sand.u32 1, %s9791_s18  }
 0x6d3   : > { %s7509_s17 = scalar_lea.sflag [#allocation3], %s7508_s25 }
 0x6d4   : > { %p9652_p2 = pnand %p9655_p1, %p9932_p6 }
 0x6d6   : > { %9786 = dma.done.wait (!%p9652_p2), %s7509_s17, 8192  }
 0x6d7   : > { %9788 = vsyncadd (!%p9652_p2), %s7509_s17, 4294959104  ;;  %s12337_s21 = sld [smem:[#allocation6_spill]]  ;;  %s12338_s30 = sld [smem:[#allocation5_spill]] }
 0x6d8   : > { %s12339_s20 = sld [smem:[#allocation7_spill]]  ;;  %s12340_s18 = smov %s9795_s19 }
 0x6dd   : > { %p25_p3 = scmp.ge.s32.totalorder %s12337_s21, 10   ;;  %s12341_s19 = smov %s12338_s30 }
 0x6df   :  { %27 = sbr.rel (!%p25_p3) target bundleno = 3 (0x3), region = 121 }
 0x6e6   :  { %7514 = vsyncpa [#allocation3], 1 }
 0x6e7   :  { %7516 = vsyncpa [#allocation3 + $0x1], 1 }

</bundles_post_ra>
